<compile_context>
chip_gen: v6e
topology: v6e:2x2x1
jax: 0.10.0
libtpu: 0.0.40
codegen_flags: <defaults>
</compile_context>

<pallas_src>
import functools
import math

import jax
import jax.numpy as jnp
from jax import lax
from jax.experimental import pallas as pl
from jax.experimental.pallas import tpu as pltpu

BN_EPS = 1e-5
LANE = 128


def _round_up(x, m):
    return ((x + m - 1) // m) * m


# ----------------------------------------------------------------------------
# Pallas kernels
# ----------------------------------------------------------------------------
def _conv_body(x_ref, w_ref, scale_ref, bias_ref, res_ref, o_ref,
               taps, oh_count, ow, relu):
    """Fused im2col conv + BN (+residual) (+ReLU) for ONE image.

    x_ref:   (s*s*Hq, Wq, Cin_p)   phase-decomposed, spatially padded input (bf16)
    w_ref:   (kh*kw, Cin_p, CoutP) weights (bf16, zero padded)
    scale_ref/bias_ref: (1, CoutP) f32 folded BatchNorm
    res_ref: (OH, OW, CoutP) bf16 residual or None
    o_ref:   (OH, OW, CoutP) bf16
    taps:    static tuple of (row_base, col_start) per kernel tap.
    """
    scale = scale_ref[...]
    bias = bias_ref[...]

    def body(oh, carry):
        acc = None
        for t, (rb, qx) in enumerate(taps):
            lhs = x_ref[rb + oh, pl.ds(qx, ow), :]          # (OW, Cin_p) bf16
            d = jnp.dot(lhs, w_ref[t], preferred_element_type=jnp.float32)
            acc = d if acc is None else acc + d
        out = acc * scale + bias                            # f32 epilogue
        if res_ref is not None:
            out = out + res_ref[oh].astype(jnp.float32)
        if relu:
            out = jnp.maximum(out, 0.0)
        o_ref[oh] = out.astype(o_ref.dtype)                 # lane-dense row store
        return carry

    lax.fori_loop(0, oh_count, body, 0)


def _conv_bn_kernel(x_ref, w_ref, scale_ref, bias_ref, o_ref, *,
                    taps, oh_count, ow, relu):
    _conv_body(x_ref, w_ref, scale_ref, bias_ref, None, o_ref,
               taps, oh_count, ow, relu)


def _conv_bn_res_kernel(x_ref, w_ref, scale_ref, bias_ref, res_ref, o_ref, *,
                        taps, oh_count, ow, relu):
    _conv_body(x_ref, w_ref, scale_ref, bias_ref, res_ref, o_ref,
               taps, oh_count, ow, relu)


def _fc_kernel(a_ref, w_ref, b_ref, o_ref):
    o_ref[...] = (jnp.dot(a_ref[...], w_ref[...],
                          preferred_element_type=jnp.float32) + b_ref[...])


# ----------------------------------------------------------------------------
# Pallas wrappers
# ----------------------------------------------------------------------------
def conv_bn_fused(x, w, bn, stride, padding, relu, residual=None):
    """x: (N,H,W,Cin_p) bf16 channel-padded NHWC; w: (Cout,Cin,kh,kw) PyTorch layout;
    bn = (gamma, beta, mean, var); residual: (N,OH,OW,CoutP) bf16 or None.
    Returns (N, OH, OW, CoutP) bf16 with CoutP = round_up(Cout, 128)."""
    N, H, W, Cin_p = x.shape
    Cout, Cin, kh, kw = w.shape
    s = stride
    OH = (H + 2 * padding - kh) // s + 1
    OW = (W + 2 * padding - kw) // s + 1
    CoutP = _round_up(Cout, LANE)

    # Spatial zero-pad, then pad H/W up to a multiple of the stride so the
    # stride folds into a phase decomposition (no strided loads in the kernel;
    # the extra pad rows/cols are never read by any valid tap window).
    Hp, Wp = H + 2 * padding, W + 2 * padding
    Hp2, Wp2 = _round_up(Hp, s), _round_up(Wp, s)
    xp = jnp.pad(x, ((0, 0),
                     (padding, padding + Hp2 - Hp),
                     (padding, padding + Wp2 - Wp),
                     (0, 0)))
    Hq, Wq = Hp2 // s, Wp2 // s
    # (N,Hp2,Wp2,C) -> (N, s, s, Hq, Wq, C) -> (N, s*s*Hq, Wq, C).  For s == 1
    # this is a no-op reshape.  Tap (dy,dx) then reads rows
    # ((dy%s)*s + dx%s)*Hq + dy//s + oh and a contiguous column window at dx//s.
    xf = (xp.reshape(N, Hq, s, Wq, s, Cin_p)
            .transpose(0, 2, 4, 1, 3, 5)
            .reshape(N, s * s * Hq, Wq, Cin_p))

    # Weights -> (kh*kw, Cin_p, CoutP), zero padded, bf16.
    wt = jnp.transpose(w, (2, 3, 1, 0)).reshape(kh * kw, Cin, Cout)
    wt = jnp.pad(wt, ((0, 0), (0, Cin_p - Cin), (0, CoutP - Cout)))
    wt = wt.astype(jnp.bfloat16)

    gamma, beta, mean, var = bn
    scale = gamma / jnp.sqrt(var + BN_EPS)
    bias = beta - mean * scale
    scale = jnp.pad(scale, (0, CoutP - Cout)).reshape(1, CoutP).astype(jnp.float32)
    bias = jnp.pad(bias, (0, CoutP - Cout)).reshape(1, CoutP).astype(jnp.float32)

    taps = tuple((((dy % s) * s + (dx % s)) * Hq + dy // s, dx // s)
                 for dy in range(kh) for dx in range(kw))

    kk = kh * kw
    R = s * s * Hq
    in_specs = [
        pl.BlockSpec((None, R, Wq, Cin_p), lambda n: (n, 0, 0, 0)),
        pl.BlockSpec((kk, Cin_p, CoutP), lambda n: (0, 0, 0)),
        pl.BlockSpec((1, CoutP), lambda n: (0, 0)),
        pl.BlockSpec((1, CoutP), lambda n: (0, 0)),
    ]
    args = [xf, wt, scale, bias]
    if residual is not None:
        in_specs.append(pl.BlockSpec((None, OH, OW, CoutP), lambda n: (n, 0, 0, 0)))
        args.append(residual)
        kernel = functools.partial(_conv_bn_res_kernel, taps=taps,
                                   oh_count=OH, ow=OW, relu=relu)
    else:
        kernel = functools.partial(_conv_bn_kernel, taps=taps,
                                   oh_count=OH, ow=OW, relu=relu)

    return pl.pallas_call(
        kernel,
        out_shape=jax.ShapeDtypeStruct((N, OH, OW, CoutP), jnp.bfloat16),
        grid=(N,),
        in_specs=in_specs,
        out_specs=pl.BlockSpec((None, OH, OW, CoutP), lambda n: (n, 0, 0, 0)),
        compiler_params=pltpu.CompilerParams(
            dimension_semantics=("parallel",)),
    )(*args)


def maxpool2d(x, k, stride, padding):
    # Per perf review: a dedicated Pallas launch for this few-KB, narrow-channel
    # pool costs more than the op itself; lax.reduce_window fuses with neighbors.
    return lax.reduce_window(
        x, jnp.array(-jnp.inf, x.dtype), lax.max,
        window_dimensions=(1, k, k, 1),
        window_strides=(1, stride, stride, 1),
        padding=((0, 0), (padding, padding), (padding, padding), (0, 0)))


def avgpool_fc(x, w, b):
    """AdaptiveAvgPool2d((1,1)) + flatten + Linear.

    Spatial mean first (tiny XLA reduction), then a single fused Pallas matmul
    over the channel-padded features (no hw-replicated FC weights)."""
    N, H, W, CP = x.shape
    ncls, C = w.shape
    pooled = jnp.mean(x.astype(jnp.float32), axis=(1, 2)).astype(jnp.bfloat16)   # (N, CP)
    wt = jnp.pad(jnp.transpose(w), ((0, CP - C), (0, 0))).astype(jnp.bfloat16)   # (CP, ncls)
    bias = b.reshape(1, ncls).astype(jnp.float32)
    return pl.pallas_call(
        _fc_kernel,
        out_shape=jax.ShapeDtypeStruct((N, ncls), jnp.float32),
        grid=(1,),
        in_specs=[pl.BlockSpec((N, CP), lambda i: (0, 0)),
                  pl.BlockSpec((CP, ncls), lambda i: (0, 0)),
                  pl.BlockSpec((1, ncls), lambda i: (0, 0))],
        out_specs=pl.BlockSpec((N, ncls), lambda i: (0, 0)),
    )(pooled, wt, bias)


# ----------------------------------------------------------------------------
# ResNet (BasicBlock, expansion = 1)
# ----------------------------------------------------------------------------
def basic_block(x, blk):
    identity = x
    out = conv_bn_fused(x, blk["conv1_w"], blk["bn1"],
                        stride=blk["stride"], padding=1, relu=True)
    if "down_w" in blk:
        identity = conv_bn_fused(x, blk["down_w"], blk["down_bn"],
                                 stride=blk["stride"], padding=0, relu=False)
    # conv2 + bn2 + residual add + relu, all fused in the conv epilogue
    return conv_bn_fused(out, blk["conv2_w"], blk["bn2"], stride=1, padding=1,
                         relu=True, residual=identity)


def resnet_forward(params, x_nchw):
    x = jnp.transpose(x_nchw, (0, 2, 3, 1)).astype(jnp.bfloat16)  # NCHW -> NHWC bf16
    cin = x.shape[-1]
    cin_p = _round_up(max(cin, 8), 8)
    if cin_p != cin:
        x = jnp.pad(x, ((0, 0), (0, 0), (0, 0), (0, cin_p - cin)))
    x = conv_bn_fused(x, params["conv1_w"], params["bn1"], stride=2,
                      padding=params["first_conv_k"] // 2, relu=True)
    k = params["max_pool_k"]
    x = maxpool2d(x, k, 2, 0 if k == 2 else k // 2)
    for layer in params["layers"]:
        for blk in layer:
            x = basic_block(x, blk)
    # avgpool (spatial mean) + flatten + fc (one Pallas matmul)
    return avgpool_fc(x, params["fc_w"], params["fc_b"])


# ----------------------------------------------------------------------------
# Deterministic parameter construction (matches module __init__ shapes)
# ----------------------------------------------------------------------------
def _kaiming_conv(key, cout, cin, kh, kw):
    fan_out = cout * kh * kw  # mode='fan_out', relu gain
    std = math.sqrt(2.0 / fan_out)
    return std * jax.random.normal(key, (cout, cin, kh, kw), jnp.float32)


def _bn_params(c):
    # gamma=1, beta=0, running_mean=0, running_var=1 (eval mode)
    return (jnp.ones((c,), jnp.float32), jnp.zeros((c,), jnp.float32),
            jnp.zeros((c,), jnp.float32), jnp.ones((c,), jnp.float32))


def build_resnet_params(key, inplanes=8, layers=(1, 1, 1, 1),
                        num_classes=10, first_conv_k=7, max_pool_k=3):
    keys = iter(jax.random.split(key, 64))
    params = {
        "first_conv_k": first_conv_k,
        "max_pool_k": max_pool_k,
        "conv1_w": _kaiming_conv(next(keys), inplanes, 3, first_conv_k, first_conv_k),
        "bn1": _bn_params(inplanes),
    }
    in_c = inplanes
    layer_list = []
    for li, nblocks in enumerate(layers):
        planes = inplanes * (2 ** li)
        stride = 1 if li == 0 else 2
        blocks = []
        for bi in range(nblocks):
            s = stride if bi == 0 else 1
            blk = {
                "stride": s,
                "conv1_w": _kaiming_conv(next(keys), planes, in_c, 3, 3),
                "bn1": _bn_params(planes),
                "conv2_w": _kaiming_conv(next(keys), planes, planes, 3, 3),
                "bn2": _bn_params(planes),
            }
            if s != 1 or in_c != planes:  # downsample = conv1x1 + bn
                blk["down_w"] = _kaiming_conv(next(keys), planes, in_c, 1, 1)
                blk["down_bn"] = _bn_params(planes)
            blocks.append(blk)
            in_c = planes
        layer_list.append(blocks)
    params["layers"] = layer_list

    fin = in_c  # inplanes * 8 * expansion(=1)
    bound = 1.0 / math.sqrt(fin)
    params["fc_w"] = jax.random.uniform(next(keys), (num_classes, fin),
                                        jnp.float32, -bound, bound)
    params["fc_b"] = jax.random.uniform(next(keys), (num_classes,),
                                        jnp.float32, -bound, bound)
    return params


if __name__ == "__main__":
    key = jax.random.PRNGKey(0)
    pkey, xkey = jax.random.split(key)

    # Small ResNet: inplanes=8, layers=[1,1,1,1], 10 classes, input 2x3x32x32 (NCHW)
    params = build_resnet_params(pkey, inplanes=8, layers=(1, 1, 1, 1),
                                 num_classes=10, first_conv_k=7, max_pool_k=3)
    x = jax.random.normal(xkey, (2, 3, 32, 32), jnp.float32)

    fwd = jax.jit(lambda inp: resnet_forward(params, inp))
    out = jax.block_until_ready(fwd(x))
    assert out.shape == (2, 10), out.shape
    assert out.dtype == jnp.float32, out.dtype
    assert bool(jnp.all(jnp.isfinite(out)))
    print("KERNEL_OK")
</pallas_src>

<mosaic_0001>
module attributes {stable_mosaic.version = 11 : i64} {
  func.func @_conv_bn_kernel(%arg0: i32, %arg1: memref<1x76x19x8xbf16, #tpu.memory_space<vmem>>, %arg2: memref<49x8x128xbf16, #tpu.memory_space<vmem>>, %arg3: memref<1x128xf32, #tpu.memory_space<vmem>>, %arg4: memref<1x128xf32, #tpu.memory_space<vmem>>, %arg5: memref<1x16x16x128xbf16, #tpu.memory_space<vmem>>) attributes {dimension_semantics = [#tpu.dimension_semantics<parallel>], iteration_bounds = array<i64: 2>, scalar_prefetch = 0 : i64, scratch_operands = 0 : i64, tpu.core_type = #tpu.core_type<tc>, window_params = [{transform_indices = @transform_0, window_bounds = array<i64: 1, 76, 19, 8>}, {pipeline_mode = #tpu.pipeline_mode<synchronous>, transform_indices = @transform_1, window_bounds = array<i64: 49, 8, 128>}, {pipeline_mode = #tpu.pipeline_mode<synchronous>, transform_indices = @transform_2, window_bounds = array<i64: 1, 128>}, {pipeline_mode = #tpu.pipeline_mode<synchronous>, transform_indices = @transform_3, window_bounds = array<i64: 1, 128>}, {transform_indices = @transform_4, window_bounds = array<i64: 1, 16, 16, 128>}]} {
    %c0 = arith.constant 0 : index
    %c0_0 = arith.constant 0 : index
    %0 = vector.load %arg3[%c0, %c0_0] : memref<1x128xf32, #tpu.memory_space<vmem>>, vector<1x128xf32>
    %c0_1 = arith.constant 0 : index
    %c0_2 = arith.constant 0 : index
    %1 = vector.load %arg4[%c0_1, %c0_2] : memref<1x128xf32, #tpu.memory_space<vmem>>, vector<1x128xf32>
    %c0_i32 = arith.constant 0 : i32
    %c16_i32 = arith.constant 16 : i32
    %2 = arith.addi %c0_i32, %c16_i32 : i32
    %c1_i32 = arith.constant 1 : i32
    scf.for %arg6 = %c0_i32 to %2 step %c1_i32  : i32 {
      %c0_i32_4 = arith.constant 0 : i32
      %3 = arith.addi %c0_i32_4, %arg6 : i32
      %c0_5 = arith.constant 0 : index
      %4 = arith.index_cast %3 : i32 to index
      %c0_6 = arith.constant 0 : index
      %c0_7 = arith.constant 0 : index
      %5 = vector.load %arg1[%c0_5, %4, %c0_6, %c0_7] : memref<1x76x19x8xbf16, #tpu.memory_space<vmem>>, vector<1x1x16x8xbf16>
      %6 = vector.shape_cast %5 : vector<1x1x16x8xbf16> to vector<16x8xbf16>
      %c0_8 = arith.constant 0 : index
      %c0_9 = arith.constant 0 : index
      %c0_10 = arith.constant 0 : index
      %7 = vector.load %arg2[%c0_8, %c0_9, %c0_10] : memref<49x8x128xbf16, #tpu.memory_space<vmem>>, vector<1x8x128xbf16>
      %8 = vector.shape_cast %7 : vector<1x8x128xbf16> to vector<8x128xbf16>
      %cst = arith.constant dense<0.000000e+00> : vector<16x128xf32>
      %9 = tpu.matmul %6, %8, %cst {dimension_numbers = #tpu.dot_dimension_numbers<[1], [0], [0], [1], [0, 0, 1, 1], [], []>} : vector<16x8xbf16>, vector<8x128xbf16>, vector<16x128xf32> -> vector<16x128xf32>
      %c19_i32 = arith.constant 19 : i32
      %10 = arith.addi %c19_i32, %arg6 : i32
      %c0_11 = arith.constant 0 : index
      %11 = arith.index_cast %10 : i32 to index
      %c0_12 = arith.constant 0 : index
      %c0_13 = arith.constant 0 : index
      %12 = vector.load %arg1[%c0_11, %11, %c0_12, %c0_13] : memref<1x76x19x8xbf16, #tpu.memory_space<vmem>>, vector<1x1x16x8xbf16>
      %13 = vector.shape_cast %12 : vector<1x1x16x8xbf16> to vector<16x8xbf16>
      %c1 = arith.constant 1 : index
      %c0_14 = arith.constant 0 : index
      %c0_15 = arith.constant 0 : index
      %14 = vector.load %arg2[%c1, %c0_14, %c0_15] : memref<49x8x128xbf16, #tpu.memory_space<vmem>>, vector<1x8x128xbf16>
      %15 = vector.shape_cast %14 : vector<1x8x128xbf16> to vector<8x128xbf16>
      %cst_16 = arith.constant dense<0.000000e+00> : vector<16x128xf32>
      %16 = tpu.matmul %13, %15, %cst_16 {dimension_numbers = #tpu.dot_dimension_numbers<[1], [0], [0], [1], [0, 0, 1, 1], [], []>} : vector<16x8xbf16>, vector<8x128xbf16>, vector<16x128xf32> -> vector<16x128xf32>
      %17 = arith.addf %9, %16 : vector<16x128xf32>
      %c0_i32_17 = arith.constant 0 : i32
      %18 = arith.addi %c0_i32_17, %arg6 : i32
      %c0_18 = arith.constant 0 : index
      %19 = arith.index_cast %18 : i32 to index
      %c1_19 = arith.constant 1 : index
      %c0_20 = arith.constant 0 : index
      %20 = vector.load %arg1[%c0_18, %19, %c1_19, %c0_20] : memref<1x76x19x8xbf16, #tpu.memory_space<vmem>>, vector<1x1x16x8xbf16>
      %21 = vector.shape_cast %20 : vector<1x1x16x8xbf16> to vector<16x8xbf16>
      %c2 = arith.constant 2 : index
      %c0_21 = arith.constant 0 : index
      %c0_22 = arith.constant 0 : index
      %22 = vector.load %arg2[%c2, %c0_21, %c0_22] : memref<49x8x128xbf16, #tpu.memory_space<vmem>>, vector<1x8x128xbf16>
      %23 = vector.shape_cast %22 : vector<1x8x128xbf16> to vector<8x128xbf16>
      %cst_23 = arith.constant dense<0.000000e+00> : vector<16x128xf32>
      %24 = tpu.matmul %21, %23, %cst_23 {dimension_numbers = #tpu.dot_dimension_numbers<[1], [0], [0], [1], [0, 0, 1, 1], [], []>} : vector<16x8xbf16>, vector<8x128xbf16>, vector<16x128xf32> -> vector<16x128xf32>
      %25 = arith.addf %17, %24 : vector<16x128xf32>
      %c19_i32_24 = arith.constant 19 : i32
      %26 = arith.addi %c19_i32_24, %arg6 : i32
      %c0_25 = arith.constant 0 : index
      %27 = arith.index_cast %26 : i32 to index
      %c1_26 = arith.constant 1 : index
      %c0_27 = arith.constant 0 : index
      %28 = vector.load %arg1[%c0_25, %27, %c1_26, %c0_27] : memref<1x76x19x8xbf16, #tpu.memory_space<vmem>>, vector<1x1x16x8xbf16>
      %29 = vector.shape_cast %28 : vector<1x1x16x8xbf16> to vector<16x8xbf16>
      %c3 = arith.constant 3 : index
      %c0_28 = arith.constant 0 : index
      %c0_29 = arith.constant 0 : index
      %30 = vector.load %arg2[%c3, %c0_28, %c0_29] : memref<49x8x128xbf16, #tpu.memory_space<vmem>>, vector<1x8x128xbf16>
      %31 = vector.shape_cast %30 : vector<1x8x128xbf16> to vector<8x128xbf16>
      %cst_30 = arith.constant dense<0.000000e+00> : vector<16x128xf32>
      %32 = tpu.matmul %29, %31, %cst_30 {dimension_numbers = #tpu.dot_dimension_numbers<[1], [0], [0], [1], [0, 0, 1, 1], [], []>} : vector<16x8xbf16>, vector<8x128xbf16>, vector<16x128xf32> -> vector<16x128xf32>
      %33 = arith.addf %25, %32 : vector<16x128xf32>
      %c0_i32_31 = arith.constant 0 : i32
      %34 = arith.addi %c0_i32_31, %arg6 : i32
      %c0_32 = arith.constant 0 : index
      %35 = arith.index_cast %34 : i32 to index
      %c2_33 = arith.constant 2 : index
      %c0_34 = arith.constant 0 : index
      %36 = vector.load %arg1[%c0_32, %35, %c2_33, %c0_34] : memref<1x76x19x8xbf16, #tpu.memory_space<vmem>>, vector<1x1x16x8xbf16>
      %37 = vector.shape_cast %36 : vector<1x1x16x8xbf16> to vector<16x8xbf16>
      %c4 = arith.constant 4 : index
      %c0_35 = arith.constant 0 : index
      %c0_36 = arith.constant 0 : index
      %38 = vector.load %arg2[%c4, %c0_35, %c0_36] : memref<49x8x128xbf16, #tpu.memory_space<vmem>>, vector<1x8x128xbf16>
      %39 = vector.shape_cast %38 : vector<1x8x128xbf16> to vector<8x128xbf16>
      %cst_37 = arith.constant dense<0.000000e+00> : vector<16x128xf32>
      %40 = tpu.matmul %37, %39, %cst_37 {dimension_numbers = #tpu.dot_dimension_numbers<[1], [0], [0], [1], [0, 0, 1, 1], [], []>} : vector<16x8xbf16>, vector<8x128xbf16>, vector<16x128xf32> -> vector<16x128xf32>
      %41 = arith.addf %33, %40 : vector<16x128xf32>
      %c19_i32_38 = arith.constant 19 : i32
      %42 = arith.addi %c19_i32_38, %arg6 : i32
      %c0_39 = arith.constant 0 : index
      %43 = arith.index_cast %42 : i32 to index
      %c2_40 = arith.constant 2 : index
      %c0_41 = arith.constant 0 : index
      %44 = vector.load %arg1[%c0_39, %43, %c2_40, %c0_41] : memref<1x76x19x8xbf16, #tpu.memory_space<vmem>>, vector<1x1x16x8xbf16>
      %45 = vector.shape_cast %44 : vector<1x1x16x8xbf16> to vector<16x8xbf16>
      %c5 = arith.constant 5 : index
      %c0_42 = arith.constant 0 : index
      %c0_43 = arith.constant 0 : index
      %46 = vector.load %arg2[%c5, %c0_42, %c0_43] : memref<49x8x128xbf16, #tpu.memory_space<vmem>>, vector<1x8x128xbf16>
      %47 = vector.shape_cast %46 : vector<1x8x128xbf16> to vector<8x128xbf16>
      %cst_44 = arith.constant dense<0.000000e+00> : vector<16x128xf32>
      %48 = tpu.matmul %45, %47, %cst_44 {dimension_numbers = #tpu.dot_dimension_numbers<[1], [0], [0], [1], [0, 0, 1, 1], [], []>} : vector<16x8xbf16>, vector<8x128xbf16>, vector<16x128xf32> -> vector<16x128xf32>
      %49 = arith.addf %41, %48 : vector<16x128xf32>
      %c0_i32_45 = arith.constant 0 : i32
      %50 = arith.addi %c0_i32_45, %arg6 : i32
      %c0_46 = arith.constant 0 : index
      %51 = arith.index_cast %50 : i32 to index
      %c3_47 = arith.constant 3 : index
      %c0_48 = arith.constant 0 : index
      %52 = vector.load %arg1[%c0_46, %51, %c3_47, %c0_48] : memref<1x76x19x8xbf16, #tpu.memory_space<vmem>>, vector<1x1x16x8xbf16>
      %53 = vector.shape_cast %52 : vector<1x1x16x8xbf16> to vector<16x8xbf16>
      %c6 = arith.constant 6 : index
      %c0_49 = arith.constant 0 : index
      %c0_50 = arith.constant 0 : index
      %54 = vector.load %arg2[%c6, %c0_49, %c0_50] : memref<49x8x128xbf16, #tpu.memory_space<vmem>>, vector<1x8x128xbf16>
      %55 = vector.shape_cast %54 : vector<1x8x128xbf16> to vector<8x128xbf16>
      %cst_51 = arith.constant dense<0.000000e+00> : vector<16x128xf32>
      %56 = tpu.matmul %53, %55, %cst_51 {dimension_numbers = #tpu.dot_dimension_numbers<[1], [0], [0], [1], [0, 0, 1, 1], [], []>} : vector<16x8xbf16>, vector<8x128xbf16>, vector<16x128xf32> -> vector<16x128xf32>
      %57 = arith.addf %49, %56 : vector<16x128xf32>
      %c38_i32 = arith.constant 38 : i32
      %58 = arith.addi %c38_i32, %arg6 : i32
      %c0_52 = arith.constant 0 : index
      %59 = arith.index_cast %58 : i32 to index
      %c0_53 = arith.constant 0 : index
      %c0_54 = arith.constant 0 : index
      %60 = vector.load %arg1[%c0_52, %59, %c0_53, %c0_54] : memref<1x76x19x8xbf16, #tpu.memory_space<vmem>>, vector<1x1x16x8xbf16>
      %61 = vector.shape_cast %60 : vector<1x1x16x8xbf16> to vector<16x8xbf16>
      %c7 = arith.constant 7 : index
      %c0_55 = arith.constant 0 : index
      %c0_56 = arith.constant 0 : index
      %62 = vector.load %arg2[%c7, %c0_55, %c0_56] : memref<49x8x128xbf16, #tpu.memory_space<vmem>>, vector<1x8x128xbf16>
      %63 = vector.shape_cast %62 : vector<1x8x128xbf16> to vector<8x128xbf16>
      %cst_57 = arith.constant dense<0.000000e+00> : vector<16x128xf32>
      %64 = tpu.matmul %61, %63, %cst_57 {dimension_numbers = #tpu.dot_dimension_numbers<[1], [0], [0], [1], [0, 0, 1, 1], [], []>} : vector<16x8xbf16>, vector<8x128xbf16>, vector<16x128xf32> -> vector<16x128xf32>
      %65 = arith.addf %57, %64 : vector<16x128xf32>
      %c57_i32 = arith.constant 57 : i32
      %66 = arith.addi %c57_i32, %arg6 : i32
      %c0_58 = arith.constant 0 : index
      %67 = arith.index_cast %66 : i32 to index
      %c0_59 = arith.constant 0 : index
      %c0_60 = arith.constant 0 : index
      %68 = vector.load %arg1[%c0_58, %67, %c0_59, %c0_60] : memref<1x76x19x8xbf16, #tpu.memory_space<vmem>>, vector<1x1x16x8xbf16>
      %69 = vector.shape_cast %68 : vector<1x1x16x8xbf16> to vector<16x8xbf16>
      %c8 = arith.constant 8 : index
      %c0_61 = arith.constant 0 : index
      %c0_62 = arith.constant 0 : index
      %70 = vector.load %arg2[%c8, %c0_61, %c0_62] : memref<49x8x128xbf16, #tpu.memory_space<vmem>>, vector<1x8x128xbf16>
      %71 = vector.shape_cast %70 : vector<1x8x128xbf16> to vector<8x128xbf16>
      %cst_63 = arith.constant dense<0.000000e+00> : vector<16x128xf32>
      %72 = tpu.matmul %69, %71, %cst_63 {dimension_numbers = #tpu.dot_dimension_numbers<[1], [0], [0], [1], [0, 0, 1, 1], [], []>} : vector<16x8xbf16>, vector<8x128xbf16>, vector<16x128xf32> -> vector<16x128xf32>
      %73 = arith.addf %65, %72 : vector<16x128xf32>
      %c38_i32_64 = arith.constant 38 : i32
      %74 = arith.addi %c38_i32_64, %arg6 : i32
      %c0_65 = arith.constant 0 : index
      %75 = arith.index_cast %74 : i32 to index
      %c1_66 = arith.constant 1 : index
      %c0_67 = arith.constant 0 : index
      %76 = vector.load %arg1[%c0_65, %75, %c1_66, %c0_67] : memref<1x76x19x8xbf16, #tpu.memory_space<vmem>>, vector<1x1x16x8xbf16>
      %77 = vector.shape_cast %76 : vector<1x1x16x8xbf16> to vector<16x8xbf16>
      %c9 = arith.constant 9 : index
      %c0_68 = arith.constant 0 : index
      %c0_69 = arith.constant 0 : index
      %78 = vector.load %arg2[%c9, %c0_68, %c0_69] : memref<49x8x128xbf16, #tpu.memory_space<vmem>>, vector<1x8x128xbf16>
      %79 = vector.shape_cast %78 : vector<1x8x128xbf16> to vector<8x128xbf16>
      %cst_70 = arith.constant dense<0.000000e+00> : vector<16x128xf32>
      %80 = tpu.matmul %77, %79, %cst_70 {dimension_numbers = #tpu.dot_dimension_numbers<[1], [0], [0], [1], [0, 0, 1, 1], [], []>} : vector<16x8xbf16>, vector<8x128xbf16>, vector<16x128xf32> -> vector<16x128xf32>
      %81 = arith.addf %73, %80 : vector<16x128xf32>
      %c57_i32_71 = arith.constant 57 : i32
      %82 = arith.addi %c57_i32_71, %arg6 : i32
      %c0_72 = arith.constant 0 : index
      %83 = arith.index_cast %82 : i32 to index
      %c1_73 = arith.constant 1 : index
      %c0_74 = arith.constant 0 : index
      %84 = vector.load %arg1[%c0_72, %83, %c1_73, %c0_74] : memref<1x76x19x8xbf16, #tpu.memory_space<vmem>>, vector<1x1x16x8xbf16>
      %85 = vector.shape_cast %84 : vector<1x1x16x8xbf16> to vector<16x8xbf16>
      %c10 = arith.constant 10 : index
      %c0_75 = arith.constant 0 : index
      %c0_76 = arith.constant 0 : index
      %86 = vector.load %arg2[%c10, %c0_75, %c0_76] : memref<49x8x128xbf16, #tpu.memory_space<vmem>>, vector<1x8x128xbf16>
      %87 = vector.shape_cast %86 : vector<1x8x128xbf16> to vector<8x128xbf16>
      %cst_77 = arith.constant dense<0.000000e+00> : vector<16x128xf32>
      %88 = tpu.matmul %85, %87, %cst_77 {dimension_numbers = #tpu.dot_dimension_numbers<[1], [0], [0], [1], [0, 0, 1, 1], [], []>} : vector<16x8xbf16>, vector<8x128xbf16>, vector<16x128xf32> -> vector<16x128xf32>
      %89 = arith.addf %81, %88 : vector<16x128xf32>
      %c38_i32_78 = arith.constant 38 : i32
      %90 = arith.addi %c38_i32_78, %arg6 : i32
      %c0_79 = arith.constant 0 : index
      %91 = arith.index_cast %90 : i32 to index
      %c2_80 = arith.constant 2 : index
      %c0_81 = arith.constant 0 : index
      %92 = vector.load %arg1[%c0_79, %91, %c2_80, %c0_81] : memref<1x76x19x8xbf16, #tpu.memory_space<vmem>>, vector<1x1x16x8xbf16>
      %93 = vector.shape_cast %92 : vector<1x1x16x8xbf16> to vector<16x8xbf16>
      %c11 = arith.constant 11 : index
      %c0_82 = arith.constant 0 : index
      %c0_83 = arith.constant 0 : index
      %94 = vector.load %arg2[%c11, %c0_82, %c0_83] : memref<49x8x128xbf16, #tpu.memory_space<vmem>>, vector<1x8x128xbf16>
      %95 = vector.shape_cast %94 : vector<1x8x128xbf16> to vector<8x128xbf16>
      %cst_84 = arith.constant dense<0.000000e+00> : vector<16x128xf32>
      %96 = tpu.matmul %93, %95, %cst_84 {dimension_numbers = #tpu.dot_dimension_numbers<[1], [0], [0], [1], [0, 0, 1, 1], [], []>} : vector<16x8xbf16>, vector<8x128xbf16>, vector<16x128xf32> -> vector<16x128xf32>
      %97 = arith.addf %89, %96 : vector<16x128xf32>
      %c57_i32_85 = arith.constant 57 : i32
      %98 = arith.addi %c57_i32_85, %arg6 : i32
      %c0_86 = arith.constant 0 : index
      %99 = arith.index_cast %98 : i32 to index
      %c2_87 = arith.constant 2 : index
      %c0_88 = arith.constant 0 : index
      %100 = vector.load %arg1[%c0_86, %99, %c2_87, %c0_88] : memref<1x76x19x8xbf16, #tpu.memory_space<vmem>>, vector<1x1x16x8xbf16>
      %101 = vector.shape_cast %100 : vector<1x1x16x8xbf16> to vector<16x8xbf16>
      %c12 = arith.constant 12 : index
      %c0_89 = arith.constant 0 : index
      %c0_90 = arith.constant 0 : index
      %102 = vector.load %arg2[%c12, %c0_89, %c0_90] : memref<49x8x128xbf16, #tpu.memory_space<vmem>>, vector<1x8x128xbf16>
      %103 = vector.shape_cast %102 : vector<1x8x128xbf16> to vector<8x128xbf16>
      %cst_91 = arith.constant dense<0.000000e+00> : vector<16x128xf32>
      %104 = tpu.matmul %101, %103, %cst_91 {dimension_numbers = #tpu.dot_dimension_numbers<[1], [0], [0], [1], [0, 0, 1, 1], [], []>} : vector<16x8xbf16>, vector<8x128xbf16>, vector<16x128xf32> -> vector<16x128xf32>
      %105 = arith.addf %97, %104 : vector<16x128xf32>
      %c38_i32_92 = arith.constant 38 : i32
      %106 = arith.addi %c38_i32_92, %arg6 : i32
      %c0_93 = arith.constant 0 : index
      %107 = arith.index_cast %106 : i32 to index
      %c3_94 = arith.constant 3 : index
      %c0_95 = arith.constant 0 : index
      %108 = vector.load %arg1[%c0_93, %107, %c3_94, %c0_95] : memref<1x76x19x8xbf16, #tpu.memory_space<vmem>>, vector<1x1x16x8xbf16>
      %109 = vector.shape_cast %108 : vector<1x1x16x8xbf16> to vector<16x8xbf16>
      %c13 = arith.constant 13 : index
      %c0_96 = arith.constant 0 : index
      %c0_97 = arith.constant 0 : index
      %110 = vector.load %arg2[%c13, %c0_96, %c0_97] : memref<49x8x128xbf16, #tpu.memory_space<vmem>>, vector<1x8x128xbf16>
      %111 = vector.shape_cast %110 : vector<1x8x128xbf16> to vector<8x128xbf16>
      %cst_98 = arith.constant dense<0.000000e+00> : vector<16x128xf32>
      %112 = tpu.matmul %109, %111, %cst_98 {dimension_numbers = #tpu.dot_dimension_numbers<[1], [0], [0], [1], [0, 0, 1, 1], [], []>} : vector<16x8xbf16>, vector<8x128xbf16>, vector<16x128xf32> -> vector<16x128xf32>
      %113 = arith.addf %105, %112 : vector<16x128xf32>
      %c1_i32_99 = arith.constant 1 : i32
      %114 = arith.addi %c1_i32_99, %arg6 : i32
      %c0_100 = arith.constant 0 : index
      %115 = arith.index_cast %114 : i32 to index
      %c0_101 = arith.constant 0 : index
      %c0_102 = arith.constant 0 : index
      %116 = vector.load %arg1[%c0_100, %115, %c0_101, %c0_102] : memref<1x76x19x8xbf16, #tpu.memory_space<vmem>>, vector<1x1x16x8xbf16>
      %117 = vector.shape_cast %116 : vector<1x1x16x8xbf16> to vector<16x8xbf16>
      %c14 = arith.constant 14 : index
      %c0_103 = arith.constant 0 : index
      %c0_104 = arith.constant 0 : index
      %118 = vector.load %arg2[%c14, %c0_103, %c0_104] : memref<49x8x128xbf16, #tpu.memory_space<vmem>>, vector<1x8x128xbf16>
      %119 = vector.shape_cast %118 : vector<1x8x128xbf16> to vector<8x128xbf16>
      %cst_105 = arith.constant dense<0.000000e+00> : vector<16x128xf32>
      %120 = tpu.matmul %117, %119, %cst_105 {dimension_numbers = #tpu.dot_dimension_numbers<[1], [0], [0], [1], [0, 0, 1, 1], [], []>} : vector<16x8xbf16>, vector<8x128xbf16>, vector<16x128xf32> -> vector<16x128xf32>
      %121 = arith.addf %113, %120 : vector<16x128xf32>
      %c20_i32 = arith.constant 20 : i32
      %122 = arith.addi %c20_i32, %arg6 : i32
      %c0_106 = arith.constant 0 : index
      %123 = arith.index_cast %122 : i32 to index
      %c0_107 = arith.constant 0 : index
      %c0_108 = arith.constant 0 : index
      %124 = vector.load %arg1[%c0_106, %123, %c0_107, %c0_108] : memref<1x76x19x8xbf16, #tpu.memory_space<vmem>>, vector<1x1x16x8xbf16>
      %125 = vector.shape_cast %124 : vector<1x1x16x8xbf16> to vector<16x8xbf16>
      %c15 = arith.constant 15 : index
      %c0_109 = arith.constant 0 : index
      %c0_110 = arith.constant 0 : index
      %126 = vector.load %arg2[%c15, %c0_109, %c0_110] : memref<49x8x128xbf16, #tpu.memory_space<vmem>>, vector<1x8x128xbf16>
      %127 = vector.shape_cast %126 : vector<1x8x128xbf16> to vector<8x128xbf16>
      %cst_111 = arith.constant dense<0.000000e+00> : vector<16x128xf32>
      %128 = tpu.matmul %125, %127, %cst_111 {dimension_numbers = #tpu.dot_dimension_numbers<[1], [0], [0], [1], [0, 0, 1, 1], [], []>} : vector<16x8xbf16>, vector<8x128xbf16>, vector<16x128xf32> -> vector<16x128xf32>
      %129 = arith.addf %121, %128 : vector<16x128xf32>
      %c1_i32_112 = arith.constant 1 : i32
      %130 = arith.addi %c1_i32_112, %arg6 : i32
      %c0_113 = arith.constant 0 : index
      %131 = arith.index_cast %130 : i32 to index
      %c1_114 = arith.constant 1 : index
      %c0_115 = arith.constant 0 : index
      %132 = vector.load %arg1[%c0_113, %131, %c1_114, %c0_115] : memref<1x76x19x8xbf16, #tpu.memory_space<vmem>>, vector<1x1x16x8xbf16>
      %133 = vector.shape_cast %132 : vector<1x1x16x8xbf16> to vector<16x8xbf16>
      %c16 = arith.constant 16 : index
      %c0_116 = arith.constant 0 : index
      %c0_117 = arith.constant 0 : index
      %134 = vector.load %arg2[%c16, %c0_116, %c0_117] : memref<49x8x128xbf16, #tpu.memory_space<vmem>>, vector<1x8x128xbf16>
      %135 = vector.shape_cast %134 : vector<1x8x128xbf16> to vector<8x128xbf16>
      %cst_118 = arith.constant dense<0.000000e+00> : vector<16x128xf32>
      %136 = tpu.matmul %133, %135, %cst_118 {dimension_numbers = #tpu.dot_dimension_numbers<[1], [0], [0], [1], [0, 0, 1, 1], [], []>} : vector<16x8xbf16>, vector<8x128xbf16>, vector<16x128xf32> -> vector<16x128xf32>
      %137 = arith.addf %129, %136 : vector<16x128xf32>
      %c20_i32_119 = arith.constant 20 : i32
      %138 = arith.addi %c20_i32_119, %arg6 : i32
      %c0_120 = arith.constant 0 : index
      %139 = arith.index_cast %138 : i32 to index
      %c1_121 = arith.constant 1 : index
      %c0_122 = arith.constant 0 : index
      %140 = vector.load %arg1[%c0_120, %139, %c1_121, %c0_122] : memref<1x76x19x8xbf16, #tpu.memory_space<vmem>>, vector<1x1x16x8xbf16>
      %141 = vector.shape_cast %140 : vector<1x1x16x8xbf16> to vector<16x8xbf16>
      %c17 = arith.constant 17 : index
      %c0_123 = arith.constant 0 : index
      %c0_124 = arith.constant 0 : index
      %142 = vector.load %arg2[%c17, %c0_123, %c0_124] : memref<49x8x128xbf16, #tpu.memory_space<vmem>>, vector<1x8x128xbf16>
      %143 = vector.shape_cast %142 : vector<1x8x128xbf16> to vector<8x128xbf16>
      %cst_125 = arith.constant dense<0.000000e+00> : vector<16x128xf32>
      %144 = tpu.matmul %141, %143, %cst_125 {dimension_numbers = #tpu.dot_dimension_numbers<[1], [0], [0], [1], [0, 0, 1, 1], [], []>} : vector<16x8xbf16>, vector<8x128xbf16>, vector<16x128xf32> -> vector<16x128xf32>
      %145 = arith.addf %137, %144 : vector<16x128xf32>
      %c1_i32_126 = arith.constant 1 : i32
      %146 = arith.addi %c1_i32_126, %arg6 : i32
      %c0_127 = arith.constant 0 : index
      %147 = arith.index_cast %146 : i32 to index
      %c2_128 = arith.constant 2 : index
      %c0_129 = arith.constant 0 : index
      %148 = vector.load %arg1[%c0_127, %147, %c2_128, %c0_129] : memref<1x76x19x8xbf16, #tpu.memory_space<vmem>>, vector<1x1x16x8xbf16>
      %149 = vector.shape_cast %148 : vector<1x1x16x8xbf16> to vector<16x8xbf16>
      %c18 = arith.constant 18 : index
      %c0_130 = arith.constant 0 : index
      %c0_131 = arith.constant 0 : index
      %150 = vector.load %arg2[%c18, %c0_130, %c0_131] : memref<49x8x128xbf16, #tpu.memory_space<vmem>>, vector<1x8x128xbf16>
      %151 = vector.shape_cast %150 : vector<1x8x128xbf16> to vector<8x128xbf16>
      %cst_132 = arith.constant dense<0.000000e+00> : vector<16x128xf32>
      %152 = tpu.matmul %149, %151, %cst_132 {dimension_numbers = #tpu.dot_dimension_numbers<[1], [0], [0], [1], [0, 0, 1, 1], [], []>} : vector<16x8xbf16>, vector<8x128xbf16>, vector<16x128xf32> -> vector<16x128xf32>
      %153 = arith.addf %145, %152 : vector<16x128xf32>
      %c20_i32_133 = arith.constant 20 : i32
      %154 = arith.addi %c20_i32_133, %arg6 : i32
      %c0_134 = arith.constant 0 : index
      %155 = arith.index_cast %154 : i32 to index
      %c2_135 = arith.constant 2 : index
      %c0_136 = arith.constant 0 : index
      %156 = vector.load %arg1[%c0_134, %155, %c2_135, %c0_136] : memref<1x76x19x8xbf16, #tpu.memory_space<vmem>>, vector<1x1x16x8xbf16>
      %157 = vector.shape_cast %156 : vector<1x1x16x8xbf16> to vector<16x8xbf16>
      %c19 = arith.constant 19 : index
      %c0_137 = arith.constant 0 : index
      %c0_138 = arith.constant 0 : index
      %158 = vector.load %arg2[%c19, %c0_137, %c0_138] : memref<49x8x128xbf16, #tpu.memory_space<vmem>>, vector<1x8x128xbf16>
      %159 = vector.shape_cast %158 : vector<1x8x128xbf16> to vector<8x128xbf16>
      %cst_139 = arith.constant dense<0.000000e+00> : vector<16x128xf32>
      %160 = tpu.matmul %157, %159, %cst_139 {dimension_numbers = #tpu.dot_dimension_numbers<[1], [0], [0], [1], [0, 0, 1, 1], [], []>} : vector<16x8xbf16>, vector<8x128xbf16>, vector<16x128xf32> -> vector<16x128xf32>
      %161 = arith.addf %153, %160 : vector<16x128xf32>
      %c1_i32_140 = arith.constant 1 : i32
      %162 = arith.addi %c1_i32_140, %arg6 : i32
      %c0_141 = arith.constant 0 : index
      %163 = arith.index_cast %162 : i32 to index
      %c3_142 = arith.constant 3 : index
      %c0_143 = arith.constant 0 : index
      %164 = vector.load %arg1[%c0_141, %163, %c3_142, %c0_143] : memref<1x76x19x8xbf16, #tpu.memory_space<vmem>>, vector<1x1x16x8xbf16>
      %165 = vector.shape_cast %164 : vector<1x1x16x8xbf16> to vector<16x8xbf16>
      %c20 = arith.constant 20 : index
      %c0_144 = arith.constant 0 : index
      %c0_145 = arith.constant 0 : index
      %166 = vector.load %arg2[%c20, %c0_144, %c0_145] : memref<49x8x128xbf16, #tpu.memory_space<vmem>>, vector<1x8x128xbf16>
      %167 = vector.shape_cast %166 : vector<1x8x128xbf16> to vector<8x128xbf16>
      %cst_146 = arith.constant dense<0.000000e+00> : vector<16x128xf32>
      %168 = tpu.matmul %165, %167, %cst_146 {dimension_numbers = #tpu.dot_dimension_numbers<[1], [0], [0], [1], [0, 0, 1, 1], [], []>} : vector<16x8xbf16>, vector<8x128xbf16>, vector<16x128xf32> -> vector<16x128xf32>
      %169 = arith.addf %161, %168 : vector<16x128xf32>
      %c39_i32 = arith.constant 39 : i32
      %170 = arith.addi %c39_i32, %arg6 : i32
      %c0_147 = arith.constant 0 : index
      %171 = arith.index_cast %170 : i32 to index
      %c0_148 = arith.constant 0 : index
      %c0_149 = arith.constant 0 : index
      %172 = vector.load %arg1[%c0_147, %171, %c0_148, %c0_149] : memref<1x76x19x8xbf16, #tpu.memory_space<vmem>>, vector<1x1x16x8xbf16>
      %173 = vector.shape_cast %172 : vector<1x1x16x8xbf16> to vector<16x8xbf16>
      %c21 = arith.constant 21 : index
      %c0_150 = arith.constant 0 : index
      %c0_151 = arith.constant 0 : index
      %174 = vector.load %arg2[%c21, %c0_150, %c0_151] : memref<49x8x128xbf16, #tpu.memory_space<vmem>>, vector<1x8x128xbf16>
      %175 = vector.shape_cast %174 : vector<1x8x128xbf16> to vector<8x128xbf16>
      %cst_152 = arith.constant dense<0.000000e+00> : vector<16x128xf32>
      %176 = tpu.matmul %173, %175, %cst_152 {dimension_numbers = #tpu.dot_dimension_numbers<[1], [0], [0], [1], [0, 0, 1, 1], [], []>} : vector<16x8xbf16>, vector<8x128xbf16>, vector<16x128xf32> -> vector<16x128xf32>
      %177 = arith.addf %169, %176 : vector<16x128xf32>
      %c58_i32 = arith.constant 58 : i32
      %178 = arith.addi %c58_i32, %arg6 : i32
      %c0_153 = arith.constant 0 : index
      %179 = arith.index_cast %178 : i32 to index
      %c0_154 = arith.constant 0 : index
      %c0_155 = arith.constant 0 : index
      %180 = vector.load %arg1[%c0_153, %179, %c0_154, %c0_155] : memref<1x76x19x8xbf16, #tpu.memory_space<vmem>>, vector<1x1x16x8xbf16>
      %181 = vector.shape_cast %180 : vector<1x1x16x8xbf16> to vector<16x8xbf16>
      %c22 = arith.constant 22 : index
      %c0_156 = arith.constant 0 : index
      %c0_157 = arith.constant 0 : index
      %182 = vector.load %arg2[%c22, %c0_156, %c0_157] : memref<49x8x128xbf16, #tpu.memory_space<vmem>>, vector<1x8x128xbf16>
      %183 = vector.shape_cast %182 : vector<1x8x128xbf16> to vector<8x128xbf16>
      %cst_158 = arith.constant dense<0.000000e+00> : vector<16x128xf32>
      %184 = tpu.matmul %181, %183, %cst_158 {dimension_numbers = #tpu.dot_dimension_numbers<[1], [0], [0], [1], [0, 0, 1, 1], [], []>} : vector<16x8xbf16>, vector<8x128xbf16>, vector<16x128xf32> -> vector<16x128xf32>
      %185 = arith.addf %177, %184 : vector<16x128xf32>
      %c39_i32_159 = arith.constant 39 : i32
      %186 = arith.addi %c39_i32_159, %arg6 : i32
      %c0_160 = arith.constant 0 : index
      %187 = arith.index_cast %186 : i32 to index
      %c1_161 = arith.constant 1 : index
      %c0_162 = arith.constant 0 : index
      %188 = vector.load %arg1[%c0_160, %187, %c1_161, %c0_162] : memref<1x76x19x8xbf16, #tpu.memory_space<vmem>>, vector<1x1x16x8xbf16>
      %189 = vector.shape_cast %188 : vector<1x1x16x8xbf16> to vector<16x8xbf16>
      %c23 = arith.constant 23 : index
      %c0_163 = arith.constant 0 : index
      %c0_164 = arith.constant 0 : index
      %190 = vector.load %arg2[%c23, %c0_163, %c0_164] : memref<49x8x128xbf16, #tpu.memory_space<vmem>>, vector<1x8x128xbf16>
      %191 = vector.shape_cast %190 : vector<1x8x128xbf16> to vector<8x128xbf16>
      %cst_165 = arith.constant dense<0.000000e+00> : vector<16x128xf32>
      %192 = tpu.matmul %189, %191, %cst_165 {dimension_numbers = #tpu.dot_dimension_numbers<[1], [0], [0], [1], [0, 0, 1, 1], [], []>} : vector<16x8xbf16>, vector<8x128xbf16>, vector<16x128xf32> -> vector<16x128xf32>
      %193 = arith.addf %185, %192 : vector<16x128xf32>
      %c58_i32_166 = arith.constant 58 : i32
      %194 = arith.addi %c58_i32_166, %arg6 : i32
      %c0_167 = arith.constant 0 : index
      %195 = arith.index_cast %194 : i32 to index
      %c1_168 = arith.constant 1 : index
      %c0_169 = arith.constant 0 : index
      %196 = vector.load %arg1[%c0_167, %195, %c1_168, %c0_169] : memref<1x76x19x8xbf16, #tpu.memory_space<vmem>>, vector<1x1x16x8xbf16>
      %197 = vector.shape_cast %196 : vector<1x1x16x8xbf16> to vector<16x8xbf16>
      %c24 = arith.constant 24 : index
      %c0_170 = arith.constant 0 : index
      %c0_171 = arith.constant 0 : index
      %198 = vector.load %arg2[%c24, %c0_170, %c0_171] : memref<49x8x128xbf16, #tpu.memory_space<vmem>>, vector<1x8x128xbf16>
      %199 = vector.shape_cast %198 : vector<1x8x128xbf16> to vector<8x128xbf16>
      %cst_172 = arith.constant dense<0.000000e+00> : vector<16x128xf32>
      %200 = tpu.matmul %197, %199, %cst_172 {dimension_numbers = #tpu.dot_dimension_numbers<[1], [0], [0], [1], [0, 0, 1, 1], [], []>} : vector<16x8xbf16>, vector<8x128xbf16>, vector<16x128xf32> -> vector<16x128xf32>
      %201 = arith.addf %193, %200 : vector<16x128xf32>
      %c39_i32_173 = arith.constant 39 : i32
      %202 = arith.addi %c39_i32_173, %arg6 : i32
      %c0_174 = arith.constant 0 : index
      %203 = arith.index_cast %202 : i32 to index
      %c2_175 = arith.constant 2 : index
      %c0_176 = arith.constant 0 : index
      %204 = vector.load %arg1[%c0_174, %203, %c2_175, %c0_176] : memref<1x76x19x8xbf16, #tpu.memory_space<vmem>>, vector<1x1x16x8xbf16>
      %205 = vector.shape_cast %204 : vector<1x1x16x8xbf16> to vector<16x8xbf16>
      %c25 = arith.constant 25 : index
      %c0_177 = arith.constant 0 : index
      %c0_178 = arith.constant 0 : index
      %206 = vector.load %arg2[%c25, %c0_177, %c0_178] : memref<49x8x128xbf16, #tpu.memory_space<vmem>>, vector<1x8x128xbf16>
      %207 = vector.shape_cast %206 : vector<1x8x128xbf16> to vector<8x128xbf16>
      %cst_179 = arith.constant dense<0.000000e+00> : vector<16x128xf32>
      %208 = tpu.matmul %205, %207, %cst_179 {dimension_numbers = #tpu.dot_dimension_numbers<[1], [0], [0], [1], [0, 0, 1, 1], [], []>} : vector<16x8xbf16>, vector<8x128xbf16>, vector<16x128xf32> -> vector<16x128xf32>
      %209 = arith.addf %201, %208 : vector<16x128xf32>
      %c58_i32_180 = arith.constant 58 : i32
      %210 = arith.addi %c58_i32_180, %arg6 : i32
      %c0_181 = arith.constant 0 : index
      %211 = arith.index_cast %210 : i32 to index
      %c2_182 = arith.constant 2 : index
      %c0_183 = arith.constant 0 : index
      %212 = vector.load %arg1[%c0_181, %211, %c2_182, %c0_183] : memref<1x76x19x8xbf16, #tpu.memory_space<vmem>>, vector<1x1x16x8xbf16>
      %213 = vector.shape_cast %212 : vector<1x1x16x8xbf16> to vector<16x8xbf16>
      %c26 = arith.constant 26 : index
      %c0_184 = arith.constant 0 : index
      %c0_185 = arith.constant 0 : index
      %214 = vector.load %arg2[%c26, %c0_184, %c0_185] : memref<49x8x128xbf16, #tpu.memory_space<vmem>>, vector<1x8x128xbf16>
      %215 = vector.shape_cast %214 : vector<1x8x128xbf16> to vector<8x128xbf16>
      %cst_186 = arith.constant dense<0.000000e+00> : vector<16x128xf32>
      %216 = tpu.matmul %213, %215, %cst_186 {dimension_numbers = #tpu.dot_dimension_numbers<[1], [0], [0], [1], [0, 0, 1, 1], [], []>} : vector<16x8xbf16>, vector<8x128xbf16>, vector<16x128xf32> -> vector<16x128xf32>
      %217 = arith.addf %209, %216 : vector<16x128xf32>
      %c39_i32_187 = arith.constant 39 : i32
      %218 = arith.addi %c39_i32_187, %arg6 : i32
      %c0_188 = arith.constant 0 : index
      %219 = arith.index_cast %218 : i32 to index
      %c3_189 = arith.constant 3 : index
      %c0_190 = arith.constant 0 : index
      %220 = vector.load %arg1[%c0_188, %219, %c3_189, %c0_190] : memref<1x76x19x8xbf16, #tpu.memory_space<vmem>>, vector<1x1x16x8xbf16>
      %221 = vector.shape_cast %220 : vector<1x1x16x8xbf16> to vector<16x8xbf16>
      %c27 = arith.constant 27 : index
      %c0_191 = arith.constant 0 : index
      %c0_192 = arith.constant 0 : index
      %222 = vector.load %arg2[%c27, %c0_191, %c0_192] : memref<49x8x128xbf16, #tpu.memory_space<vmem>>, vector<1x8x128xbf16>
      %223 = vector.shape_cast %222 : vector<1x8x128xbf16> to vector<8x128xbf16>
      %cst_193 = arith.constant dense<0.000000e+00> : vector<16x128xf32>
      %224 = tpu.matmul %221, %223, %cst_193 {dimension_numbers = #tpu.dot_dimension_numbers<[1], [0], [0], [1], [0, 0, 1, 1], [], []>} : vector<16x8xbf16>, vector<8x128xbf16>, vector<16x128xf32> -> vector<16x128xf32>
      %225 = arith.addf %217, %224 : vector<16x128xf32>
      %c2_i32 = arith.constant 2 : i32
      %226 = arith.addi %c2_i32, %arg6 : i32
      %c0_194 = arith.constant 0 : index
      %227 = arith.index_cast %226 : i32 to index
      %c0_195 = arith.constant 0 : index
      %c0_196 = arith.constant 0 : index
      %228 = vector.load %arg1[%c0_194, %227, %c0_195, %c0_196] : memref<1x76x19x8xbf16, #tpu.memory_space<vmem>>, vector<1x1x16x8xbf16>
      %229 = vector.shape_cast %228 : vector<1x1x16x8xbf16> to vector<16x8xbf16>
      %c28 = arith.constant 28 : index
      %c0_197 = arith.constant 0 : index
      %c0_198 = arith.constant 0 : index
      %230 = vector.load %arg2[%c28, %c0_197, %c0_198] : memref<49x8x128xbf16, #tpu.memory_space<vmem>>, vector<1x8x128xbf16>
      %231 = vector.shape_cast %230 : vector<1x8x128xbf16> to vector<8x128xbf16>
      %cst_199 = arith.constant dense<0.000000e+00> : vector<16x128xf32>
      %232 = tpu.matmul %229, %231, %cst_199 {dimension_numbers = #tpu.dot_dimension_numbers<[1], [0], [0], [1], [0, 0, 1, 1], [], []>} : vector<16x8xbf16>, vector<8x128xbf16>, vector<16x128xf32> -> vector<16x128xf32>
      %233 = arith.addf %225, %232 : vector<16x128xf32>
      %c21_i32 = arith.constant 21 : i32
      %234 = arith.addi %c21_i32, %arg6 : i32
      %c0_200 = arith.constant 0 : index
      %235 = arith.index_cast %234 : i32 to index
      %c0_201 = arith.constant 0 : index
      %c0_202 = arith.constant 0 : index
      %236 = vector.load %arg1[%c0_200, %235, %c0_201, %c0_202] : memref<1x76x19x8xbf16, #tpu.memory_space<vmem>>, vector<1x1x16x8xbf16>
      %237 = vector.shape_cast %236 : vector<1x1x16x8xbf16> to vector<16x8xbf16>
      %c29 = arith.constant 29 : index
      %c0_203 = arith.constant 0 : index
      %c0_204 = arith.constant 0 : index
      %238 = vector.load %arg2[%c29, %c0_203, %c0_204] : memref<49x8x128xbf16, #tpu.memory_space<vmem>>, vector<1x8x128xbf16>
      %239 = vector.shape_cast %238 : vector<1x8x128xbf16> to vector<8x128xbf16>
      %cst_205 = arith.constant dense<0.000000e+00> : vector<16x128xf32>
      %240 = tpu.matmul %237, %239, %cst_205 {dimension_numbers = #tpu.dot_dimension_numbers<[1], [0], [0], [1], [0, 0, 1, 1], [], []>} : vector<16x8xbf16>, vector<8x128xbf16>, vector<16x128xf32> -> vector<16x128xf32>
      %241 = arith.addf %233, %240 : vector<16x128xf32>
      %c2_i32_206 = arith.constant 2 : i32
      %242 = arith.addi %c2_i32_206, %arg6 : i32
      %c0_207 = arith.constant 0 : index
      %243 = arith.index_cast %242 : i32 to index
      %c1_208 = arith.constant 1 : index
      %c0_209 = arith.constant 0 : index
      %244 = vector.load %arg1[%c0_207, %243, %c1_208, %c0_209] : memref<1x76x19x8xbf16, #tpu.memory_space<vmem>>, vector<1x1x16x8xbf16>
      %245 = vector.shape_cast %244 : vector<1x1x16x8xbf16> to vector<16x8xbf16>
      %c30 = arith.constant 30 : index
      %c0_210 = arith.constant 0 : index
      %c0_211 = arith.constant 0 : index
      %246 = vector.load %arg2[%c30, %c0_210, %c0_211] : memref<49x8x128xbf16, #tpu.memory_space<vmem>>, vector<1x8x128xbf16>
      %247 = vector.shape_cast %246 : vector<1x8x128xbf16> to vector<8x128xbf16>
      %cst_212 = arith.constant dense<0.000000e+00> : vector<16x128xf32>
      %248 = tpu.matmul %245, %247, %cst_212 {dimension_numbers = #tpu.dot_dimension_numbers<[1], [0], [0], [1], [0, 0, 1, 1], [], []>} : vector<16x8xbf16>, vector<8x128xbf16>, vector<16x128xf32> -> vector<16x128xf32>
      %249 = arith.addf %241, %248 : vector<16x128xf32>
      %c21_i32_213 = arith.constant 21 : i32
      %250 = arith.addi %c21_i32_213, %arg6 : i32
      %c0_214 = arith.constant 0 : index
      %251 = arith.index_cast %250 : i32 to index
      %c1_215 = arith.constant 1 : index
      %c0_216 = arith.constant 0 : index
      %252 = vector.load %arg1[%c0_214, %251, %c1_215, %c0_216] : memref<1x76x19x8xbf16, #tpu.memory_space<vmem>>, vector<1x1x16x8xbf16>
      %253 = vector.shape_cast %252 : vector<1x1x16x8xbf16> to vector<16x8xbf16>
      %c31 = arith.constant 31 : index
      %c0_217 = arith.constant 0 : index
      %c0_218 = arith.constant 0 : index
      %254 = vector.load %arg2[%c31, %c0_217, %c0_218] : memref<49x8x128xbf16, #tpu.memory_space<vmem>>, vector<1x8x128xbf16>
      %255 = vector.shape_cast %254 : vector<1x8x128xbf16> to vector<8x128xbf16>
      %cst_219 = arith.constant dense<0.000000e+00> : vector<16x128xf32>
      %256 = tpu.matmul %253, %255, %cst_219 {dimension_numbers = #tpu.dot_dimension_numbers<[1], [0], [0], [1], [0, 0, 1, 1], [], []>} : vector<16x8xbf16>, vector<8x128xbf16>, vector<16x128xf32> -> vector<16x128xf32>
      %257 = arith.addf %249, %256 : vector<16x128xf32>
      %c2_i32_220 = arith.constant 2 : i32
      %258 = arith.addi %c2_i32_220, %arg6 : i32
      %c0_221 = arith.constant 0 : index
      %259 = arith.index_cast %258 : i32 to index
      %c2_222 = arith.constant 2 : index
      %c0_223 = arith.constant 0 : index
      %260 = vector.load %arg1[%c0_221, %259, %c2_222, %c0_223] : memref<1x76x19x8xbf16, #tpu.memory_space<vmem>>, vector<1x1x16x8xbf16>
      %261 = vector.shape_cast %260 : vector<1x1x16x8xbf16> to vector<16x8xbf16>
      %c32 = arith.constant 32 : index
      %c0_224 = arith.constant 0 : index
      %c0_225 = arith.constant 0 : index
      %262 = vector.load %arg2[%c32, %c0_224, %c0_225] : memref<49x8x128xbf16, #tpu.memory_space<vmem>>, vector<1x8x128xbf16>
      %263 = vector.shape_cast %262 : vector<1x8x128xbf16> to vector<8x128xbf16>
      %cst_226 = arith.constant dense<0.000000e+00> : vector<16x128xf32>
      %264 = tpu.matmul %261, %263, %cst_226 {dimension_numbers = #tpu.dot_dimension_numbers<[1], [0], [0], [1], [0, 0, 1, 1], [], []>} : vector<16x8xbf16>, vector<8x128xbf16>, vector<16x128xf32> -> vector<16x128xf32>
      %265 = arith.addf %257, %264 : vector<16x128xf32>
      %c21_i32_227 = arith.constant 21 : i32
      %266 = arith.addi %c21_i32_227, %arg6 : i32
      %c0_228 = arith.constant 0 : index
      %267 = arith.index_cast %266 : i32 to index
      %c2_229 = arith.constant 2 : index
      %c0_230 = arith.constant 0 : index
      %268 = vector.load %arg1[%c0_228, %267, %c2_229, %c0_230] : memref<1x76x19x8xbf16, #tpu.memory_space<vmem>>, vector<1x1x16x8xbf16>
      %269 = vector.shape_cast %268 : vector<1x1x16x8xbf16> to vector<16x8xbf16>
      %c33 = arith.constant 33 : index
      %c0_231 = arith.constant 0 : index
      %c0_232 = arith.constant 0 : index
      %270 = vector.load %arg2[%c33, %c0_231, %c0_232] : memref<49x8x128xbf16, #tpu.memory_space<vmem>>, vector<1x8x128xbf16>
      %271 = vector.shape_cast %270 : vector<1x8x128xbf16> to vector<8x128xbf16>
      %cst_233 = arith.constant dense<0.000000e+00> : vector<16x128xf32>
      %272 = tpu.matmul %269, %271, %cst_233 {dimension_numbers = #tpu.dot_dimension_numbers<[1], [0], [0], [1], [0, 0, 1, 1], [], []>} : vector<16x8xbf16>, vector<8x128xbf16>, vector<16x128xf32> -> vector<16x128xf32>
      %273 = arith.addf %265, %272 : vector<16x128xf32>
      %c2_i32_234 = arith.constant 2 : i32
      %274 = arith.addi %c2_i32_234, %arg6 : i32
      %c0_235 = arith.constant 0 : index
      %275 = arith.index_cast %274 : i32 to index
      %c3_236 = arith.constant 3 : index
      %c0_237 = arith.constant 0 : index
      %276 = vector.load %arg1[%c0_235, %275, %c3_236, %c0_237] : memref<1x76x19x8xbf16, #tpu.memory_space<vmem>>, vector<1x1x16x8xbf16>
      %277 = vector.shape_cast %276 : vector<1x1x16x8xbf16> to vector<16x8xbf16>
      %c34 = arith.constant 34 : index
      %c0_238 = arith.constant 0 : index
      %c0_239 = arith.constant 0 : index
      %278 = vector.load %arg2[%c34, %c0_238, %c0_239] : memref<49x8x128xbf16, #tpu.memory_space<vmem>>, vector<1x8x128xbf16>
      %279 = vector.shape_cast %278 : vector<1x8x128xbf16> to vector<8x128xbf16>
      %cst_240 = arith.constant dense<0.000000e+00> : vector<16x128xf32>
      %280 = tpu.matmul %277, %279, %cst_240 {dimension_numbers = #tpu.dot_dimension_numbers<[1], [0], [0], [1], [0, 0, 1, 1], [], []>} : vector<16x8xbf16>, vector<8x128xbf16>, vector<16x128xf32> -> vector<16x128xf32>
      %281 = arith.addf %273, %280 : vector<16x128xf32>
      %c40_i32 = arith.constant 40 : i32
      %282 = arith.addi %c40_i32, %arg6 : i32
      %c0_241 = arith.constant 0 : index
      %283 = arith.index_cast %282 : i32 to index
      %c0_242 = arith.constant 0 : index
      %c0_243 = arith.constant 0 : index
      %284 = vector.load %arg1[%c0_241, %283, %c0_242, %c0_243] : memref<1x76x19x8xbf16, #tpu.memory_space<vmem>>, vector<1x1x16x8xbf16>
      %285 = vector.shape_cast %284 : vector<1x1x16x8xbf16> to vector<16x8xbf16>
      %c35 = arith.constant 35 : index
      %c0_244 = arith.constant 0 : index
      %c0_245 = arith.constant 0 : index
      %286 = vector.load %arg2[%c35, %c0_244, %c0_245] : memref<49x8x128xbf16, #tpu.memory_space<vmem>>, vector<1x8x128xbf16>
      %287 = vector.shape_cast %286 : vector<1x8x128xbf16> to vector<8x128xbf16>
      %cst_246 = arith.constant dense<0.000000e+00> : vector<16x128xf32>
      %288 = tpu.matmul %285, %287, %cst_246 {dimension_numbers = #tpu.dot_dimension_numbers<[1], [0], [0], [1], [0, 0, 1, 1], [], []>} : vector<16x8xbf16>, vector<8x128xbf16>, vector<16x128xf32> -> vector<16x128xf32>
      %289 = arith.addf %281, %288 : vector<16x128xf32>
      %c59_i32 = arith.constant 59 : i32
      %290 = arith.addi %c59_i32, %arg6 : i32
      %c0_247 = arith.constant 0 : index
      %291 = arith.index_cast %290 : i32 to index
      %c0_248 = arith.constant 0 : index
      %c0_249 = arith.constant 0 : index
      %292 = vector.load %arg1[%c0_247, %291, %c0_248, %c0_249] : memref<1x76x19x8xbf16, #tpu.memory_space<vmem>>, vector<1x1x16x8xbf16>
      %293 = vector.shape_cast %292 : vector<1x1x16x8xbf16> to vector<16x8xbf16>
      %c36 = arith.constant 36 : index
      %c0_250 = arith.constant 0 : index
      %c0_251 = arith.constant 0 : index
      %294 = vector.load %arg2[%c36, %c0_250, %c0_251] : memref<49x8x128xbf16, #tpu.memory_space<vmem>>, vector<1x8x128xbf16>
      %295 = vector.shape_cast %294 : vector<1x8x128xbf16> to vector<8x128xbf16>
      %cst_252 = arith.constant dense<0.000000e+00> : vector<16x128xf32>
      %296 = tpu.matmul %293, %295, %cst_252 {dimension_numbers = #tpu.dot_dimension_numbers<[1], [0], [0], [1], [0, 0, 1, 1], [], []>} : vector<16x8xbf16>, vector<8x128xbf16>, vector<16x128xf32> -> vector<16x128xf32>
      %297 = arith.addf %289, %296 : vector<16x128xf32>
      %c40_i32_253 = arith.constant 40 : i32
      %298 = arith.addi %c40_i32_253, %arg6 : i32
      %c0_254 = arith.constant 0 : index
      %299 = arith.index_cast %298 : i32 to index
      %c1_255 = arith.constant 1 : index
      %c0_256 = arith.constant 0 : index
      %300 = vector.load %arg1[%c0_254, %299, %c1_255, %c0_256] : memref<1x76x19x8xbf16, #tpu.memory_space<vmem>>, vector<1x1x16x8xbf16>
      %301 = vector.shape_cast %300 : vector<1x1x16x8xbf16> to vector<16x8xbf16>
      %c37 = arith.constant 37 : index
      %c0_257 = arith.constant 0 : index
      %c0_258 = arith.constant 0 : index
      %302 = vector.load %arg2[%c37, %c0_257, %c0_258] : memref<49x8x128xbf16, #tpu.memory_space<vmem>>, vector<1x8x128xbf16>
      %303 = vector.shape_cast %302 : vector<1x8x128xbf16> to vector<8x128xbf16>
      %cst_259 = arith.constant dense<0.000000e+00> : vector<16x128xf32>
      %304 = tpu.matmul %301, %303, %cst_259 {dimension_numbers = #tpu.dot_dimension_numbers<[1], [0], [0], [1], [0, 0, 1, 1], [], []>} : vector<16x8xbf16>, vector<8x128xbf16>, vector<16x128xf32> -> vector<16x128xf32>
      %305 = arith.addf %297, %304 : vector<16x128xf32>
      %c59_i32_260 = arith.constant 59 : i32
      %306 = arith.addi %c59_i32_260, %arg6 : i32
      %c0_261 = arith.constant 0 : index
      %307 = arith.index_cast %306 : i32 to index
      %c1_262 = arith.constant 1 : index
      %c0_263 = arith.constant 0 : index
      %308 = vector.load %arg1[%c0_261, %307, %c1_262, %c0_263] : memref<1x76x19x8xbf16, #tpu.memory_space<vmem>>, vector<1x1x16x8xbf16>
      %309 = vector.shape_cast %308 : vector<1x1x16x8xbf16> to vector<16x8xbf16>
      %c38 = arith.constant 38 : index
      %c0_264 = arith.constant 0 : index
      %c0_265 = arith.constant 0 : index
      %310 = vector.load %arg2[%c38, %c0_264, %c0_265] : memref<49x8x128xbf16, #tpu.memory_space<vmem>>, vector<1x8x128xbf16>
      %311 = vector.shape_cast %310 : vector<1x8x128xbf16> to vector<8x128xbf16>
      %cst_266 = arith.constant dense<0.000000e+00> : vector<16x128xf32>
      %312 = tpu.matmul %309, %311, %cst_266 {dimension_numbers = #tpu.dot_dimension_numbers<[1], [0], [0], [1], [0, 0, 1, 1], [], []>} : vector<16x8xbf16>, vector<8x128xbf16>, vector<16x128xf32> -> vector<16x128xf32>
      %313 = arith.addf %305, %312 : vector<16x128xf32>
      %c40_i32_267 = arith.constant 40 : i32
      %314 = arith.addi %c40_i32_267, %arg6 : i32
      %c0_268 = arith.constant 0 : index
      %315 = arith.index_cast %314 : i32 to index
      %c2_269 = arith.constant 2 : index
      %c0_270 = arith.constant 0 : index
      %316 = vector.load %arg1[%c0_268, %315, %c2_269, %c0_270] : memref<1x76x19x8xbf16, #tpu.memory_space<vmem>>, vector<1x1x16x8xbf16>
      %317 = vector.shape_cast %316 : vector<1x1x16x8xbf16> to vector<16x8xbf16>
      %c39 = arith.constant 39 : index
      %c0_271 = arith.constant 0 : index
      %c0_272 = arith.constant 0 : index
      %318 = vector.load %arg2[%c39, %c0_271, %c0_272] : memref<49x8x128xbf16, #tpu.memory_space<vmem>>, vector<1x8x128xbf16>
      %319 = vector.shape_cast %318 : vector<1x8x128xbf16> to vector<8x128xbf16>
      %cst_273 = arith.constant dense<0.000000e+00> : vector<16x128xf32>
      %320 = tpu.matmul %317, %319, %cst_273 {dimension_numbers = #tpu.dot_dimension_numbers<[1], [0], [0], [1], [0, 0, 1, 1], [], []>} : vector<16x8xbf16>, vector<8x128xbf16>, vector<16x128xf32> -> vector<16x128xf32>
      %321 = arith.addf %313, %320 : vector<16x128xf32>
      %c59_i32_274 = arith.constant 59 : i32
      %322 = arith.addi %c59_i32_274, %arg6 : i32
      %c0_275 = arith.constant 0 : index
      %323 = arith.index_cast %322 : i32 to index
      %c2_276 = arith.constant 2 : index
      %c0_277 = arith.constant 0 : index
      %324 = vector.load %arg1[%c0_275, %323, %c2_276, %c0_277] : memref<1x76x19x8xbf16, #tpu.memory_space<vmem>>, vector<1x1x16x8xbf16>
      %325 = vector.shape_cast %324 : vector<1x1x16x8xbf16> to vector<16x8xbf16>
      %c40 = arith.constant 40 : index
      %c0_278 = arith.constant 0 : index
      %c0_279 = arith.constant 0 : index
      %326 = vector.load %arg2[%c40, %c0_278, %c0_279] : memref<49x8x128xbf16, #tpu.memory_space<vmem>>, vector<1x8x128xbf16>
      %327 = vector.shape_cast %326 : vector<1x8x128xbf16> to vector<8x128xbf16>
      %cst_280 = arith.constant dense<0.000000e+00> : vector<16x128xf32>
      %328 = tpu.matmul %325, %327, %cst_280 {dimension_numbers = #tpu.dot_dimension_numbers<[1], [0], [0], [1], [0, 0, 1, 1], [], []>} : vector<16x8xbf16>, vector<8x128xbf16>, vector<16x128xf32> -> vector<16x128xf32>
      %329 = arith.addf %321, %328 : vector<16x128xf32>
      %c40_i32_281 = arith.constant 40 : i32
      %330 = arith.addi %c40_i32_281, %arg6 : i32
      %c0_282 = arith.constant 0 : index
      %331 = arith.index_cast %330 : i32 to index
      %c3_283 = arith.constant 3 : index
      %c0_284 = arith.constant 0 : index
      %332 = vector.load %arg1[%c0_282, %331, %c3_283, %c0_284] : memref<1x76x19x8xbf16, #tpu.memory_space<vmem>>, vector<1x1x16x8xbf16>
      %333 = vector.shape_cast %332 : vector<1x1x16x8xbf16> to vector<16x8xbf16>
      %c41 = arith.constant 41 : index
      %c0_285 = arith.constant 0 : index
      %c0_286 = arith.constant 0 : index
      %334 = vector.load %arg2[%c41, %c0_285, %c0_286] : memref<49x8x128xbf16, #tpu.memory_space<vmem>>, vector<1x8x128xbf16>
      %335 = vector.shape_cast %334 : vector<1x8x128xbf16> to vector<8x128xbf16>
      %cst_287 = arith.constant dense<0.000000e+00> : vector<16x128xf32>
      %336 = tpu.matmul %333, %335, %cst_287 {dimension_numbers = #tpu.dot_dimension_numbers<[1], [0], [0], [1], [0, 0, 1, 1], [], []>} : vector<16x8xbf16>, vector<8x128xbf16>, vector<16x128xf32> -> vector<16x128xf32>
      %337 = arith.addf %329, %336 : vector<16x128xf32>
      %c3_i32 = arith.constant 3 : i32
      %338 = arith.addi %c3_i32, %arg6 : i32
      %c0_288 = arith.constant 0 : index
      %339 = arith.index_cast %338 : i32 to index
      %c0_289 = arith.constant 0 : index
      %c0_290 = arith.constant 0 : index
      %340 = vector.load %arg1[%c0_288, %339, %c0_289, %c0_290] : memref<1x76x19x8xbf16, #tpu.memory_space<vmem>>, vector<1x1x16x8xbf16>
      %341 = vector.shape_cast %340 : vector<1x1x16x8xbf16> to vector<16x8xbf16>
      %c42 = arith.constant 42 : index
      %c0_291 = arith.constant 0 : index
      %c0_292 = arith.constant 0 : index
      %342 = vector.load %arg2[%c42, %c0_291, %c0_292] : memref<49x8x128xbf16, #tpu.memory_space<vmem>>, vector<1x8x128xbf16>
      %343 = vector.shape_cast %342 : vector<1x8x128xbf16> to vector<8x128xbf16>
      %cst_293 = arith.constant dense<0.000000e+00> : vector<16x128xf32>
      %344 = tpu.matmul %341, %343, %cst_293 {dimension_numbers = #tpu.dot_dimension_numbers<[1], [0], [0], [1], [0, 0, 1, 1], [], []>} : vector<16x8xbf16>, vector<8x128xbf16>, vector<16x128xf32> -> vector<16x128xf32>
      %345 = arith.addf %337, %344 : vector<16x128xf32>
      %c22_i32 = arith.constant 22 : i32
      %346 = arith.addi %c22_i32, %arg6 : i32
      %c0_294 = arith.constant 0 : index
      %347 = arith.index_cast %346 : i32 to index
      %c0_295 = arith.constant 0 : index
      %c0_296 = arith.constant 0 : index
      %348 = vector.load %arg1[%c0_294, %347, %c0_295, %c0_296] : memref<1x76x19x8xbf16, #tpu.memory_space<vmem>>, vector<1x1x16x8xbf16>
      %349 = vector.shape_cast %348 : vector<1x1x16x8xbf16> to vector<16x8xbf16>
      %c43 = arith.constant 43 : index
      %c0_297 = arith.constant 0 : index
      %c0_298 = arith.constant 0 : index
      %350 = vector.load %arg2[%c43, %c0_297, %c0_298] : memref<49x8x128xbf16, #tpu.memory_space<vmem>>, vector<1x8x128xbf16>
      %351 = vector.shape_cast %350 : vector<1x8x128xbf16> to vector<8x128xbf16>
      %cst_299 = arith.constant dense<0.000000e+00> : vector<16x128xf32>
      %352 = tpu.matmul %349, %351, %cst_299 {dimension_numbers = #tpu.dot_dimension_numbers<[1], [0], [0], [1], [0, 0, 1, 1], [], []>} : vector<16x8xbf16>, vector<8x128xbf16>, vector<16x128xf32> -> vector<16x128xf32>
      %353 = arith.addf %345, %352 : vector<16x128xf32>
      %c3_i32_300 = arith.constant 3 : i32
      %354 = arith.addi %c3_i32_300, %arg6 : i32
      %c0_301 = arith.constant 0 : index
      %355 = arith.index_cast %354 : i32 to index
      %c1_302 = arith.constant 1 : index
      %c0_303 = arith.constant 0 : index
      %356 = vector.load %arg1[%c0_301, %355, %c1_302, %c0_303] : memref<1x76x19x8xbf16, #tpu.memory_space<vmem>>, vector<1x1x16x8xbf16>
      %357 = vector.shape_cast %356 : vector<1x1x16x8xbf16> to vector<16x8xbf16>
      %c44 = arith.constant 44 : index
      %c0_304 = arith.constant 0 : index
      %c0_305 = arith.constant 0 : index
      %358 = vector.load %arg2[%c44, %c0_304, %c0_305] : memref<49x8x128xbf16, #tpu.memory_space<vmem>>, vector<1x8x128xbf16>
      %359 = vector.shape_cast %358 : vector<1x8x128xbf16> to vector<8x128xbf16>
      %cst_306 = arith.constant dense<0.000000e+00> : vector<16x128xf32>
      %360 = tpu.matmul %357, %359, %cst_306 {dimension_numbers = #tpu.dot_dimension_numbers<[1], [0], [0], [1], [0, 0, 1, 1], [], []>} : vector<16x8xbf16>, vector<8x128xbf16>, vector<16x128xf32> -> vector<16x128xf32>
      %361 = arith.addf %353, %360 : vector<16x128xf32>
      %c22_i32_307 = arith.constant 22 : i32
      %362 = arith.addi %c22_i32_307, %arg6 : i32
      %c0_308 = arith.constant 0 : index
      %363 = arith.index_cast %362 : i32 to index
      %c1_309 = arith.constant 1 : index
      %c0_310 = arith.constant 0 : index
      %364 = vector.load %arg1[%c0_308, %363, %c1_309, %c0_310] : memref<1x76x19x8xbf16, #tpu.memory_space<vmem>>, vector<1x1x16x8xbf16>
      %365 = vector.shape_cast %364 : vector<1x1x16x8xbf16> to vector<16x8xbf16>
      %c45 = arith.constant 45 : index
      %c0_311 = arith.constant 0 : index
      %c0_312 = arith.constant 0 : index
      %366 = vector.load %arg2[%c45, %c0_311, %c0_312] : memref<49x8x128xbf16, #tpu.memory_space<vmem>>, vector<1x8x128xbf16>
      %367 = vector.shape_cast %366 : vector<1x8x128xbf16> to vector<8x128xbf16>
      %cst_313 = arith.constant dense<0.000000e+00> : vector<16x128xf32>
      %368 = tpu.matmul %365, %367, %cst_313 {dimension_numbers = #tpu.dot_dimension_numbers<[1], [0], [0], [1], [0, 0, 1, 1], [], []>} : vector<16x8xbf16>, vector<8x128xbf16>, vector<16x128xf32> -> vector<16x128xf32>
      %369 = arith.addf %361, %368 : vector<16x128xf32>
      %c3_i32_314 = arith.constant 3 : i32
      %370 = arith.addi %c3_i32_314, %arg6 : i32
      %c0_315 = arith.constant 0 : index
      %371 = arith.index_cast %370 : i32 to index
      %c2_316 = arith.constant 2 : index
      %c0_317 = arith.constant 0 : index
      %372 = vector.load %arg1[%c0_315, %371, %c2_316, %c0_317] : memref<1x76x19x8xbf16, #tpu.memory_space<vmem>>, vector<1x1x16x8xbf16>
      %373 = vector.shape_cast %372 : vector<1x1x16x8xbf16> to vector<16x8xbf16>
      %c46 = arith.constant 46 : index
      %c0_318 = arith.constant 0 : index
      %c0_319 = arith.constant 0 : index
      %374 = vector.load %arg2[%c46, %c0_318, %c0_319] : memref<49x8x128xbf16, #tpu.memory_space<vmem>>, vector<1x8x128xbf16>
      %375 = vector.shape_cast %374 : vector<1x8x128xbf16> to vector<8x128xbf16>
      %cst_320 = arith.constant dense<0.000000e+00> : vector<16x128xf32>
      %376 = tpu.matmul %373, %375, %cst_320 {dimension_numbers = #tpu.dot_dimension_numbers<[1], [0], [0], [1], [0, 0, 1, 1], [], []>} : vector<16x8xbf16>, vector<8x128xbf16>, vector<16x128xf32> -> vector<16x128xf32>
      %377 = arith.addf %369, %376 : vector<16x128xf32>
      %c22_i32_321 = arith.constant 22 : i32
      %378 = arith.addi %c22_i32_321, %arg6 : i32
      %c0_322 = arith.constant 0 : index
      %379 = arith.index_cast %378 : i32 to index
      %c2_323 = arith.constant 2 : index
      %c0_324 = arith.constant 0 : index
      %380 = vector.load %arg1[%c0_322, %379, %c2_323, %c0_324] : memref<1x76x19x8xbf16, #tpu.memory_space<vmem>>, vector<1x1x16x8xbf16>
      %381 = vector.shape_cast %380 : vector<1x1x16x8xbf16> to vector<16x8xbf16>
      %c47 = arith.constant 47 : index
      %c0_325 = arith.constant 0 : index
      %c0_326 = arith.constant 0 : index
      %382 = vector.load %arg2[%c47, %c0_325, %c0_326] : memref<49x8x128xbf16, #tpu.memory_space<vmem>>, vector<1x8x128xbf16>
      %383 = vector.shape_cast %382 : vector<1x8x128xbf16> to vector<8x128xbf16>
      %cst_327 = arith.constant dense<0.000000e+00> : vector<16x128xf32>
      %384 = tpu.matmul %381, %383, %cst_327 {dimension_numbers = #tpu.dot_dimension_numbers<[1], [0], [0], [1], [0, 0, 1, 1], [], []>} : vector<16x8xbf16>, vector<8x128xbf16>, vector<16x128xf32> -> vector<16x128xf32>
      %385 = arith.addf %377, %384 : vector<16x128xf32>
      %c3_i32_328 = arith.constant 3 : i32
      %386 = arith.addi %c3_i32_328, %arg6 : i32
      %c0_329 = arith.constant 0 : index
      %387 = arith.index_cast %386 : i32 to index
      %c3_330 = arith.constant 3 : index
      %c0_331 = arith.constant 0 : index
      %388 = vector.load %arg1[%c0_329, %387, %c3_330, %c0_331] : memref<1x76x19x8xbf16, #tpu.memory_space<vmem>>, vector<1x1x16x8xbf16>
      %389 = vector.shape_cast %388 : vector<1x1x16x8xbf16> to vector<16x8xbf16>
      %c48 = arith.constant 48 : index
      %c0_332 = arith.constant 0 : index
      %c0_333 = arith.constant 0 : index
      %390 = vector.load %arg2[%c48, %c0_332, %c0_333] : memref<49x8x128xbf16, #tpu.memory_space<vmem>>, vector<1x8x128xbf16>
      %391 = vector.shape_cast %390 : vector<1x8x128xbf16> to vector<8x128xbf16>
      %cst_334 = arith.constant dense<0.000000e+00> : vector<16x128xf32>
      %392 = tpu.matmul %389, %391, %cst_334 {dimension_numbers = #tpu.dot_dimension_numbers<[1], [0], [0], [1], [0, 0, 1, 1], [], []>} : vector<16x8xbf16>, vector<8x128xbf16>, vector<16x128xf32> -> vector<16x128xf32>
      %393 = arith.addf %385, %392 : vector<16x128xf32>
      %394 = vector.broadcast %0 : vector<1x128xf32> to vector<16x128xf32>
      %395 = arith.mulf %393, %394 : vector<16x128xf32>
      %396 = vector.broadcast %1 : vector<1x128xf32> to vector<16x128xf32>
      %397 = arith.addf %395, %396 : vector<16x128xf32>
      %cst_335 = arith.constant 0.000000e+00 : f32
      %398 = vector.broadcast %cst_335 : f32 to vector<16x128xf32>
      %399 = arith.maximumf %397, %398 : vector<16x128xf32>
      %400 = arith.truncf %399 : vector<16x128xf32> to vector<16x128xbf16>
      %c0_336 = arith.constant 0 : index
      %401 = arith.index_cast %arg6 : i32 to index
      %c0_337 = arith.constant 0 : index
      %c0_338 = arith.constant 0 : index
      %402 = vector.load %arg5[%c0_336, %401, %c0_337, %c0_338] : memref<1x16x16x128xbf16, #tpu.memory_space<vmem>>, vector<1x1x16x128xbf16>
      %403 = vector.shape_cast %402 : vector<1x1x16x128xbf16> to vector<16x128xbf16>
      %404 = vector.shape_cast %400 : vector<16x128xbf16> to vector<1x1x16x128xbf16>
      tpu.vector_store %arg5[%c0_336, %401, %c0_337, %c0_338], %404 {strides = array<i32>} : memref<1x16x16x128xbf16, #tpu.memory_space<vmem>>, vector<1x1x16x128xbf16>,
    }
    %c16_i32_3 = arith.constant 16 : i32
    return
  }
  func.func @transform_0(%arg0: i32) -> (i32, i32, i32, i32) {
    %c0_i32 = arith.constant 0 : i32
    %c0_i32_0 = arith.constant 0 : i32
    %c0_i32_1 = arith.constant 0 : i32
    %c0_i32_2 = arith.constant 0 : i32
    return %arg0, %c0_i32, %c0_i32_0, %c0_i32_1 : i32, i32, i32, i32
  }
  func.func @transform_1(%arg0: i32) -> (i32, i32, i32) {
    %c0_i32 = arith.constant 0 : i32
    %c0_i32_0 = arith.constant 0 : i32
    %c0_i32_1 = arith.constant 0 : i32
    %c0_i32_2 = arith.constant 0 : i32
    return %c0_i32, %c0_i32_0, %c0_i32_1 : i32, i32, i32
  }
  func.func @transform_2(%arg0: i32) -> (i32, i32) {
    %c0_i32 = arith.constant 0 : i32
    %c0_i32_0 = arith.constant 0 : i32
    %c0_i32_1 = arith.constant 0 : i32
    return %c0_i32, %c0_i32_0 : i32, i32
  }
  func.func @transform_3(%arg0: i32) -> (i32, i32) {
    %c0_i32 = arith.constant 0 : i32
    %c0_i32_0 = arith.constant 0 : i32
    %c0_i32_1 = arith.constant 0 : i32
    return %c0_i32, %c0_i32_0 : i32, i32
  }
  func.func @transform_4(%arg0: i32) -> (i32, i32, i32, i32) {
    %c0_i32 = arith.constant 0 : i32
    %c0_i32_0 = arith.constant 0 : i32
    %c0_i32_1 = arith.constant 0 : i32
    %c0_i32_2 = arith.constant 0 : i32
    return %arg0, %c0_i32, %c0_i32_0, %c0_i32_1 : i32, i32, i32, i32
  }
}

module attributes {stable_mosaic.version = 11 : i64} {
  func.func @_conv_bn_kernel(%arg0: i32, %arg1: memref<1x10x10x128xbf16, #tpu.memory_space<vmem>>, %arg2: memref<9x128x128xbf16, #tpu.memory_space<vmem>>, %arg3: memref<1x128xf32, #tpu.memory_space<vmem>>, %arg4: memref<1x128xf32, #tpu.memory_space<vmem>>, %arg5: memref<1x8x8x128xbf16, #tpu.memory_space<vmem>>) attributes {dimension_semantics = [#tpu.dimension_semantics<parallel>], iteration_bounds = array<i64: 2>, scalar_prefetch = 0 : i64, scratch_operands = 0 : i64, tpu.core_type = #tpu.core_type<tc>, window_params = [{transform_indices = @transform_0, window_bounds = array<i64: 1, 10, 10, 128>}, {pipeline_mode = #tpu.pipeline_mode<synchronous>, transform_indices = @transform_1, window_bounds = array<i64: 9, 128, 128>}, {pipeline_mode = #tpu.pipeline_mode<synchronous>, transform_indices = @transform_2, window_bounds = array<i64: 1, 128>}, {pipeline_mode = #tpu.pipeline_mode<synchronous>, transform_indices = @transform_3, window_bounds = array<i64: 1, 128>}, {transform_indices = @transform_4, window_bounds = array<i64: 1, 8, 8, 128>}]} {
    %c0 = arith.constant 0 : index
    %c0_0 = arith.constant 0 : index
    %0 = vector.load %arg3[%c0, %c0_0] : memref<1x128xf32, #tpu.memory_space<vmem>>, vector<1x128xf32>
    %c0_1 = arith.constant 0 : index
    %c0_2 = arith.constant 0 : index
    %1 = vector.load %arg4[%c0_1, %c0_2] : memref<1x128xf32, #tpu.memory_space<vmem>>, vector<1x128xf32>
    %c0_i32 = arith.constant 0 : i32
    %c8_i32 = arith.constant 8 : i32
    %2 = arith.addi %c0_i32, %c8_i32 : i32
    %c1_i32 = arith.constant 1 : i32
    scf.for %arg6 = %c0_i32 to %2 step %c1_i32  : i32 {
      %c0_i32_4 = arith.constant 0 : i32
      %3 = arith.addi %c0_i32_4, %arg6 : i32
      %c0_5 = arith.constant 0 : index
      %4 = arith.index_cast %3 : i32 to index
      %c0_6 = arith.constant 0 : index
      %c0_7 = arith.constant 0 : index
      %5 = vector.load %arg1[%c0_5, %4, %c0_6, %c0_7] : memref<1x10x10x128xbf16, #tpu.memory_space<vmem>>, vector<1x1x8x128xbf16>
      %6 = vector.shape_cast %5 : vector<1x1x8x128xbf16> to vector<8x128xbf16>
      %c0_8 = arith.constant 0 : index
      %c0_9 = arith.constant 0 : index
      %c0_10 = arith.constant 0 : index
      %7 = vector.load %arg2[%c0_8, %c0_9, %c0_10] : memref<9x128x128xbf16, #tpu.memory_space<vmem>>, vector<1x128x128xbf16>
      %8 = vector.shape_cast %7 : vector<1x128x128xbf16> to vector<128x128xbf16>
      %cst = arith.constant dense<0.000000e+00> : vector<8x128xf32>
      %9 = tpu.matmul %6, %8, %cst {dimension_numbers = #tpu.dot_dimension_numbers<[1], [0], [0], [1], [0, 0, 1, 1], [], []>} : vector<8x128xbf16>, vector<128x128xbf16>, vector<8x128xf32> -> vector<8x128xf32>
      %c0_i32_11 = arith.constant 0 : i32
      %10 = arith.addi %c0_i32_11, %arg6 : i32
      %c0_12 = arith.constant 0 : index
      %11 = arith.index_cast %10 : i32 to index
      %c1 = arith.constant 1 : index
      %c0_13 = arith.constant 0 : index
      %12 = vector.load %arg1[%c0_12, %11, %c1, %c0_13] : memref<1x10x10x128xbf16, #tpu.memory_space<vmem>>, vector<1x1x8x128xbf16>
      %13 = vector.shape_cast %12 : vector<1x1x8x128xbf16> to vector<8x128xbf16>
      %c1_14 = arith.constant 1 : index
      %c0_15 = arith.constant 0 : index
      %c0_16 = arith.constant 0 : index
      %14 = vector.load %arg2[%c1_14, %c0_15, %c0_16] : memref<9x128x128xbf16, #tpu.memory_space<vmem>>, vector<1x128x128xbf16>
      %15 = vector.shape_cast %14 : vector<1x128x128xbf16> to vector<128x128xbf16>
      %cst_17 = arith.constant dense<0.000000e+00> : vector<8x128xf32>
      %16 = tpu.matmul %13, %15, %cst_17 {dimension_numbers = #tpu.dot_dimension_numbers<[1], [0], [0], [1], [0, 0, 1, 1], [], []>} : vector<8x128xbf16>, vector<128x128xbf16>, vector<8x128xf32> -> vector<8x128xf32>
      %17 = arith.addf %9, %16 : vector<8x128xf32>
      %c0_i32_18 = arith.constant 0 : i32
      %18 = arith.addi %c0_i32_18, %arg6 : i32
      %c0_19 = arith.constant 0 : index
      %19 = arith.index_cast %18 : i32 to index
      %c2 = arith.constant 2 : index
      %c0_20 = arith.constant 0 : index
      %20 = vector.load %arg1[%c0_19, %19, %c2, %c0_20] : memref<1x10x10x128xbf16, #tpu.memory_space<vmem>>, vector<1x1x8x128xbf16>
      %21 = vector.shape_cast %20 : vector<1x1x8x128xbf16> to vector<8x128xbf16>
      %c2_21 = arith.constant 2 : index
      %c0_22 = arith.constant 0 : index
      %c0_23 = arith.constant 0 : index
      %22 = vector.load %arg2[%c2_21, %c0_22, %c0_23] : memref<9x128x128xbf16, #tpu.memory_space<vmem>>, vector<1x128x128xbf16>
      %23 = vector.shape_cast %22 : vector<1x128x128xbf16> to vector<128x128xbf16>
      %cst_24 = arith.constant dense<0.000000e+00> : vector<8x128xf32>
      %24 = tpu.matmul %21, %23, %cst_24 {dimension_numbers = #tpu.dot_dimension_numbers<[1], [0], [0], [1], [0, 0, 1, 1], [], []>} : vector<8x128xbf16>, vector<128x128xbf16>, vector<8x128xf32> -> vector<8x128xf32>
      %25 = arith.addf %17, %24 : vector<8x128xf32>
      %c1_i32_25 = arith.constant 1 : i32
      %26 = arith.addi %c1_i32_25, %arg6 : i32
      %c0_26 = arith.constant 0 : index
      %27 = arith.index_cast %26 : i32 to index
      %c0_27 = arith.constant 0 : index
      %c0_28 = arith.constant 0 : index
      %28 = vector.load %arg1[%c0_26, %27, %c0_27, %c0_28] : memref<1x10x10x128xbf16, #tpu.memory_space<vmem>>, vector<1x1x8x128xbf16>
      %29 = vector.shape_cast %28 : vector<1x1x8x128xbf16> to vector<8x128xbf16>
      %c3 = arith.constant 3 : index
      %c0_29 = arith.constant 0 : index
      %c0_30 = arith.constant 0 : index
      %30 = vector.load %arg2[%c3, %c0_29, %c0_30] : memref<9x128x128xbf16, #tpu.memory_space<vmem>>, vector<1x128x128xbf16>
      %31 = vector.shape_cast %30 : vector<1x128x128xbf16> to vector<128x128xbf16>
      %cst_31 = arith.constant dense<0.000000e+00> : vector<8x128xf32>
      %32 = tpu.matmul %29, %31, %cst_31 {dimension_numbers = #tpu.dot_dimension_numbers<[1], [0], [0], [1], [0, 0, 1, 1], [], []>} : vector<8x128xbf16>, vector<128x128xbf16>, vector<8x128xf32> -> vector<8x128xf32>
      %33 = arith.addf %25, %32 : vector<8x128xf32>
      %c1_i32_32 = arith.constant 1 : i32
      %34 = arith.addi %c1_i32_32, %arg6 : i32
      %c0_33 = arith.constant 0 : index
      %35 = arith.index_cast %34 : i32 to index
      %c1_34 = arith.constant 1 : index
      %c0_35 = arith.constant 0 : index
      %36 = vector.load %arg1[%c0_33, %35, %c1_34, %c0_35] : memref<1x10x10x128xbf16, #tpu.memory_space<vmem>>, vector<1x1x8x128xbf16>
      %37 = vector.shape_cast %36 : vector<1x1x8x128xbf16> to vector<8x128xbf16>
      %c4 = arith.constant 4 : index
      %c0_36 = arith.constant 0 : index
      %c0_37 = arith.constant 0 : index
      %38 = vector.load %arg2[%c4, %c0_36, %c0_37] : memref<9x128x128xbf16, #tpu.memory_space<vmem>>, vector<1x128x128xbf16>
      %39 = vector.shape_cast %38 : vector<1x128x128xbf16> to vector<128x128xbf16>
      %cst_38 = arith.constant dense<0.000000e+00> : vector<8x128xf32>
      %40 = tpu.matmul %37, %39, %cst_38 {dimension_numbers = #tpu.dot_dimension_numbers<[1], [0], [0], [1], [0, 0, 1, 1], [], []>} : vector<8x128xbf16>, vector<128x128xbf16>, vector<8x128xf32> -> vector<8x128xf32>
      %41 = arith.addf %33, %40 : vector<8x128xf32>
      %c1_i32_39 = arith.constant 1 : i32
      %42 = arith.addi %c1_i32_39, %arg6 : i32
      %c0_40 = arith.constant 0 : index
      %43 = arith.index_cast %42 : i32 to index
      %c2_41 = arith.constant 2 : index
      %c0_42 = arith.constant 0 : index
      %44 = vector.load %arg1[%c0_40, %43, %c2_41, %c0_42] : memref<1x10x10x128xbf16, #tpu.memory_space<vmem>>, vector<1x1x8x128xbf16>
      %45 = vector.shape_cast %44 : vector<1x1x8x128xbf16> to vector<8x128xbf16>
      %c5 = arith.constant 5 : index
      %c0_43 = arith.constant 0 : index
      %c0_44 = arith.constant 0 : index
      %46 = vector.load %arg2[%c5, %c0_43, %c0_44] : memref<9x128x128xbf16, #tpu.memory_space<vmem>>, vector<1x128x128xbf16>
      %47 = vector.shape_cast %46 : vector<1x128x128xbf16> to vector<128x128xbf16>
      %cst_45 = arith.constant dense<0.000000e+00> : vector<8x128xf32>
      %48 = tpu.matmul %45, %47, %cst_45 {dimension_numbers = #tpu.dot_dimension_numbers<[1], [0], [0], [1], [0, 0, 1, 1], [], []>} : vector<8x128xbf16>, vector<128x128xbf16>, vector<8x128xf32> -> vector<8x128xf32>
      %49 = arith.addf %41, %48 : vector<8x128xf32>
      %c2_i32 = arith.constant 2 : i32
      %50 = arith.addi %c2_i32, %arg6 : i32
      %c0_46 = arith.constant 0 : index
      %51 = arith.index_cast %50 : i32 to index
      %c0_47 = arith.constant 0 : index
      %c0_48 = arith.constant 0 : index
      %52 = vector.load %arg1[%c0_46, %51, %c0_47, %c0_48] : memref<1x10x10x128xbf16, #tpu.memory_space<vmem>>, vector<1x1x8x128xbf16>
      %53 = vector.shape_cast %52 : vector<1x1x8x128xbf16> to vector<8x128xbf16>
      %c6 = arith.constant 6 : index
      %c0_49 = arith.constant 0 : index
      %c0_50 = arith.constant 0 : index
      %54 = vector.load %arg2[%c6, %c0_49, %c0_50] : memref<9x128x128xbf16, #tpu.memory_space<vmem>>, vector<1x128x128xbf16>
      %55 = vector.shape_cast %54 : vector<1x128x128xbf16> to vector<128x128xbf16>
      %cst_51 = arith.constant dense<0.000000e+00> : vector<8x128xf32>
      %56 = tpu.matmul %53, %55, %cst_51 {dimension_numbers = #tpu.dot_dimension_numbers<[1], [0], [0], [1], [0, 0, 1, 1], [], []>} : vector<8x128xbf16>, vector<128x128xbf16>, vector<8x128xf32> -> vector<8x128xf32>
      %57 = arith.addf %49, %56 : vector<8x128xf32>
      %c2_i32_52 = arith.constant 2 : i32
      %58 = arith.addi %c2_i32_52, %arg6 : i32
      %c0_53 = arith.constant 0 : index
      %59 = arith.index_cast %58 : i32 to index
      %c1_54 = arith.constant 1 : index
      %c0_55 = arith.constant 0 : index
      %60 = vector.load %arg1[%c0_53, %59, %c1_54, %c0_55] : memref<1x10x10x128xbf16, #tpu.memory_space<vmem>>, vector<1x1x8x128xbf16>
      %61 = vector.shape_cast %60 : vector<1x1x8x128xbf16> to vector<8x128xbf16>
      %c7 = arith.constant 7 : index
      %c0_56 = arith.constant 0 : index
      %c0_57 = arith.constant 0 : index
      %62 = vector.load %arg2[%c7, %c0_56, %c0_57] : memref<9x128x128xbf16, #tpu.memory_space<vmem>>, vector<1x128x128xbf16>
      %63 = vector.shape_cast %62 : vector<1x128x128xbf16> to vector<128x128xbf16>
      %cst_58 = arith.constant dense<0.000000e+00> : vector<8x128xf32>
      %64 = tpu.matmul %61, %63, %cst_58 {dimension_numbers = #tpu.dot_dimension_numbers<[1], [0], [0], [1], [0, 0, 1, 1], [], []>} : vector<8x128xbf16>, vector<128x128xbf16>, vector<8x128xf32> -> vector<8x128xf32>
      %65 = arith.addf %57, %64 : vector<8x128xf32>
      %c2_i32_59 = arith.constant 2 : i32
      %66 = arith.addi %c2_i32_59, %arg6 : i32
      %c0_60 = arith.constant 0 : index
      %67 = arith.index_cast %66 : i32 to index
      %c2_61 = arith.constant 2 : index
      %c0_62 = arith.constant 0 : index
      %68 = vector.load %arg1[%c0_60, %67, %c2_61, %c0_62] : memref<1x10x10x128xbf16, #tpu.memory_space<vmem>>, vector<1x1x8x128xbf16>
      %69 = vector.shape_cast %68 : vector<1x1x8x128xbf16> to vector<8x128xbf16>
      %c8 = arith.constant 8 : index
      %c0_63 = arith.constant 0 : index
      %c0_64 = arith.constant 0 : index
      %70 = vector.load %arg2[%c8, %c0_63, %c0_64] : memref<9x128x128xbf16, #tpu.memory_space<vmem>>, vector<1x128x128xbf16>
      %71 = vector.shape_cast %70 : vector<1x128x128xbf16> to vector<128x128xbf16>
      %cst_65 = arith.constant dense<0.000000e+00> : vector<8x128xf32>
      %72 = tpu.matmul %69, %71, %cst_65 {dimension_numbers = #tpu.dot_dimension_numbers<[1], [0], [0], [1], [0, 0, 1, 1], [], []>} : vector<8x128xbf16>, vector<128x128xbf16>, vector<8x128xf32> -> vector<8x128xf32>
      %73 = arith.addf %65, %72 : vector<8x128xf32>
      %74 = vector.broadcast %0 : vector<1x128xf32> to vector<8x128xf32>
      %75 = arith.mulf %73, %74 : vector<8x128xf32>
      %76 = vector.broadcast %1 : vector<1x128xf32> to vector<8x128xf32>
      %77 = arith.addf %75, %76 : vector<8x128xf32>
      %cst_66 = arith.constant 0.000000e+00 : f32
      %78 = vector.broadcast %cst_66 : f32 to vector<8x128xf32>
      %79 = arith.maximumf %77, %78 : vector<8x128xf32>
      %80 = arith.truncf %79 : vector<8x128xf32> to vector<8x128xbf16>
      %c0_67 = arith.constant 0 : index
      %81 = arith.index_cast %arg6 : i32 to index
      %c0_68 = arith.constant 0 : index
      %c0_69 = arith.constant 0 : index
      %82 = vector.load %arg5[%c0_67, %81, %c0_68, %c0_69] : memref<1x8x8x128xbf16, #tpu.memory_space<vmem>>, vector<1x1x8x128xbf16>
      %83 = vector.shape_cast %82 : vector<1x1x8x128xbf16> to vector<8x128xbf16>
      %84 = vector.shape_cast %80 : vector<8x128xbf16> to vector<1x1x8x128xbf16>
      tpu.vector_store %arg5[%c0_67, %81, %c0_68, %c0_69], %84 {strides = array<i32>} : memref<1x8x8x128xbf16, #tpu.memory_space<vmem>>, vector<1x1x8x128xbf16>,
    }
    %c8_i32_3 = arith.constant 8 : i32
    return
  }
  func.func @transform_0(%arg0: i32) -> (i32, i32, i32, i32) {
    %c0_i32 = arith.constant 0 : i32
    %c0_i32_0 = arith.constant 0 : i32
    %c0_i32_1 = arith.constant 0 : i32
    %c0_i32_2 = arith.constant 0 : i32
    return %arg0, %c0_i32, %c0_i32_0, %c0_i32_1 : i32, i32, i32, i32
  }
  func.func @transform_1(%arg0: i32) -> (i32, i32, i32) {
    %c0_i32 = arith.constant 0 : i32
    %c0_i32_0 = arith.constant 0 : i32
    %c0_i32_1 = arith.constant 0 : i32
    %c0_i32_2 = arith.constant 0 : i32
    return %c0_i32, %c0_i32_0, %c0_i32_1 : i32, i32, i32
  }
  func.func @transform_2(%arg0: i32) -> (i32, i32) {
    %c0_i32 = arith.constant 0 : i32
    %c0_i32_0 = arith.constant 0 : i32
    %c0_i32_1 = arith.constant 0 : i32
    return %c0_i32, %c0_i32_0 : i32, i32
  }
  func.func @transform_3(%arg0: i32) -> (i32, i32) {
    %c0_i32 = arith.constant 0 : i32
    %c0_i32_0 = arith.constant 0 : i32
    %c0_i32_1 = arith.constant 0 : i32
    return %c0_i32, %c0_i32_0 : i32, i32
  }
  func.func @transform_4(%arg0: i32) -> (i32, i32, i32, i32) {
    %c0_i32 = arith.constant 0 : i32
    %c0_i32_0 = arith.constant 0 : i32
    %c0_i32_1 = arith.constant 0 : i32
    %c0_i32_2 = arith.constant 0 : i32
    return %arg0, %c0_i32, %c0_i32_0, %c0_i32_1 : i32, i32, i32, i32
  }
}

module attributes {stable_mosaic.version = 11 : i64} {
  func.func @_conv_bn_res_kernel(%arg0: i32, %arg1: memref<1x10x10x128xbf16, #tpu.memory_space<vmem>>, %arg2: memref<9x128x128xbf16, #tpu.memory_space<vmem>>, %arg3: memref<1x128xf32, #tpu.memory_space<vmem>>, %arg4: memref<1x128xf32, #tpu.memory_space<vmem>>, %arg5: memref<1x8x8x128xbf16, #tpu.memory_space<vmem>>, %arg6: memref<1x8x8x128xbf16, #tpu.memory_space<vmem>>) attributes {dimension_semantics = [#tpu.dimension_semantics<parallel>], iteration_bounds = array<i64: 2>, scalar_prefetch = 0 : i64, scratch_operands = 0 : i64, tpu.core_type = #tpu.core_type<tc>, window_params = [{transform_indices = @transform_0, window_bounds = array<i64: 1, 10, 10, 128>}, {pipeline_mode = #tpu.pipeline_mode<synchronous>, transform_indices = @transform_1, window_bounds = array<i64: 9, 128, 128>}, {pipeline_mode = #tpu.pipeline_mode<synchronous>, transform_indices = @transform_2, window_bounds = array<i64: 1, 128>}, {pipeline_mode = #tpu.pipeline_mode<synchronous>, transform_indices = @transform_3, window_bounds = array<i64: 1, 128>}, {transform_indices = @transform_4, window_bounds = array<i64: 1, 8, 8, 128>}, {transform_indices = @transform_5, window_bounds = array<i64: 1, 8, 8, 128>}]} {
    %c0 = arith.constant 0 : index
    %c0_0 = arith.constant 0 : index
    %0 = vector.load %arg3[%c0, %c0_0] : memref<1x128xf32, #tpu.memory_space<vmem>>, vector<1x128xf32>
    %c0_1 = arith.constant 0 : index
    %c0_2 = arith.constant 0 : index
    %1 = vector.load %arg4[%c0_1, %c0_2] : memref<1x128xf32, #tpu.memory_space<vmem>>, vector<1x128xf32>
    %c0_i32 = arith.constant 0 : i32
    %c8_i32 = arith.constant 8 : i32
    %2 = arith.addi %c0_i32, %c8_i32 : i32
    %c1_i32 = arith.constant 1 : i32
    scf.for %arg7 = %c0_i32 to %2 step %c1_i32  : i32 {
      %c0_i32_4 = arith.constant 0 : i32
      %3 = arith.addi %c0_i32_4, %arg7 : i32
      %c0_5 = arith.constant 0 : index
      %4 = arith.index_cast %3 : i32 to index
      %c0_6 = arith.constant 0 : index
      %c0_7 = arith.constant 0 : index
      %5 = vector.load %arg1[%c0_5, %4, %c0_6, %c0_7] : memref<1x10x10x128xbf16, #tpu.memory_space<vmem>>, vector<1x1x8x128xbf16>
      %6 = vector.shape_cast %5 : vector<1x1x8x128xbf16> to vector<8x128xbf16>
      %c0_8 = arith.constant 0 : index
      %c0_9 = arith.constant 0 : index
      %c0_10 = arith.constant 0 : index
      %7 = vector.load %arg2[%c0_8, %c0_9, %c0_10] : memref<9x128x128xbf16, #tpu.memory_space<vmem>>, vector<1x128x128xbf16>
      %8 = vector.shape_cast %7 : vector<1x128x128xbf16> to vector<128x128xbf16>
      %cst = arith.constant dense<0.000000e+00> : vector<8x128xf32>
      %9 = tpu.matmul %6, %8, %cst {dimension_numbers = #tpu.dot_dimension_numbers<[1], [0], [0], [1], [0, 0, 1, 1], [], []>} : vector<8x128xbf16>, vector<128x128xbf16>, vector<8x128xf32> -> vector<8x128xf32>
      %c0_i32_11 = arith.constant 0 : i32
      %10 = arith.addi %c0_i32_11, %arg7 : i32
      %c0_12 = arith.constant 0 : index
      %11 = arith.index_cast %10 : i32 to index
      %c1 = arith.constant 1 : index
      %c0_13 = arith.constant 0 : index
      %12 = vector.load %arg1[%c0_12, %11, %c1, %c0_13] : memref<1x10x10x128xbf16, #tpu.memory_space<vmem>>, vector<1x1x8x128xbf16>
      %13 = vector.shape_cast %12 : vector<1x1x8x128xbf16> to vector<8x128xbf16>
      %c1_14 = arith.constant 1 : index
      %c0_15 = arith.constant 0 : index
      %c0_16 = arith.constant 0 : index
      %14 = vector.load %arg2[%c1_14, %c0_15, %c0_16] : memref<9x128x128xbf16, #tpu.memory_space<vmem>>, vector<1x128x128xbf16>
      %15 = vector.shape_cast %14 : vector<1x128x128xbf16> to vector<128x128xbf16>
      %cst_17 = arith.constant dense<0.000000e+00> : vector<8x128xf32>
      %16 = tpu.matmul %13, %15, %cst_17 {dimension_numbers = #tpu.dot_dimension_numbers<[1], [0], [0], [1], [0, 0, 1, 1], [], []>} : vector<8x128xbf16>, vector<128x128xbf16>, vector<8x128xf32> -> vector<8x128xf32>
      %17 = arith.addf %9, %16 : vector<8x128xf32>
      %c0_i32_18 = arith.constant 0 : i32
      %18 = arith.addi %c0_i32_18, %arg7 : i32
      %c0_19 = arith.constant 0 : index
      %19 = arith.index_cast %18 : i32 to index
      %c2 = arith.constant 2 : index
      %c0_20 = arith.constant 0 : index
      %20 = vector.load %arg1[%c0_19, %19, %c2, %c0_20] : memref<1x10x10x128xbf16, #tpu.memory_space<vmem>>, vector<1x1x8x128xbf16>
      %21 = vector.shape_cast %20 : vector<1x1x8x128xbf16> to vector<8x128xbf16>
      %c2_21 = arith.constant 2 : index
      %c0_22 = arith.constant 0 : index
      %c0_23 = arith.constant 0 : index
      %22 = vector.load %arg2[%c2_21, %c0_22, %c0_23] : memref<9x128x128xbf16, #tpu.memory_space<vmem>>, vector<1x128x128xbf16>
      %23 = vector.shape_cast %22 : vector<1x128x128xbf16> to vector<128x128xbf16>
      %cst_24 = arith.constant dense<0.000000e+00> : vector<8x128xf32>
      %24 = tpu.matmul %21, %23, %cst_24 {dimension_numbers = #tpu.dot_dimension_numbers<[1], [0], [0], [1], [0, 0, 1, 1], [], []>} : vector<8x128xbf16>, vector<128x128xbf16>, vector<8x128xf32> -> vector<8x128xf32>
      %25 = arith.addf %17, %24 : vector<8x128xf32>
      %c1_i32_25 = arith.constant 1 : i32
      %26 = arith.addi %c1_i32_25, %arg7 : i32
      %c0_26 = arith.constant 0 : index
      %27 = arith.index_cast %26 : i32 to index
      %c0_27 = arith.constant 0 : index
      %c0_28 = arith.constant 0 : index
      %28 = vector.load %arg1[%c0_26, %27, %c0_27, %c0_28] : memref<1x10x10x128xbf16, #tpu.memory_space<vmem>>, vector<1x1x8x128xbf16>
      %29 = vector.shape_cast %28 : vector<1x1x8x128xbf16> to vector<8x128xbf16>
      %c3 = arith.constant 3 : index
      %c0_29 = arith.constant 0 : index
      %c0_30 = arith.constant 0 : index
      %30 = vector.load %arg2[%c3, %c0_29, %c0_30] : memref<9x128x128xbf16, #tpu.memory_space<vmem>>, vector<1x128x128xbf16>
      %31 = vector.shape_cast %30 : vector<1x128x128xbf16> to vector<128x128xbf16>
      %cst_31 = arith.constant dense<0.000000e+00> : vector<8x128xf32>
      %32 = tpu.matmul %29, %31, %cst_31 {dimension_numbers = #tpu.dot_dimension_numbers<[1], [0], [0], [1], [0, 0, 1, 1], [], []>} : vector<8x128xbf16>, vector<128x128xbf16>, vector<8x128xf32> -> vector<8x128xf32>
      %33 = arith.addf %25, %32 : vector<8x128xf32>
      %c1_i32_32 = arith.constant 1 : i32
      %34 = arith.addi %c1_i32_32, %arg7 : i32
      %c0_33 = arith.constant 0 : index
      %35 = arith.index_cast %34 : i32 to index
      %c1_34 = arith.constant 1 : index
      %c0_35 = arith.constant 0 : index
      %36 = vector.load %arg1[%c0_33, %35, %c1_34, %c0_35] : memref<1x10x10x128xbf16, #tpu.memory_space<vmem>>, vector<1x1x8x128xbf16>
      %37 = vector.shape_cast %36 : vector<1x1x8x128xbf16> to vector<8x128xbf16>
      %c4 = arith.constant 4 : index
      %c0_36 = arith.constant 0 : index
      %c0_37 = arith.constant 0 : index
      %38 = vector.load %arg2[%c4, %c0_36, %c0_37] : memref<9x128x128xbf16, #tpu.memory_space<vmem>>, vector<1x128x128xbf16>
      %39 = vector.shape_cast %38 : vector<1x128x128xbf16> to vector<128x128xbf16>
      %cst_38 = arith.constant dense<0.000000e+00> : vector<8x128xf32>
      %40 = tpu.matmul %37, %39, %cst_38 {dimension_numbers = #tpu.dot_dimension_numbers<[1], [0], [0], [1], [0, 0, 1, 1], [], []>} : vector<8x128xbf16>, vector<128x128xbf16>, vector<8x128xf32> -> vector<8x128xf32>
      %41 = arith.addf %33, %40 : vector<8x128xf32>
      %c1_i32_39 = arith.constant 1 : i32
      %42 = arith.addi %c1_i32_39, %arg7 : i32
      %c0_40 = arith.constant 0 : index
      %43 = arith.index_cast %42 : i32 to index
      %c2_41 = arith.constant 2 : index
      %c0_42 = arith.constant 0 : index
      %44 = vector.load %arg1[%c0_40, %43, %c2_41, %c0_42] : memref<1x10x10x128xbf16, #tpu.memory_space<vmem>>, vector<1x1x8x128xbf16>
      %45 = vector.shape_cast %44 : vector<1x1x8x128xbf16> to vector<8x128xbf16>
      %c5 = arith.constant 5 : index
      %c0_43 = arith.constant 0 : index
      %c0_44 = arith.constant 0 : index
      %46 = vector.load %arg2[%c5, %c0_43, %c0_44] : memref<9x128x128xbf16, #tpu.memory_space<vmem>>, vector<1x128x128xbf16>
      %47 = vector.shape_cast %46 : vector<1x128x128xbf16> to vector<128x128xbf16>
      %cst_45 = arith.constant dense<0.000000e+00> : vector<8x128xf32>
      %48 = tpu.matmul %45, %47, %cst_45 {dimension_numbers = #tpu.dot_dimension_numbers<[1], [0], [0], [1], [0, 0, 1, 1], [], []>} : vector<8x128xbf16>, vector<128x128xbf16>, vector<8x128xf32> -> vector<8x128xf32>
      %49 = arith.addf %41, %48 : vector<8x128xf32>
      %c2_i32 = arith.constant 2 : i32
      %50 = arith.addi %c2_i32, %arg7 : i32
      %c0_46 = arith.constant 0 : index
      %51 = arith.index_cast %50 : i32 to index
      %c0_47 = arith.constant 0 : index
      %c0_48 = arith.constant 0 : index
      %52 = vector.load %arg1[%c0_46, %51, %c0_47, %c0_48] : memref<1x10x10x128xbf16, #tpu.memory_space<vmem>>, vector<1x1x8x128xbf16>
      %53 = vector.shape_cast %52 : vector<1x1x8x128xbf16> to vector<8x128xbf16>
      %c6 = arith.constant 6 : index
      %c0_49 = arith.constant 0 : index
      %c0_50 = arith.constant 0 : index
      %54 = vector.load %arg2[%c6, %c0_49, %c0_50] : memref<9x128x128xbf16, #tpu.memory_space<vmem>>, vector<1x128x128xbf16>
      %55 = vector.shape_cast %54 : vector<1x128x128xbf16> to vector<128x128xbf16>
      %cst_51 = arith.constant dense<0.000000e+00> : vector<8x128xf32>
      %56 = tpu.matmul %53, %55, %cst_51 {dimension_numbers = #tpu.dot_dimension_numbers<[1], [0], [0], [1], [0, 0, 1, 1], [], []>} : vector<8x128xbf16>, vector<128x128xbf16>, vector<8x128xf32> -> vector<8x128xf32>
      %57 = arith.addf %49, %56 : vector<8x128xf32>
      %c2_i32_52 = arith.constant 2 : i32
      %58 = arith.addi %c2_i32_52, %arg7 : i32
      %c0_53 = arith.constant 0 : index
      %59 = arith.index_cast %58 : i32 to index
      %c1_54 = arith.constant 1 : index
      %c0_55 = arith.constant 0 : index
      %60 = vector.load %arg1[%c0_53, %59, %c1_54, %c0_55] : memref<1x10x10x128xbf16, #tpu.memory_space<vmem>>, vector<1x1x8x128xbf16>
      %61 = vector.shape_cast %60 : vector<1x1x8x128xbf16> to vector<8x128xbf16>
      %c7 = arith.constant 7 : index
      %c0_56 = arith.constant 0 : index
      %c0_57 = arith.constant 0 : index
      %62 = vector.load %arg2[%c7, %c0_56, %c0_57] : memref<9x128x128xbf16, #tpu.memory_space<vmem>>, vector<1x128x128xbf16>
      %63 = vector.shape_cast %62 : vector<1x128x128xbf16> to vector<128x128xbf16>
      %cst_58 = arith.constant dense<0.000000e+00> : vector<8x128xf32>
      %64 = tpu.matmul %61, %63, %cst_58 {dimension_numbers = #tpu.dot_dimension_numbers<[1], [0], [0], [1], [0, 0, 1, 1], [], []>} : vector<8x128xbf16>, vector<128x128xbf16>, vector<8x128xf32> -> vector<8x128xf32>
      %65 = arith.addf %57, %64 : vector<8x128xf32>
      %c2_i32_59 = arith.constant 2 : i32
      %66 = arith.addi %c2_i32_59, %arg7 : i32
      %c0_60 = arith.constant 0 : index
      %67 = arith.index_cast %66 : i32 to index
      %c2_61 = arith.constant 2 : index
      %c0_62 = arith.constant 0 : index
      %68 = vector.load %arg1[%c0_60, %67, %c2_61, %c0_62] : memref<1x10x10x128xbf16, #tpu.memory_space<vmem>>, vector<1x1x8x128xbf16>
      %69 = vector.shape_cast %68 : vector<1x1x8x128xbf16> to vector<8x128xbf16>
      %c8 = arith.constant 8 : index
      %c0_63 = arith.constant 0 : index
      %c0_64 = arith.constant 0 : index
      %70 = vector.load %arg2[%c8, %c0_63, %c0_64] : memref<9x128x128xbf16, #tpu.memory_space<vmem>>, vector<1x128x128xbf16>
      %71 = vector.shape_cast %70 : vector<1x128x128xbf16> to vector<128x128xbf16>
      %cst_65 = arith.constant dense<0.000000e+00> : vector<8x128xf32>
      %72 = tpu.matmul %69, %71, %cst_65 {dimension_numbers = #tpu.dot_dimension_numbers<[1], [0], [0], [1], [0, 0, 1, 1], [], []>} : vector<8x128xbf16>, vector<128x128xbf16>, vector<8x128xf32> -> vector<8x128xf32>
      %73 = arith.addf %65, %72 : vector<8x128xf32>
      %74 = vector.broadcast %0 : vector<1x128xf32> to vector<8x128xf32>
      %75 = arith.mulf %73, %74 : vector<8x128xf32>
      %76 = vector.broadcast %1 : vector<1x128xf32> to vector<8x128xf32>
      %77 = arith.addf %75, %76 : vector<8x128xf32>
      %c0_66 = arith.constant 0 : index
      %78 = arith.index_cast %arg7 : i32 to index
      %c0_67 = arith.constant 0 : index
      %c0_68 = arith.constant 0 : index
      %79 = vector.load %arg5[%c0_66, %78, %c0_67, %c0_68] : memref<1x8x8x128xbf16, #tpu.memory_space<vmem>>, vector<1x1x8x128xbf16>
      %80 = vector.shape_cast %79 : vector<1x1x8x128xbf16> to vector<8x128xbf16>
      %81 = arith.extf %80 : vector<8x128xbf16> to vector<8x128xf32>
      %82 = arith.addf %77, %81 : vector<8x128xf32>
      %cst_69 = arith.constant 0.000000e+00 : f32
      %83 = vector.broadcast %cst_69 : f32 to vector<8x128xf32>
      %84 = arith.maximumf %82, %83 : vector<8x128xf32>
      %85 = arith.truncf %84 : vector<8x128xf32> to vector<8x128xbf16>
      %c0_70 = arith.constant 0 : index
      %86 = arith.index_cast %arg7 : i32 to index
      %c0_71 = arith.constant 0 : index
      %c0_72 = arith.constant 0 : index
      %87 = vector.load %arg6[%c0_70, %86, %c0_71, %c0_72] : memref<1x8x8x128xbf16, #tpu.memory_space<vmem>>, vector<1x1x8x128xbf16>
      %88 = vector.shape_cast %87 : vector<1x1x8x128xbf16> to vector<8x128xbf16>
      %89 = vector.shape_cast %85 : vector<8x128xbf16> to vector<1x1x8x128xbf16>
      tpu.vector_store %arg6[%c0_70, %86, %c0_71, %c0_72], %89 {strides = array<i32>} : memref<1x8x8x128xbf16, #tpu.memory_space<vmem>>, vector<1x1x8x128xbf16>,
    }
    %c8_i32_3 = arith.constant 8 : i32
    return
  }
  func.func @transform_0(%arg0: i32) -> (i32, i32, i32, i32) {
    %c0_i32 = arith.constant 0 : i32
    %c0_i32_0 = arith.constant 0 : i32
    %c0_i32_1 = arith.constant 0 : i32
    %c0_i32_2 = arith.constant 0 : i32
    return %arg0, %c0_i32, %c0_i32_0, %c0_i32_1 : i32, i32, i32, i32
  }
  func.func @transform_1(%arg0: i32) -> (i32, i32, i32) {
    %c0_i32 = arith.constant 0 : i32
    %c0_i32_0 = arith.constant 0 : i32
    %c0_i32_1 = arith.constant 0 : i32
    %c0_i32_2 = arith.constant 0 : i32
    return %c0_i32, %c0_i32_0, %c0_i32_1 : i32, i32, i32
  }
  func.func @transform_2(%arg0: i32) -> (i32, i32) {
    %c0_i32 = arith.constant 0 : i32
    %c0_i32_0 = arith.constant 0 : i32
    %c0_i32_1 = arith.constant 0 : i32
    return %c0_i32, %c0_i32_0 : i32, i32
  }
  func.func @transform_3(%arg0: i32) -> (i32, i32) {
    %c0_i32 = arith.constant 0 : i32
    %c0_i32_0 = arith.constant 0 : i32
    %c0_i32_1 = arith.constant 0 : i32
    return %c0_i32, %c0_i32_0 : i32, i32
  }
  func.func @transform_4(%arg0: i32) -> (i32, i32, i32, i32) {
    %c0_i32 = arith.constant 0 : i32
    %c0_i32_0 = arith.constant 0 : i32
    %c0_i32_1 = arith.constant 0 : i32
    %c0_i32_2 = arith.constant 0 : i32
    return %arg0, %c0_i32, %c0_i32_0, %c0_i32_1 : i32, i32, i32, i32
  }
  func.func @transform_5(%arg0: i32) -> (i32, i32, i32, i32) {
    %c0_i32 = arith.constant 0 : i32
    %c0_i32_0 = arith.constant 0 : i32
    %c0_i32_1 = arith.constant 0 : i32
    %c0_i32_2 = arith.constant 0 : i32
    return %arg0, %c0_i32, %c0_i32_0, %c0_i32_1 : i32, i32, i32, i32
  }
}

module attributes {stable_mosaic.version = 11 : i64} {
  func.func @_conv_bn_kernel(%arg0: i32, %arg1: memref<1x20x5x128xbf16, #tpu.memory_space<vmem>>, %arg2: memref<9x128x128xbf16, #tpu.memory_space<vmem>>, %arg3: memref<1x128xf32, #tpu.memory_space<vmem>>, %arg4: memref<1x128xf32, #tpu.memory_space<vmem>>, %arg5: memref<1x4x4x128xbf16, #tpu.memory_space<vmem>>) attributes {dimension_semantics = [#tpu.dimension_semantics<parallel>], iteration_bounds = array<i64: 2>, scalar_prefetch = 0 : i64, scratch_operands = 0 : i64, tpu.core_type = #tpu.core_type<tc>, window_params = [{transform_indices = @transform_0, window_bounds = array<i64: 1, 20, 5, 128>}, {pipeline_mode = #tpu.pipeline_mode<synchronous>, transform_indices = @transform_1, window_bounds = array<i64: 9, 128, 128>}, {pipeline_mode = #tpu.pipeline_mode<synchronous>, transform_indices = @transform_2, window_bounds = array<i64: 1, 128>}, {pipeline_mode = #tpu.pipeline_mode<synchronous>, transform_indices = @transform_3, window_bounds = array<i64: 1, 128>}, {transform_indices = @transform_4, window_bounds = array<i64: 1, 4, 4, 128>}]} {
    %c0 = arith.constant 0 : index
    %c0_0 = arith.constant 0 : index
    %0 = vector.load %arg3[%c0, %c0_0] : memref<1x128xf32, #tpu.memory_space<vmem>>, vector<1x128xf32>
    %c0_1 = arith.constant 0 : index
    %c0_2 = arith.constant 0 : index
    %1 = vector.load %arg4[%c0_1, %c0_2] : memref<1x128xf32, #tpu.memory_space<vmem>>, vector<1x128xf32>
    %c0_i32 = arith.constant 0 : i32
    %c4_i32 = arith.constant 4 : i32
    %2 = arith.addi %c0_i32, %c4_i32 : i32
    %c1_i32 = arith.constant 1 : i32
    scf.for %arg6 = %c0_i32 to %2 step %c1_i32  : i32 {
      %c0_i32_4 = arith.constant 0 : i32
      %3 = arith.addi %c0_i32_4, %arg6 : i32
      %c0_5 = arith.constant 0 : index
      %4 = arith.index_cast %3 : i32 to index
      %c0_6 = arith.constant 0 : index
      %c0_7 = arith.constant 0 : index
      %5 = vector.load %arg1[%c0_5, %4, %c0_6, %c0_7] : memref<1x20x5x128xbf16, #tpu.memory_space<vmem>>, vector<1x1x4x128xbf16>
      %6 = vector.shape_cast %5 : vector<1x1x4x128xbf16> to vector<4x128xbf16>
      %c0_8 = arith.constant 0 : index
      %c0_9 = arith.constant 0 : index
      %c0_10 = arith.constant 0 : index
      %7 = vector.load %arg2[%c0_8, %c0_9, %c0_10] : memref<9x128x128xbf16, #tpu.memory_space<vmem>>, vector<1x128x128xbf16>
      %8 = vector.shape_cast %7 : vector<1x128x128xbf16> to vector<128x128xbf16>
      %cst = arith.constant dense<0.000000e+00> : vector<4x128xf32>
      %9 = tpu.matmul %6, %8, %cst {dimension_numbers = #tpu.dot_dimension_numbers<[1], [0], [0], [1], [0, 0, 1, 1], [], []>} : vector<4x128xbf16>, vector<128x128xbf16>, vector<4x128xf32> -> vector<4x128xf32>
      %c5_i32 = arith.constant 5 : i32
      %10 = arith.addi %c5_i32, %arg6 : i32
      %c0_11 = arith.constant 0 : index
      %11 = arith.index_cast %10 : i32 to index
      %c0_12 = arith.constant 0 : index
      %c0_13 = arith.constant 0 : index
      %12 = vector.load %arg1[%c0_11, %11, %c0_12, %c0_13] : memref<1x20x5x128xbf16, #tpu.memory_space<vmem>>, vector<1x1x4x128xbf16>
      %13 = vector.shape_cast %12 : vector<1x1x4x128xbf16> to vector<4x128xbf16>
      %c1 = arith.constant 1 : index
      %c0_14 = arith.constant 0 : index
      %c0_15 = arith.constant 0 : index
      %14 = vector.load %arg2[%c1, %c0_14, %c0_15] : memref<9x128x128xbf16, #tpu.memory_space<vmem>>, vector<1x128x128xbf16>
      %15 = vector.shape_cast %14 : vector<1x128x128xbf16> to vector<128x128xbf16>
      %cst_16 = arith.constant dense<0.000000e+00> : vector<4x128xf32>
      %16 = tpu.matmul %13, %15, %cst_16 {dimension_numbers = #tpu.dot_dimension_numbers<[1], [0], [0], [1], [0, 0, 1, 1], [], []>} : vector<4x128xbf16>, vector<128x128xbf16>, vector<4x128xf32> -> vector<4x128xf32>
      %17 = arith.addf %9, %16 : vector<4x128xf32>
      %c0_i32_17 = arith.constant 0 : i32
      %18 = arith.addi %c0_i32_17, %arg6 : i32
      %c0_18 = arith.constant 0 : index
      %19 = arith.index_cast %18 : i32 to index
      %c1_19 = arith.constant 1 : index
      %c0_20 = arith.constant 0 : index
      %20 = vector.load %arg1[%c0_18, %19, %c1_19, %c0_20] : memref<1x20x5x128xbf16, #tpu.memory_space<vmem>>, vector<1x1x4x128xbf16>
      %21 = vector.shape_cast %20 : vector<1x1x4x128xbf16> to vector<4x128xbf16>
      %c2 = arith.constant 2 : index
      %c0_21 = arith.constant 0 : index
      %c0_22 = arith.constant 0 : index
      %22 = vector.load %arg2[%c2, %c0_21, %c0_22] : memref<9x128x128xbf16, #tpu.memory_space<vmem>>, vector<1x128x128xbf16>
      %23 = vector.shape_cast %22 : vector<1x128x128xbf16> to vector<128x128xbf16>
      %cst_23 = arith.constant dense<0.000000e+00> : vector<4x128xf32>
      %24 = tpu.matmul %21, %23, %cst_23 {dimension_numbers = #tpu.dot_dimension_numbers<[1], [0], [0], [1], [0, 0, 1, 1], [], []>} : vector<4x128xbf16>, vector<128x128xbf16>, vector<4x128xf32> -> vector<4x128xf32>
      %25 = arith.addf %17, %24 : vector<4x128xf32>
      %c10_i32 = arith.constant 10 : i32
      %26 = arith.addi %c10_i32, %arg6 : i32
      %c0_24 = arith.constant 0 : index
      %27 = arith.index_cast %26 : i32 to index
      %c0_25 = arith.constant 0 : index
      %c0_26 = arith.constant 0 : index
      %28 = vector.load %arg1[%c0_24, %27, %c0_25, %c0_26] : memref<1x20x5x128xbf16, #tpu.memory_space<vmem>>, vector<1x1x4x128xbf16>
      %29 = vector.shape_cast %28 : vector<1x1x4x128xbf16> to vector<4x128xbf16>
      %c3 = arith.constant 3 : index
      %c0_27 = arith.constant 0 : index
      %c0_28 = arith.constant 0 : index
      %30 = vector.load %arg2[%c3, %c0_27, %c0_28] : memref<9x128x128xbf16, #tpu.memory_space<vmem>>, vector<1x128x128xbf16>
      %31 = vector.shape_cast %30 : vector<1x128x128xbf16> to vector<128x128xbf16>
      %cst_29 = arith.constant dense<0.000000e+00> : vector<4x128xf32>
      %32 = tpu.matmul %29, %31, %cst_29 {dimension_numbers = #tpu.dot_dimension_numbers<[1], [0], [0], [1], [0, 0, 1, 1], [], []>} : vector<4x128xbf16>, vector<128x128xbf16>, vector<4x128xf32> -> vector<4x128xf32>
      %33 = arith.addf %25, %32 : vector<4x128xf32>
      %c15_i32 = arith.constant 15 : i32
      %34 = arith.addi %c15_i32, %arg6 : i32
      %c0_30 = arith.constant 0 : index
      %35 = arith.index_cast %34 : i32 to index
      %c0_31 = arith.constant 0 : index
      %c0_32 = arith.constant 0 : index
      %36 = vector.load %arg1[%c0_30, %35, %c0_31, %c0_32] : memref<1x20x5x128xbf16, #tpu.memory_space<vmem>>, vector<1x1x4x128xbf16>
      %37 = vector.shape_cast %36 : vector<1x1x4x128xbf16> to vector<4x128xbf16>
      %c4 = arith.constant 4 : index
      %c0_33 = arith.constant 0 : index
      %c0_34 = arith.constant 0 : index
      %38 = vector.load %arg2[%c4, %c0_33, %c0_34] : memref<9x128x128xbf16, #tpu.memory_space<vmem>>, vector<1x128x128xbf16>
      %39 = vector.shape_cast %38 : vector<1x128x128xbf16> to vector<128x128xbf16>
      %cst_35 = arith.constant dense<0.000000e+00> : vector<4x128xf32>
      %40 = tpu.matmul %37, %39, %cst_35 {dimension_numbers = #tpu.dot_dimension_numbers<[1], [0], [0], [1], [0, 0, 1, 1], [], []>} : vector<4x128xbf16>, vector<128x128xbf16>, vector<4x128xf32> -> vector<4x128xf32>
      %41 = arith.addf %33, %40 : vector<4x128xf32>
      %c10_i32_36 = arith.constant 10 : i32
      %42 = arith.addi %c10_i32_36, %arg6 : i32
      %c0_37 = arith.constant 0 : index
      %43 = arith.index_cast %42 : i32 to index
      %c1_38 = arith.constant 1 : index
      %c0_39 = arith.constant 0 : index
      %44 = vector.load %arg1[%c0_37, %43, %c1_38, %c0_39] : memref<1x20x5x128xbf16, #tpu.memory_space<vmem>>, vector<1x1x4x128xbf16>
      %45 = vector.shape_cast %44 : vector<1x1x4x128xbf16> to vector<4x128xbf16>
      %c5 = arith.constant 5 : index
      %c0_40 = arith.constant 0 : index
      %c0_41 = arith.constant 0 : index
      %46 = vector.load %arg2[%c5, %c0_40, %c0_41] : memref<9x128x128xbf16, #tpu.memory_space<vmem>>, vector<1x128x128xbf16>
      %47 = vector.shape_cast %46 : vector<1x128x128xbf16> to vector<128x128xbf16>
      %cst_42 = arith.constant dense<0.000000e+00> : vector<4x128xf32>
      %48 = tpu.matmul %45, %47, %cst_42 {dimension_numbers = #tpu.dot_dimension_numbers<[1], [0], [0], [1], [0, 0, 1, 1], [], []>} : vector<4x128xbf16>, vector<128x128xbf16>, vector<4x128xf32> -> vector<4x128xf32>
      %49 = arith.addf %41, %48 : vector<4x128xf32>
      %c1_i32_43 = arith.constant 1 : i32
      %50 = arith.addi %c1_i32_43, %arg6 : i32
      %c0_44 = arith.constant 0 : index
      %51 = arith.index_cast %50 : i32 to index
      %c0_45 = arith.constant 0 : index
      %c0_46 = arith.constant 0 : index
      %52 = vector.load %arg1[%c0_44, %51, %c0_45, %c0_46] : memref<1x20x5x128xbf16, #tpu.memory_space<vmem>>, vector<1x1x4x128xbf16>
      %53 = vector.shape_cast %52 : vector<1x1x4x128xbf16> to vector<4x128xbf16>
      %c6 = arith.constant 6 : index
      %c0_47 = arith.constant 0 : index
      %c0_48 = arith.constant 0 : index
      %54 = vector.load %arg2[%c6, %c0_47, %c0_48] : memref<9x128x128xbf16, #tpu.memory_space<vmem>>, vector<1x128x128xbf16>
      %55 = vector.shape_cast %54 : vector<1x128x128xbf16> to vector<128x128xbf16>
      %cst_49 = arith.constant dense<0.000000e+00> : vector<4x128xf32>
      %56 = tpu.matmul %53, %55, %cst_49 {dimension_numbers = #tpu.dot_dimension_numbers<[1], [0], [0], [1], [0, 0, 1, 1], [], []>} : vector<4x128xbf16>, vector<128x128xbf16>, vector<4x128xf32> -> vector<4x128xf32>
      %57 = arith.addf %49, %56 : vector<4x128xf32>
      %c6_i32 = arith.constant 6 : i32
      %58 = arith.addi %c6_i32, %arg6 : i32
      %c0_50 = arith.constant 0 : index
      %59 = arith.index_cast %58 : i32 to index
      %c0_51 = arith.constant 0 : index
      %c0_52 = arith.constant 0 : index
      %60 = vector.load %arg1[%c0_50, %59, %c0_51, %c0_52] : memref<1x20x5x128xbf16, #tpu.memory_space<vmem>>, vector<1x1x4x128xbf16>
      %61 = vector.shape_cast %60 : vector<1x1x4x128xbf16> to vector<4x128xbf16>
      %c7 = arith.constant 7 : index
      %c0_53 = arith.constant 0 : index
      %c0_54 = arith.constant 0 : index
      %62 = vector.load %arg2[%c7, %c0_53, %c0_54] : memref<9x128x128xbf16, #tpu.memory_space<vmem>>, vector<1x128x128xbf16>
      %63 = vector.shape_cast %62 : vector<1x128x128xbf16> to vector<128x128xbf16>
      %cst_55 = arith.constant dense<0.000000e+00> : vector<4x128xf32>
      %64 = tpu.matmul %61, %63, %cst_55 {dimension_numbers = #tpu.dot_dimension_numbers<[1], [0], [0], [1], [0, 0, 1, 1], [], []>} : vector<4x128xbf16>, vector<128x128xbf16>, vector<4x128xf32> -> vector<4x128xf32>
      %65 = arith.addf %57, %64 : vector<4x128xf32>
      %c1_i32_56 = arith.constant 1 : i32
      %66 = arith.addi %c1_i32_56, %arg6 : i32
      %c0_57 = arith.constant 0 : index
      %67 = arith.index_cast %66 : i32 to index
      %c1_58 = arith.constant 1 : index
      %c0_59 = arith.constant 0 : index
      %68 = vector.load %arg1[%c0_57, %67, %c1_58, %c0_59] : memref<1x20x5x128xbf16, #tpu.memory_space<vmem>>, vector<1x1x4x128xbf16>
      %69 = vector.shape_cast %68 : vector<1x1x4x128xbf16> to vector<4x128xbf16>
      %c8 = arith.constant 8 : index
      %c0_60 = arith.constant 0 : index
      %c0_61 = arith.constant 0 : index
      %70 = vector.load %arg2[%c8, %c0_60, %c0_61] : memref<9x128x128xbf16, #tpu.memory_space<vmem>>, vector<1x128x128xbf16>
      %71 = vector.shape_cast %70 : vector<1x128x128xbf16> to vector<128x128xbf16>
      %cst_62 = arith.constant dense<0.000000e+00> : vector<4x128xf32>
      %72 = tpu.matmul %69, %71, %cst_62 {dimension_numbers = #tpu.dot_dimension_numbers<[1], [0], [0], [1], [0, 0, 1, 1], [], []>} : vector<4x128xbf16>, vector<128x128xbf16>, vector<4x128xf32> -> vector<4x128xf32>
      %73 = arith.addf %65, %72 : vector<4x128xf32>
      %74 = vector.broadcast %0 : vector<1x128xf32> to vector<4x128xf32>
      %75 = arith.mulf %73, %74 : vector<4x128xf32>
      %76 = vector.broadcast %1 : vector<1x128xf32> to vector<4x128xf32>
      %77 = arith.addf %75, %76 : vector<4x128xf32>
      %cst_63 = arith.constant 0.000000e+00 : f32
      %78 = vector.broadcast %cst_63 : f32 to vector<4x128xf32>
      %79 = arith.maximumf %77, %78 : vector<4x128xf32>
      %80 = arith.truncf %79 : vector<4x128xf32> to vector<4x128xbf16>
      %c0_64 = arith.constant 0 : index
      %81 = arith.index_cast %arg6 : i32 to index
      %c0_65 = arith.constant 0 : index
      %c0_66 = arith.constant 0 : index
      %82 = vector.load %arg5[%c0_64, %81, %c0_65, %c0_66] : memref<1x4x4x128xbf16, #tpu.memory_space<vmem>>, vector<1x1x4x128xbf16>
      %83 = vector.shape_cast %82 : vector<1x1x4x128xbf16> to vector<4x128xbf16>
      %84 = vector.shape_cast %80 : vector<4x128xbf16> to vector<1x1x4x128xbf16>
      tpu.vector_store %arg5[%c0_64, %81, %c0_65, %c0_66], %84 {strides = array<i32>} : memref<1x4x4x128xbf16, #tpu.memory_space<vmem>>, vector<1x1x4x128xbf16>,
    }
    %c4_i32_3 = arith.constant 4 : i32
    return
  }
  func.func @transform_0(%arg0: i32) -> (i32, i32, i32, i32) {
    %c0_i32 = arith.constant 0 : i32
    %c0_i32_0 = arith.constant 0 : i32
    %c0_i32_1 = arith.constant 0 : i32
    %c0_i32_2 = arith.constant 0 : i32
    return %arg0, %c0_i32, %c0_i32_0, %c0_i32_1 : i32, i32, i32, i32
  }
  func.func @transform_1(%arg0: i32) -> (i32, i32, i32) {
    %c0_i32 = arith.constant 0 : i32
    %c0_i32_0 = arith.constant 0 : i32
    %c0_i32_1 = arith.constant 0 : i32
    %c0_i32_2 = arith.constant 0 : i32
    return %c0_i32, %c0_i32_0, %c0_i32_1 : i32, i32, i32
  }
  func.func @transform_2(%arg0: i32) -> (i32, i32) {
    %c0_i32 = arith.constant 0 : i32
    %c0_i32_0 = arith.constant 0 : i32
    %c0_i32_1 = arith.constant 0 : i32
    return %c0_i32, %c0_i32_0 : i32, i32
  }
  func.func @transform_3(%arg0: i32) -> (i32, i32) {
    %c0_i32 = arith.constant 0 : i32
    %c0_i32_0 = arith.constant 0 : i32
    %c0_i32_1 = arith.constant 0 : i32
    return %c0_i32, %c0_i32_0 : i32, i32
  }
  func.func @transform_4(%arg0: i32) -> (i32, i32, i32, i32) {
    %c0_i32 = arith.constant 0 : i32
    %c0_i32_0 = arith.constant 0 : i32
    %c0_i32_1 = arith.constant 0 : i32
    %c0_i32_2 = arith.constant 0 : i32
    return %arg0, %c0_i32, %c0_i32_0, %c0_i32_1 : i32, i32, i32, i32
  }
}

module attributes {stable_mosaic.version = 11 : i64} {
  func.func @_conv_bn_kernel(%arg0: i32, %arg1: memref<1x16x4x128xbf16, #tpu.memory_space<vmem>>, %arg2: memref<1x128x128xbf16, #tpu.memory_space<vmem>>, %arg3: memref<1x128xf32, #tpu.memory_space<vmem>>, %arg4: memref<1x128xf32, #tpu.memory_space<vmem>>, %arg5: memref<1x4x4x128xbf16, #tpu.memory_space<vmem>>) attributes {dimension_semantics = [#tpu.dimension_semantics<parallel>], iteration_bounds = array<i64: 2>, scalar_prefetch = 0 : i64, scratch_operands = 0 : i64, tpu.core_type = #tpu.core_type<tc>, window_params = [{transform_indices = @transform_0, window_bounds = array<i64: 1, 16, 4, 128>}, {pipeline_mode = #tpu.pipeline_mode<synchronous>, transform_indices = @transform_1, window_bounds = array<i64: 1, 128, 128>}, {pipeline_mode = #tpu.pipeline_mode<synchronous>, transform_indices = @transform_2, window_bounds = array<i64: 1, 128>}, {pipeline_mode = #tpu.pipeline_mode<synchronous>, transform_indices = @transform_3, window_bounds = array<i64: 1, 128>}, {transform_indices = @transform_4, window_bounds = array<i64: 1, 4, 4, 128>}]} {
    %c0 = arith.constant 0 : index
    %c0_0 = arith.constant 0 : index
    %0 = vector.load %arg3[%c0, %c0_0] : memref<1x128xf32, #tpu.memory_space<vmem>>, vector<1x128xf32>
    %c0_1 = arith.constant 0 : index
    %c0_2 = arith.constant 0 : index
    %1 = vector.load %arg4[%c0_1, %c0_2] : memref<1x128xf32, #tpu.memory_space<vmem>>, vector<1x128xf32>
    %c0_i32 = arith.constant 0 : i32
    %c4_i32 = arith.constant 4 : i32
    %2 = arith.addi %c0_i32, %c4_i32 : i32
    %c1_i32 = arith.constant 1 : i32
    scf.for %arg6 = %c0_i32 to %2 step %c1_i32  : i32 {
      %c0_i32_4 = arith.constant 0 : i32
      %3 = arith.addi %c0_i32_4, %arg6 : i32
      %c0_5 = arith.constant 0 : index
      %4 = arith.index_cast %3 : i32 to index
      %c0_6 = arith.constant 0 : index
      %c0_7 = arith.constant 0 : index
      %5 = vector.load %arg1[%c0_5, %4, %c0_6, %c0_7] : memref<1x16x4x128xbf16, #tpu.memory_space<vmem>>, vector<1x1x4x128xbf16>
      %6 = vector.shape_cast %5 : vector<1x1x4x128xbf16> to vector<4x128xbf16>
      %c0_8 = arith.constant 0 : index
      %c0_9 = arith.constant 0 : index
      %c0_10 = arith.constant 0 : index
      %7 = vector.load %arg2[%c0_8, %c0_9, %c0_10] : memref<1x128x128xbf16, #tpu.memory_space<vmem>>, vector<1x128x128xbf16>
      %8 = vector.shape_cast %7 : vector<1x128x128xbf16> to vector<128x128xbf16>
      %cst = arith.constant dense<0.000000e+00> : vector<4x128xf32>
      %9 = tpu.matmul %6, %8, %cst {dimension_numbers = #tpu.dot_dimension_numbers<[1], [0], [0], [1], [0, 0, 1, 1], [], []>} : vector<4x128xbf16>, vector<128x128xbf16>, vector<4x128xf32> -> vector<4x128xf32>
      %10 = vector.broadcast %0 : vector<1x128xf32> to vector<4x128xf32>
      %11 = arith.mulf %9, %10 : vector<4x128xf32>
      %12 = vector.broadcast %1 : vector<1x128xf32> to vector<4x128xf32>
      %13 = arith.addf %11, %12 : vector<4x128xf32>
      %14 = arith.truncf %13 : vector<4x128xf32> to vector<4x128xbf16>
      %c0_11 = arith.constant 0 : index
      %15 = arith.index_cast %arg6 : i32 to index
      %c0_12 = arith.constant 0 : index
      %c0_13 = arith.constant 0 : index
      %16 = vector.load %arg5[%c0_11, %15, %c0_12, %c0_13] : memref<1x4x4x128xbf16, #tpu.memory_space<vmem>>, vector<1x1x4x128xbf16>
      %17 = vector.shape_cast %16 : vector<1x1x4x128xbf16> to vector<4x128xbf16>
      %18 = vector.shape_cast %14 : vector<4x128xbf16> to vector<1x1x4x128xbf16>
      tpu.vector_store %arg5[%c0_11, %15, %c0_12, %c0_13], %18 {strides = array<i32>} : memref<1x4x4x128xbf16, #tpu.memory_space<vmem>>, vector<1x1x4x128xbf16>,
    }
    %c4_i32_3 = arith.constant 4 : i32
    return
  }
  func.func @transform_0(%arg0: i32) -> (i32, i32, i32, i32) {
    %c0_i32 = arith.constant 0 : i32
    %c0_i32_0 = arith.constant 0 : i32
    %c0_i32_1 = arith.constant 0 : i32
    %c0_i32_2 = arith.constant 0 : i32
    return %arg0, %c0_i32, %c0_i32_0, %c0_i32_1 : i32, i32, i32, i32
  }
  func.func @transform_1(%arg0: i32) -> (i32, i32, i32) {
    %c0_i32 = arith.constant 0 : i32
    %c0_i32_0 = arith.constant 0 : i32
    %c0_i32_1 = arith.constant 0 : i32
    %c0_i32_2 = arith.constant 0 : i32
    return %c0_i32, %c0_i32_0, %c0_i32_1 : i32, i32, i32
  }
  func.func @transform_2(%arg0: i32) -> (i32, i32) {
    %c0_i32 = arith.constant 0 : i32
    %c0_i32_0 = arith.constant 0 : i32
    %c0_i32_1 = arith.constant 0 : i32
    return %c0_i32, %c0_i32_0 : i32, i32
  }
  func.func @transform_3(%arg0: i32) -> (i32, i32) {
    %c0_i32 = arith.constant 0 : i32
    %c0_i32_0 = arith.constant 0 : i32
    %c0_i32_1 = arith.constant 0 : i32
    return %c0_i32, %c0_i32_0 : i32, i32
  }
  func.func @transform_4(%arg0: i32) -> (i32, i32, i32, i32) {
    %c0_i32 = arith.constant 0 : i32
    %c0_i32_0 = arith.constant 0 : i32
    %c0_i32_1 = arith.constant 0 : i32
    %c0_i32_2 = arith.constant 0 : i32
    return %arg0, %c0_i32, %c0_i32_0, %c0_i32_1 : i32, i32, i32, i32
  }
}

module attributes {stable_mosaic.version = 11 : i64} {
  func.func @_conv_bn_res_kernel(%arg0: i32, %arg1: memref<1x6x6x128xbf16, #tpu.memory_space<vmem>>, %arg2: memref<9x128x128xbf16, #tpu.memory_space<vmem>>, %arg3: memref<1x128xf32, #tpu.memory_space<vmem>>, %arg4: memref<1x128xf32, #tpu.memory_space<vmem>>, %arg5: memref<1x4x4x128xbf16, #tpu.memory_space<vmem>>, %arg6: memref<1x4x4x128xbf16, #tpu.memory_space<vmem>>) attributes {dimension_semantics = [#tpu.dimension_semantics<parallel>], iteration_bounds = array<i64: 2>, scalar_prefetch = 0 : i64, scratch_operands = 0 : i64, tpu.core_type = #tpu.core_type<tc>, window_params = [{transform_indices = @transform_0, window_bounds = array<i64: 1, 6, 6, 128>}, {pipeline_mode = #tpu.pipeline_mode<synchronous>, transform_indices = @transform_1, window_bounds = array<i64: 9, 128, 128>}, {pipeline_mode = #tpu.pipeline_mode<synchronous>, transform_indices = @transform_2, window_bounds = array<i64: 1, 128>}, {pipeline_mode = #tpu.pipeline_mode<synchronous>, transform_indices = @transform_3, window_bounds = array<i64: 1, 128>}, {transform_indices = @transform_4, window_bounds = array<i64: 1, 4, 4, 128>}, {transform_indices = @transform_5, window_bounds = array<i64: 1, 4, 4, 128>}]} {
    %c0 = arith.constant 0 : index
    %c0_0 = arith.constant 0 : index
    %0 = vector.load %arg3[%c0, %c0_0] : memref<1x128xf32, #tpu.memory_space<vmem>>, vector<1x128xf32>
    %c0_1 = arith.constant 0 : index
    %c0_2 = arith.constant 0 : index
    %1 = vector.load %arg4[%c0_1, %c0_2] : memref<1x128xf32, #tpu.memory_space<vmem>>, vector<1x128xf32>
    %c0_i32 = arith.constant 0 : i32
    %c4_i32 = arith.constant 4 : i32
    %2 = arith.addi %c0_i32, %c4_i32 : i32
    %c1_i32 = arith.constant 1 : i32
    scf.for %arg7 = %c0_i32 to %2 step %c1_i32  : i32 {
      %c0_i32_4 = arith.constant 0 : i32
      %3 = arith.addi %c0_i32_4, %arg7 : i32
      %c0_5 = arith.constant 0 : index
      %4 = arith.index_cast %3 : i32 to index
      %c0_6 = arith.constant 0 : index
      %c0_7 = arith.constant 0 : index
      %5 = vector.load %arg1[%c0_5, %4, %c0_6, %c0_7] : memref<1x6x6x128xbf16, #tpu.memory_space<vmem>>, vector<1x1x4x128xbf16>
      %6 = vector.shape_cast %5 : vector<1x1x4x128xbf16> to vector<4x128xbf16>
      %c0_8 = arith.constant 0 : index
      %c0_9 = arith.constant 0 : index
      %c0_10 = arith.constant 0 : index
      %7 = vector.load %arg2[%c0_8, %c0_9, %c0_10] : memref<9x128x128xbf16, #tpu.memory_space<vmem>>, vector<1x128x128xbf16>
      %8 = vector.shape_cast %7 : vector<1x128x128xbf16> to vector<128x128xbf16>
      %cst = arith.constant dense<0.000000e+00> : vector<4x128xf32>
      %9 = tpu.matmul %6, %8, %cst {dimension_numbers = #tpu.dot_dimension_numbers<[1], [0], [0], [1], [0, 0, 1, 1], [], []>} : vector<4x128xbf16>, vector<128x128xbf16>, vector<4x128xf32> -> vector<4x128xf32>
      %c0_i32_11 = arith.constant 0 : i32
      %10 = arith.addi %c0_i32_11, %arg7 : i32
      %c0_12 = arith.constant 0 : index
      %11 = arith.index_cast %10 : i32 to index
      %c1 = arith.constant 1 : index
      %c0_13 = arith.constant 0 : index
      %12 = vector.load %arg1[%c0_12, %11, %c1, %c0_13] : memref<1x6x6x128xbf16, #tpu.memory_space<vmem>>, vector<1x1x4x128xbf16>
      %13 = vector.shape_cast %12 : vector<1x1x4x128xbf16> to vector<4x128xbf16>
      %c1_14 = arith.constant 1 : index
      %c0_15 = arith.constant 0 : index
      %c0_16 = arith.constant 0 : index
      %14 = vector.load %arg2[%c1_14, %c0_15, %c0_16] : memref<9x128x128xbf16, #tpu.memory_space<vmem>>, vector<1x128x128xbf16>
      %15 = vector.shape_cast %14 : vector<1x128x128xbf16> to vector<128x128xbf16>
      %cst_17 = arith.constant dense<0.000000e+00> : vector<4x128xf32>
      %16 = tpu.matmul %13, %15, %cst_17 {dimension_numbers = #tpu.dot_dimension_numbers<[1], [0], [0], [1], [0, 0, 1, 1], [], []>} : vector<4x128xbf16>, vector<128x128xbf16>, vector<4x128xf32> -> vector<4x128xf32>
      %17 = arith.addf %9, %16 : vector<4x128xf32>
      %c0_i32_18 = arith.constant 0 : i32
      %18 = arith.addi %c0_i32_18, %arg7 : i32
      %c0_19 = arith.constant 0 : index
      %19 = arith.index_cast %18 : i32 to index
      %c2 = arith.constant 2 : index
      %c0_20 = arith.constant 0 : index
      %20 = vector.load %arg1[%c0_19, %19, %c2, %c0_20] : memref<1x6x6x128xbf16, #tpu.memory_space<vmem>>, vector<1x1x4x128xbf16>
      %21 = vector.shape_cast %20 : vector<1x1x4x128xbf16> to vector<4x128xbf16>
      %c2_21 = arith.constant 2 : index
      %c0_22 = arith.constant 0 : index
      %c0_23 = arith.constant 0 : index
      %22 = vector.load %arg2[%c2_21, %c0_22, %c0_23] : memref<9x128x128xbf16, #tpu.memory_space<vmem>>, vector<1x128x128xbf16>
      %23 = vector.shape_cast %22 : vector<1x128x128xbf16> to vector<128x128xbf16>
      %cst_24 = arith.constant dense<0.000000e+00> : vector<4x128xf32>
      %24 = tpu.matmul %21, %23, %cst_24 {dimension_numbers = #tpu.dot_dimension_numbers<[1], [0], [0], [1], [0, 0, 1, 1], [], []>} : vector<4x128xbf16>, vector<128x128xbf16>, vector<4x128xf32> -> vector<4x128xf32>
      %25 = arith.addf %17, %24 : vector<4x128xf32>
      %c1_i32_25 = arith.constant 1 : i32
      %26 = arith.addi %c1_i32_25, %arg7 : i32
      %c0_26 = arith.constant 0 : index
      %27 = arith.index_cast %26 : i32 to index
      %c0_27 = arith.constant 0 : index
      %c0_28 = arith.constant 0 : index
      %28 = vector.load %arg1[%c0_26, %27, %c0_27, %c0_28] : memref<1x6x6x128xbf16, #tpu.memory_space<vmem>>, vector<1x1x4x128xbf16>
      %29 = vector.shape_cast %28 : vector<1x1x4x128xbf16> to vector<4x128xbf16>
      %c3 = arith.constant 3 : index
      %c0_29 = arith.constant 0 : index
      %c0_30 = arith.constant 0 : index
      %30 = vector.load %arg2[%c3, %c0_29, %c0_30] : memref<9x128x128xbf16, #tpu.memory_space<vmem>>, vector<1x128x128xbf16>
      %31 = vector.shape_cast %30 : vector<1x128x128xbf16> to vector<128x128xbf16>
      %cst_31 = arith.constant dense<0.000000e+00> : vector<4x128xf32>
      %32 = tpu.matmul %29, %31, %cst_31 {dimension_numbers = #tpu.dot_dimension_numbers<[1], [0], [0], [1], [0, 0, 1, 1], [], []>} : vector<4x128xbf16>, vector<128x128xbf16>, vector<4x128xf32> -> vector<4x128xf32>
      %33 = arith.addf %25, %32 : vector<4x128xf32>
      %c1_i32_32 = arith.constant 1 : i32
      %34 = arith.addi %c1_i32_32, %arg7 : i32
      %c0_33 = arith.constant 0 : index
      %35 = arith.index_cast %34 : i32 to index
      %c1_34 = arith.constant 1 : index
      %c0_35 = arith.constant 0 : index
      %36 = vector.load %arg1[%c0_33, %35, %c1_34, %c0_35] : memref<1x6x6x128xbf16, #tpu.memory_space<vmem>>, vector<1x1x4x128xbf16>
      %37 = vector.shape_cast %36 : vector<1x1x4x128xbf16> to vector<4x128xbf16>
      %c4 = arith.constant 4 : index
      %c0_36 = arith.constant 0 : index
      %c0_37 = arith.constant 0 : index
      %38 = vector.load %arg2[%c4, %c0_36, %c0_37] : memref<9x128x128xbf16, #tpu.memory_space<vmem>>, vector<1x128x128xbf16>
      %39 = vector.shape_cast %38 : vector<1x128x128xbf16> to vector<128x128xbf16>
      %cst_38 = arith.constant dense<0.000000e+00> : vector<4x128xf32>
      %40 = tpu.matmul %37, %39, %cst_38 {dimension_numbers = #tpu.dot_dimension_numbers<[1], [0], [0], [1], [0, 0, 1, 1], [], []>} : vector<4x128xbf16>, vector<128x128xbf16>, vector<4x128xf32> -> vector<4x128xf32>
      %41 = arith.addf %33, %40 : vector<4x128xf32>
      %c1_i32_39 = arith.constant 1 : i32
      %42 = arith.addi %c1_i32_39, %arg7 : i32
      %c0_40 = arith.constant 0 : index
      %43 = arith.index_cast %42 : i32 to index
      %c2_41 = arith.constant 2 : index
      %c0_42 = arith.constant 0 : index
      %44 = vector.load %arg1[%c0_40, %43, %c2_41, %c0_42] : memref<1x6x6x128xbf16, #tpu.memory_space<vmem>>, vector<1x1x4x128xbf16>
      %45 = vector.shape_cast %44 : vector<1x1x4x128xbf16> to vector<4x128xbf16>
      %c5 = arith.constant 5 : index
      %c0_43 = arith.constant 0 : index
      %c0_44 = arith.constant 0 : index
      %46 = vector.load %arg2[%c5, %c0_43, %c0_44] : memref<9x128x128xbf16, #tpu.memory_space<vmem>>, vector<1x128x128xbf16>
      %47 = vector.shape_cast %46 : vector<1x128x128xbf16> to vector<128x128xbf16>
      %cst_45 = arith.constant dense<0.000000e+00> : vector<4x128xf32>
      %48 = tpu.matmul %45, %47, %cst_45 {dimension_numbers = #tpu.dot_dimension_numbers<[1], [0], [0], [1], [0, 0, 1, 1], [], []>} : vector<4x128xbf16>, vector<128x128xbf16>, vector<4x128xf32> -> vector<4x128xf32>
      %49 = arith.addf %41, %48 : vector<4x128xf32>
      %c2_i32 = arith.constant 2 : i32
      %50 = arith.addi %c2_i32, %arg7 : i32
      %c0_46 = arith.constant 0 : index
      %51 = arith.index_cast %50 : i32 to index
      %c0_47 = arith.constant 0 : index
      %c0_48 = arith.constant 0 : index
      %52 = vector.load %arg1[%c0_46, %51, %c0_47, %c0_48] : memref<1x6x6x128xbf16, #tpu.memory_space<vmem>>, vector<1x1x4x128xbf16>
      %53 = vector.shape_cast %52 : vector<1x1x4x128xbf16> to vector<4x128xbf16>
      %c6 = arith.constant 6 : index
      %c0_49 = arith.constant 0 : index
      %c0_50 = arith.constant 0 : index
      %54 = vector.load %arg2[%c6, %c0_49, %c0_50] : memref<9x128x128xbf16, #tpu.memory_space<vmem>>, vector<1x128x128xbf16>
      %55 = vector.shape_cast %54 : vector<1x128x128xbf16> to vector<128x128xbf16>
      %cst_51 = arith.constant dense<0.000000e+00> : vector<4x128xf32>
      %56 = tpu.matmul %53, %55, %cst_51 {dimension_numbers = #tpu.dot_dimension_numbers<[1], [0], [0], [1], [0, 0, 1, 1], [], []>} : vector<4x128xbf16>, vector<128x128xbf16>, vector<4x128xf32> -> vector<4x128xf32>
      %57 = arith.addf %49, %56 : vector<4x128xf32>
      %c2_i32_52 = arith.constant 2 : i32
      %58 = arith.addi %c2_i32_52, %arg7 : i32
      %c0_53 = arith.constant 0 : index
      %59 = arith.index_cast %58 : i32 to index
      %c1_54 = arith.constant 1 : index
      %c0_55 = arith.constant 0 : index
      %60 = vector.load %arg1[%c0_53, %59, %c1_54, %c0_55] : memref<1x6x6x128xbf16, #tpu.memory_space<vmem>>, vector<1x1x4x128xbf16>
      %61 = vector.shape_cast %60 : vector<1x1x4x128xbf16> to vector<4x128xbf16>
      %c7 = arith.constant 7 : index
      %c0_56 = arith.constant 0 : index
      %c0_57 = arith.constant 0 : index
      %62 = vector.load %arg2[%c7, %c0_56, %c0_57] : memref<9x128x128xbf16, #tpu.memory_space<vmem>>, vector<1x128x128xbf16>
      %63 = vector.shape_cast %62 : vector<1x128x128xbf16> to vector<128x128xbf16>
      %cst_58 = arith.constant dense<0.000000e+00> : vector<4x128xf32>
      %64 = tpu.matmul %61, %63, %cst_58 {dimension_numbers = #tpu.dot_dimension_numbers<[1], [0], [0], [1], [0, 0, 1, 1], [], []>} : vector<4x128xbf16>, vector<128x128xbf16>, vector<4x128xf32> -> vector<4x128xf32>
      %65 = arith.addf %57, %64 : vector<4x128xf32>
      %c2_i32_59 = arith.constant 2 : i32
      %66 = arith.addi %c2_i32_59, %arg7 : i32
      %c0_60 = arith.constant 0 : index
      %67 = arith.index_cast %66 : i32 to index
      %c2_61 = arith.constant 2 : index
      %c0_62 = arith.constant 0 : index
      %68 = vector.load %arg1[%c0_60, %67, %c2_61, %c0_62] : memref<1x6x6x128xbf16, #tpu.memory_space<vmem>>, vector<1x1x4x128xbf16>
      %69 = vector.shape_cast %68 : vector<1x1x4x128xbf16> to vector<4x128xbf16>
      %c8 = arith.constant 8 : index
      %c0_63 = arith.constant 0 : index
      %c0_64 = arith.constant 0 : index
      %70 = vector.load %arg2[%c8, %c0_63, %c0_64] : memref<9x128x128xbf16, #tpu.memory_space<vmem>>, vector<1x128x128xbf16>
      %71 = vector.shape_cast %70 : vector<1x128x128xbf16> to vector<128x128xbf16>
      %cst_65 = arith.constant dense<0.000000e+00> : vector<4x128xf32>
      %72 = tpu.matmul %69, %71, %cst_65 {dimension_numbers = #tpu.dot_dimension_numbers<[1], [0], [0], [1], [0, 0, 1, 1], [], []>} : vector<4x128xbf16>, vector<128x128xbf16>, vector<4x128xf32> -> vector<4x128xf32>
      %73 = arith.addf %65, %72 : vector<4x128xf32>
      %74 = vector.broadcast %0 : vector<1x128xf32> to vector<4x128xf32>
      %75 = arith.mulf %73, %74 : vector<4x128xf32>
      %76 = vector.broadcast %1 : vector<1x128xf32> to vector<4x128xf32>
      %77 = arith.addf %75, %76 : vector<4x128xf32>
      %c0_66 = arith.constant 0 : index
      %78 = arith.index_cast %arg7 : i32 to index
      %c0_67 = arith.constant 0 : index
      %c0_68 = arith.constant 0 : index
      %79 = vector.load %arg5[%c0_66, %78, %c0_67, %c0_68] : memref<1x4x4x128xbf16, #tpu.memory_space<vmem>>, vector<1x1x4x128xbf16>
      %80 = vector.shape_cast %79 : vector<1x1x4x128xbf16> to vector<4x128xbf16>
      %81 = arith.extf %80 : vector<4x128xbf16> to vector<4x128xf32>
      %82 = arith.addf %77, %81 : vector<4x128xf32>
      %cst_69 = arith.constant 0.000000e+00 : f32
      %83 = vector.broadcast %cst_69 : f32 to vector<4x128xf32>
      %84 = arith.maximumf %82, %83 : vector<4x128xf32>
      %85 = arith.truncf %84 : vector<4x128xf32> to vector<4x128xbf16>
      %c0_70 = arith.constant 0 : index
      %86 = arith.index_cast %arg7 : i32 to index
      %c0_71 = arith.constant 0 : index
      %c0_72 = arith.constant 0 : index
      %87 = vector.load %arg6[%c0_70, %86, %c0_71, %c0_72] : memref<1x4x4x128xbf16, #tpu.memory_space<vmem>>, vector<1x1x4x128xbf16>
      %88 = vector.shape_cast %87 : vector<1x1x4x128xbf16> to vector<4x128xbf16>
      %89 = vector.shape_cast %85 : vector<4x128xbf16> to vector<1x1x4x128xbf16>
      tpu.vector_store %arg6[%c0_70, %86, %c0_71, %c0_72], %89 {strides = array<i32>} : memref<1x4x4x128xbf16, #tpu.memory_space<vmem>>, vector<1x1x4x128xbf16>,
    }
    %c4_i32_3 = arith.constant 4 : i32
    return
  }
  func.func @transform_0(%arg0: i32) -> (i32, i32, i32, i32) {
    %c0_i32 = arith.constant 0 : i32
    %c0_i32_0 = arith.constant 0 : i32
    %c0_i32_1 = arith.constant 0 : i32
    %c0_i32_2 = arith.constant 0 : i32
    return %arg0, %c0_i32, %c0_i32_0, %c0_i32_1 : i32, i32, i32, i32
  }
  func.func @transform_1(%arg0: i32) -> (i32, i32, i32) {
    %c0_i32 = arith.constant 0 : i32
    %c0_i32_0 = arith.constant 0 : i32
    %c0_i32_1 = arith.constant 0 : i32
    %c0_i32_2 = arith.constant 0 : i32
    return %c0_i32, %c0_i32_0, %c0_i32_1 : i32, i32, i32
  }
  func.func @transform_2(%arg0: i32) -> (i32, i32) {
    %c0_i32 = arith.constant 0 : i32
    %c0_i32_0 = arith.constant 0 : i32
    %c0_i32_1 = arith.constant 0 : i32
    return %c0_i32, %c0_i32_0 : i32, i32
  }
  func.func @transform_3(%arg0: i32) -> (i32, i32) {
    %c0_i32 = arith.constant 0 : i32
    %c0_i32_0 = arith.constant 0 : i32
    %c0_i32_1 = arith.constant 0 : i32
    return %c0_i32, %c0_i32_0 : i32, i32
  }
  func.func @transform_4(%arg0: i32) -> (i32, i32, i32, i32) {
    %c0_i32 = arith.constant 0 : i32
    %c0_i32_0 = arith.constant 0 : i32
    %c0_i32_1 = arith.constant 0 : i32
    %c0_i32_2 = arith.constant 0 : i32
    return %arg0, %c0_i32, %c0_i32_0, %c0_i32_1 : i32, i32, i32, i32
  }
  func.func @transform_5(%arg0: i32) -> (i32, i32, i32, i32) {
    %c0_i32 = arith.constant 0 : i32
    %c0_i32_0 = arith.constant 0 : i32
    %c0_i32_1 = arith.constant 0 : i32
    %c0_i32_2 = arith.constant 0 : i32
    return %arg0, %c0_i32, %c0_i32_0, %c0_i32_1 : i32, i32, i32, i32
  }
}

module attributes {stable_mosaic.version = 11 : i64} {
  func.func @_conv_bn_kernel(%arg0: i32, %arg1: memref<1x12x3x128xbf16, #tpu.memory_space<vmem>>, %arg2: memref<9x128x128xbf16, #tpu.memory_space<vmem>>, %arg3: memref<1x128xf32, #tpu.memory_space<vmem>>, %arg4: memref<1x128xf32, #tpu.memory_space<vmem>>, %arg5: memref<1x2x2x128xbf16, #tpu.memory_space<vmem>>) attributes {dimension_semantics = [#tpu.dimension_semantics<parallel>], iteration_bounds = array<i64: 2>, scalar_prefetch = 0 : i64, scratch_operands = 0 : i64, tpu.core_type = #tpu.core_type<tc>, window_params = [{transform_indices = @transform_0, window_bounds = array<i64: 1, 12, 3, 128>}, {pipeline_mode = #tpu.pipeline_mode<synchronous>, transform_indices = @transform_1, window_bounds = array<i64: 9, 128, 128>}, {pipeline_mode = #tpu.pipeline_mode<synchronous>, transform_indices = @transform_2, window_bounds = array<i64: 1, 128>}, {pipeline_mode = #tpu.pipeline_mode<synchronous>, transform_indices = @transform_3, window_bounds = array<i64: 1, 128>}, {transform_indices = @transform_4, window_bounds = array<i64: 1, 2, 2, 128>}]} {
    %c0 = arith.constant 0 : index
    %c0_0 = arith.constant 0 : index
    %0 = vector.load %arg3[%c0, %c0_0] : memref<1x128xf32, #tpu.memory_space<vmem>>, vector<1x128xf32>
    %c0_1 = arith.constant 0 : index
    %c0_2 = arith.constant 0 : index
    %1 = vector.load %arg4[%c0_1, %c0_2] : memref<1x128xf32, #tpu.memory_space<vmem>>, vector<1x128xf32>
    %c0_i32 = arith.constant 0 : i32
    %c2_i32 = arith.constant 2 : i32
    %2 = arith.addi %c0_i32, %c2_i32 : i32
    %c1_i32 = arith.constant 1 : i32
    scf.for %arg6 = %c0_i32 to %2 step %c1_i32  : i32 {
      %c0_i32_4 = arith.constant 0 : i32
      %3 = arith.addi %c0_i32_4, %arg6 : i32
      %c0_5 = arith.constant 0 : index
      %4 = arith.index_cast %3 : i32 to index
      %c0_6 = arith.constant 0 : index
      %c0_7 = arith.constant 0 : index
      %5 = vector.load %arg1[%c0_5, %4, %c0_6, %c0_7] : memref<1x12x3x128xbf16, #tpu.memory_space<vmem>>, vector<1x1x2x128xbf16>
      %6 = vector.shape_cast %5 : vector<1x1x2x128xbf16> to vector<2x128xbf16>
      %c0_8 = arith.constant 0 : index
      %c0_9 = arith.constant 0 : index
      %c0_10 = arith.constant 0 : index
      %7 = vector.load %arg2[%c0_8, %c0_9, %c0_10] : memref<9x128x128xbf16, #tpu.memory_space<vmem>>, vector<1x128x128xbf16>
      %8 = vector.shape_cast %7 : vector<1x128x128xbf16> to vector<128x128xbf16>
      %cst = arith.constant dense<0.000000e+00> : vector<2x128xf32>
      %9 = tpu.matmul %6, %8, %cst {dimension_numbers = #tpu.dot_dimension_numbers<[1], [0], [0], [1], [0, 0, 1, 1], [], []>} : vector<2x128xbf16>, vector<128x128xbf16>, vector<2x128xf32> -> vector<2x128xf32>
      %c3_i32 = arith.constant 3 : i32
      %10 = arith.addi %c3_i32, %arg6 : i32
      %c0_11 = arith.constant 0 : index
      %11 = arith.index_cast %10 : i32 to index
      %c0_12 = arith.constant 0 : index
      %c0_13 = arith.constant 0 : index
      %12 = vector.load %arg1[%c0_11, %11, %c0_12, %c0_13] : memref<1x12x3x128xbf16, #tpu.memory_space<vmem>>, vector<1x1x2x128xbf16>
      %13 = vector.shape_cast %12 : vector<1x1x2x128xbf16> to vector<2x128xbf16>
      %c1 = arith.constant 1 : index
      %c0_14 = arith.constant 0 : index
      %c0_15 = arith.constant 0 : index
      %14 = vector.load %arg2[%c1, %c0_14, %c0_15] : memref<9x128x128xbf16, #tpu.memory_space<vmem>>, vector<1x128x128xbf16>
      %15 = vector.shape_cast %14 : vector<1x128x128xbf16> to vector<128x128xbf16>
      %cst_16 = arith.constant dense<0.000000e+00> : vector<2x128xf32>
      %16 = tpu.matmul %13, %15, %cst_16 {dimension_numbers = #tpu.dot_dimension_numbers<[1], [0], [0], [1], [0, 0, 1, 1], [], []>} : vector<2x128xbf16>, vector<128x128xbf16>, vector<2x128xf32> -> vector<2x128xf32>
      %17 = arith.addf %9, %16 : vector<2x128xf32>
      %c0_i32_17 = arith.constant 0 : i32
      %18 = arith.addi %c0_i32_17, %arg6 : i32
      %c0_18 = arith.constant 0 : index
      %19 = arith.index_cast %18 : i32 to index
      %c1_19 = arith.constant 1 : index
      %c0_20 = arith.constant 0 : index
      %20 = vector.load %arg1[%c0_18, %19, %c1_19, %c0_20] : memref<1x12x3x128xbf16, #tpu.memory_space<vmem>>, vector<1x1x2x128xbf16>
      %21 = vector.shape_cast %20 : vector<1x1x2x128xbf16> to vector<2x128xbf16>
      %c2 = arith.constant 2 : index
      %c0_21 = arith.constant 0 : index
      %c0_22 = arith.constant 0 : index
      %22 = vector.load %arg2[%c2, %c0_21, %c0_22] : memref<9x128x128xbf16, #tpu.memory_space<vmem>>, vector<1x128x128xbf16>
      %23 = vector.shape_cast %22 : vector<1x128x128xbf16> to vector<128x128xbf16>
      %cst_23 = arith.constant dense<0.000000e+00> : vector<2x128xf32>
      %24 = tpu.matmul %21, %23, %cst_23 {dimension_numbers = #tpu.dot_dimension_numbers<[1], [0], [0], [1], [0, 0, 1, 1], [], []>} : vector<2x128xbf16>, vector<128x128xbf16>, vector<2x128xf32> -> vector<2x128xf32>
      %25 = arith.addf %17, %24 : vector<2x128xf32>
      %c6_i32 = arith.constant 6 : i32
      %26 = arith.addi %c6_i32, %arg6 : i32
      %c0_24 = arith.constant 0 : index
      %27 = arith.index_cast %26 : i32 to index
      %c0_25 = arith.constant 0 : index
      %c0_26 = arith.constant 0 : index
      %28 = vector.load %arg1[%c0_24, %27, %c0_25, %c0_26] : memref<1x12x3x128xbf16, #tpu.memory_space<vmem>>, vector<1x1x2x128xbf16>
      %29 = vector.shape_cast %28 : vector<1x1x2x128xbf16> to vector<2x128xbf16>
      %c3 = arith.constant 3 : index
      %c0_27 = arith.constant 0 : index
      %c0_28 = arith.constant 0 : index
      %30 = vector.load %arg2[%c3, %c0_27, %c0_28] : memref<9x128x128xbf16, #tpu.memory_space<vmem>>, vector<1x128x128xbf16>
      %31 = vector.shape_cast %30 : vector<1x128x128xbf16> to vector<128x128xbf16>
      %cst_29 = arith.constant dense<0.000000e+00> : vector<2x128xf32>
      %32 = tpu.matmul %29, %31, %cst_29 {dimension_numbers = #tpu.dot_dimension_numbers<[1], [0], [0], [1], [0, 0, 1, 1], [], []>} : vector<2x128xbf16>, vector<128x128xbf16>, vector<2x128xf32> -> vector<2x128xf32>
      %33 = arith.addf %25, %32 : vector<2x128xf32>
      %c9_i32 = arith.constant 9 : i32
      %34 = arith.addi %c9_i32, %arg6 : i32
      %c0_30 = arith.constant 0 : index
      %35 = arith.index_cast %34 : i32 to index
      %c0_31 = arith.constant 0 : index
      %c0_32 = arith.constant 0 : index
      %36 = vector.load %arg1[%c0_30, %35, %c0_31, %c0_32] : memref<1x12x3x128xbf16, #tpu.memory_space<vmem>>, vector<1x1x2x128xbf16>
      %37 = vector.shape_cast %36 : vector<1x1x2x128xbf16> to vector<2x128xbf16>
      %c4 = arith.constant 4 : index
      %c0_33 = arith.constant 0 : index
      %c0_34 = arith.constant 0 : index
      %38 = vector.load %arg2[%c4, %c0_33, %c0_34] : memref<9x128x128xbf16, #tpu.memory_space<vmem>>, vector<1x128x128xbf16>
      %39 = vector.shape_cast %38 : vector<1x128x128xbf16> to vector<128x128xbf16>
      %cst_35 = arith.constant dense<0.000000e+00> : vector<2x128xf32>
      %40 = tpu.matmul %37, %39, %cst_35 {dimension_numbers = #tpu.dot_dimension_numbers<[1], [0], [0], [1], [0, 0, 1, 1], [], []>} : vector<2x128xbf16>, vector<128x128xbf16>, vector<2x128xf32> -> vector<2x128xf32>
      %41 = arith.addf %33, %40 : vector<2x128xf32>
      %c6_i32_36 = arith.constant 6 : i32
      %42 = arith.addi %c6_i32_36, %arg6 : i32
      %c0_37 = arith.constant 0 : index
      %43 = arith.index_cast %42 : i32 to index
      %c1_38 = arith.constant 1 : index
      %c0_39 = arith.constant 0 : index
      %44 = vector.load %arg1[%c0_37, %43, %c1_38, %c0_39] : memref<1x12x3x128xbf16, #tpu.memory_space<vmem>>, vector<1x1x2x128xbf16>
      %45 = vector.shape_cast %44 : vector<1x1x2x128xbf16> to vector<2x128xbf16>
      %c5 = arith.constant 5 : index
      %c0_40 = arith.constant 0 : index
      %c0_41 = arith.constant 0 : index
      %46 = vector.load %arg2[%c5, %c0_40, %c0_41] : memref<9x128x128xbf16, #tpu.memory_space<vmem>>, vector<1x128x128xbf16>
      %47 = vector.shape_cast %46 : vector<1x128x128xbf16> to vector<128x128xbf16>
      %cst_42 = arith.constant dense<0.000000e+00> : vector<2x128xf32>
      %48 = tpu.matmul %45, %47, %cst_42 {dimension_numbers = #tpu.dot_dimension_numbers<[1], [0], [0], [1], [0, 0, 1, 1], [], []>} : vector<2x128xbf16>, vector<128x128xbf16>, vector<2x128xf32> -> vector<2x128xf32>
      %49 = arith.addf %41, %48 : vector<2x128xf32>
      %c1_i32_43 = arith.constant 1 : i32
      %50 = arith.addi %c1_i32_43, %arg6 : i32
      %c0_44 = arith.constant 0 : index
      %51 = arith.index_cast %50 : i32 to index
      %c0_45 = arith.constant 0 : index
      %c0_46 = arith.constant 0 : index
      %52 = vector.load %arg1[%c0_44, %51, %c0_45, %c0_46] : memref<1x12x3x128xbf16, #tpu.memory_space<vmem>>, vector<1x1x2x128xbf16>
      %53 = vector.shape_cast %52 : vector<1x1x2x128xbf16> to vector<2x128xbf16>
      %c6 = arith.constant 6 : index
      %c0_47 = arith.constant 0 : index
      %c0_48 = arith.constant 0 : index
      %54 = vector.load %arg2[%c6, %c0_47, %c0_48] : memref<9x128x128xbf16, #tpu.memory_space<vmem>>, vector<1x128x128xbf16>
      %55 = vector.shape_cast %54 : vector<1x128x128xbf16> to vector<128x128xbf16>
      %cst_49 = arith.constant dense<0.000000e+00> : vector<2x128xf32>
      %56 = tpu.matmul %53, %55, %cst_49 {dimension_numbers = #tpu.dot_dimension_numbers<[1], [0], [0], [1], [0, 0, 1, 1], [], []>} : vector<2x128xbf16>, vector<128x128xbf16>, vector<2x128xf32> -> vector<2x128xf32>
      %57 = arith.addf %49, %56 : vector<2x128xf32>
      %c4_i32 = arith.constant 4 : i32
      %58 = arith.addi %c4_i32, %arg6 : i32
      %c0_50 = arith.constant 0 : index
      %59 = arith.index_cast %58 : i32 to index
      %c0_51 = arith.constant 0 : index
      %c0_52 = arith.constant 0 : index
      %60 = vector.load %arg1[%c0_50, %59, %c0_51, %c0_52] : memref<1x12x3x128xbf16, #tpu.memory_space<vmem>>, vector<1x1x2x128xbf16>
      %61 = vector.shape_cast %60 : vector<1x1x2x128xbf16> to vector<2x128xbf16>
      %c7 = arith.constant 7 : index
      %c0_53 = arith.constant 0 : index
      %c0_54 = arith.constant 0 : index
      %62 = vector.load %arg2[%c7, %c0_53, %c0_54] : memref<9x128x128xbf16, #tpu.memory_space<vmem>>, vector<1x128x128xbf16>
      %63 = vector.shape_cast %62 : vector<1x128x128xbf16> to vector<128x128xbf16>
      %cst_55 = arith.constant dense<0.000000e+00> : vector<2x128xf32>
      %64 = tpu.matmul %61, %63, %cst_55 {dimension_numbers = #tpu.dot_dimension_numbers<[1], [0], [0], [1], [0, 0, 1, 1], [], []>} : vector<2x128xbf16>, vector<128x128xbf16>, vector<2x128xf32> -> vector<2x128xf32>
      %65 = arith.addf %57, %64 : vector<2x128xf32>
      %c1_i32_56 = arith.constant 1 : i32
      %66 = arith.addi %c1_i32_56, %arg6 : i32
      %c0_57 = arith.constant 0 : index
      %67 = arith.index_cast %66 : i32 to index
      %c1_58 = arith.constant 1 : index
      %c0_59 = arith.constant 0 : index
      %68 = vector.load %arg1[%c0_57, %67, %c1_58, %c0_59] : memref<1x12x3x128xbf16, #tpu.memory_space<vmem>>, vector<1x1x2x128xbf16>
      %69 = vector.shape_cast %68 : vector<1x1x2x128xbf16> to vector<2x128xbf16>
      %c8 = arith.constant 8 : index
      %c0_60 = arith.constant 0 : index
      %c0_61 = arith.constant 0 : index
      %70 = vector.load %arg2[%c8, %c0_60, %c0_61] : memref<9x128x128xbf16, #tpu.memory_space<vmem>>, vector<1x128x128xbf16>
      %71 = vector.shape_cast %70 : vector<1x128x128xbf16> to vector<128x128xbf16>
      %cst_62 = arith.constant dense<0.000000e+00> : vector<2x128xf32>
      %72 = tpu.matmul %69, %71, %cst_62 {dimension_numbers = #tpu.dot_dimension_numbers<[1], [0], [0], [1], [0, 0, 1, 1], [], []>} : vector<2x128xbf16>, vector<128x128xbf16>, vector<2x128xf32> -> vector<2x128xf32>
      %73 = arith.addf %65, %72 : vector<2x128xf32>
      %74 = vector.broadcast %0 : vector<1x128xf32> to vector<2x128xf32>
      %75 = arith.mulf %73, %74 : vector<2x128xf32>
      %76 = vector.broadcast %1 : vector<1x128xf32> to vector<2x128xf32>
      %77 = arith.addf %75, %76 : vector<2x128xf32>
      %cst_63 = arith.constant 0.000000e+00 : f32
      %78 = vector.broadcast %cst_63 : f32 to vector<2x128xf32>
      %79 = arith.maximumf %77, %78 : vector<2x128xf32>
      %80 = arith.truncf %79 : vector<2x128xf32> to vector<2x128xbf16>
      %c0_64 = arith.constant 0 : index
      %81 = arith.index_cast %arg6 : i32 to index
      %c0_65 = arith.constant 0 : index
      %c0_66 = arith.constant 0 : index
      %82 = vector.load %arg5[%c0_64, %81, %c0_65, %c0_66] : memref<1x2x2x128xbf16, #tpu.memory_space<vmem>>, vector<1x1x2x128xbf16>
      %83 = vector.shape_cast %82 : vector<1x1x2x128xbf16> to vector<2x128xbf16>
      %84 = vector.shape_cast %80 : vector<2x128xbf16> to vector<1x1x2x128xbf16>
      tpu.vector_store %arg5[%c0_64, %81, %c0_65, %c0_66], %84 {strides = array<i32>} : memref<1x2x2x128xbf16, #tpu.memory_space<vmem>>, vector<1x1x2x128xbf16>,
    }
    %c2_i32_3 = arith.constant 2 : i32
    return
  }
  func.func @transform_0(%arg0: i32) -> (i32, i32, i32, i32) {
    %c0_i32 = arith.constant 0 : i32
    %c0_i32_0 = arith.constant 0 : i32
    %c0_i32_1 = arith.constant 0 : i32
    %c0_i32_2 = arith.constant 0 : i32
    return %arg0, %c0_i32, %c0_i32_0, %c0_i32_1 : i32, i32, i32, i32
  }
  func.func @transform_1(%arg0: i32) -> (i32, i32, i32) {
    %c0_i32 = arith.constant 0 : i32
    %c0_i32_0 = arith.constant 0 : i32
    %c0_i32_1 = arith.constant 0 : i32
    %c0_i32_2 = arith.constant 0 : i32
    return %c0_i32, %c0_i32_0, %c0_i32_1 : i32, i32, i32
  }
  func.func @transform_2(%arg0: i32) -> (i32, i32) {
    %c0_i32 = arith.constant 0 : i32
    %c0_i32_0 = arith.constant 0 : i32
    %c0_i32_1 = arith.constant 0 : i32
    return %c0_i32, %c0_i32_0 : i32, i32
  }
  func.func @transform_3(%arg0: i32) -> (i32, i32) {
    %c0_i32 = arith.constant 0 : i32
    %c0_i32_0 = arith.constant 0 : i32
    %c0_i32_1 = arith.constant 0 : i32
    return %c0_i32, %c0_i32_0 : i32, i32
  }
  func.func @transform_4(%arg0: i32) -> (i32, i32, i32, i32) {
    %c0_i32 = arith.constant 0 : i32
    %c0_i32_0 = arith.constant 0 : i32
    %c0_i32_1 = arith.constant 0 : i32
    %c0_i32_2 = arith.constant 0 : i32
    return %arg0, %c0_i32, %c0_i32_0, %c0_i32_1 : i32, i32, i32, i32
  }
}

module attributes {stable_mosaic.version = 11 : i64} {
  func.func @_conv_bn_kernel(%arg0: i32, %arg1: memref<1x8x2x128xbf16, #tpu.memory_space<vmem>>, %arg2: memref<1x128x128xbf16, #tpu.memory_space<vmem>>, %arg3: memref<1x128xf32, #tpu.memory_space<vmem>>, %arg4: memref<1x128xf32, #tpu.memory_space<vmem>>, %arg5: memref<1x2x2x128xbf16, #tpu.memory_space<vmem>>) attributes {dimension_semantics = [#tpu.dimension_semantics<parallel>], iteration_bounds = array<i64: 2>, scalar_prefetch = 0 : i64, scratch_operands = 0 : i64, tpu.core_type = #tpu.core_type<tc>, window_params = [{transform_indices = @transform_0, window_bounds = array<i64: 1, 8, 2, 128>}, {pipeline_mode = #tpu.pipeline_mode<synchronous>, transform_indices = @transform_1, window_bounds = array<i64: 1, 128, 128>}, {pipeline_mode = #tpu.pipeline_mode<synchronous>, transform_indices = @transform_2, window_bounds = array<i64: 1, 128>}, {pipeline_mode = #tpu.pipeline_mode<synchronous>, transform_indices = @transform_3, window_bounds = array<i64: 1, 128>}, {transform_indices = @transform_4, window_bounds = array<i64: 1, 2, 2, 128>}]} {
    %c0 = arith.constant 0 : index
    %c0_0 = arith.constant 0 : index
    %0 = vector.load %arg3[%c0, %c0_0] : memref<1x128xf32, #tpu.memory_space<vmem>>, vector<1x128xf32>
    %c0_1 = arith.constant 0 : index
    %c0_2 = arith.constant 0 : index
    %1 = vector.load %arg4[%c0_1, %c0_2] : memref<1x128xf32, #tpu.memory_space<vmem>>, vector<1x128xf32>
    %c0_i32 = arith.constant 0 : i32
    %c2_i32 = arith.constant 2 : i32
    %2 = arith.addi %c0_i32, %c2_i32 : i32
    %c1_i32 = arith.constant 1 : i32
    scf.for %arg6 = %c0_i32 to %2 step %c1_i32  : i32 {
      %c0_i32_4 = arith.constant 0 : i32
      %3 = arith.addi %c0_i32_4, %arg6 : i32
      %c0_5 = arith.constant 0 : index
      %4 = arith.index_cast %3 : i32 to index
      %c0_6 = arith.constant 0 : index
      %c0_7 = arith.constant 0 : index
      %5 = vector.load %arg1[%c0_5, %4, %c0_6, %c0_7] : memref<1x8x2x128xbf16, #tpu.memory_space<vmem>>, vector<1x1x2x128xbf16>
      %6 = vector.shape_cast %5 : vector<1x1x2x128xbf16> to vector<2x128xbf16>
      %c0_8 = arith.constant 0 : index
      %c0_9 = arith.constant 0 : index
      %c0_10 = arith.constant 0 : index
      %7 = vector.load %arg2[%c0_8, %c0_9, %c0_10] : memref<1x128x128xbf16, #tpu.memory_space<vmem>>, vector<1x128x128xbf16>
      %8 = vector.shape_cast %7 : vector<1x128x128xbf16> to vector<128x128xbf16>
      %cst = arith.constant dense<0.000000e+00> : vector<2x128xf32>
      %9 = tpu.matmul %6, %8, %cst {dimension_numbers = #tpu.dot_dimension_numbers<[1], [0], [0], [1], [0, 0, 1, 1], [], []>} : vector<2x128xbf16>, vector<128x128xbf16>, vector<2x128xf32> -> vector<2x128xf32>
      %10 = vector.broadcast %0 : vector<1x128xf32> to vector<2x128xf32>
      %11 = arith.mulf %9, %10 : vector<2x128xf32>
      %12 = vector.broadcast %1 : vector<1x128xf32> to vector<2x128xf32>
      %13 = arith.addf %11, %12 : vector<2x128xf32>
      %14 = arith.truncf %13 : vector<2x128xf32> to vector<2x128xbf16>
      %c0_11 = arith.constant 0 : index
      %15 = arith.index_cast %arg6 : i32 to index
      %c0_12 = arith.constant 0 : index
      %c0_13 = arith.constant 0 : index
      %16 = vector.load %arg5[%c0_11, %15, %c0_12, %c0_13] : memref<1x2x2x128xbf16, #tpu.memory_space<vmem>>, vector<1x1x2x128xbf16>
      %17 = vector.shape_cast %16 : vector<1x1x2x128xbf16> to vector<2x128xbf16>
      %18 = vector.shape_cast %14 : vector<2x128xbf16> to vector<1x1x2x128xbf16>
      tpu.vector_store %arg5[%c0_11, %15, %c0_12, %c0_13], %18 {strides = array<i32>} : memref<1x2x2x128xbf16, #tpu.memory_space<vmem>>, vector<1x1x2x128xbf16>,
    }
    %c2_i32_3 = arith.constant 2 : i32
    return
  }
  func.func @transform_0(%arg0: i32) -> (i32, i32, i32, i32) {
    %c0_i32 = arith.constant 0 : i32
    %c0_i32_0 = arith.constant 0 : i32
    %c0_i32_1 = arith.constant 0 : i32
    %c0_i32_2 = arith.constant 0 : i32
    return %arg0, %c0_i32, %c0_i32_0, %c0_i32_1 : i32, i32, i32, i32
  }
  func.func @transform_1(%arg0: i32) -> (i32, i32, i32) {
    %c0_i32 = arith.constant 0 : i32
    %c0_i32_0 = arith.constant 0 : i32
    %c0_i32_1 = arith.constant 0 : i32
    %c0_i32_2 = arith.constant 0 : i32
    return %c0_i32, %c0_i32_0, %c0_i32_1 : i32, i32, i32
  }
  func.func @transform_2(%arg0: i32) -> (i32, i32) {
    %c0_i32 = arith.constant 0 : i32
    %c0_i32_0 = arith.constant 0 : i32
    %c0_i32_1 = arith.constant 0 : i32
    return %c0_i32, %c0_i32_0 : i32, i32
  }
  func.func @transform_3(%arg0: i32) -> (i32, i32) {
    %c0_i32 = arith.constant 0 : i32
    %c0_i32_0 = arith.constant 0 : i32
    %c0_i32_1 = arith.constant 0 : i32
    return %c0_i32, %c0_i32_0 : i32, i32
  }
  func.func @transform_4(%arg0: i32) -> (i32, i32, i32, i32) {
    %c0_i32 = arith.constant 0 : i32
    %c0_i32_0 = arith.constant 0 : i32
    %c0_i32_1 = arith.constant 0 : i32
    %c0_i32_2 = arith.constant 0 : i32
    return %arg0, %c0_i32, %c0_i32_0, %c0_i32_1 : i32, i32, i32, i32
  }
}

module attributes {stable_mosaic.version = 11 : i64} {
  func.func @_conv_bn_res_kernel(%arg0: i32, %arg1: memref<1x4x4x128xbf16, #tpu.memory_space<vmem>>, %arg2: memref<9x128x128xbf16, #tpu.memory_space<vmem>>, %arg3: memref<1x128xf32, #tpu.memory_space<vmem>>, %arg4: memref<1x128xf32, #tpu.memory_space<vmem>>, %arg5: memref<1x2x2x128xbf16, #tpu.memory_space<vmem>>, %arg6: memref<1x2x2x128xbf16, #tpu.memory_space<vmem>>) attributes {dimension_semantics = [#tpu.dimension_semantics<parallel>], iteration_bounds = array<i64: 2>, scalar_prefetch = 0 : i64, scratch_operands = 0 : i64, tpu.core_type = #tpu.core_type<tc>, window_params = [{transform_indices = @transform_0, window_bounds = array<i64: 1, 4, 4, 128>}, {pipeline_mode = #tpu.pipeline_mode<synchronous>, transform_indices = @transform_1, window_bounds = array<i64: 9, 128, 128>}, {pipeline_mode = #tpu.pipeline_mode<synchronous>, transform_indices = @transform_2, window_bounds = array<i64: 1, 128>}, {pipeline_mode = #tpu.pipeline_mode<synchronous>, transform_indices = @transform_3, window_bounds = array<i64: 1, 128>}, {transform_indices = @transform_4, window_bounds = array<i64: 1, 2, 2, 128>}, {transform_indices = @transform_5, window_bounds = array<i64: 1, 2, 2, 128>}]} {
    %c0 = arith.constant 0 : index
    %c0_0 = arith.constant 0 : index
    %0 = vector.load %arg3[%c0, %c0_0] : memref<1x128xf32, #tpu.memory_space<vmem>>, vector<1x128xf32>
    %c0_1 = arith.constant 0 : index
    %c0_2 = arith.constant 0 : index
    %1 = vector.load %arg4[%c0_1, %c0_2] : memref<1x128xf32, #tpu.memory_space<vmem>>, vector<1x128xf32>
    %c0_i32 = arith.constant 0 : i32
    %c2_i32 = arith.constant 2 : i32
    %2 = arith.addi %c0_i32, %c2_i32 : i32
    %c1_i32 = arith.constant 1 : i32
    scf.for %arg7 = %c0_i32 to %2 step %c1_i32  : i32 {
      %c0_i32_4 = arith.constant 0 : i32
      %3 = arith.addi %c0_i32_4, %arg7 : i32
      %c0_5 = arith.constant 0 : index
      %4 = arith.index_cast %3 : i32 to index
      %c0_6 = arith.constant 0 : index
      %c0_7 = arith.constant 0 : index
      %5 = vector.load %arg1[%c0_5, %4, %c0_6, %c0_7] : memref<1x4x4x128xbf16, #tpu.memory_space<vmem>>, vector<1x1x2x128xbf16>
      %6 = vector.shape_cast %5 : vector<1x1x2x128xbf16> to vector<2x128xbf16>
      %c0_8 = arith.constant 0 : index
      %c0_9 = arith.constant 0 : index
      %c0_10 = arith.constant 0 : index
      %7 = vector.load %arg2[%c0_8, %c0_9, %c0_10] : memref<9x128x128xbf16, #tpu.memory_space<vmem>>, vector<1x128x128xbf16>
      %8 = vector.shape_cast %7 : vector<1x128x128xbf16> to vector<128x128xbf16>
      %cst = arith.constant dense<0.000000e+00> : vector<2x128xf32>
      %9 = tpu.matmul %6, %8, %cst {dimension_numbers = #tpu.dot_dimension_numbers<[1], [0], [0], [1], [0, 0, 1, 1], [], []>} : vector<2x128xbf16>, vector<128x128xbf16>, vector<2x128xf32> -> vector<2x128xf32>
      %c0_i32_11 = arith.constant 0 : i32
      %10 = arith.addi %c0_i32_11, %arg7 : i32
      %c0_12 = arith.constant 0 : index
      %11 = arith.index_cast %10 : i32 to index
      %c1 = arith.constant 1 : index
      %c0_13 = arith.constant 0 : index
      %12 = vector.load %arg1[%c0_12, %11, %c1, %c0_13] : memref<1x4x4x128xbf16, #tpu.memory_space<vmem>>, vector<1x1x2x128xbf16>
      %13 = vector.shape_cast %12 : vector<1x1x2x128xbf16> to vector<2x128xbf16>
      %c1_14 = arith.constant 1 : index
      %c0_15 = arith.constant 0 : index
      %c0_16 = arith.constant 0 : index
      %14 = vector.load %arg2[%c1_14, %c0_15, %c0_16] : memref<9x128x128xbf16, #tpu.memory_space<vmem>>, vector<1x128x128xbf16>
      %15 = vector.shape_cast %14 : vector<1x128x128xbf16> to vector<128x128xbf16>
      %cst_17 = arith.constant dense<0.000000e+00> : vector<2x128xf32>
      %16 = tpu.matmul %13, %15, %cst_17 {dimension_numbers = #tpu.dot_dimension_numbers<[1], [0], [0], [1], [0, 0, 1, 1], [], []>} : vector<2x128xbf16>, vector<128x128xbf16>, vector<2x128xf32> -> vector<2x128xf32>
      %17 = arith.addf %9, %16 : vector<2x128xf32>
      %c0_i32_18 = arith.constant 0 : i32
      %18 = arith.addi %c0_i32_18, %arg7 : i32
      %c0_19 = arith.constant 0 : index
      %19 = arith.index_cast %18 : i32 to index
      %c2 = arith.constant 2 : index
      %c0_20 = arith.constant 0 : index
      %20 = vector.load %arg1[%c0_19, %19, %c2, %c0_20] : memref<1x4x4x128xbf16, #tpu.memory_space<vmem>>, vector<1x1x2x128xbf16>
      %21 = vector.shape_cast %20 : vector<1x1x2x128xbf16> to vector<2x128xbf16>
      %c2_21 = arith.constant 2 : index
      %c0_22 = arith.constant 0 : index
      %c0_23 = arith.constant 0 : index
      %22 = vector.load %arg2[%c2_21, %c0_22, %c0_23] : memref<9x128x128xbf16, #tpu.memory_space<vmem>>, vector<1x128x128xbf16>
      %23 = vector.shape_cast %22 : vector<1x128x128xbf16> to vector<128x128xbf16>
      %cst_24 = arith.constant dense<0.000000e+00> : vector<2x128xf32>
      %24 = tpu.matmul %21, %23, %cst_24 {dimension_numbers = #tpu.dot_dimension_numbers<[1], [0], [0], [1], [0, 0, 1, 1], [], []>} : vector<2x128xbf16>, vector<128x128xbf16>, vector<2x128xf32> -> vector<2x128xf32>
      %25 = arith.addf %17, %24 : vector<2x128xf32>
      %c1_i32_25 = arith.constant 1 : i32
      %26 = arith.addi %c1_i32_25, %arg7 : i32
      %c0_26 = arith.constant 0 : index
      %27 = arith.index_cast %26 : i32 to index
      %c0_27 = arith.constant 0 : index
      %c0_28 = arith.constant 0 : index
      %28 = vector.load %arg1[%c0_26, %27, %c0_27, %c0_28] : memref<1x4x4x128xbf16, #tpu.memory_space<vmem>>, vector<1x1x2x128xbf16>
      %29 = vector.shape_cast %28 : vector<1x1x2x128xbf16> to vector<2x128xbf16>
      %c3 = arith.constant 3 : index
      %c0_29 = arith.constant 0 : index
      %c0_30 = arith.constant 0 : index
      %30 = vector.load %arg2[%c3, %c0_29, %c0_30] : memref<9x128x128xbf16, #tpu.memory_space<vmem>>, vector<1x128x128xbf16>
      %31 = vector.shape_cast %30 : vector<1x128x128xbf16> to vector<128x128xbf16>
      %cst_31 = arith.constant dense<0.000000e+00> : vector<2x128xf32>
      %32 = tpu.matmul %29, %31, %cst_31 {dimension_numbers = #tpu.dot_dimension_numbers<[1], [0], [0], [1], [0, 0, 1, 1], [], []>} : vector<2x128xbf16>, vector<128x128xbf16>, vector<2x128xf32> -> vector<2x128xf32>
      %33 = arith.addf %25, %32 : vector<2x128xf32>
      %c1_i32_32 = arith.constant 1 : i32
      %34 = arith.addi %c1_i32_32, %arg7 : i32
      %c0_33 = arith.constant 0 : index
      %35 = arith.index_cast %34 : i32 to index
      %c1_34 = arith.constant 1 : index
      %c0_35 = arith.constant 0 : index
      %36 = vector.load %arg1[%c0_33, %35, %c1_34, %c0_35] : memref<1x4x4x128xbf16, #tpu.memory_space<vmem>>, vector<1x1x2x128xbf16>
      %37 = vector.shape_cast %36 : vector<1x1x2x128xbf16> to vector<2x128xbf16>
      %c4 = arith.constant 4 : index
      %c0_36 = arith.constant 0 : index
      %c0_37 = arith.constant 0 : index
      %38 = vector.load %arg2[%c4, %c0_36, %c0_37] : memref<9x128x128xbf16, #tpu.memory_space<vmem>>, vector<1x128x128xbf16>
      %39 = vector.shape_cast %38 : vector<1x128x128xbf16> to vector<128x128xbf16>
      %cst_38 = arith.constant dense<0.000000e+00> : vector<2x128xf32>
      %40 = tpu.matmul %37, %39, %cst_38 {dimension_numbers = #tpu.dot_dimension_numbers<[1], [0], [0], [1], [0, 0, 1, 1], [], []>} : vector<2x128xbf16>, vector<128x128xbf16>, vector<2x128xf32> -> vector<2x128xf32>
      %41 = arith.addf %33, %40 : vector<2x128xf32>
      %c1_i32_39 = arith.constant 1 : i32
      %42 = arith.addi %c1_i32_39, %arg7 : i32
      %c0_40 = arith.constant 0 : index
      %43 = arith.index_cast %42 : i32 to index
      %c2_41 = arith.constant 2 : index
      %c0_42 = arith.constant 0 : index
      %44 = vector.load %arg1[%c0_40, %43, %c2_41, %c0_42] : memref<1x4x4x128xbf16, #tpu.memory_space<vmem>>, vector<1x1x2x128xbf16>
      %45 = vector.shape_cast %44 : vector<1x1x2x128xbf16> to vector<2x128xbf16>
      %c5 = arith.constant 5 : index
      %c0_43 = arith.constant 0 : index
      %c0_44 = arith.constant 0 : index
      %46 = vector.load %arg2[%c5, %c0_43, %c0_44] : memref<9x128x128xbf16, #tpu.memory_space<vmem>>, vector<1x128x128xbf16>
      %47 = vector.shape_cast %46 : vector<1x128x128xbf16> to vector<128x128xbf16>
      %cst_45 = arith.constant dense<0.000000e+00> : vector<2x128xf32>
      %48 = tpu.matmul %45, %47, %cst_45 {dimension_numbers = #tpu.dot_dimension_numbers<[1], [0], [0], [1], [0, 0, 1, 1], [], []>} : vector<2x128xbf16>, vector<128x128xbf16>, vector<2x128xf32> -> vector<2x128xf32>
      %49 = arith.addf %41, %48 : vector<2x128xf32>
      %c2_i32_46 = arith.constant 2 : i32
      %50 = arith.addi %c2_i32_46, %arg7 : i32
      %c0_47 = arith.constant 0 : index
      %51 = arith.index_cast %50 : i32 to index
      %c0_48 = arith.constant 0 : index
      %c0_49 = arith.constant 0 : index
      %52 = vector.load %arg1[%c0_47, %51, %c0_48, %c0_49] : memref<1x4x4x128xbf16, #tpu.memory_space<vmem>>, vector<1x1x2x128xbf16>
      %53 = vector.shape_cast %52 : vector<1x1x2x128xbf16> to vector<2x128xbf16>
      %c6 = arith.constant 6 : index
      %c0_50 = arith.constant 0 : index
      %c0_51 = arith.constant 0 : index
      %54 = vector.load %arg2[%c6, %c0_50, %c0_51] : memref<9x128x128xbf16, #tpu.memory_space<vmem>>, vector<1x128x128xbf16>
      %55 = vector.shape_cast %54 : vector<1x128x128xbf16> to vector<128x128xbf16>
      %cst_52 = arith.constant dense<0.000000e+00> : vector<2x128xf32>
      %56 = tpu.matmul %53, %55, %cst_52 {dimension_numbers = #tpu.dot_dimension_numbers<[1], [0], [0], [1], [0, 0, 1, 1], [], []>} : vector<2x128xbf16>, vector<128x128xbf16>, vector<2x128xf32> -> vector<2x128xf32>
      %57 = arith.addf %49, %56 : vector<2x128xf32>
      %c2_i32_53 = arith.constant 2 : i32
      %58 = arith.addi %c2_i32_53, %arg7 : i32
      %c0_54 = arith.constant 0 : index
      %59 = arith.index_cast %58 : i32 to index
      %c1_55 = arith.constant 1 : index
      %c0_56 = arith.constant 0 : index
      %60 = vector.load %arg1[%c0_54, %59, %c1_55, %c0_56] : memref<1x4x4x128xbf16, #tpu.memory_space<vmem>>, vector<1x1x2x128xbf16>
      %61 = vector.shape_cast %60 : vector<1x1x2x128xbf16> to vector<2x128xbf16>
      %c7 = arith.constant 7 : index
      %c0_57 = arith.constant 0 : index
      %c0_58 = arith.constant 0 : index
      %62 = vector.load %arg2[%c7, %c0_57, %c0_58] : memref<9x128x128xbf16, #tpu.memory_space<vmem>>, vector<1x128x128xbf16>
      %63 = vector.shape_cast %62 : vector<1x128x128xbf16> to vector<128x128xbf16>
      %cst_59 = arith.constant dense<0.000000e+00> : vector<2x128xf32>
      %64 = tpu.matmul %61, %63, %cst_59 {dimension_numbers = #tpu.dot_dimension_numbers<[1], [0], [0], [1], [0, 0, 1, 1], [], []>} : vector<2x128xbf16>, vector<128x128xbf16>, vector<2x128xf32> -> vector<2x128xf32>
      %65 = arith.addf %57, %64 : vector<2x128xf32>
      %c2_i32_60 = arith.constant 2 : i32
      %66 = arith.addi %c2_i32_60, %arg7 : i32
      %c0_61 = arith.constant 0 : index
      %67 = arith.index_cast %66 : i32 to index
      %c2_62 = arith.constant 2 : index
      %c0_63 = arith.constant 0 : index
      %68 = vector.load %arg1[%c0_61, %67, %c2_62, %c0_63] : memref<1x4x4x128xbf16, #tpu.memory_space<vmem>>, vector<1x1x2x128xbf16>
      %69 = vector.shape_cast %68 : vector<1x1x2x128xbf16> to vector<2x128xbf16>
      %c8 = arith.constant 8 : index
      %c0_64 = arith.constant 0 : index
      %c0_65 = arith.constant 0 : index
      %70 = vector.load %arg2[%c8, %c0_64, %c0_65] : memref<9x128x128xbf16, #tpu.memory_space<vmem>>, vector<1x128x128xbf16>
      %71 = vector.shape_cast %70 : vector<1x128x128xbf16> to vector<128x128xbf16>
      %cst_66 = arith.constant dense<0.000000e+00> : vector<2x128xf32>
      %72 = tpu.matmul %69, %71, %cst_66 {dimension_numbers = #tpu.dot_dimension_numbers<[1], [0], [0], [1], [0, 0, 1, 1], [], []>} : vector<2x128xbf16>, vector<128x128xbf16>, vector<2x128xf32> -> vector<2x128xf32>
      %73 = arith.addf %65, %72 : vector<2x128xf32>
      %74 = vector.broadcast %0 : vector<1x128xf32> to vector<2x128xf32>
      %75 = arith.mulf %73, %74 : vector<2x128xf32>
      %76 = vector.broadcast %1 : vector<1x128xf32> to vector<2x128xf32>
      %77 = arith.addf %75, %76 : vector<2x128xf32>
      %c0_67 = arith.constant 0 : index
      %78 = arith.index_cast %arg7 : i32 to index
      %c0_68 = arith.constant 0 : index
      %c0_69 = arith.constant 0 : index
      %79 = vector.load %arg5[%c0_67, %78, %c0_68, %c0_69] : memref<1x2x2x128xbf16, #tpu.memory_space<vmem>>, vector<1x1x2x128xbf16>
      %80 = vector.shape_cast %79 : vector<1x1x2x128xbf16> to vector<2x128xbf16>
      %81 = arith.extf %80 : vector<2x128xbf16> to vector<2x128xf32>
      %82 = arith.addf %77, %81 : vector<2x128xf32>
      %cst_70 = arith.constant 0.000000e+00 : f32
      %83 = vector.broadcast %cst_70 : f32 to vector<2x128xf32>
      %84 = arith.maximumf %82, %83 : vector<2x128xf32>
      %85 = arith.truncf %84 : vector<2x128xf32> to vector<2x128xbf16>
      %c0_71 = arith.constant 0 : index
      %86 = arith.index_cast %arg7 : i32 to index
      %c0_72 = arith.constant 0 : index
      %c0_73 = arith.constant 0 : index
      %87 = vector.load %arg6[%c0_71, %86, %c0_72, %c0_73] : memref<1x2x2x128xbf16, #tpu.memory_space<vmem>>, vector<1x1x2x128xbf16>
      %88 = vector.shape_cast %87 : vector<1x1x2x128xbf16> to vector<2x128xbf16>
      %89 = vector.shape_cast %85 : vector<2x128xbf16> to vector<1x1x2x128xbf16>
      tpu.vector_store %arg6[%c0_71, %86, %c0_72, %c0_73], %89 {strides = array<i32>} : memref<1x2x2x128xbf16, #tpu.memory_space<vmem>>, vector<1x1x2x128xbf16>,
    }
    %c2_i32_3 = arith.constant 2 : i32
    return
  }
  func.func @transform_0(%arg0: i32) -> (i32, i32, i32, i32) {
    %c0_i32 = arith.constant 0 : i32
    %c0_i32_0 = arith.constant 0 : i32
    %c0_i32_1 = arith.constant 0 : i32
    %c0_i32_2 = arith.constant 0 : i32
    return %arg0, %c0_i32, %c0_i32_0, %c0_i32_1 : i32, i32, i32, i32
  }
  func.func @transform_1(%arg0: i32) -> (i32, i32, i32) {
    %c0_i32 = arith.constant 0 : i32
    %c0_i32_0 = arith.constant 0 : i32
    %c0_i32_1 = arith.constant 0 : i32
    %c0_i32_2 = arith.constant 0 : i32
    return %c0_i32, %c0_i32_0, %c0_i32_1 : i32, i32, i32
  }
  func.func @transform_2(%arg0: i32) -> (i32, i32) {
    %c0_i32 = arith.constant 0 : i32
    %c0_i32_0 = arith.constant 0 : i32
    %c0_i32_1 = arith.constant 0 : i32
    return %c0_i32, %c0_i32_0 : i32, i32
  }
  func.func @transform_3(%arg0: i32) -> (i32, i32) {
    %c0_i32 = arith.constant 0 : i32
    %c0_i32_0 = arith.constant 0 : i32
    %c0_i32_1 = arith.constant 0 : i32
    return %c0_i32, %c0_i32_0 : i32, i32
  }
  func.func @transform_4(%arg0: i32) -> (i32, i32, i32, i32) {
    %c0_i32 = arith.constant 0 : i32
    %c0_i32_0 = arith.constant 0 : i32
    %c0_i32_1 = arith.constant 0 : i32
    %c0_i32_2 = arith.constant 0 : i32
    return %arg0, %c0_i32, %c0_i32_0, %c0_i32_1 : i32, i32, i32, i32
  }
  func.func @transform_5(%arg0: i32) -> (i32, i32, i32, i32) {
    %c0_i32 = arith.constant 0 : i32
    %c0_i32_0 = arith.constant 0 : i32
    %c0_i32_1 = arith.constant 0 : i32
    %c0_i32_2 = arith.constant 0 : i32
    return %arg0, %c0_i32, %c0_i32_0, %c0_i32_1 : i32, i32, i32, i32
  }
}

module attributes {stable_mosaic.version = 11 : i64} {
  func.func @_conv_bn_kernel(%arg0: i32, %arg1: memref<1x8x2x128xbf16, #tpu.memory_space<vmem>>, %arg2: memref<9x128x128xbf16, #tpu.memory_space<vmem>>, %arg3: memref<1x128xf32, #tpu.memory_space<vmem>>, %arg4: memref<1x128xf32, #tpu.memory_space<vmem>>, %arg5: memref<1x1x1x128xbf16, #tpu.memory_space<vmem>>) attributes {dimension_semantics = [#tpu.dimension_semantics<parallel>], iteration_bounds = array<i64: 2>, scalar_prefetch = 0 : i64, scratch_operands = 0 : i64, tpu.core_type = #tpu.core_type<tc>, window_params = [{transform_indices = @transform_0, window_bounds = array<i64: 1, 8, 2, 128>}, {pipeline_mode = #tpu.pipeline_mode<synchronous>, transform_indices = @transform_1, window_bounds = array<i64: 9, 128, 128>}, {pipeline_mode = #tpu.pipeline_mode<synchronous>, transform_indices = @transform_2, window_bounds = array<i64: 1, 128>}, {pipeline_mode = #tpu.pipeline_mode<synchronous>, transform_indices = @transform_3, window_bounds = array<i64: 1, 128>}, {transform_indices = @transform_4, window_bounds = array<i64: 1, 1, 1, 128>}]} {
    %c0 = arith.constant 0 : index
    %c0_0 = arith.constant 0 : index
    %0 = vector.load %arg3[%c0, %c0_0] : memref<1x128xf32, #tpu.memory_space<vmem>>, vector<1x128xf32>
    %c0_1 = arith.constant 0 : index
    %c0_2 = arith.constant 0 : index
    %1 = vector.load %arg4[%c0_1, %c0_2] : memref<1x128xf32, #tpu.memory_space<vmem>>, vector<1x128xf32>
    %c0_i32 = arith.constant 0 : i32
    %c0_i32_3 = arith.constant 0 : i32
    %2 = arith.addi %c0_i32_3, %c0_i32 : i32
    %c0_4 = arith.constant 0 : index
    %3 = arith.index_cast %2 : i32 to index
    %c0_5 = arith.constant 0 : index
    %c0_6 = arith.constant 0 : index
    %4 = vector.load %arg1[%c0_4, %3, %c0_5, %c0_6] : memref<1x8x2x128xbf16, #tpu.memory_space<vmem>>, vector<1x1x1x128xbf16>
    %5 = vector.shape_cast %4 : vector<1x1x1x128xbf16> to vector<1x128xbf16>
    %c0_7 = arith.constant 0 : index
    %c0_8 = arith.constant 0 : index
    %c0_9 = arith.constant 0 : index
    %6 = vector.load %arg2[%c0_7, %c0_8, %c0_9] : memref<9x128x128xbf16, #tpu.memory_space<vmem>>, vector<1x128x128xbf16>
    %7 = vector.shape_cast %6 : vector<1x128x128xbf16> to vector<128x128xbf16>
    %cst = arith.constant dense<0.000000e+00> : vector<1x128xf32>
    %8 = tpu.matmul %5, %7, %cst {dimension_numbers = #tpu.dot_dimension_numbers<[1], [0], [0], [1], [0, 0, 1, 1], [], []>} : vector<1x128xbf16>, vector<128x128xbf16>, vector<1x128xf32> -> vector<1x128xf32>
    %c2_i32 = arith.constant 2 : i32
    %9 = arith.addi %c2_i32, %c0_i32 : i32
    %c0_10 = arith.constant 0 : index
    %10 = arith.index_cast %9 : i32 to index
    %c0_11 = arith.constant 0 : index
    %c0_12 = arith.constant 0 : index
    %11 = vector.load %arg1[%c0_10, %10, %c0_11, %c0_12] : memref<1x8x2x128xbf16, #tpu.memory_space<vmem>>, vector<1x1x1x128xbf16>
    %12 = vector.shape_cast %11 : vector<1x1x1x128xbf16> to vector<1x128xbf16>
    %c1 = arith.constant 1 : index
    %c0_13 = arith.constant 0 : index
    %c0_14 = arith.constant 0 : index
    %13 = vector.load %arg2[%c1, %c0_13, %c0_14] : memref<9x128x128xbf16, #tpu.memory_space<vmem>>, vector<1x128x128xbf16>
    %14 = vector.shape_cast %13 : vector<1x128x128xbf16> to vector<128x128xbf16>
    %cst_15 = arith.constant dense<0.000000e+00> : vector<1x128xf32>
    %15 = tpu.matmul %12, %14, %cst_15 {dimension_numbers = #tpu.dot_dimension_numbers<[1], [0], [0], [1], [0, 0, 1, 1], [], []>} : vector<1x128xbf16>, vector<128x128xbf16>, vector<1x128xf32> -> vector<1x128xf32>
    %16 = arith.addf %8, %15 : vector<1x128xf32>
    %c0_i32_16 = arith.constant 0 : i32
    %17 = arith.addi %c0_i32_16, %c0_i32 : i32
    %c0_17 = arith.constant 0 : index
    %18 = arith.index_cast %17 : i32 to index
    %c1_18 = arith.constant 1 : index
    %c0_19 = arith.constant 0 : index
    %19 = vector.load %arg1[%c0_17, %18, %c1_18, %c0_19] : memref<1x8x2x128xbf16, #tpu.memory_space<vmem>>, vector<1x1x1x128xbf16>
    %20 = vector.shape_cast %19 : vector<1x1x1x128xbf16> to vector<1x128xbf16>
    %c2 = arith.constant 2 : index
    %c0_20 = arith.constant 0 : index
    %c0_21 = arith.constant 0 : index
    %21 = vector.load %arg2[%c2, %c0_20, %c0_21] : memref<9x128x128xbf16, #tpu.memory_space<vmem>>, vector<1x128x128xbf16>
    %22 = vector.shape_cast %21 : vector<1x128x128xbf16> to vector<128x128xbf16>
    %cst_22 = arith.constant dense<0.000000e+00> : vector<1x128xf32>
    %23 = tpu.matmul %20, %22, %cst_22 {dimension_numbers = #tpu.dot_dimension_numbers<[1], [0], [0], [1], [0, 0, 1, 1], [], []>} : vector<1x128xbf16>, vector<128x128xbf16>, vector<1x128xf32> -> vector<1x128xf32>
    %24 = arith.addf %16, %23 : vector<1x128xf32>
    %c4_i32 = arith.constant 4 : i32
    %25 = arith.addi %c4_i32, %c0_i32 : i32
    %c0_23 = arith.constant 0 : index
    %26 = arith.index_cast %25 : i32 to index
    %c0_24 = arith.constant 0 : index
    %c0_25 = arith.constant 0 : index
    %27 = vector.load %arg1[%c0_23, %26, %c0_24, %c0_25] : memref<1x8x2x128xbf16, #tpu.memory_space<vmem>>, vector<1x1x1x128xbf16>
    %28 = vector.shape_cast %27 : vector<1x1x1x128xbf16> to vector<1x128xbf16>
    %c3 = arith.constant 3 : index
    %c0_26 = arith.constant 0 : index
    %c0_27 = arith.constant 0 : index
    %29 = vector.load %arg2[%c3, %c0_26, %c0_27] : memref<9x128x128xbf16, #tpu.memory_space<vmem>>, vector<1x128x128xbf16>
    %30 = vector.shape_cast %29 : vector<1x128x128xbf16> to vector<128x128xbf16>
    %cst_28 = arith.constant dense<0.000000e+00> : vector<1x128xf32>
    %31 = tpu.matmul %28, %30, %cst_28 {dimension_numbers = #tpu.dot_dimension_numbers<[1], [0], [0], [1], [0, 0, 1, 1], [], []>} : vector<1x128xbf16>, vector<128x128xbf16>, vector<1x128xf32> -> vector<1x128xf32>
    %32 = arith.addf %24, %31 : vector<1x128xf32>
    %c6_i32 = arith.constant 6 : i32
    %33 = arith.addi %c6_i32, %c0_i32 : i32
    %c0_29 = arith.constant 0 : index
    %34 = arith.index_cast %33 : i32 to index
    %c0_30 = arith.constant 0 : index
    %c0_31 = arith.constant 0 : index
    %35 = vector.load %arg1[%c0_29, %34, %c0_30, %c0_31] : memref<1x8x2x128xbf16, #tpu.memory_space<vmem>>, vector<1x1x1x128xbf16>
    %36 = vector.shape_cast %35 : vector<1x1x1x128xbf16> to vector<1x128xbf16>
    %c4 = arith.constant 4 : index
    %c0_32 = arith.constant 0 : index
    %c0_33 = arith.constant 0 : index
    %37 = vector.load %arg2[%c4, %c0_32, %c0_33] : memref<9x128x128xbf16, #tpu.memory_space<vmem>>, vector<1x128x128xbf16>
    %38 = vector.shape_cast %37 : vector<1x128x128xbf16> to vector<128x128xbf16>
    %cst_34 = arith.constant dense<0.000000e+00> : vector<1x128xf32>
    %39 = tpu.matmul %36, %38, %cst_34 {dimension_numbers = #tpu.dot_dimension_numbers<[1], [0], [0], [1], [0, 0, 1, 1], [], []>} : vector<1x128xbf16>, vector<128x128xbf16>, vector<1x128xf32> -> vector<1x128xf32>
    %40 = arith.addf %32, %39 : vector<1x128xf32>
    %c4_i32_35 = arith.constant 4 : i32
    %41 = arith.addi %c4_i32_35, %c0_i32 : i32
    %c0_36 = arith.constant 0 : index
    %42 = arith.index_cast %41 : i32 to index
    %c1_37 = arith.constant 1 : index
    %c0_38 = arith.constant 0 : index
    %43 = vector.load %arg1[%c0_36, %42, %c1_37, %c0_38] : memref<1x8x2x128xbf16, #tpu.memory_space<vmem>>, vector<1x1x1x128xbf16>
    %44 = vector.shape_cast %43 : vector<1x1x1x128xbf16> to vector<1x128xbf16>
    %c5 = arith.constant 5 : index
    %c0_39 = arith.constant 0 : index
    %c0_40 = arith.constant 0 : index
    %45 = vector.load %arg2[%c5, %c0_39, %c0_40] : memref<9x128x128xbf16, #tpu.memory_space<vmem>>, vector<1x128x128xbf16>
    %46 = vector.shape_cast %45 : vector<1x128x128xbf16> to vector<128x128xbf16>
    %cst_41 = arith.constant dense<0.000000e+00> : vector<1x128xf32>
    %47 = tpu.matmul %44, %46, %cst_41 {dimension_numbers = #tpu.dot_dimension_numbers<[1], [0], [0], [1], [0, 0, 1, 1], [], []>} : vector<1x128xbf16>, vector<128x128xbf16>, vector<1x128xf32> -> vector<1x128xf32>
    %48 = arith.addf %40, %47 : vector<1x128xf32>
    %c1_i32 = arith.constant 1 : i32
    %49 = arith.addi %c1_i32, %c0_i32 : i32
    %c0_42 = arith.constant 0 : index
    %50 = arith.index_cast %49 : i32 to index
    %c0_43 = arith.constant 0 : index
    %c0_44 = arith.constant 0 : index
    %51 = vector.load %arg1[%c0_42, %50, %c0_43, %c0_44] : memref<1x8x2x128xbf16, #tpu.memory_space<vmem>>, vector<1x1x1x128xbf16>
    %52 = vector.shape_cast %51 : vector<1x1x1x128xbf16> to vector<1x128xbf16>
    %c6 = arith.constant 6 : index
    %c0_45 = arith.constant 0 : index
    %c0_46 = arith.constant 0 : index
    %53 = vector.load %arg2[%c6, %c0_45, %c0_46] : memref<9x128x128xbf16, #tpu.memory_space<vmem>>, vector<1x128x128xbf16>
    %54 = vector.shape_cast %53 : vector<1x128x128xbf16> to vector<128x128xbf16>
    %cst_47 = arith.constant dense<0.000000e+00> : vector<1x128xf32>
    %55 = tpu.matmul %52, %54, %cst_47 {dimension_numbers = #tpu.dot_dimension_numbers<[1], [0], [0], [1], [0, 0, 1, 1], [], []>} : vector<1x128xbf16>, vector<128x128xbf16>, vector<1x128xf32> -> vector<1x128xf32>
    %56 = arith.addf %48, %55 : vector<1x128xf32>
    %c3_i32 = arith.constant 3 : i32
    %57 = arith.addi %c3_i32, %c0_i32 : i32
    %c0_48 = arith.constant 0 : index
    %58 = arith.index_cast %57 : i32 to index
    %c0_49 = arith.constant 0 : index
    %c0_50 = arith.constant 0 : index
    %59 = vector.load %arg1[%c0_48, %58, %c0_49, %c0_50] : memref<1x8x2x128xbf16, #tpu.memory_space<vmem>>, vector<1x1x1x128xbf16>
    %60 = vector.shape_cast %59 : vector<1x1x1x128xbf16> to vector<1x128xbf16>
    %c7 = arith.constant 7 : index
    %c0_51 = arith.constant 0 : index
    %c0_52 = arith.constant 0 : index
    %61 = vector.load %arg2[%c7, %c0_51, %c0_52] : memref<9x128x128xbf16, #tpu.memory_space<vmem>>, vector<1x128x128xbf16>
    %62 = vector.shape_cast %61 : vector<1x128x128xbf16> to vector<128x128xbf16>
    %cst_53 = arith.constant dense<0.000000e+00> : vector<1x128xf32>
    %63 = tpu.matmul %60, %62, %cst_53 {dimension_numbers = #tpu.dot_dimension_numbers<[1], [0], [0], [1], [0, 0, 1, 1], [], []>} : vector<1x128xbf16>, vector<128x128xbf16>, vector<1x128xf32> -> vector<1x128xf32>
    %64 = arith.addf %56, %63 : vector<1x128xf32>
    %c1_i32_54 = arith.constant 1 : i32
    %65 = arith.addi %c1_i32_54, %c0_i32 : i32
    %c0_55 = arith.constant 0 : index
    %66 = arith.index_cast %65 : i32 to index
    %c1_56 = arith.constant 1 : index
    %c0_57 = arith.constant 0 : index
    %67 = vector.load %arg1[%c0_55, %66, %c1_56, %c0_57] : memref<1x8x2x128xbf16, #tpu.memory_space<vmem>>, vector<1x1x1x128xbf16>
    %68 = vector.shape_cast %67 : vector<1x1x1x128xbf16> to vector<1x128xbf16>
    %c8 = arith.constant 8 : index
    %c0_58 = arith.constant 0 : index
    %c0_59 = arith.constant 0 : index
    %69 = vector.load %arg2[%c8, %c0_58, %c0_59] : memref<9x128x128xbf16, #tpu.memory_space<vmem>>, vector<1x128x128xbf16>
    %70 = vector.shape_cast %69 : vector<1x128x128xbf16> to vector<128x128xbf16>
    %cst_60 = arith.constant dense<0.000000e+00> : vector<1x128xf32>
    %71 = tpu.matmul %68, %70, %cst_60 {dimension_numbers = #tpu.dot_dimension_numbers<[1], [0], [0], [1], [0, 0, 1, 1], [], []>} : vector<1x128xbf16>, vector<128x128xbf16>, vector<1x128xf32> -> vector<1x128xf32>
    %72 = arith.addf %64, %71 : vector<1x128xf32>
    %73 = arith.mulf %72, %0 : vector<1x128xf32>
    %74 = arith.addf %73, %1 : vector<1x128xf32>
    %cst_61 = arith.constant 0.000000e+00 : f32
    %75 = vector.broadcast %cst_61 : f32 to vector<1x128xf32>
    %76 = arith.maximumf %74, %75 : vector<1x128xf32>
    %77 = arith.truncf %76 : vector<1x128xf32> to vector<1x128xbf16>
    %c0_62 = arith.constant 0 : index
    %78 = arith.index_cast %c0_i32 : i32 to index
    %c0_63 = arith.constant 0 : index
    %c0_64 = arith.constant 0 : index
    %79 = vector.load %arg5[%c0_62, %78, %c0_63, %c0_64] : memref<1x1x1x128xbf16, #tpu.memory_space<vmem>>, vector<1x1x1x128xbf16>
    %80 = vector.shape_cast %79 : vector<1x1x1x128xbf16> to vector<1x128xbf16>
    %81 = vector.shape_cast %77 : vector<1x128xbf16> to vector<1x1x1x128xbf16>
    tpu.vector_store %arg5[%c0_62, %78, %c0_63, %c0_64], %81 {strides = array<i32>} : memref<1x1x1x128xbf16, #tpu.memory_space<vmem>>, vector<1x1x1x128xbf16>,
    %c1_i32_65 = arith.constant 1 : i32
    return
  }
  func.func @transform_0(%arg0: i32) -> (i32, i32, i32, i32) {
    %c0_i32 = arith.constant 0 : i32
    %c0_i32_0 = arith.constant 0 : i32
    %c0_i32_1 = arith.constant 0 : i32
    %c0_i32_2 = arith.constant 0 : i32
    return %arg0, %c0_i32, %c0_i32_0, %c0_i32_1 : i32, i32, i32, i32
  }
  func.func @transform_1(%arg0: i32) -> (i32, i32, i32) {
    %c0_i32 = arith.constant 0 : i32
    %c0_i32_0 = arith.constant 0 : i32
    %c0_i32_1 = arith.constant 0 : i32
    %c0_i32_2 = arith.constant 0 : i32
    return %c0_i32, %c0_i32_0, %c0_i32_1 : i32, i32, i32
  }
  func.func @transform_2(%arg0: i32) -> (i32, i32) {
    %c0_i32 = arith.constant 0 : i32
    %c0_i32_0 = arith.constant 0 : i32
    %c0_i32_1 = arith.constant 0 : i32
    return %c0_i32, %c0_i32_0 : i32, i32
  }
  func.func @transform_3(%arg0: i32) -> (i32, i32) {
    %c0_i32 = arith.constant 0 : i32
    %c0_i32_0 = arith.constant 0 : i32
    %c0_i32_1 = arith.constant 0 : i32
    return %c0_i32, %c0_i32_0 : i32, i32
  }
  func.func @transform_4(%arg0: i32) -> (i32, i32, i32, i32) {
    %c0_i32 = arith.constant 0 : i32
    %c0_i32_0 = arith.constant 0 : i32
    %c0_i32_1 = arith.constant 0 : i32
    %c0_i32_2 = arith.constant 0 : i32
    return %arg0, %c0_i32, %c0_i32_0, %c0_i32_1 : i32, i32, i32, i32
  }
}

module attributes {stable_mosaic.version = 11 : i64} {
  func.func @_conv_bn_kernel(%arg0: i32, %arg1: memref<1x4x1x128xbf16, #tpu.memory_space<vmem>>, %arg2: memref<1x128x128xbf16, #tpu.memory_space<vmem>>, %arg3: memref<1x128xf32, #tpu.memory_space<vmem>>, %arg4: memref<1x128xf32, #tpu.memory_space<vmem>>, %arg5: memref<1x1x1x128xbf16, #tpu.memory_space<vmem>>) attributes {dimension_semantics = [#tpu.dimension_semantics<parallel>], iteration_bounds = array<i64: 2>, scalar_prefetch = 0 : i64, scratch_operands = 0 : i64, tpu.core_type = #tpu.core_type<tc>, window_params = [{transform_indices = @transform_0, window_bounds = array<i64: 1, 4, 1, 128>}, {pipeline_mode = #tpu.pipeline_mode<synchronous>, transform_indices = @transform_1, window_bounds = array<i64: 1, 128, 128>}, {pipeline_mode = #tpu.pipeline_mode<synchronous>, transform_indices = @transform_2, window_bounds = array<i64: 1, 128>}, {pipeline_mode = #tpu.pipeline_mode<synchronous>, transform_indices = @transform_3, window_bounds = array<i64: 1, 128>}, {transform_indices = @transform_4, window_bounds = array<i64: 1, 1, 1, 128>}]} {
    %c0 = arith.constant 0 : index
    %c0_0 = arith.constant 0 : index
    %0 = vector.load %arg3[%c0, %c0_0] : memref<1x128xf32, #tpu.memory_space<vmem>>, vector<1x128xf32>
    %c0_1 = arith.constant 0 : index
    %c0_2 = arith.constant 0 : index
    %1 = vector.load %arg4[%c0_1, %c0_2] : memref<1x128xf32, #tpu.memory_space<vmem>>, vector<1x128xf32>
    %c0_i32 = arith.constant 0 : i32
    %c0_i32_3 = arith.constant 0 : i32
    %2 = arith.addi %c0_i32_3, %c0_i32 : i32
    %c0_4 = arith.constant 0 : index
    %3 = arith.index_cast %2 : i32 to index
    %c0_5 = arith.constant 0 : index
    %c0_6 = arith.constant 0 : index
    %4 = vector.load %arg1[%c0_4, %3, %c0_5, %c0_6] : memref<1x4x1x128xbf16, #tpu.memory_space<vmem>>, vector<1x1x1x128xbf16>
    %5 = vector.shape_cast %4 : vector<1x1x1x128xbf16> to vector<1x128xbf16>
    %c0_7 = arith.constant 0 : index
    %c0_8 = arith.constant 0 : index
    %c0_9 = arith.constant 0 : index
    %6 = vector.load %arg2[%c0_7, %c0_8, %c0_9] : memref<1x128x128xbf16, #tpu.memory_space<vmem>>, vector<1x128x128xbf16>
    %7 = vector.shape_cast %6 : vector<1x128x128xbf16> to vector<128x128xbf16>
    %cst = arith.constant dense<0.000000e+00> : vector<1x128xf32>
    %8 = tpu.matmul %5, %7, %cst {dimension_numbers = #tpu.dot_dimension_numbers<[1], [0], [0], [1], [0, 0, 1, 1], [], []>} : vector<1x128xbf16>, vector<128x128xbf16>, vector<1x128xf32> -> vector<1x128xf32>
    %9 = arith.mulf %8, %0 : vector<1x128xf32>
    %10 = arith.addf %9, %1 : vector<1x128xf32>
    %11 = arith.truncf %10 : vector<1x128xf32> to vector<1x128xbf16>
    %c0_10 = arith.constant 0 : index
    %12 = arith.index_cast %c0_i32 : i32 to index
    %c0_11 = arith.constant 0 : index
    %c0_12 = arith.constant 0 : index
    %13 = vector.load %arg5[%c0_10, %12, %c0_11, %c0_12] : memref<1x1x1x128xbf16, #tpu.memory_space<vmem>>, vector<1x1x1x128xbf16>
    %14 = vector.shape_cast %13 : vector<1x1x1x128xbf16> to vector<1x128xbf16>
    %15 = vector.shape_cast %11 : vector<1x128xbf16> to vector<1x1x1x128xbf16>
    tpu.vector_store %arg5[%c0_10, %12, %c0_11, %c0_12], %15 {strides = array<i32>} : memref<1x1x1x128xbf16, #tpu.memory_space<vmem>>, vector<1x1x1x128xbf16>,
    %c1_i32 = arith.constant 1 : i32
    return
  }
  func.func @transform_0(%arg0: i32) -> (i32, i32, i32, i32) {
    %c0_i32 = arith.constant 0 : i32
    %c0_i32_0 = arith.constant 0 : i32
    %c0_i32_1 = arith.constant 0 : i32
    %c0_i32_2 = arith.constant 0 : i32
    return %arg0, %c0_i32, %c0_i32_0, %c0_i32_1 : i32, i32, i32, i32
  }
  func.func @transform_1(%arg0: i32) -> (i32, i32, i32) {
    %c0_i32 = arith.constant 0 : i32
    %c0_i32_0 = arith.constant 0 : i32
    %c0_i32_1 = arith.constant 0 : i32
    %c0_i32_2 = arith.constant 0 : i32
    return %c0_i32, %c0_i32_0, %c0_i32_1 : i32, i32, i32
  }
  func.func @transform_2(%arg0: i32) -> (i32, i32) {
    %c0_i32 = arith.constant 0 : i32
    %c0_i32_0 = arith.constant 0 : i32
    %c0_i32_1 = arith.constant 0 : i32
    return %c0_i32, %c0_i32_0 : i32, i32
  }
  func.func @transform_3(%arg0: i32) -> (i32, i32) {
    %c0_i32 = arith.constant 0 : i32
    %c0_i32_0 = arith.constant 0 : i32
    %c0_i32_1 = arith.constant 0 : i32
    return %c0_i32, %c0_i32_0 : i32, i32
  }
  func.func @transform_4(%arg0: i32) -> (i32, i32, i32, i32) {
    %c0_i32 = arith.constant 0 : i32
    %c0_i32_0 = arith.constant 0 : i32
    %c0_i32_1 = arith.constant 0 : i32
    %c0_i32_2 = arith.constant 0 : i32
    return %arg0, %c0_i32, %c0_i32_0, %c0_i32_1 : i32, i32, i32, i32
  }
}

module attributes {stable_mosaic.version = 11 : i64} {
  func.func @_conv_bn_res_kernel(%arg0: i32, %arg1: memref<1x3x3x128xbf16, #tpu.memory_space<vmem>>, %arg2: memref<9x128x128xbf16, #tpu.memory_space<vmem>>, %arg3: memref<1x128xf32, #tpu.memory_space<vmem>>, %arg4: memref<1x128xf32, #tpu.memory_space<vmem>>, %arg5: memref<1x1x1x128xbf16, #tpu.memory_space<vmem>>, %arg6: memref<1x1x1x128xbf16, #tpu.memory_space<vmem>>) attributes {dimension_semantics = [#tpu.dimension_semantics<parallel>], iteration_bounds = array<i64: 2>, scalar_prefetch = 0 : i64, scratch_operands = 0 : i64, tpu.core_type = #tpu.core_type<tc>, window_params = [{transform_indices = @transform_0, window_bounds = array<i64: 1, 3, 3, 128>}, {pipeline_mode = #tpu.pipeline_mode<synchronous>, transform_indices = @transform_1, window_bounds = array<i64: 9, 128, 128>}, {pipeline_mode = #tpu.pipeline_mode<synchronous>, transform_indices = @transform_2, window_bounds = array<i64: 1, 128>}, {pipeline_mode = #tpu.pipeline_mode<synchronous>, transform_indices = @transform_3, window_bounds = array<i64: 1, 128>}, {transform_indices = @transform_4, window_bounds = array<i64: 1, 1, 1, 128>}, {transform_indices = @transform_5, window_bounds = array<i64: 1, 1, 1, 128>}]} {
    %c0 = arith.constant 0 : index
    %c0_0 = arith.constant 0 : index
    %0 = vector.load %arg3[%c0, %c0_0] : memref<1x128xf32, #tpu.memory_space<vmem>>, vector<1x128xf32>
    %c0_1 = arith.constant 0 : index
    %c0_2 = arith.constant 0 : index
    %1 = vector.load %arg4[%c0_1, %c0_2] : memref<1x128xf32, #tpu.memory_space<vmem>>, vector<1x128xf32>
    %c0_i32 = arith.constant 0 : i32
    %c0_i32_3 = arith.constant 0 : i32
    %2 = arith.addi %c0_i32_3, %c0_i32 : i32
    %c0_4 = arith.constant 0 : index
    %3 = arith.index_cast %2 : i32 to index
    %c0_5 = arith.constant 0 : index
    %c0_6 = arith.constant 0 : index
    %4 = vector.load %arg1[%c0_4, %3, %c0_5, %c0_6] : memref<1x3x3x128xbf16, #tpu.memory_space<vmem>>, vector<1x1x1x128xbf16>
    %5 = vector.shape_cast %4 : vector<1x1x1x128xbf16> to vector<1x128xbf16>
    %c0_7 = arith.constant 0 : index
    %c0_8 = arith.constant 0 : index
    %c0_9 = arith.constant 0 : index
    %6 = vector.load %arg2[%c0_7, %c0_8, %c0_9] : memref<9x128x128xbf16, #tpu.memory_space<vmem>>, vector<1x128x128xbf16>
    %7 = vector.shape_cast %6 : vector<1x128x128xbf16> to vector<128x128xbf16>
    %cst = arith.constant dense<0.000000e+00> : vector<1x128xf32>
    %8 = tpu.matmul %5, %7, %cst {dimension_numbers = #tpu.dot_dimension_numbers<[1], [0], [0], [1], [0, 0, 1, 1], [], []>} : vector<1x128xbf16>, vector<128x128xbf16>, vector<1x128xf32> -> vector<1x128xf32>
    %c0_i32_10 = arith.constant 0 : i32
    %9 = arith.addi %c0_i32_10, %c0_i32 : i32
    %c0_11 = arith.constant 0 : index
    %10 = arith.index_cast %9 : i32 to index
    %c1 = arith.constant 1 : index
    %c0_12 = arith.constant 0 : index
    %11 = vector.load %arg1[%c0_11, %10, %c1, %c0_12] : memref<1x3x3x128xbf16, #tpu.memory_space<vmem>>, vector<1x1x1x128xbf16>
    %12 = vector.shape_cast %11 : vector<1x1x1x128xbf16> to vector<1x128xbf16>
    %c1_13 = arith.constant 1 : index
    %c0_14 = arith.constant 0 : index
    %c0_15 = arith.constant 0 : index
    %13 = vector.load %arg2[%c1_13, %c0_14, %c0_15] : memref<9x128x128xbf16, #tpu.memory_space<vmem>>, vector<1x128x128xbf16>
    %14 = vector.shape_cast %13 : vector<1x128x128xbf16> to vector<128x128xbf16>
    %cst_16 = arith.constant dense<0.000000e+00> : vector<1x128xf32>
    %15 = tpu.matmul %12, %14, %cst_16 {dimension_numbers = #tpu.dot_dimension_numbers<[1], [0], [0], [1], [0, 0, 1, 1], [], []>} : vector<1x128xbf16>, vector<128x128xbf16>, vector<1x128xf32> -> vector<1x128xf32>
    %16 = arith.addf %8, %15 : vector<1x128xf32>
    %c0_i32_17 = arith.constant 0 : i32
    %17 = arith.addi %c0_i32_17, %c0_i32 : i32
    %c0_18 = arith.constant 0 : index
    %18 = arith.index_cast %17 : i32 to index
    %c2 = arith.constant 2 : index
    %c0_19 = arith.constant 0 : index
    %19 = vector.load %arg1[%c0_18, %18, %c2, %c0_19] : memref<1x3x3x128xbf16, #tpu.memory_space<vmem>>, vector<1x1x1x128xbf16>
    %20 = vector.shape_cast %19 : vector<1x1x1x128xbf16> to vector<1x128xbf16>
    %c2_20 = arith.constant 2 : index
    %c0_21 = arith.constant 0 : index
    %c0_22 = arith.constant 0 : index
    %21 = vector.load %arg2[%c2_20, %c0_21, %c0_22] : memref<9x128x128xbf16, #tpu.memory_space<vmem>>, vector<1x128x128xbf16>
    %22 = vector.shape_cast %21 : vector<1x128x128xbf16> to vector<128x128xbf16>
    %cst_23 = arith.constant dense<0.000000e+00> : vector<1x128xf32>
    %23 = tpu.matmul %20, %22, %cst_23 {dimension_numbers = #tpu.dot_dimension_numbers<[1], [0], [0], [1], [0, 0, 1, 1], [], []>} : vector<1x128xbf16>, vector<128x128xbf16>, vector<1x128xf32> -> vector<1x128xf32>
    %24 = arith.addf %16, %23 : vector<1x128xf32>
    %c1_i32 = arith.constant 1 : i32
    %25 = arith.addi %c1_i32, %c0_i32 : i32
    %c0_24 = arith.constant 0 : index
    %26 = arith.index_cast %25 : i32 to index
    %c0_25 = arith.constant 0 : index
    %c0_26 = arith.constant 0 : index
    %27 = vector.load %arg1[%c0_24, %26, %c0_25, %c0_26] : memref<1x3x3x128xbf16, #tpu.memory_space<vmem>>, vector<1x1x1x128xbf16>
    %28 = vector.shape_cast %27 : vector<1x1x1x128xbf16> to vector<1x128xbf16>
    %c3 = arith.constant 3 : index
    %c0_27 = arith.constant 0 : index
    %c0_28 = arith.constant 0 : index
    %29 = vector.load %arg2[%c3, %c0_27, %c0_28] : memref<9x128x128xbf16, #tpu.memory_space<vmem>>, vector<1x128x128xbf16>
    %30 = vector.shape_cast %29 : vector<1x128x128xbf16> to vector<128x128xbf16>
    %cst_29 = arith.constant dense<0.000000e+00> : vector<1x128xf32>
    %31 = tpu.matmul %28, %30, %cst_29 {dimension_numbers = #tpu.dot_dimension_numbers<[1], [0], [0], [1], [0, 0, 1, 1], [], []>} : vector<1x128xbf16>, vector<128x128xbf16>, vector<1x128xf32> -> vector<1x128xf32>
    %32 = arith.addf %24, %31 : vector<1x128xf32>
    %c1_i32_30 = arith.constant 1 : i32
    %33 = arith.addi %c1_i32_30, %c0_i32 : i32
    %c0_31 = arith.constant 0 : index
    %34 = arith.index_cast %33 : i32 to index
    %c1_32 = arith.constant 1 : index
    %c0_33 = arith.constant 0 : index
    %35 = vector.load %arg1[%c0_31, %34, %c1_32, %c0_33] : memref<1x3x3x128xbf16, #tpu.memory_space<vmem>>, vector<1x1x1x128xbf16>
    %36 = vector.shape_cast %35 : vector<1x1x1x128xbf16> to vector<1x128xbf16>
    %c4 = arith.constant 4 : index
    %c0_34 = arith.constant 0 : index
    %c0_35 = arith.constant 0 : index
    %37 = vector.load %arg2[%c4, %c0_34, %c0_35] : memref<9x128x128xbf16, #tpu.memory_space<vmem>>, vector<1x128x128xbf16>
    %38 = vector.shape_cast %37 : vector<1x128x128xbf16> to vector<128x128xbf16>
    %cst_36 = arith.constant dense<0.000000e+00> : vector<1x128xf32>
    %39 = tpu.matmul %36, %38, %cst_36 {dimension_numbers = #tpu.dot_dimension_numbers<[1], [0], [0], [1], [0, 0, 1, 1], [], []>} : vector<1x128xbf16>, vector<128x128xbf16>, vector<1x128xf32> -> vector<1x128xf32>
    %40 = arith.addf %32, %39 : vector<1x128xf32>
    %c1_i32_37 = arith.constant 1 : i32
    %41 = arith.addi %c1_i32_37, %c0_i32 : i32
    %c0_38 = arith.constant 0 : index
    %42 = arith.index_cast %41 : i32 to index
    %c2_39 = arith.constant 2 : index
    %c0_40 = arith.constant 0 : index
    %43 = vector.load %arg1[%c0_38, %42, %c2_39, %c0_40] : memref<1x3x3x128xbf16, #tpu.memory_space<vmem>>, vector<1x1x1x128xbf16>
    %44 = vector.shape_cast %43 : vector<1x1x1x128xbf16> to vector<1x128xbf16>
    %c5 = arith.constant 5 : index
    %c0_41 = arith.constant 0 : index
    %c0_42 = arith.constant 0 : index
    %45 = vector.load %arg2[%c5, %c0_41, %c0_42] : memref<9x128x128xbf16, #tpu.memory_space<vmem>>, vector<1x128x128xbf16>
    %46 = vector.shape_cast %45 : vector<1x128x128xbf16> to vector<128x128xbf16>
    %cst_43 = arith.constant dense<0.000000e+00> : vector<1x128xf32>
    %47 = tpu.matmul %44, %46, %cst_43 {dimension_numbers = #tpu.dot_dimension_numbers<[1], [0], [0], [1], [0, 0, 1, 1], [], []>} : vector<1x128xbf16>, vector<128x128xbf16>, vector<1x128xf32> -> vector<1x128xf32>
    %48 = arith.addf %40, %47 : vector<1x128xf32>
    %c2_i32 = arith.constant 2 : i32
    %49 = arith.addi %c2_i32, %c0_i32 : i32
    %c0_44 = arith.constant 0 : index
    %50 = arith.index_cast %49 : i32 to index
    %c0_45 = arith.constant 0 : index
    %c0_46 = arith.constant 0 : index
    %51 = vector.load %arg1[%c0_44, %50, %c0_45, %c0_46] : memref<1x3x3x128xbf16, #tpu.memory_space<vmem>>, vector<1x1x1x128xbf16>
    %52 = vector.shape_cast %51 : vector<1x1x1x128xbf16> to vector<1x128xbf16>
    %c6 = arith.constant 6 : index
    %c0_47 = arith.constant 0 : index
    %c0_48 = arith.constant 0 : index
    %53 = vector.load %arg2[%c6, %c0_47, %c0_48] : memref<9x128x128xbf16, #tpu.memory_space<vmem>>, vector<1x128x128xbf16>
    %54 = vector.shape_cast %53 : vector<1x128x128xbf16> to vector<128x128xbf16>
    %cst_49 = arith.constant dense<0.000000e+00> : vector<1x128xf32>
    %55 = tpu.matmul %52, %54, %cst_49 {dimension_numbers = #tpu.dot_dimension_numbers<[1], [0], [0], [1], [0, 0, 1, 1], [], []>} : vector<1x128xbf16>, vector<128x128xbf16>, vector<1x128xf32> -> vector<1x128xf32>
    %56 = arith.addf %48, %55 : vector<1x128xf32>
    %c2_i32_50 = arith.constant 2 : i32
    %57 = arith.addi %c2_i32_50, %c0_i32 : i32
    %c0_51 = arith.constant 0 : index
    %58 = arith.index_cast %57 : i32 to index
    %c1_52 = arith.constant 1 : index
    %c0_53 = arith.constant 0 : index
    %59 = vector.load %arg1[%c0_51, %58, %c1_52, %c0_53] : memref<1x3x3x128xbf16, #tpu.memory_space<vmem>>, vector<1x1x1x128xbf16>
    %60 = vector.shape_cast %59 : vector<1x1x1x128xbf16> to vector<1x128xbf16>
    %c7 = arith.constant 7 : index
    %c0_54 = arith.constant 0 : index
    %c0_55 = arith.constant 0 : index
    %61 = vector.load %arg2[%c7, %c0_54, %c0_55] : memref<9x128x128xbf16, #tpu.memory_space<vmem>>, vector<1x128x128xbf16>
    %62 = vector.shape_cast %61 : vector<1x128x128xbf16> to vector<128x128xbf16>
    %cst_56 = arith.constant dense<0.000000e+00> : vector<1x128xf32>
    %63 = tpu.matmul %60, %62, %cst_56 {dimension_numbers = #tpu.dot_dimension_numbers<[1], [0], [0], [1], [0, 0, 1, 1], [], []>} : vector<1x128xbf16>, vector<128x128xbf16>, vector<1x128xf32> -> vector<1x128xf32>
    %64 = arith.addf %56, %63 : vector<1x128xf32>
    %c2_i32_57 = arith.constant 2 : i32
    %65 = arith.addi %c2_i32_57, %c0_i32 : i32
    %c0_58 = arith.constant 0 : index
    %66 = arith.index_cast %65 : i32 to index
    %c2_59 = arith.constant 2 : index
    %c0_60 = arith.constant 0 : index
    %67 = vector.load %arg1[%c0_58, %66, %c2_59, %c0_60] : memref<1x3x3x128xbf16, #tpu.memory_space<vmem>>, vector<1x1x1x128xbf16>
    %68 = vector.shape_cast %67 : vector<1x1x1x128xbf16> to vector<1x128xbf16>
    %c8 = arith.constant 8 : index
    %c0_61 = arith.constant 0 : index
    %c0_62 = arith.constant 0 : index
    %69 = vector.load %arg2[%c8, %c0_61, %c0_62] : memref<9x128x128xbf16, #tpu.memory_space<vmem>>, vector<1x128x128xbf16>
    %70 = vector.shape_cast %69 : vector<1x128x128xbf16> to vector<128x128xbf16>
    %cst_63 = arith.constant dense<0.000000e+00> : vector<1x128xf32>
    %71 = tpu.matmul %68, %70, %cst_63 {dimension_numbers = #tpu.dot_dimension_numbers<[1], [0], [0], [1], [0, 0, 1, 1], [], []>} : vector<1x128xbf16>, vector<128x128xbf16>, vector<1x128xf32> -> vector<1x128xf32>
    %72 = arith.addf %64, %71 : vector<1x128xf32>
    %73 = arith.mulf %72, %0 : vector<1x128xf32>
    %74 = arith.addf %73, %1 : vector<1x128xf32>
    %c0_64 = arith.constant 0 : index
    %75 = arith.index_cast %c0_i32 : i32 to index
    %c0_65 = arith.constant 0 : index
    %c0_66 = arith.constant 0 : index
    %76 = vector.load %arg5[%c0_64, %75, %c0_65, %c0_66] : memref<1x1x1x128xbf16, #tpu.memory_space<vmem>>, vector<1x1x1x128xbf16>
    %77 = vector.shape_cast %76 : vector<1x1x1x128xbf16> to vector<1x128xbf16>
    %78 = arith.extf %77 : vector<1x128xbf16> to vector<1x128xf32>
    %79 = arith.addf %74, %78 : vector<1x128xf32>
    %cst_67 = arith.constant 0.000000e+00 : f32
    %80 = vector.broadcast %cst_67 : f32 to vector<1x128xf32>
    %81 = arith.maximumf %79, %80 : vector<1x128xf32>
    %82 = arith.truncf %81 : vector<1x128xf32> to vector<1x128xbf16>
    %c0_68 = arith.constant 0 : index
    %83 = arith.index_cast %c0_i32 : i32 to index
    %c0_69 = arith.constant 0 : index
    %c0_70 = arith.constant 0 : index
    %84 = vector.load %arg6[%c0_68, %83, %c0_69, %c0_70] : memref<1x1x1x128xbf16, #tpu.memory_space<vmem>>, vector<1x1x1x128xbf16>
    %85 = vector.shape_cast %84 : vector<1x1x1x128xbf16> to vector<1x128xbf16>
    %86 = vector.shape_cast %82 : vector<1x128xbf16> to vector<1x1x1x128xbf16>
    tpu.vector_store %arg6[%c0_68, %83, %c0_69, %c0_70], %86 {strides = array<i32>} : memref<1x1x1x128xbf16, #tpu.memory_space<vmem>>, vector<1x1x1x128xbf16>,
    %c1_i32_71 = arith.constant 1 : i32
    return
  }
  func.func @transform_0(%arg0: i32) -> (i32, i32, i32, i32) {
    %c0_i32 = arith.constant 0 : i32
    %c0_i32_0 = arith.constant 0 : i32
    %c0_i32_1 = arith.constant 0 : i32
    %c0_i32_2 = arith.constant 0 : i32
    return %arg0, %c0_i32, %c0_i32_0, %c0_i32_1 : i32, i32, i32, i32
  }
  func.func @transform_1(%arg0: i32) -> (i32, i32, i32) {
    %c0_i32 = arith.constant 0 : i32
    %c0_i32_0 = arith.constant 0 : i32
    %c0_i32_1 = arith.constant 0 : i32
    %c0_i32_2 = arith.constant 0 : i32
    return %c0_i32, %c0_i32_0, %c0_i32_1 : i32, i32, i32
  }
  func.func @transform_2(%arg0: i32) -> (i32, i32) {
    %c0_i32 = arith.constant 0 : i32
    %c0_i32_0 = arith.constant 0 : i32
    %c0_i32_1 = arith.constant 0 : i32
    return %c0_i32, %c0_i32_0 : i32, i32
  }
  func.func @transform_3(%arg0: i32) -> (i32, i32) {
    %c0_i32 = arith.constant 0 : i32
    %c0_i32_0 = arith.constant 0 : i32
    %c0_i32_1 = arith.constant 0 : i32
    return %c0_i32, %c0_i32_0 : i32, i32
  }
  func.func @transform_4(%arg0: i32) -> (i32, i32, i32, i32) {
    %c0_i32 = arith.constant 0 : i32
    %c0_i32_0 = arith.constant 0 : i32
    %c0_i32_1 = arith.constant 0 : i32
    %c0_i32_2 = arith.constant 0 : i32
    return %arg0, %c0_i32, %c0_i32_0, %c0_i32_1 : i32, i32, i32, i32
  }
  func.func @transform_5(%arg0: i32) -> (i32, i32, i32, i32) {
    %c0_i32 = arith.constant 0 : i32
    %c0_i32_0 = arith.constant 0 : i32
    %c0_i32_1 = arith.constant 0 : i32
    %c0_i32_2 = arith.constant 0 : i32
    return %arg0, %c0_i32, %c0_i32_0, %c0_i32_1 : i32, i32, i32, i32
  }
}

module attributes {stable_mosaic.version = 11 : i64} {
  func.func @_fc_kernel(%arg0: i32, %arg1: memref<2x128xbf16, #tpu.memory_space<vmem>>, %arg2: memref<128x10xbf16, #tpu.memory_space<vmem>>, %arg3: memref<1x10xf32, #tpu.memory_space<vmem>>, %arg4: memref<2x10xf32, #tpu.memory_space<vmem>>) attributes {dimension_semantics = [#tpu.dimension_semantics<arbitrary>], iteration_bounds = array<i64: 1>, scalar_prefetch = 0 : i64, scratch_operands = 0 : i64, tpu.core_type = #tpu.core_type<tc>, window_params = [{pipeline_mode = #tpu.pipeline_mode<synchronous>, transform_indices = @transform_0, window_bounds = array<i64: 2, 128>}, {pipeline_mode = #tpu.pipeline_mode<synchronous>, transform_indices = @transform_1, window_bounds = array<i64: 128, 10>}, {pipeline_mode = #tpu.pipeline_mode<synchronous>, transform_indices = @transform_2, window_bounds = array<i64: 1, 10>}, {pipeline_mode = #tpu.pipeline_mode<synchronous>, transform_indices = @transform_3, window_bounds = array<i64: 2, 10>}]} {
    %c0 = arith.constant 0 : index
    %c0_0 = arith.constant 0 : index
    %0 = vector.load %arg1[%c0, %c0_0] : memref<2x128xbf16, #tpu.memory_space<vmem>>, vector<2x128xbf16>
    %c0_1 = arith.constant 0 : index
    %c0_2 = arith.constant 0 : index
    %1 = vector.load %arg2[%c0_1, %c0_2] : memref<128x10xbf16, #tpu.memory_space<vmem>>, vector<128x10xbf16>
    %cst = arith.constant dense<0.000000e+00> : vector<2x10xf32>
    %2 = tpu.matmul %0, %1, %cst {dimension_numbers = #tpu.dot_dimension_numbers<[1], [0], [0], [1], [0, 0, 1, 1], [], []>} : vector<2x128xbf16>, vector<128x10xbf16>, vector<2x10xf32> -> vector<2x10xf32>
    %c0_3 = arith.constant 0 : index
    %c0_4 = arith.constant 0 : index
    %3 = vector.load %arg3[%c0_3, %c0_4] : memref<1x10xf32, #tpu.memory_space<vmem>>, vector<1x10xf32>
    %4 = vector.broadcast %3 : vector<1x10xf32> to vector<2x10xf32>
    %5 = arith.addf %2, %4 : vector<2x10xf32>
    %c0_5 = arith.constant 0 : index
    %c0_6 = arith.constant 0 : index
    %6 = vector.load %arg4[%c0_5, %c0_6] : memref<2x10xf32, #tpu.memory_space<vmem>>, vector<2x10xf32>
    tpu.vector_store %arg4[%c0_5, %c0_6], %5 {strides = array<i32>} : memref<2x10xf32, #tpu.memory_space<vmem>>, vector<2x10xf32>,
    return
  }
  func.func @transform_0(%arg0: i32) -> (i32, i32) {
    %c0_i32 = arith.constant 0 : i32
    %c0_i32_0 = arith.constant 0 : i32
    %c0_i32_1 = arith.constant 0 : i32
    return %c0_i32, %c0_i32_0 : i32, i32
  }
  func.func @transform_1(%arg0: i32) -> (i32, i32) {
    %c0_i32 = arith.constant 0 : i32
    %c0_i32_0 = arith.constant 0 : i32
    %c0_i32_1 = arith.constant 0 : i32
    return %c0_i32, %c0_i32_0 : i32, i32
  }
  func.func @transform_2(%arg0: i32) -> (i32, i32) {
    %c0_i32 = arith.constant 0 : i32
    %c0_i32_0 = arith.constant 0 : i32
    %c0_i32_1 = arith.constant 0 : i32
    return %c0_i32, %c0_i32_0 : i32, i32
  }
  func.func @transform_3(%arg0: i32) -> (i32, i32) {
    %c0_i32 = arith.constant 0 : i32
    %c0_i32_0 = arith.constant 0 : i32
    %c0_i32_1 = arith.constant 0 : i32
    return %c0_i32, %c0_i32_0 : i32, i32
  }
}

</mosaic_0001>

<bundles_post_ra>
// kernel: _lambda_.13
= control target key start
LH: loop header
LB: loop body
LE: loop exit
PB: predicated region body
PF: predicated region fallthrough
CT: control target
= control target key end

     0   :  { %s4348_s15 = smov 0   ;;  %s4949_s0 = inlined_call_operand.vmem [shape: bf16[2,76,19,8], index: 0, kind: input, shape index: {}]   ;;  %s4950_s1 = inlined_call_operand.vmem [shape: bf16[49,8,128], index: 1, kind: input, shape index: {}]   ;;  %s4951_s2 = inlined_call_operand.vmem [shape: f32[1,128], index: 2, kind: input, shape index: {}]   ;;  %s4952_s3 = inlined_call_operand.vmem [shape: f32[1,128], index: 3, kind: input, shape index: {}]   ;;  %s4953_s4 = inlined_call_operand.vmem [shape: bf16[2,16,16,128], index: 4, kind: output, shape index: {}]  }
   0x1 LB: > { %s3560_s16 = sadd.s32 4294967295, %s4315_s15   ;;  %p3564_p0 = scmp.ge.s32.totalorder %s4315_s15, 1  ;;  %s4315_s15 = sphi %s4348_s15, %s14_s15  }
   0x2   : > { %p162_p1 = scmp.lt.s32.totalorder %s4315_s15, 3 }
   0x4   : > { %p163_p2 = pnand %p3564_p0, %p162_p1 }
   0x5   : > { %p188_p3 = scmp.lt.s32.totalorder (!%p163_p2), %s3560_s16, 1  ;;  %s4376_s29 = smov (!%p163_p2), 0  }
   0x6   : > { %166 = sbr.rel (%p163_p2) target bundleno = 423 (0x1a7), region = 36 }
   0xb   : > { %v4359_v0 = vld [vmem:[%s4951_s2] ss:$0 sm:$0xff]  ;;  %s4955_s16 = smov (!%p188_p3, %s3560_s16), 1 }
   0xc   : > { %v4364_v1 = vld [vmem:[%s4952_s3] ss:$0 sm:$0xff]  ;;  %s4223_s21 = smul.u32 912, %s4955_s16  ;;  %s3821_s22 = sshll.u32 %s4955_s16, 7 }
   0xd   : > { %s4369_s25 = scalar_lea.vmem %s4953_s4, %s3821_s22 }
   0xe   : > { %s4374_s28 = scalar_lea.vmem %s4949_s0, %s4223_s21 }
   0xf LB: >> { %v3571_v2 = vld [vmem:[%s4950_s1 + $0x4] sm:$0xf]  ;;  %vm230_vm0 = vcmask 1043456   ;;  %v212_v3 = vld [vmem:[%s4950_s1] sm:$0xf]  ;;  %v4321_v4 = vmov 0.0   ;;  %s4319_s29 = sphi %s4376_s29, %s206_s29  }
  0x10   : >> { %3929 = vmatprep.subr.bf16.mxu0 %v4321_v4  ;;  %v232_v5 = vsel %vm230_vm0, %v3571_v2, 0  ;;  %3935 = vmatprep.subr.bf16.mxu1 %v4321_v4  ;;  %v284_v6 = vsel %vm230_vm0, %v212_v3, 0  ;;  %s3822_s8 = smul.u32 12, %s4319_s29  ;;  %v3576_v7 = vld [vmem:[%s4950_s1 + $0x8] sm:$0xf]  ;;  %vm4322_vm1 = vmmov 0  }
  0x11   : >> { %3930 = vmatpush3.bf16.msra.mxu0 %v232_v5  ;;  %3936 = vmatpush3.bf16.msra.mxu1 %v284_v6  ;;  %v3583_v8 = vld [vmem:[%s4950_s1 + $0xc] sm:$0xf]  ;;  %vm226_vm2 = vcmask 64512   ;;  %v357_v10 = vsel %vm230_vm0, %v3576_v7, 0  ;;  %vm340_vm3 = vsmask.f32 7424 }
  0x12   : >> { %3931 = vmatprep.mubr.msk.bf16.mxu0 %vm4322_vm1, %v4321_v4  ;;  %3937 = vmatprep.mubr.msk.bf16.mxu1 %vm4322_vm1, %v4321_v4  ;;  %s4404_s13 = scalar_lea.vmem %s4374_s28, %s3822_s8  ;;  %v431_v12 = vsel %vm230_vm0, %v3583_v8, 0  ;;  %v3587_v25 = vld [vmem:[%s4950_s1 + $0x10] sm:$0xf]  ;;  %v3591_v31 = vld [vmem:[%s4950_s1 + $0x14] sm:$0xf]  ;;  %vm482_vm4 = vcmask 1046528  }
  0x13   : >> { %3941 = vmatprep.subr.bf16.mxu0 %v4321_v4  ;;  %3947 = vmatprep.subr.bf16.mxu1 %v4321_v4  ;;  %v4242_v9 = vld [vmem:[%s4404_s13 + $0xe4] sm:$0xff]   ;;  %v327_v13 = vld [vmem:[%s4404_s13] sm:$0xf]  ;;  %v4247_v24 = vld [vmem:[%s4404_s13 + $0xec] ss:$0 sps:$4 sm:$0x11]  }
  0x14   : >> { %v4243_v11 = vld [vmem:[%s4404_s13] sm:$0xff]   ;;  %3932 = vmatmul.mubr.msk.bf16.vlgmr.msra.gmra.mxu0 %vm226_vm2, %v4242_v9  ;;  %v4245_v16 = vld [vmem:[%s4404_s13 + $0x8] ss:$0 sps:$4 sm:$0x11]   ;;  %v423_v30 = vshll.u32 %v4247_v24, 16  ;;  %v490_v38 = vsel %vm230_vm0, %v3587_v25, 0 }
  0x15   : >> { %v328_v14 = vld [vmem:[%s4404_s13 + $0x4] sm:$0xf]  ;;  %3938 = vmatmul.mubr.msk.bf16.vlgmr.msra.gmra.mxu1 %vm226_vm2, %v4243_v11  ;;  %3942 = vmatpush3.bf16.msra.mxu0 %v357_v10  ;;  %v3581_v18 = vld [vmem:[%s4404_s13 + $0xe8] sm:$0xf]  ;;  %v476_v19 = vld [vmem:[%s4404_s13] sm:$0xe] }
  0x16   : >> { %v3577_v15 = vcombine.low %v327_v13, %v328_v14  ;;  %v3580_v17 = vld [vmem:[%s4404_s13 + $0xe4] sm:$0xf]  ;;  %3948 = vmatpush3.bf16.msra.mxu1 %v431_v12  ;;  %3943 = vmatprep.mubr.msk.bf16.mxu0 %vm4322_vm1, %v4321_v4  ;;  %v349_v22 = vshll.u32 %v4245_v16, 16  ;;  %v3588_v32 = vcombine.low %v476_v19, %v328_v14  ;;  %v4250_v36 = vld [vmem:[%s4404_s13 + $0x8] ss:$0 sps:$4 sm:$0x33]  }
  0x17   : >> { %3949 = vmatprep.mubr.msk.bf16.mxu1 %vm4322_vm1, %v4321_v4  ;;  %3953 = vmatprep.subr.bf16.mxu0 %v4321_v4  ;;  %v3584_v23 = vcombine.low %v3580_v17, %v3581_v18  ;;  %v3590_v33 = vld [vmem:[%s4404_s13 + $0xe4] sm:$0xe]  ;;  %v425_v37 = vrot.slane %v423_v30, 1  ;;  %v548_v42 = vsel %vm230_vm0, %v3591_v31, 0  ;;  %v484_v44 = vrot.slane %v4245_v16, 1  ;;  %v4251_v14 = vld [vmem:[%s4404_s13 + $0x1c8] sm:$0xff]  }
  0x18   : >> { %v342_v20 = vshrl.u32 %v3577_v15, 16  ;;  %v344_v21 = vshll.u32 %v3577_v15, 16  ;;  %3959 = vmatprep.subr.bf16.mxu1 %v4321_v4  ;;  %v351_v27 = vrot.slane %v349_v22, 1  ;;  %v3592_v41 = vcombine.low %v3590_v33, %v3581_v18  ;;  %v3594_v52 = vld [vmem:[%s4950_s1 + $0x18] sm:$0xf]  ;;  %s3825_s20 = sshll.u32 %s4319_s29, 3 }
  0x19   : >> { %v416_v28 = vshrl.u32 %v3584_v23, 16  ;;  %v418_v29 = vshll.u32 %v3584_v23, 16  ;;  %v483_v43 = vrot.slane %v3588_v32, 1  ;;  %v601_v45 = vshrl.u32 %v3588_v32, 16  ;;  %v3599_v54 = vld [vmem:[%s4950_s1 + $0x1c] sm:$0xf]  ;;  %s3454_s21 = scalar_lea.vmem %s4369_s25, %s3825_s20 }
  0x1a   : >> { %v346_v26 = vrot.slane %v344_v21, 1  ;;  %v604_v47 = vshll.u32 %v3588_v32, 16  ;;  %v609_v48 = vshrl.u32 %v4250_v36, 16  ;;  %v612_v49 = vshll.u32 %v4250_v36, 16  ;;  %v3607_v55 = vld [vmem:[%s4404_s13 + $0x1c8] sm:$0xf] }
  0x1b   : >> { %v420_v35 = vrot.slane %v418_v29, 1  ;;  %v541_v50 = vrot.slane %v3592_v41, 1  ;;  %v542_v51 = vrot.slane %v4247_v24, 1  ;;  %v485_v53 = vsel %vm482_vm4, %v483_v43, %v484_v44  ;;  %v3608_v56 = vld [vmem:[%s4404_s13 + $0x1cc] sm:$0xf]  ;;  %s206_s29 = sadd.s32 1, %s4319_s29  }
  0x1c   : >> { %v347_v34 = vor.u32 %v346_v26, %v342_v20  ;;  %v603_v57 = vrot.slane %v601_v45, 1  ;;  %v606_v58 = vrot.slane %v604_v47, 2  ;;  %v611_v59 = vrot.slane %v609_v48, 1  ;;  %v3614_v6 = vld [vmem:[%s4404_s13 + $0x2ac] sm:$0xf]  ;;  %p203_p4 = scmp.ge.s32.totalorder %s206_s29, 16  }
  0x1d   : >> { %v421_v40 = vor.u32 %v420_v35, %v416_v28  ;;  %v614_v60 = vrot.slane %v612_v49, 2  ;;  %v621_v61 = vsel %vm230_vm0, %v3594_v52, 0  ;;  %v543_v62 = vsel %vm482_vm4, %v541_v50, %v542_v51  ;;  %v4465_v7 = vld [vmem:[%s4404_s13 + $0x2b0] sm:$0xf]  ;;  %v3604_v8 = vld [vmem:[%s4950_s1 + $0x20] sm:$0xf] }
  0x1e   : >> { %v352_v39 = vsel %vm340_vm3, %v347_v34, %v351_v27  ;;  %v3611_v63 = vcombine.low %v3607_v55, %v3608_v56  ;;  %v683_v2 = vsel %vm230_vm0, %v3599_v54, 0  ;;  %vm599_vm5 = vsmask.f32 6400  ;;  %v4254_v9 = vld [vmem:[%s4404_s13 + $0x1d0] ss:$0 sps:$4 sm:$0x11]  }
  0x1f   : >> { %3944 = vmatmul.mubr.msk.bf16.vlgmr.msra.gmra.mxu0 %vm226_vm2, %v352_v39  ;;  %v426_v46 = vsel %vm340_vm3, %v421_v40, %v425_v37  ;;  %v607_v3 = vor.u32 %v606_v58, %v603_v57  ;;  %v615_v5 = vor.u32 %v614_v60, %v611_v59  ;;  %v3610_v12 = vld [vmem:[%s4950_s1 + $0x24] sm:$0xf]  ;;  %v3618_v13 = vcombine.low %v3614_v6, %v4465_v7  ;;  %v4486_v20 = vld [vmem:[%s4404_s13 + $0x2b4] ss:$0 sps:$4 sm:$0x11]   ;;  %v4252_v26 = vld [vmem:[%s4404_s13 + $0x2ac] sm:$0xff]  }
  0x20   : >> { %3954 = vmatpush3.bf16.msra.mxu0 %v490_v38  ;;  %3955 = vmatprep.mubr.msk.bf16.mxu0 %vm4322_vm1, %v4321_v4  ;;  %v806_v10 = vshll.u32 %v3611_v63, 16  ;;  %v745_v15 = vsel %vm230_vm0, %v3604_v8, 0  ;;  %v804_v16 = vshrl.u32 %v3611_v63, 16  ;;  %v811_v18 = vshll.u32 %v4254_v9, 16  ;;  %v3617_v24 = vld [vmem:[%s4950_s1 + $0x28] sm:$0xf] }
  0x21   : >> { %3950 = vmatmul.mubr.msk.bf16.vlgmr.msra.gmra.mxu1 %vm226_vm2, %v426_v46  ;;  %3965 = vmatprep.subr.bf16.mxu0 %v4321_v4  ;;  %v616_v11 = vsel %vm599_vm5, %v607_v3, %v615_v5  ;;  %v819_v19 = vsel %vm230_vm0, %v3610_v12, 0  ;;  %v880_v21 = vshll.u32 %v3618_v13, 16  ;;  %v3621_v25 = vld [vmem:[%s4404_s13 + $0x1c8] sm:$0xe]  ;;  %v3622_v27 = vld [vmem:[%s4950_s1 + $0x2c] sm:$0xf] }
  0x22   : >> { %3960 = vmatpush3.bf16.msra.mxu1 %v548_v42  ;;  %3961 = vmatprep.mubr.msk.bf16.mxu1 %vm4322_vm1, %v4321_v4  ;;  %v808_v17 = vrot.slane %v806_v10, 1  ;;  %v813_v23 = vrot.slane %v811_v18, 1  ;;  %v878_v28 = vshrl.u32 %v3618_v13, 16  ;;  %v885_v30 = vshll.u32 %v4486_v20, 16  ;;  %v3626_v38 = vld [vmem:[%s4950_s1 + $0x30] sm:$0xf] }
  0x23   : >> { %3971 = vmatprep.subr.bf16.mxu1 %v4321_v4  ;;  %v882_v29 = vrot.slane %v880_v21, 1  ;;  %v893_v31 = vsel %vm230_vm0, %v3617_v24, 0  ;;  %v3623_v32 = vcombine.low %v3621_v25, %v3608_v56  ;;  %v4259_v34 = vld [vmem:[%s4404_s13 + $0x1d0] ss:$0 sps:$4 sm:$0x33]   ;;  %v951_v35 = vsel %vm230_vm0, %v3622_v27, 0 }
  0x24   : >> { %v809_v22 = vor.u32 %v808_v17, %v804_v16  ;;  %v887_v37 = vrot.slane %v885_v30, 1  ;;  %v945_v40 = vrot.slane %v4254_v9, 1  ;;  %v3625_v41 = vld [vmem:[%s4404_s13 + $0x2ac] sm:$0xe]  ;;  %v1069_v44 = vshrl.u32 %v4259_v34, 16  ;;  %v4261_v21 = vld [vmem:[%s4404_s13 + $0xf0] sm:$0xff]  }
  0x25   : >> { %v883_v36 = vor.u32 %v882_v29, %v878_v28  ;;  %v944_v39 = vrot.slane %v3623_v32, 1  ;;  %v1061_v42 = vshrl.u32 %v3623_v32, 16  ;;  %v1064_v43 = vshll.u32 %v3623_v32, 16  ;;  %v3630_v47 = vld [vmem:[%s4950_s1 + $0x34] sm:$0xf]  ;;  %v4260_v16 = vld [vmem:[%s4404_s13 + $0xc] sm:$0xff]  }
  0x26   : >> { %v814_v33 = vsel %vm340_vm3, %v809_v22, %v813_v23  ;;  %v1072_v45 = vshll.u32 %v4259_v34, 16  ;;  %v3627_v48 = vcombine.low %v3625_v41, %v4465_v7  ;;  %v1009_v50 = vsel %vm230_vm0, %v3626_v38, 0  ;;  %v3643_v58 = vld [vmem:[%s4404_s13 + $0xc] sm:$0xf]  ;;  %v3644_v59 = vld [vmem:[%s4404_s13 + $0x10] sm:$0xf] }
  0x27   : >> { %3956 = vmatmul.mubr.msk.bf16.vlgmr.msra.gmra.mxu0 %vm226_vm2, %v485_v53  ;;  %v888_v46 = vsel %vm340_vm3, %v883_v36, %v887_v37  ;;  %v946_v49 = vsel %vm482_vm4, %v944_v39, %v945_v40  ;;  %v1063_v51 = vrot.slane %v1061_v42, 1  ;;  %v1066_v52 = vrot.slane %v1064_v43, 2  ;;  %v3650_v63 = vld [vmem:[%s4404_s13 + $0xf0] sm:$0xf]  ;;  %v3640_v5 = vld [vmem:[%s4950_s1 + $0x3c] sm:$0xf] }
  0x28   : >> { %3966 = vmatpush3.bf16.msra.mxu0 %v621_v61  ;;  %3967 = vmatprep.mubr.msk.bf16.mxu0 %vm4322_vm1, %v4321_v4  ;;  %v1071_v53 = vrot.slane %v1069_v44, 1  ;;  %v1074_v54 = vrot.slane %v1072_v45, 2  ;;  %v1081_v55 = vsel %vm230_vm0, %v3630_v47, 0  ;;  %v1002_v56 = vrot.slane %v3627_v48, 1  ;;  %v3646_v13 = vld [vmem:[%s4950_s1 + $0x40] sm:$0xf] }
  0x29   : >> { %3962 = vmatmul.mubr.msk.bf16.vlgmr.msra.gmra.mxu1 %vm226_vm2, %v543_v62  ;;  %3977 = vmatprep.subr.bf16.mxu0 %v4321_v4  ;;  %v1003_v57 = vrot.slane %v4486_v20, 1  ;;  %v1067_v60 = vor.u32 %v1066_v52, %v1063_v51  ;;  %v3635_v62 = vld [vmem:[%s4950_s1 + $0x38] sm:$0xf]  ;;  %v3647_v6 = vcombine.low %v3643_v58, %v3644_v59  ;;  %v1205_v10 = vsel %vm230_vm0, %v3640_v5, 0  ;;  %v3653_v17 = vld [vmem:[%s4950_s1 + $0x44] sm:$0xf] }
  0x2a   : >> { %3972 = vmatpush3.bf16.msra.mxu1 %v683_v2  ;;  %3973 = vmatprep.mubr.msk.bf16.mxu1 %vm4322_vm1, %v4321_v4  ;;  %v1075_v61 = vor.u32 %v1074_v54, %v1071_v53  ;;  %v4542_v2 = vld [vmem:[%s4404_s13 + $0xf4] sm:$0xf]  ;;  %v1143_v7 = vsel %vm230_vm0, %v3635_v62, 0  ;;  %v1279_v22 = vsel %vm230_vm0, %v3646_v13, 0  ;;  %v3657_v29 = vld [vmem:[%s4404_s13 + $0xc] sm:$0xe] }
  0x2b   : >> { %3983 = vmatprep.subr.bf16.mxu1 %v4321_v4  ;;  %v1004_v3 = vsel %vm482_vm4, %v1002_v56, %v1003_v57  ;;  %v3654_v9 = vcombine.low %v3650_v63, %v4542_v2  ;;  %v1266_v12 = vshll.u32 %v3647_v6, 16  ;;  %v1264_v18 = vshrl.u32 %v3647_v6, 16  ;;  %v3658_v32 = vld [vmem:[%s4950_s1 + $0x48] sm:$0xf]  ;;  %v3661_v34 = vld [vmem:[%s4404_s13 + $0xf0] sm:$0xe] }
  0x2c   : >> { %v1076_v8 = vsel %vm599_vm5, %v1067_v60, %v1075_v61  ;;  %v3662_v36 = vld [vmem:[%s4950_s1 + $0x4c] sm:$0xf]  ;;  %v4268_v37 = vld [vmem:[%s4404_s13 + $0x14] ss:$0 sps:$4 sm:$0x33]   ;;  %v1411_v38 = vsel %vm230_vm0, %v3658_v32, 0  ;;  %v3663_v40 = vcombine.low %v3661_v34, %v4542_v2 }
  0x2d   : >> { %v1338_v23 = vshrl.u32 %v3654_v9, 16  ;;  %v1469_v41 = vsel %vm230_vm0, %v3662_v36, 0  ;;  %v1532_v47 = vshll.u32 %v4268_v37, 16  ;;  %v3671_v52 = vld [vmem:[%s4950_s1 + $0x54] sm:$0xf] }
  0x2e   : >> { %v1462_v48 = vrot.slane %v3663_v40, 1  ;;  %v3679_v53 = vld [vmem:[%s4404_s13 + $0x1d4] sm:$0xf]  ;;  %v3680_v54 = vld [vmem:[%s4404_s13 + $0x1d8] sm:$0xf]  ;;  %v1603_v62 = vsel %vm230_vm0, %v3671_v52, 0 }
  0x2f   : >> { %3968 = vmatmul.mubr.msk.bf16.vlgmr.msra.gmra.mxu0 %vm226_vm2, %v616_v11  ;;  %v4554_v11 = vld [vmem:[%s4404_s13 + $0x14] ss:$0 sps:$4 sm:$0x11]   ;;  %v1534_v58 = vrot.slane %v1532_v47, 2  ;;  %v3683_v61 = vcombine.low %v3679_v53, %v3680_v54  ;;  %v4629_v5 = vld [vmem:[%s4404_s13 + $0x2bc] sm:$0xf] }
  0x30   : >> { %3978 = vmatpush3.bf16.msra.mxu0 %v745_v15  ;;  %3979 = vmatprep.mubr.msk.bf16.mxu0 %vm4322_vm1, %v4321_v4  ;;  %v1340_v15 = vshll.u32 %v3654_v9, 16  ;;  %v1271_v20 = vshll.u32 %v4554_v11, 16  ;;  %v1405_v43 = vrot.slane %v4554_v11, 1  ;;  %v3676_v6 = vld [vmem:[%s4950_s1 + $0x58] sm:$0xf] }
  0x31   : >> { %3974 = vmatmul.mubr.msk.bf16.vlgmr.msra.gmra.mxu1 %vm226_vm2, %v4251_v14  ;;  %3989 = vmatprep.subr.bf16.mxu0 %v4321_v4  ;;  %v4566_v14 = vld [vmem:[%s4404_s13 + $0xf8] ss:$0 sps:$4 sm:$0x11]   ;;  %v1665_v13 = vsel %vm230_vm0, %v3676_v6, 0 }
  0x32   : >> { %3984 = vmatpush3.bf16.msra.mxu1 %v819_v19  ;;  %3985 = vmatprep.mubr.msk.bf16.mxu1 %vm4322_vm1, %v4321_v4  ;;  %v1268_v19 = vrot.slane %v1266_v12, 1  ;;  %v1342_v24 = vrot.slane %v1340_v15, 1  ;;  %v1345_v25 = vshll.u32 %v4566_v14, 16  ;;  %v1273_v28 = vrot.slane %v1271_v20, 1  ;;  %v4269_v12 = vld [vmem:[%s4404_s13 + $0x1d4] sm:$0xff]  }
  0x33   : >> { %3995 = vmatprep.subr.bf16.mxu1 %v4321_v4  ;;  %v4277_v32 = vld [vmem:[%s4404_s13 + $0x1dc] ss:$0 sps:$4 sm:$0x33]  }
  0x34   : >> { %v1269_v27 = vor.u32 %v1268_v19, %v1264_v18  ;;  %v1343_v30 = vor.u32 %v1342_v24, %v1338_v23  ;;  %v4650_v18 = vld [vmem:[%s4404_s13 + $0x2c0] ss:$0 sps:$4 sm:$0x11]   ;;  %v3693_v23 = vld [vmem:[%s4404_s13 + $0x1d4] sm:$0xe]  ;;  %v4270_v24 = vld [vmem:[%s4404_s13 + $0x2b8] sm:$0xff]  }
  0x37   : >> { %3980 = vmatmul.mubr.msk.bf16.vlgmr.msra.gmra.mxu0 %vm226_vm2, %v4252_v26  ;;  %v1353_v26 = vsel %vm230_vm0, %v3653_v17, 0 }
  0x38   : >> { %3990 = vmatpush3.bf16.msra.mxu0 %v893_v31  ;;  %3991 = vmatprep.mubr.msk.bf16.mxu0 %vm4322_vm1, %v4321_v4  ;;  %v1347_v31 = vrot.slane %v1345_v25, 1  ;;  %v3694_v25 = vld [vmem:[%s4950_s1 + $0x64] sm:$0xf] }
  0x39   : >> { %3986 = vmatmul.mubr.msk.bf16.vlgmr.msra.gmra.mxu1 %vm226_vm2, %v814_v33  ;;  %4001 = vmatprep.subr.bf16.mxu0 %v4321_v4  ;;  %v3659_v33 = vcombine.low %v3657_v29, %v3644_v59 }
  0x3a   : >> { %3996 = vmatpush3.bf16.msra.mxu1 %v951_v35  ;;  %3997 = vmatprep.mubr.msk.bf16.mxu1 %vm4322_vm1, %v4321_v4  ;;  %v1274_v35 = vsel %vm340_vm3, %v1269_v27, %v1273_v28  ;;  %v1348_v39 = vsel %vm340_vm3, %v1343_v30, %v1347_v31  ;;  %v1805_v28 = vshll.u32 %v4650_v18, 16  ;;  %v3695_v30 = vcombine.low %v3693_v23, %v3680_v54 }
  0x3b   : >> { %4007 = vmatprep.subr.bf16.mxu1 %v4321_v4  ;;  %v1404_v42 = vrot.slane %v3659_v33, 1  ;;  %v1521_v44 = vshrl.u32 %v3659_v33, 16  ;;  %v1524_v45 = vshll.u32 %v3659_v33, 16  ;;  %v1871_v33 = vsel %vm230_vm0, %v3694_v25, 0 }
  0x3c   : >> { %v1864_v36 = vrot.slane %v3695_v30, 1  ;;  %v1981_v40 = vshrl.u32 %v3695_v30, 16 }
  0x3d   : >> { %v1406_v51 = vsel %vm482_vm4, %v1404_v42, %v1405_v43  ;;  %v1526_v56 = vrot.slane %v1524_v45, 2  ;;  %v1989_v42 = vshrl.u32 %v4277_v32, 16  ;;  %v1992_v43 = vshll.u32 %v4277_v32, 16  ;;  %v3702_v45 = vld [vmem:[%s4950_s1 + $0x6c] sm:$0xf] }
  0x3e   : >> { %v2001_v53 = vsel %vm230_vm0, %v3702_v45, 0  ;;  %v3733_v32 = vld [vmem:[%s4404_s13 + $0xfc] sm:$0xe] }
  0x3f   : >> { %3992 = vmatmul.mubr.msk.bf16.vlgmr.msra.gmra.mxu0 %vm226_vm2, %v888_v46  ;;  %v1529_v46 = vshrl.u32 %v4268_v37, 16  ;;  %v1994_v52 = vrot.slane %v1992_v43, 2 }
  0x40   : >> { %4002 = vmatpush3.bf16.msra.mxu0 %v1009_v50  ;;  %4003 = vmatprep.mubr.msk.bf16.mxu0 %vm4322_vm1, %v4321_v4  ;;  %v3666_v50 = vld [vmem:[%s4950_s1 + $0x50] sm:$0xf] }
  0x41   : >> { %3998 = vmatmul.mubr.msk.bf16.vlgmr.msra.gmra.mxu1 %vm226_vm2, %v946_v49  ;;  %4013 = vmatprep.subr.bf16.mxu0 %v4321_v4  ;;  %v1463_v49 = vrot.slane %v4566_v14, 1  ;;  %v1531_v57 = vrot.slane %v1529_v46, 1  ;;  %v1541_v59 = vsel %vm230_vm0, %v3666_v50, 0  ;;  %v1724_v14 = vshrl.u32 %v3683_v61, 16 }
  0x42   : >> { %4008 = vmatpush3.bf16.msra.mxu1 %v1081_v55  ;;  %4009 = vmatprep.mubr.msk.bf16.mxu1 %vm4322_vm1, %v4321_v4  ;;  %v1523_v55 = vrot.slane %v1521_v44, 1 }
  0x43   : >> { %4019 = vmatprep.subr.bf16.mxu1 %v4321_v4  ;;  %v1464_v60 = vsel %vm482_vm4, %v1462_v48, %v1463_v49  ;;  %v1535_v2 = vor.u32 %v1534_v58, %v1531_v57  ;;  %v1983_v49 = vrot.slane %v1981_v40, 1  ;;  %v3716_v57 = vld [vmem:[%s4404_s13 + $0x1c] sm:$0xf] }
  0x44   : >> { %v1527_v63 = vor.u32 %v1526_v56, %v1523_v55  ;;  %v1923_v55 = vrot.slane %v4650_v18, 1  ;;  %v3715_v56 = vld [vmem:[%s4404_s13 + $0x18] sm:$0xf] }
  0x46   : >> { %v1536_v9 = vsel %vm599_vm5, %v1527_v63, %v1535_v2  ;;  %v3712_v2 = vld [vmem:[%s4950_s1 + $0x74] sm:$0xf] }
  0x47   : >> { %4004 = vmatmul.mubr.msk.bf16.vlgmr.msra.gmra.mxu0 %vm226_vm2, %v1004_v3  ;;  %v3686_v3 = vld [vmem:[%s4404_s13 + $0x2b8] sm:$0xf] }
  0x48   : >> { %4014 = vmatpush3.bf16.msra.mxu0 %v1143_v7  ;;  %4015 = vmatprep.mubr.msk.bf16.mxu0 %vm4322_vm1, %v4321_v4  ;;  %v4272_v7 = vld [vmem:[%s4404_s13 + $0x1dc] ss:$0 sps:$4 sm:$0x11]   ;;  %v3690_v11 = vcombine.low %v3686_v3, %v4629_v5  ;;  %v3719_v3 = vcombine.low %v3715_v56, %v3716_v57 }
  0x49   : >> { %4010 = vmatmul.mubr.msk.bf16.vlgmr.msra.gmra.mxu1 %vm226_vm2, %v1076_v8  ;;  %4025 = vmatprep.subr.bf16.mxu0 %v4321_v4  ;;  %v1726_v8 = vshll.u32 %v3683_v61, 16  ;;  %v1865_v37 = vrot.slane %v4272_v7, 1  ;;  %v3722_v61 = vld [vmem:[%s4404_s13 + $0xfc] sm:$0xf] }
  0x4a   : >> { %4020 = vmatpush3.bf16.msra.mxu1 %v1205_v10  ;;  %4021 = vmatprep.mubr.msk.bf16.mxu1 %vm4322_vm1, %v4321_v4  ;;  %v3682_v10 = vld [vmem:[%s4950_s1 + $0x5c] sm:$0xf]  ;;  %v1800_v19 = vshll.u32 %v3690_v11, 16 }
  0x4b   : >> { %4031 = vmatprep.subr.bf16.mxu1 %v4321_v4  ;;  %v1728_v15 = vrot.slane %v1726_v8, 1  ;;  %v1739_v17 = vsel %vm230_vm0, %v3682_v10, 0  ;;  %v1866_v47 = vsel %vm482_vm4, %v1864_v36, %v1865_v37  ;;  %v2125_v8 = vsel %vm230_vm0, %v3712_v2, 0  ;;  %v4789_v2 = vld [vmem:[%s4404_s13 + $0x2c8] sm:$0xf] }
  0x4c   : >> { %v1802_v27 = vrot.slane %v1800_v19, 1  ;;  %v2186_v10 = vshll.u32 %v3719_v3, 16  ;;  %v4279_v19 = vld [vmem:[%s4404_s13 + $0xfc] sm:$0xff]  }
  0x4d   : >> { %v1729_v20 = vor.u32 %v1728_v15, %v1724_v14  ;;  %v4278_v14 = vld [vmem:[%s4404_s13 + $0x18] sm:$0xff]  }
  0x4e   : >> { %v3725_v15 = vld [vmem:[%s4950_s1 + $0x7c] sm:$0xf] }
  0x4f   : >> { %4016 = vmatmul.mubr.msk.bf16.vlgmr.msra.gmra.mxu0 %vm226_vm2, %v4260_v16  ;;  %v1731_v16 = vshll.u32 %v4272_v7, 16 }
  0x50   : >> { %4026 = vmatpush3.bf16.msra.mxu0 %v1279_v22  ;;  %4027 = vmatprep.mubr.msk.bf16.mxu0 %vm4322_vm1, %v4321_v4  ;;  %v3689_v22 = vld [vmem:[%s4950_s1 + $0x60] sm:$0xf] }
  0x51   : >> { %4022 = vmatmul.mubr.msk.bf16.vlgmr.msra.gmra.mxu1 %vm226_vm2, %v4261_v21  ;;  %4037 = vmatprep.subr.bf16.mxu0 %v4321_v4  ;;  %v1733_v21 = vrot.slane %v1731_v16, 1  ;;  %v1813_v29 = vsel %vm230_vm0, %v3689_v22, 0  ;;  %v2184_v16 = vshrl.u32 %v3719_v3, 16  ;;  %v3748_v3 = vld [vmem:[%s4950_s1 + $0x90] sm:$0xf] }
  0x52   : >> { %4032 = vmatpush3.bf16.msra.mxu1 %v1353_v26  ;;  %4033 = vmatprep.mubr.msk.bf16.mxu1 %vm4322_vm1, %v4321_v4  ;;  %v1798_v26 = vshrl.u32 %v3690_v11, 16  ;;  %v3718_v11 = vld [vmem:[%s4950_s1 + $0x78] sm:$0xf] }
  0x53   : >> { %4043 = vmatprep.subr.bf16.mxu1 %v4321_v4  ;;  %v1734_v31 = vsel %vm340_vm3, %v1729_v20, %v1733_v21  ;;  %v2199_v20 = vsel %vm230_vm0, %v3718_v11, 0  ;;  %v2585_v11 = vsel %vm230_vm0, %v3748_v3, 0 }
  0x54   : >> { %v1803_v34 = vor.u32 %v1802_v27, %v1798_v26  ;;  %v3729_v27 = vld [vmem:[%s4404_s13 + $0x18] sm:$0xe] }
  0x57   : >> { %4028 = vmatmul.mubr.msk.bf16.vlgmr.msra.gmra.mxu0 %vm226_vm2, %v1274_v35  ;;  %v1807_v35 = vrot.slane %v1805_v28, 1 }
  0x58   : >> { %4038 = vmatpush3.bf16.msra.mxu0 %v1411_v38  ;;  %4039 = vmatprep.mubr.msk.bf16.mxu0 %vm4322_vm1, %v4321_v4  ;;  %v3697_v38 = vld [vmem:[%s4404_s13 + $0x2b8] sm:$0xe] }
  0x59   : >> { %4034 = vmatmul.mubr.msk.bf16.vlgmr.msra.gmra.mxu1 %vm226_vm2, %v1348_v39  ;;  %4049 = vmatprep.subr.bf16.mxu0 %v4321_v4  ;;  %v3698_v39 = vld [vmem:[%s4950_s1 + $0x68] sm:$0xf]  ;;  %v1808_v44 = vsel %vm340_vm3, %v1803_v34, %v1807_v35  ;;  %v3699_v46 = vcombine.low %v3697_v38, %v4629_v5  ;;  %v3734_v34 = vld [vmem:[%s4950_s1 + $0x84] sm:$0xf] }
  0x5a   : >> { %4044 = vmatpush3.bf16.msra.mxu1 %v1469_v41  ;;  %4045 = vmatprep.mubr.msk.bf16.mxu1 %vm4322_vm1, %v4321_v4  ;;  %v1984_v41 = vshll.u32 %v3695_v30, 16  ;;  %v1929_v48 = vsel %vm230_vm0, %v3698_v39, 0  ;;  %v3730_v30 = vld [vmem:[%s4950_s1 + $0x80] sm:$0xf]  ;;  %v2389_v39 = vsel %vm230_vm0, %v3734_v34, 0 }
  0x5b   : >> { %4055 = vmatprep.subr.bf16.mxu1 %v4321_v4  ;;  %v1922_v54 = vrot.slane %v3699_v46, 1  ;;  %v4286_v35 = vld [vmem:[%s4404_s13 + $0x20] ss:$0 sps:$4 sm:$0x33]   ;;  %v2331_v36 = vsel %vm230_vm0, %v3730_v30, 0 }
  0x5c   : >> { %v1986_v50 = vrot.slane %v1984_v41, 2  ;;  %v2452_v45 = vshll.u32 %v4286_v35, 16  ;;  %v4295_v30 = vld [vmem:[%s4404_s13 + $0x1e8] ss:$0 sps:$4 sm:$0x33]  }
  0x5d   : >> { %v1924_v63 = vsel %vm482_vm4, %v1922_v54, %v1923_v55 }
  0x5e   : >> { %v1987_v58 = vor.u32 %v1986_v50, %v1983_v49  ;;  %v3751_v50 = vld [vmem:[%s4404_s13 + $0x1e0] sm:$0xf]  ;;  %v2454_v56 = vrot.slane %v2452_v45, 2 }
  0x5f   : >> { %4040 = vmatmul.mubr.msk.bf16.vlgmr.msra.gmra.mxu0 %vm226_vm2, %v1406_v51  ;;  %v1991_v51 = vrot.slane %v1989_v42, 1 }
  0x60   : >> { %4050 = vmatpush3.bf16.msra.mxu0 %v1541_v59  ;;  %4051 = vmatprep.mubr.msk.bf16.mxu0 %vm4322_vm1, %v4321_v4 }
  0x61   : >> { %4046 = vmatmul.mubr.msk.bf16.vlgmr.msra.gmra.mxu1 %vm226_vm2, %v1464_v60  ;;  %4061 = vmatprep.subr.bf16.mxu0 %v4321_v4  ;;  %v1995_v59 = vor.u32 %v1994_v52, %v1991_v51  ;;  %v3707_v60 = vld [vmem:[%s4950_s1 + $0x70] sm:$0xf]  ;;  %v3752_v51 = vld [vmem:[%s4404_s13 + $0x1e4] sm:$0xf]  ;;  %v3743_v52 = vld [vmem:[%s4950_s1 + $0x8c] sm:$0xf] }
  0x62   : >> { %4056 = vmatpush3.bf16.msra.mxu1 %v1603_v62  ;;  %4057 = vmatprep.mubr.msk.bf16.mxu1 %vm4322_vm1, %v4321_v4  ;;  %v4706_v62 = vld [vmem:[%s4404_s13 + $0x100] sm:$0xf]  ;;  %v2063_v5 = vsel %vm230_vm0, %v3707_v60, 0  ;;  %v2523_v60 = vsel %vm230_vm0, %v3743_v52, 0 }
  0x63   : >> { %4067 = vmatprep.subr.bf16.mxu1 %v4321_v4  ;;  %v1996_v6 = vsel %vm599_vm5, %v1987_v58, %v1995_v59  ;;  %v3726_v7 = vcombine.low %v3722_v61, %v4706_v62  ;;  %v3735_v38 = vcombine.low %v3733_v32, %v4706_v62  ;;  %v3755_v59 = vcombine.low %v3751_v50, %v3752_v51 }
  0x65   : >> { %v2258_v21 = vshrl.u32 %v3726_v7, 16  ;;  %v2382_v46 = vrot.slane %v3735_v38, 1 }
  0x67   : >> { %4052 = vmatmul.mubr.msk.bf16.vlgmr.msra.gmra.mxu0 %vm226_vm2, %v1536_v9  ;;  %v4281_v9 = vld [vmem:[%s4404_s13 + $0x20] ss:$0 sps:$4 sm:$0x11]  }
  0x68   : >> { %4062 = vmatpush3.bf16.msra.mxu0 %v1665_v13  ;;  %4063 = vmatprep.mubr.msk.bf16.mxu0 %vm4322_vm1, %v4321_v4  ;;  %v2260_v13 = vshll.u32 %v3726_v7, 16  ;;  %v2191_v18 = vshll.u32 %v4281_v9, 16  ;;  %v2325_v41 = vrot.slane %v4281_v9, 1 }
  0x69   : >> { %4058 = vmatmul.mubr.msk.bf16.vlgmr.msra.gmra.mxu1 %vm226_vm2, %v4269_v12  ;;  %4073 = vmatprep.subr.bf16.mxu0 %v4321_v4  ;;  %v4728_v12 = vld [vmem:[%s4404_s13 + $0x104] ss:$0 sps:$4 sm:$0x11]  }
  0x6a   : >> { %4068 = vmatpush3.bf16.msra.mxu1 %v1739_v17  ;;  %4069 = vmatprep.mubr.msk.bf16.mxu1 %vm4322_vm1, %v4321_v4  ;;  %v2188_v17 = vrot.slane %v2186_v10, 1  ;;  %v2262_v22 = vrot.slane %v2260_v13, 1  ;;  %v2265_v23 = vshll.u32 %v4728_v12, 16  ;;  %v2193_v26 = vrot.slane %v2191_v18, 1  ;;  %v4287_v10 = vld [vmem:[%s4404_s13 + $0x1e0] sm:$0xff]  }
  0x6b   : >> { %4079 = vmatprep.subr.bf16.mxu1 %v4321_v4 }
  0x6c   : >> { %v2189_v25 = vor.u32 %v2188_v17, %v2184_v16  ;;  %v2263_v28 = vor.u32 %v2262_v22, %v2258_v21  ;;  %v4810_v16 = vld [vmem:[%s4404_s13 + $0x2cc] ss:$0 sps:$4 sm:$0x11]   ;;  %v3765_v21 = vld [vmem:[%s4404_s13 + $0x1e0] sm:$0xe]  ;;  %v4288_v22 = vld [vmem:[%s4404_s13 + $0x2c4] sm:$0xff]  }
  0x6f   : >> { %4064 = vmatmul.mubr.msk.bf16.vlgmr.msra.gmra.mxu0 %vm226_vm2, %v4270_v24  ;;  %v2273_v24 = vsel %vm230_vm0, %v3725_v15, 0 }
  0x70   : >> { %4074 = vmatpush3.bf16.msra.mxu0 %v1813_v29  ;;  %4075 = vmatprep.mubr.msk.bf16.mxu0 %vm4322_vm1, %v4321_v4  ;;  %v2267_v29 = vrot.slane %v2265_v23, 1  ;;  %v3766_v23 = vld [vmem:[%s4950_s1 + $0x9c] sm:$0xf] }
  0x71   : >> { %4070 = vmatmul.mubr.msk.bf16.vlgmr.msra.gmra.mxu1 %vm226_vm2, %v1734_v31  ;;  %4085 = vmatprep.subr.bf16.mxu0 %v4321_v4  ;;  %v3731_v31 = vcombine.low %v3729_v27, %v3716_v57 }
  0x72   : >> { %4080 = vmatpush3.bf16.msra.mxu1 %v1871_v33  ;;  %4081 = vmatprep.mubr.msk.bf16.mxu1 %vm4322_vm1, %v4321_v4  ;;  %v2194_v33 = vsel %vm340_vm3, %v2189_v25, %v2193_v26  ;;  %v2268_v37 = vsel %vm340_vm3, %v2263_v28, %v2267_v29  ;;  %v2725_v26 = vshll.u32 %v4810_v16, 16  ;;  %v3767_v28 = vcombine.low %v3765_v21, %v3752_v51 }
  0x73   : >> { %4091 = vmatprep.subr.bf16.mxu1 %v4321_v4  ;;  %v2324_v40 = vrot.slane %v3731_v31, 1  ;;  %v2441_v42 = vshrl.u32 %v3731_v31, 16  ;;  %v2444_v43 = vshll.u32 %v3731_v31, 16  ;;  %v2791_v31 = vsel %vm230_vm0, %v3766_v23, 0 }
  0x74   : >> { %v2784_v34 = vrot.slane %v3767_v28, 1  ;;  %v2901_v38 = vshrl.u32 %v3767_v28, 16 }
  0x75   : >> { %v2326_v49 = vsel %vm482_vm4, %v2324_v40, %v2325_v41  ;;  %v2446_v54 = vrot.slane %v2444_v43, 2  ;;  %v2909_v40 = vshrl.u32 %v4295_v30, 16  ;;  %v2912_v41 = vshll.u32 %v4295_v30, 16  ;;  %v3774_v43 = vld [vmem:[%s4950_s1 + $0xa4] sm:$0xf] }
  0x76   : >> { %v2921_v51 = vsel %vm230_vm0, %v3774_v43, 0  ;;  %v3805_v30 = vld [vmem:[%s4404_s13 + $0x108] sm:$0xe] }
  0x77   : >> { %4076 = vmatmul.mubr.msk.bf16.vlgmr.msra.gmra.mxu0 %vm226_vm2, %v1808_v44  ;;  %v2449_v44 = vshrl.u32 %v4286_v35, 16  ;;  %v2914_v50 = vrot.slane %v2912_v41, 2 }
  0x78   : >> { %4086 = vmatpush3.bf16.msra.mxu0 %v1929_v48  ;;  %4087 = vmatprep.mubr.msk.bf16.mxu0 %vm4322_vm1, %v4321_v4  ;;  %v3738_v48 = vld [vmem:[%s4950_s1 + $0x88] sm:$0xf] }
  0x79   : >> { %4082 = vmatmul.mubr.msk.bf16.vlgmr.msra.gmra.mxu1 %vm226_vm2, %v1866_v47  ;;  %4097 = vmatprep.subr.bf16.mxu0 %v4321_v4  ;;  %v2383_v47 = vrot.slane %v4728_v12, 1  ;;  %v2451_v55 = vrot.slane %v2449_v44, 1  ;;  %v2461_v57 = vsel %vm230_vm0, %v3738_v48, 0  ;;  %v2644_v12 = vshrl.u32 %v3755_v59, 16 }
  0x7a   : >> { %4092 = vmatpush3.bf16.msra.mxu1 %v2001_v53  ;;  %4093 = vmatprep.mubr.msk.bf16.mxu1 %vm4322_vm1, %v4321_v4  ;;  %v2443_v53 = vrot.slane %v2441_v42, 1 }
  0x7b   : >> { %4103 = vmatprep.subr.bf16.mxu1 %v4321_v4  ;;  %v2384_v58 = vsel %vm482_vm4, %v2382_v46, %v2383_v47  ;;  %v2455_v62 = vor.u32 %v2454_v56, %v2451_v55  ;;  %v2903_v47 = vrot.slane %v2901_v38, 1  ;;  %v3788_v55 = vld [vmem:[%s4404_s13 + $0x28] sm:$0xf] }
  0x7c   : >> { %v2447_v61 = vor.u32 %v2446_v54, %v2443_v53  ;;  %v2843_v53 = vrot.slane %v4810_v16, 1  ;;  %v3787_v54 = vld [vmem:[%s4404_s13 + $0x24] sm:$0xf] }
  0x7e   : >> { %v2456_v7 = vsel %vm599_vm5, %v2447_v61, %v2455_v62  ;;  %v3784_v62 = vld [vmem:[%s4950_s1 + $0xac] sm:$0xf] }
  0x7f   : >> { %4088 = vmatmul.mubr.msk.bf16.vlgmr.msra.gmra.mxu0 %vm226_vm2, %v1924_v63  ;;  %v3758_v63 = vld [vmem:[%s4404_s13 + $0x2c4] sm:$0xf] }
  0x80   : >> { %4098 = vmatpush3.bf16.msra.mxu0 %v2063_v5  ;;  %4099 = vmatprep.mubr.msk.bf16.mxu0 %vm4322_vm1, %v4321_v4  ;;  %v4290_v5 = vld [vmem:[%s4404_s13 + $0x1e8] ss:$0 sps:$4 sm:$0x11]   ;;  %v3762_v9 = vcombine.low %v3758_v63, %v4789_v2  ;;  %v3791_v63 = vcombine.low %v3787_v54, %v3788_v55 }
  0x81   : >> { %4094 = vmatmul.mubr.msk.bf16.vlgmr.msra.gmra.mxu1 %vm226_vm2, %v1996_v6  ;;  %4109 = vmatprep.subr.bf16.mxu0 %v4321_v4  ;;  %v2646_v6 = vshll.u32 %v3755_v59, 16  ;;  %v2785_v35 = vrot.slane %v4290_v5, 1  ;;  %v3794_v59 = vld [vmem:[%s4404_s13 + $0x108] sm:$0xf] }
  0x82   : >> { %4104 = vmatpush3.bf16.msra.mxu1 %v2125_v8  ;;  %4105 = vmatprep.mubr.msk.bf16.mxu1 %vm4322_vm1, %v4321_v4  ;;  %v3754_v8 = vld [vmem:[%s4950_s1 + $0x94] sm:$0xf]  ;;  %v2720_v17 = vshll.u32 %v3762_v9, 16 }
  0x83   : >> { %4115 = vmatprep.subr.bf16.mxu1 %v4321_v4  ;;  %v2648_v13 = vrot.slane %v2646_v6, 1  ;;  %v2659_v15 = vsel %vm230_vm0, %v3754_v8, 0  ;;  %v2786_v45 = vsel %vm482_vm4, %v2784_v34, %v2785_v35  ;;  %v3045_v6 = vsel %vm230_vm0, %v3784_v62, 0 }
  0x84   : >> { %v2722_v25 = vrot.slane %v2720_v17, 1  ;;  %v3106_v8 = vshll.u32 %v3791_v63, 16  ;;  %v4297_v17 = vld [vmem:[%s4404_s13 + $0x108] sm:$0xff]  }
  0x85   : >> { %v2649_v18 = vor.u32 %v2648_v13, %v2644_v12  ;;  %v4296_v12 = vld [vmem:[%s4404_s13 + $0x24] sm:$0xff]   ;;  %v3797_v13 = vld [vmem:[%s4950_s1 + $0xb4] sm:$0xf] }
  0x87   : >> { %4100 = vmatmul.mubr.msk.bf16.vlgmr.msra.gmra.mxu0 %vm226_vm2, %v4278_v14  ;;  %v2651_v14 = vshll.u32 %v4290_v5, 16 }
  0x88   : >> { %4110 = vmatpush3.bf16.msra.mxu0 %v2199_v20  ;;  %4111 = vmatprep.mubr.msk.bf16.mxu0 %vm4322_vm1, %v4321_v4  ;;  %v3761_v20 = vld [vmem:[%s4950_s1 + $0x98] sm:$0xf] }
  0x89   : >> { %4106 = vmatmul.mubr.msk.bf16.vlgmr.msra.gmra.mxu1 %vm226_vm2, %v4279_v19  ;;  %4121 = vmatprep.subr.bf16.mxu0 %v4321_v4  ;;  %v2653_v19 = vrot.slane %v2651_v14, 1  ;;  %v2733_v27 = vsel %vm230_vm0, %v3761_v20, 0  ;;  %v3104_v14 = vshrl.u32 %v3791_v63, 16 }
  0x8a   : >> { %4116 = vmatpush3.bf16.msra.mxu1 %v2273_v24  ;;  %4117 = vmatprep.mubr.msk.bf16.mxu1 %vm4322_vm1, %v4321_v4  ;;  %v2718_v24 = vshrl.u32 %v3762_v9, 16  ;;  %v3790_v9 = vld [vmem:[%s4950_s1 + $0xb0] sm:$0xf] }
  0x8b   : >> { %4127 = vmatprep.subr.bf16.mxu1 %v4321_v4  ;;  %v2654_v29 = vsel %vm340_vm3, %v2649_v18, %v2653_v19  ;;  %v3119_v18 = vsel %vm230_vm0, %v3790_v9, 0 }
  0x8c   : >> { %v2723_v32 = vor.u32 %v2722_v25, %v2718_v24  ;;  %v3801_v25 = vld [vmem:[%s4404_s13 + $0x24] sm:$0xe] }
  0x8f   : >> { %4112 = vmatmul.mubr.msk.bf16.vlgmr.msra.gmra.mxu0 %vm226_vm2, %v2194_v33  ;;  %v2727_v33 = vrot.slane %v2725_v26, 1 }
  0x90   : >> { %4122 = vmatpush3.bf16.msra.mxu0 %v2331_v36  ;;  %4123 = vmatprep.mubr.msk.bf16.mxu0 %vm4322_vm1, %v4321_v4  ;;  %v3769_v36 = vld [vmem:[%s4404_s13 + $0x2c4] sm:$0xe] }
  0x91   : >> { %4118 = vmatmul.mubr.msk.bf16.vlgmr.msra.gmra.mxu1 %vm226_vm2, %v2268_v37  ;;  %4133 = vmatprep.subr.bf16.mxu0 %v4321_v4  ;;  %v3770_v37 = vld [vmem:[%s4950_s1 + $0xa0] sm:$0xf]  ;;  %v2728_v42 = vsel %vm340_vm3, %v2723_v32, %v2727_v33  ;;  %v3771_v44 = vcombine.low %v3769_v36, %v4789_v2  ;;  %v3806_v32 = vld [vmem:[%s4950_s1 + $0xbc] sm:$0xf] }
  0x92   : >> { %4128 = vmatpush3.bf16.msra.mxu1 %v2389_v39  ;;  %4129 = vmatprep.mubr.msk.bf16.mxu1 %vm4322_vm1, %v4321_v4  ;;  %v2904_v39 = vshll.u32 %v3767_v28, 16  ;;  %v2849_v46 = vsel %vm230_vm0, %v3770_v37, 0  ;;  %v3802_v28 = vld [vmem:[%s4950_s1 + $0xb8] sm:$0xf]  ;;  %v3309_v37 = vsel %vm230_vm0, %v3806_v32, 0 }
  0x93   : >> { %4139 = vmatprep.subr.bf16.mxu1 %v4321_v4  ;;  %v2842_v52 = vrot.slane %v3771_v44, 1  ;;  %v4304_v33 = vld [vmem:[%s4404_s13 + $0x2c] ss:$0 sps:$4 sm:$0x33]   ;;  %v3251_v34 = vsel %vm230_vm0, %v3802_v28, 0 }
  0x94   : >> { %v2906_v48 = vrot.slane %v2904_v39, 2  ;;  %v3372_v43 = vshll.u32 %v4304_v33, 16 }
  0x95   : >> { %v2844_v61 = vsel %vm482_vm4, %v2842_v52, %v2843_v53 }
  0x96   : >> { %v2907_v56 = vor.u32 %v2906_v48, %v2903_v47 }
  0x97   : >> { %4124 = vmatmul.mubr.msk.bf16.vlgmr.msra.gmra.mxu0 %vm226_vm2, %v2326_v49  ;;  %v2911_v49 = vrot.slane %v2909_v40, 1 }
  0x98   : >> { %4134 = vmatpush3.bf16.msra.mxu0 %v2461_v57  ;;  %4135 = vmatprep.mubr.msk.bf16.mxu0 %vm4322_vm1, %v4321_v4 }
  0x99   : >> { %4130 = vmatmul.mubr.msk.bf16.vlgmr.msra.gmra.mxu1 %vm226_vm2, %v2384_v58  ;;  %4145 = vmatprep.subr.bf16.mxu0 %v4321_v4  ;;  %v2915_v57 = vor.u32 %v2914_v50, %v2911_v49  ;;  %v3779_v58 = vld [vmem:[%s4950_s1 + $0xa8] sm:$0xf] }
  0x9a   : >> { %4140 = vmatpush3.bf16.msra.mxu1 %v2523_v60  ;;  %4141 = vmatprep.mubr.msk.bf16.mxu1 %vm4322_vm1, %v4321_v4  ;;  %v4866_v60 = vld [vmem:[%s4404_s13 + $0x10c] sm:$0xf]  ;;  %v2983_v2 = vsel %vm230_vm0, %v3779_v58, 0 }
  0x9b   : >> { %4151 = vmatprep.subr.bf16.mxu1 %v4321_v4  ;;  %v2916_v3 = vsel %vm599_vm5, %v2907_v56, %v2915_v57  ;;  %v3798_v5 = vcombine.low %v3794_v59, %v4866_v60  ;;  %v3807_v36 = vcombine.low %v3805_v30, %v4866_v60 }
  0x9d   : >> { %v3178_v19 = vshrl.u32 %v3798_v5, 16  ;;  %v3302_v44 = vrot.slane %v3807_v36, 1 }
  0x9f   : >> { %4136 = vmatmul.mubr.msk.bf16.vlgmr.msra.gmra.mxu0 %vm226_vm2, %v2456_v7  ;;  %v4299_v7 = vld [vmem:[%s4404_s13 + $0x2c] ss:$0 sps:$4 sm:$0x11]  }
  0xa0   : >> { %4146 = vmatpush3.bf16.msra.mxu0 %v2585_v11  ;;  %4147 = vmatprep.mubr.msk.bf16.mxu0 %vm4322_vm1, %v4321_v4  ;;  %v3180_v11 = vshll.u32 %v3798_v5, 16  ;;  %v3111_v16 = vshll.u32 %v4299_v7, 16  ;;  %v3245_v39 = vrot.slane %v4299_v7, 1 }
  0xa1   : >> { %4142 = vmatmul.mubr.msk.bf16.vlgmr.msra.gmra.mxu1 %vm226_vm2, %v4287_v10  ;;  %4157 = vmatprep.subr.bf16.mxu0 %v4321_v4  ;;  %v4301_v10 = vld [vmem:[%s4404_s13 + $0x110] ss:$0 sps:$4 sm:$0x11]  }
  0xa2   : >> { %4152 = vmatpush3.bf16.msra.mxu1 %v2659_v15  ;;  %4153 = vmatprep.mubr.msk.bf16.mxu1 %vm4322_vm1, %v4321_v4  ;;  %v3108_v15 = vrot.slane %v3106_v8, 1  ;;  %v3182_v20 = vrot.slane %v3180_v11, 1  ;;  %v3185_v21 = vshll.u32 %v4301_v10, 16  ;;  %v3113_v24 = vrot.slane %v3111_v16, 1 }
  0xa3   : >> { %4163 = vmatprep.subr.bf16.mxu1 %v4321_v4 }
  0xa4   : >> { %v3109_v23 = vor.u32 %v3108_v15, %v3104_v14  ;;  %v3183_v26 = vor.u32 %v3182_v20, %v3178_v19 }
  0xa7   : >> { %4148 = vmatmul.mubr.msk.bf16.vlgmr.msra.gmra.mxu0 %vm226_vm2, %v4288_v22  ;;  %v3193_v22 = vsel %vm230_vm0, %v3797_v13, 0 }
  0xa8   : >> { %4158 = vmatpush3.bf16.msra.mxu0 %v2733_v27  ;;  %4159 = vmatprep.mubr.msk.bf16.mxu0 %vm4322_vm1, %v4321_v4  ;;  %v3187_v27 = vrot.slane %v3185_v21, 1 }
  0xa9   : >> { %4154 = vmatmul.mubr.msk.bf16.vlgmr.msra.gmra.mxu1 %vm226_vm2, %v2654_v29  ;;  %4169 = vmatprep.subr.bf16.mxu0 %v4321_v4  ;;  %v3803_v29 = vcombine.low %v3801_v25, %v3788_v55 }
  0xaa   : >> { %4164 = vmatpush3.bf16.msra.mxu1 %v2791_v31  ;;  %4165 = vmatprep.mubr.msk.bf16.mxu1 %vm4322_vm1, %v4321_v4  ;;  %v3114_v31 = vsel %vm340_vm3, %v3109_v23, %v3113_v24  ;;  %v3188_v35 = vsel %vm340_vm3, %v3183_v26, %v3187_v27 }
  0xab   : >> { %4175 = vmatprep.subr.bf16.mxu1 %v4321_v4  ;;  %v3244_v38 = vrot.slane %v3803_v29, 1  ;;  %v3361_v40 = vshrl.u32 %v3803_v29, 16  ;;  %v3364_v41 = vshll.u32 %v3803_v29, 16 }
  0xad   : >> { %v3246_v47 = vsel %vm482_vm4, %v3244_v38, %v3245_v39  ;;  %v3363_v48 = vrot.slane %v3361_v40, 1  ;;  %v3366_v49 = vrot.slane %v3364_v41, 2 }
  0xaf   : >> { %4160 = vmatmul.mubr.msk.bf16.vlgmr.msra.gmra.mxu0 %vm226_vm2, %v2728_v42  ;;  %v3369_v42 = vshrl.u32 %v4304_v33, 16  ;;  %v3367_v54 = vor.u32 %v3366_v49, %v3363_v48 }
  0xb0   : >> { %4170 = vmatpush3.bf16.msra.mxu0 %v2849_v46  ;;  %4171 = vmatprep.mubr.msk.bf16.mxu0 %vm4322_vm1, %v4321_v4  ;;  %v3810_v46 = vld [vmem:[%s4950_s1 + $0xc0] sm:$0xf] }
  0xb1   : >> { %4166 = vmatmul.mubr.msk.bf16.vlgmr.msra.gmra.mxu1 %vm226_vm2, %v2786_v45  ;;  %4181 = vmatprep.subr.bf16.mxu0 %v4321_v4  ;;  %v3303_v45 = vrot.slane %v4301_v10, 1  ;;  %v3371_v50 = vrot.slane %v3369_v42, 1  ;;  %v3381_v52 = vsel %vm230_vm0, %v3810_v46, 0 }
  0xb2   : >> { %4176 = vmatpush3.bf16.msra.mxu1 %v2921_v51  ;;  %4177 = vmatprep.mubr.msk.bf16.mxu1 %vm4322_vm1, %v4321_v4  ;;  %v3374_v51 = vrot.slane %v3372_v43, 2 }
  0xb3   : >> { %4187 = vmatprep.subr.bf16.mxu1 %v4321_v4  ;;  %v3304_v53 = vsel %vm482_vm4, %v3302_v44, %v3303_v45 }
  0xb4   : >> { %v3375_v55 = vor.u32 %v3374_v51, %v3371_v50 }
  0xb6   : >> { %v3376_v56 = vsel %vm599_vm5, %v3367_v54, %v3375_v55 }
  0xb7   : >> { %4172 = vmatmul.mubr.msk.bf16.vlgmr.msra.gmra.mxu0 %vm226_vm2, %v2844_v61 }
  0xb8   : >> { %4182 = vmatpush3.bf16.msra.mxu0 %v2983_v2  ;;  %4183 = vmatprep.mubr.msk.bf16.mxu0 %vm4322_vm1, %v4321_v4 }
  0xb9   : >> { %4178 = vmatmul.mubr.msk.bf16.vlgmr.msra.gmra.mxu1 %vm226_vm2, %v2916_v3  ;;  %4193 = vmatprep.subr.bf16.mxu0 %v4321_v4 }
  0xba   : >> { %4188 = vmatpush3.bf16.msra.mxu1 %v3045_v6  ;;  %4189 = vmatprep.mubr.msk.bf16.mxu1 %vm4322_vm1, %v4321_v4 }
  0xbb   : >> { %4199 = vmatprep.subr.bf16.mxu1 %v4321_v4 }
  0xbf   : >> { %4184 = vmatmul.mubr.msk.bf16.vlgmr.msra.gmra.mxu0 %vm226_vm2, %v4296_v12 }
  0xc0   : >> { %4194 = vmatpush3.bf16.msra.mxu0 %v3119_v18  ;;  %4195 = vmatprep.mubr.msk.bf16.mxu0 %vm4322_vm1, %v4321_v4 }
  0xc1   : >> { %4190 = vmatmul.mubr.msk.bf16.vlgmr.msra.gmra.mxu1 %vm226_vm2, %v4297_v17  ;;  %4205 = vmatprep.subr.bf16.mxu0 %v4321_v4 }
  0xc2   : >> { %4200 = vmatpush3.bf16.msra.mxu1 %v3193_v22  ;;  %4201 = vmatprep.mubr.msk.bf16.mxu1 %vm4322_vm1, %v4321_v4 }
  0xc3   : >> { %4211 = vmatprep.subr.bf16.mxu1 %v4321_v4 }
  0xc7   : >> { %4196 = vmatmul.mubr.msk.bf16.vlgmr.msra.gmra.mxu0 %vm226_vm2, %v3114_v31 }
  0xc8   : >> { %4206 = vmatpush3.bf16.msra.mxu0 %v3251_v34  ;;  %4207 = vmatprep.mubr.msk.bf16.mxu0 %vm4322_vm1, %v4321_v4 }
  0xc9   : >> { %4202 = vmatmul.mubr.msk.bf16.vlgmr.msra.gmra.mxu1 %vm226_vm2, %v3188_v35  ;;  %4217 = vmatprep.subr.bf16.mxu0 %v4321_v4 }
  0xca   : >> { %4212 = vmatpush3.bf16.msra.mxu1 %v3309_v37  ;;  %4213 = vmatprep.mubr.msk.bf16.mxu1 %vm4322_vm1, %v4321_v4 }
  0xcf   : >> { %4208 = vmatmul.mubr.msk.bf16.vlgmr.msra.gmra.mxu0 %vm226_vm2, %v3246_v47 }
  0xd0   : >> { %4218 = vmatpush3.bf16.msra.mxu0 %v3381_v52  ;;  %4219 = vmatprep.mubr.msk.bf16.mxu0 %vm4322_vm1, %v4321_v4 }
  0xd1   : >> { %4214 = vmatmul.mubr.msk.bf16.vlgmr.msra.gmra.mxu1 %vm226_vm2, %v3304_v53 }
  0xd4   : >> { %v268_v57 = vpop.f32.mrf.mxu0 }
  0xd5   : >> { %v320_v58 = vpop.f32.mrf.mxu1 }
  0xd6   : >> { %v321_v59 = vadd.f32 %v320_v58, %v268_v57  ;;  %v3933_v60 = vpop.f32.mrf.mxu0 }
  0xd7   : >> { %4220 = vmatmul.mubr.msk.bf16.vlgmr.msra.gmra.mxu0 %vm226_vm2, %v3376_v56  ;;  %v3939_v61 = vpop.f32.mrf.mxu1 }
  0xd8   : >> { %v271_v62 = vpop.f32.mrf.mxu0 }
  0xd9   : >> { %v323_v63 = vpop.f32.mrf.mxu1 }
  0xda   : >> { %v324_v2 = vadd.f32 %v323_v63, %v271_v62  ;;  %v3934_v3 = vpop.f32.mrf.mxu0 }
  0xdb   : >> { %v3940_v5 = vpop.f32.mrf.mxu1 }
  0xdf   : >> { %v393_v6 = vpop.f32.mrf.mxu0 }
  0xe0   : >> { %v400_v4 = vadd.f32 %v393_v6, %v321_v59 }
  0xe1   : >> { %v467_v7 = vpop.f32.mrf.mxu1  ;;  %v3945_v8 = vpop.f32.mrf.mxu0 }
  0xe2   : >> { %v474_v9 = vadd.f32 %v467_v7, %v400_v4 }
  0xe3   : >> { %v3951_v10 = vpop.f32.mrf.mxu1  ;;  %v396_v11 = vpop.f32.mrf.mxu0 }
  0xe4   : >> { %v401_v12 = vadd.f32 %v396_v11, %v324_v2 }
  0xe5   : >> { %v470_v13 = vpop.f32.mrf.mxu1  ;;  %v3946_v14 = vpop.f32.mrf.mxu0 }
  0xe6   : >> { %v475_v15 = vadd.f32 %v470_v13, %v401_v12 }
  0xe7   : >> { %v3952_v16 = vpop.f32.mrf.mxu1  ;;  %v526_v17 = vpop.f32.mrf.mxu0 }
  0xe8   : >> { %v533_v18 = vadd.f32 %v526_v17, %v474_v9 }
  0xe9   : >> { %v584_v19 = vpop.f32.mrf.mxu1  ;;  %v3957_v20 = vpop.f32.mrf.mxu0 }
  0xea   : >> { %v591_v21 = vadd.f32 %v584_v19, %v533_v18 }
  0xeb   : >> { %v3963_v22 = vpop.f32.mrf.mxu1  ;;  %v529_v23 = vpop.f32.mrf.mxu0 }
  0xec   : >> { %v534_v24 = vadd.f32 %v529_v23, %v475_v15 }
  0xed   : >> { %v587_v25 = vpop.f32.mrf.mxu1  ;;  %v3958_v26 = vpop.f32.mrf.mxu0 }
  0xee   : >> { %v592_v27 = vadd.f32 %v587_v25, %v534_v24 }
  0xef   : >> { %v3964_v28 = vpop.f32.mrf.mxu1  ;;  %v657_v29 = vpop.f32.mrf.mxu0 }
  0xf0   : >> { %v664_v30 = vadd.f32 %v657_v29, %v591_v21 }
  0xf1   : >> { %v719_v31 = vpop.f32.mrf.mxu1  ;;  %v3969_v32 = vpop.f32.mrf.mxu0 }
  0xf2   : >> { %v726_v33 = vadd.f32 %v719_v31, %v664_v30 }
  0xf3   : >> { %v3975_v34 = vpop.f32.mrf.mxu1  ;;  %v660_v35 = vpop.f32.mrf.mxu0 }
  0xf4   : >> { %v665_v36 = vadd.f32 %v660_v35, %v592_v27 }
  0xf5   : >> { %v722_v37 = vpop.f32.mrf.mxu1  ;;  %v3970_v38 = vpop.f32.mrf.mxu0 }
  0xf6   : >> { %v727_v39 = vadd.f32 %v722_v37, %v665_v36 }
  0xf7   : >> { %v3976_v40 = vpop.f32.mrf.mxu1  ;;  %v781_v41 = vpop.f32.mrf.mxu0 }
  0xf8   : >> { %v788_v42 = vadd.f32 %v781_v41, %v726_v33 }
  0xf9   : >> { %v855_v43 = vpop.f32.mrf.mxu1  ;;  %v3981_v44 = vpop.f32.mrf.mxu0 }
  0xfa   : >> { %v862_v45 = vadd.f32 %v855_v43, %v788_v42 }
  0xfb   : >> { %v3987_v46 = vpop.f32.mrf.mxu1  ;;  %v784_v47 = vpop.f32.mrf.mxu0 }
  0xfc   : >> { %v789_v48 = vadd.f32 %v784_v47, %v727_v39 }
  0xfd   : >> { %v858_v49 = vpop.f32.mrf.mxu1  ;;  %v3982_v50 = vpop.f32.mrf.mxu0 }
  0xfe   : >> { %v863_v51 = vadd.f32 %v858_v49, %v789_v48 }
  0xff   : >> { %v3988_v52 = vpop.f32.mrf.mxu1  ;;  %v929_v53 = vpop.f32.mrf.mxu0 }
 0x100   : >> { %v936_v54 = vadd.f32 %v929_v53, %v862_v45 }
 0x101   : >> { %v987_v55 = vpop.f32.mrf.mxu1  ;;  %v3993_v56 = vpop.f32.mrf.mxu0 }
 0x102   : >> { %v994_v57 = vadd.f32 %v987_v55, %v936_v54 }
 0x103   : >> { %v3999_v58 = vpop.f32.mrf.mxu1  ;;  %v932_v59 = vpop.f32.mrf.mxu0 }
 0x104   : >> { %v937_v60 = vadd.f32 %v932_v59, %v863_v51 }
 0x105   : >> { %v990_v61 = vpop.f32.mrf.mxu1  ;;  %v3994_v62 = vpop.f32.mrf.mxu0 }
 0x106   : >> { %v995_v63 = vadd.f32 %v990_v61, %v937_v60 }
 0x107   : >> { %v4000_v2 = vpop.f32.mrf.mxu1  ;;  %v1045_v3 = vpop.f32.mrf.mxu0 }
 0x108   : >> { %v1052_v5 = vadd.f32 %v1045_v3, %v994_v57 }
 0x109   : >> { %v1117_v6 = vpop.f32.mrf.mxu1  ;;  %v4005_v4 = vpop.f32.mrf.mxu0 }
 0x10a   : >> { %v1124_v7 = vadd.f32 %v1117_v6, %v1052_v5 }
 0x10b   : >> { %v4011_v8 = vpop.f32.mrf.mxu1  ;;  %v1048_v9 = vpop.f32.mrf.mxu0 }
 0x10c   : >> { %v1053_v10 = vadd.f32 %v1048_v9, %v995_v63 }
 0x10d   : >> { %v1120_v11 = vpop.f32.mrf.mxu1  ;;  %v4006_v12 = vpop.f32.mrf.mxu0 }
 0x10e   : >> { %v1125_v13 = vadd.f32 %v1120_v11, %v1053_v10 }
 0x10f   : >> { %v4012_v14 = vpop.f32.mrf.mxu1  ;;  %v1179_v15 = vpop.f32.mrf.mxu0 }
 0x110   : >> { %v1186_v16 = vadd.f32 %v1179_v15, %v1124_v7 }
 0x111   : >> { %v1241_v17 = vpop.f32.mrf.mxu1  ;;  %v4017_v18 = vpop.f32.mrf.mxu0 }
 0x112   : >> { %v1248_v19 = vadd.f32 %v1241_v17, %v1186_v16 }
 0x113   : >> { %v4023_v20 = vpop.f32.mrf.mxu1  ;;  %v1182_v21 = vpop.f32.mrf.mxu0 }
 0x114   : >> { %v1187_v22 = vadd.f32 %v1182_v21, %v1125_v13 }
 0x115   : >> { %v1244_v23 = vpop.f32.mrf.mxu1  ;;  %v4018_v24 = vpop.f32.mrf.mxu0 }
 0x116   : >> { %v1249_v25 = vadd.f32 %v1244_v23, %v1187_v22 }
 0x117   : >> { %v4024_v26 = vpop.f32.mrf.mxu1  ;;  %v1315_v27 = vpop.f32.mrf.mxu0 }
 0x118   : >> { %v1322_v28 = vadd.f32 %v1315_v27, %v1248_v19 }
 0x119   : >> { %v1389_v29 = vpop.f32.mrf.mxu1  ;;  %v4029_v30 = vpop.f32.mrf.mxu0 }
 0x11a   : >> { %v1396_v31 = vadd.f32 %v1389_v29, %v1322_v28 }
 0x11b   : >> { %v4035_v32 = vpop.f32.mrf.mxu1  ;;  %v1318_v33 = vpop.f32.mrf.mxu0 }
 0x11c   : >> { %v1323_v34 = vadd.f32 %v1318_v33, %v1249_v25 }
 0x11d   : >> { %v1392_v35 = vpop.f32.mrf.mxu1  ;;  %v4030_v36 = vpop.f32.mrf.mxu0 }
 0x11e   : >> { %v1397_v37 = vadd.f32 %v1392_v35, %v1323_v34 }
 0x11f   : >> { %v4036_v38 = vpop.f32.mrf.mxu1  ;;  %v1447_v39 = vpop.f32.mrf.mxu0 }
 0x120   : >> { %v1454_v40 = vadd.f32 %v1447_v39, %v1396_v31 }
 0x121   : >> { %v1505_v41 = vpop.f32.mrf.mxu1  ;;  %v4041_v42 = vpop.f32.mrf.mxu0 }
 0x122   : >> { %v1512_v43 = vadd.f32 %v1505_v41, %v1454_v40 }
 0x123   : >> { %v4047_v44 = vpop.f32.mrf.mxu1  ;;  %v1450_v45 = vpop.f32.mrf.mxu0 }
 0x124   : >> { %v1455_v14 = vadd.f32 %v1450_v45, %v1397_v37 }
 0x125   : >> { %v1508_v46 = vpop.f32.mrf.mxu1  ;;  %v4042_v47 = vpop.f32.mrf.mxu0 }
 0x126   : >> { %v1513_v20 = vadd.f32 %v1508_v46, %v1455_v14 }
 0x127   : >> { %v4048_v48 = vpop.f32.mrf.mxu1  ;;  %v1577_v49 = vpop.f32.mrf.mxu0 }
 0x128   : >> { %v1584_v17 = vadd.f32 %v1577_v49, %v1512_v43 }
 0x129   : >> { %v1639_v50 = vpop.f32.mrf.mxu1  ;;  %v4053_v51 = vpop.f32.mrf.mxu0 }
 0x12a   : >> { %v1646_v23 = vadd.f32 %v1639_v50, %v1584_v17 }
 0x12b   : >> { %v4059_v52 = vpop.f32.mrf.mxu1  ;;  %v1580_v53 = vpop.f32.mrf.mxu0 }
 0x12c   : >> { %v1585_v24 = vadd.f32 %v1580_v53, %v1513_v20 }
 0x12d   : >> { %v1642_v54 = vpop.f32.mrf.mxu1  ;;  %v4054_v55 = vpop.f32.mrf.mxu0 }
 0x12e   : >> { %v1647_v30 = vadd.f32 %v1642_v54, %v1585_v24 }
 0x12f   : >> { %v4060_v56 = vpop.f32.mrf.mxu1  ;;  %v1701_v57 = vpop.f32.mrf.mxu0 }
 0x130   : >> { %v1708_v27 = vadd.f32 %v1701_v57, %v1646_v23 }
 0x131   : >> { %v1775_v58 = vpop.f32.mrf.mxu1  ;;  %v4065_v59 = vpop.f32.mrf.mxu0 }
 0x132   : >> { %v1782_v33 = vadd.f32 %v1775_v58, %v1708_v27 }
 0x133   : >> { %v4071_v60 = vpop.f32.mrf.mxu1  ;;  %v1704_v61 = vpop.f32.mrf.mxu0 }
 0x134   : >> { %v1709_v34 = vadd.f32 %v1704_v61, %v1647_v30 }
 0x135   : >> { %v1778_v62 = vpop.f32.mrf.mxu1  ;;  %v4066_v63 = vpop.f32.mrf.mxu0 }
 0x136   : >> { %v1783_v40 = vadd.f32 %v1778_v62, %v1709_v34 }
 0x137   : >> { %v4072_v2 = vpop.f32.mrf.mxu1  ;;  %v1849_v3 = vpop.f32.mrf.mxu0 }
 0x138   : >> { %v1856_v37 = vadd.f32 %v1849_v3, %v1782_v33 }
 0x139   : >> { %v1907_v5 = vpop.f32.mrf.mxu1  ;;  %v4077_v6 = vpop.f32.mrf.mxu0 }
 0x13a   : >> { %v1914_v43 = vadd.f32 %v1907_v5, %v1856_v37 }
 0x13b   : >> { %v4083_v4 = vpop.f32.mrf.mxu1  ;;  %v1852_v7 = vpop.f32.mrf.mxu0 }
 0x13c   : >> { %v1857_v44 = vadd.f32 %v1852_v7, %v1783_v40 }
 0x13d   : >> { %v1910_v8 = vpop.f32.mrf.mxu1  ;;  %v4078_v9 = vpop.f32.mrf.mxu0 }
 0x13e   : >> { %v1915_v50 = vadd.f32 %v1910_v8, %v1857_v44 }
 0x13f   : >> { %v4084_v10 = vpop.f32.mrf.mxu1  ;;  %v1965_v11 = vpop.f32.mrf.mxu0 }
 0x140   : >> { %v1972_v47 = vadd.f32 %v1965_v11, %v1914_v43 }
 0x141   : >> { %v2037_v12 = vpop.f32.mrf.mxu1  ;;  %v4089_v13 = vpop.f32.mrf.mxu0 }
 0x142   : >> { %v2044_v53 = vadd.f32 %v2037_v12, %v1972_v47 }
 0x143   : >> { %v4095_v15 = vpop.f32.mrf.mxu1  ;;  %v1968_v16 = vpop.f32.mrf.mxu0 }
 0x144   : >> { %v1973_v54 = vadd.f32 %v1968_v16, %v1915_v50 }
 0x145   : >> { %v2040_v18 = vpop.f32.mrf.mxu1  ;;  %v4090_v19 = vpop.f32.mrf.mxu0 }
 0x146   : >> { %v2045_v60 = vadd.f32 %v2040_v18, %v1973_v54 }
 0x147   : >> { %v4096_v21 = vpop.f32.mrf.mxu1  ;;  %v2099_v22 = vpop.f32.mrf.mxu0 }
 0x148   : >> { %v2106_v57 = vadd.f32 %v2099_v22, %v2044_v53 }
 0x149   : >> { %v2161_v25 = vpop.f32.mrf.mxu1  ;;  %v4101_v26 = vpop.f32.mrf.mxu0 }
 0x14a   : >> { %v2168_v63 = vadd.f32 %v2161_v25, %v2106_v57 }
 0x14b   : >> { %v4107_v28 = vpop.f32.mrf.mxu1  ;;  %v2102_v29 = vpop.f32.mrf.mxu0 }
 0x14c   : >> { %v2107_v2 = vadd.f32 %v2102_v29, %v2045_v60 }
 0x14d   : >> { %v2164_v31 = vpop.f32.mrf.mxu1  ;;  %v4102_v32 = vpop.f32.mrf.mxu0 }
 0x14e   : >> { %v2169_v8 = vadd.f32 %v2164_v31, %v2107_v2 }
 0x14f   : >> { %v4108_v35 = vpop.f32.mrf.mxu1  ;;  %v2235_v36 = vpop.f32.mrf.mxu0 }
 0x150   : >> { %v2242_v6 = vadd.f32 %v2235_v36, %v2168_v63 }
 0x151   : >> { %v2309_v38 = vpop.f32.mrf.mxu1  ;;  %v4113_v39 = vpop.f32.mrf.mxu0 }
 0x152   : >> { %v2316_v11 = vadd.f32 %v2309_v38, %v2242_v6 }
 0x153   : >> { %v4119_v41 = vpop.f32.mrf.mxu1  ;;  %v2238_v42 = vpop.f32.mrf.mxu0 }
 0x154   : >> { %v2243_v12 = vadd.f32 %v2238_v42, %v2169_v8 }
 0x155   : >> { %v2312_v45 = vpop.f32.mrf.mxu1  ;;  %v4114_v46 = vpop.f32.mrf.mxu0 }
 0x156   : >> { %v2317_v18 = vadd.f32 %v2312_v45, %v2243_v12 }
 0x157   : >> { %v4120_v48 = vpop.f32.mrf.mxu1  ;;  %v2367_v49 = vpop.f32.mrf.mxu0 }
 0x158   : >> { %v2374_v15 = vadd.f32 %v2367_v49, %v2316_v11 }
 0x159   : >> { %v2425_v51 = vpop.f32.mrf.mxu1  ;;  %v4125_v52 = vpop.f32.mrf.mxu0 }
 0x15a   : >> { %v2432_v21 = vadd.f32 %v2425_v51, %v2374_v15 }
 0x15b   : >> { %v4131_v55 = vpop.f32.mrf.mxu1  ;;  %v2370_v56 = vpop.f32.mrf.mxu0 }
 0x15c   : >> { %v2375_v22 = vadd.f32 %v2370_v56, %v2317_v18 }
 0x15d   : >> { %v2428_v58 = vpop.f32.mrf.mxu1  ;;  %v4126_v59 = vpop.f32.mrf.mxu0 }
 0x15e   : >> { %v2433_v28 = vadd.f32 %v2428_v58, %v2375_v22 }
 0x15f   : >> { %v4132_v61 = vpop.f32.mrf.mxu1  ;;  %v2497_v62 = vpop.f32.mrf.mxu0 }
 0x160   : >> { %v2504_v25 = vadd.f32 %v2497_v62, %v2432_v21 }
 0x161   : >> { %v2559_v3 = vpop.f32.mrf.mxu1  ;;  %v4137_v5 = vpop.f32.mrf.mxu0 }
 0x162   : >> { %v2566_v31 = vadd.f32 %v2559_v3, %v2504_v25 }
 0x163   : >> { %v4143_v4 = vpop.f32.mrf.mxu1  ;;  %v2500_v7 = vpop.f32.mrf.mxu0 }
 0x164   : >> { %v2505_v32 = vadd.f32 %v2500_v7, %v2433_v28 }
 0x165   : >> { %v2562_v9 = vpop.f32.mrf.mxu1  ;;  %v4138_v10 = vpop.f32.mrf.mxu0 }
 0x166   : >> { %v2567_v38 = vadd.f32 %v2562_v9, %v2505_v32 }
 0x167   : >> { %v4144_v13 = vpop.f32.mrf.mxu1  ;;  %v2621_v14 = vpop.f32.mrf.mxu0 }
 0x168   : >> { %v2628_v35 = vadd.f32 %v2621_v14, %v2566_v31 }
 0x169   : >> { %v2695_v16 = vpop.f32.mrf.mxu1  ;;  %v4149_v17 = vpop.f32.mrf.mxu0 }
 0x16a   : >> { %v2702_v41 = vadd.f32 %v2695_v16, %v2628_v35 }
 0x16b   : >> { %v4155_v19 = vpop.f32.mrf.mxu1  ;;  %v2624_v20 = vpop.f32.mrf.mxu0 }
 0x16c   : >> { %v2629_v42 = vadd.f32 %v2624_v20, %v2567_v38 }
 0x16d   : >> { %v2698_v23 = vpop.f32.mrf.mxu1  ;;  %v4150_v24 = vpop.f32.mrf.mxu0 }
 0x16e   : >> { %v2703_v48 = vadd.f32 %v2698_v23, %v2629_v42 }
 0x16f   : >> { %v4156_v26 = vpop.f32.mrf.mxu1  ;;  %v2769_v27 = vpop.f32.mrf.mxu0 }
 0x170   : >> { %v2776_v45 = vadd.f32 %v2769_v27, %v2702_v41 }
 0x171   : >> { %v2827_v29 = vpop.f32.mrf.mxu1  ;;  %v4161_v30 = vpop.f32.mrf.mxu0 }
 0x172   : >> { %v2834_v51 = vadd.f32 %v2827_v29, %v2776_v45 }
 0x173   : >> { %v4167_v33 = vpop.f32.mrf.mxu1  ;;  %v2772_v34 = vpop.f32.mrf.mxu0 }
 0x174   : >> { %v2777_v52 = vadd.f32 %v2772_v34, %v2703_v48 }
 0x175   : >> { %v2830_v36 = vpop.f32.mrf.mxu1  ;;  %v4162_v37 = vpop.f32.mrf.mxu0 }
 0x176   : >> { %v2835_v58 = vadd.f32 %v2830_v36, %v2777_v52 }
 0x177   : >> { %v4168_v39 = vpop.f32.mrf.mxu1  ;;  %v2885_v40 = vpop.f32.mrf.mxu0 }
 0x178   : >> { %v2892_v55 = vadd.f32 %v2885_v40, %v2834_v51 }
 0x179   : >> { %v2957_v43 = vpop.f32.mrf.mxu1  ;;  %v4173_v44 = vpop.f32.mrf.mxu0 }
 0x17a   : >> { %v2964_v61 = vadd.f32 %v2957_v43, %v2892_v55 }
 0x17b   : >> { %v4179_v46 = vpop.f32.mrf.mxu1  ;;  %v2888_v47 = vpop.f32.mrf.mxu0 }
 0x17c   : >> { %v2893_v62 = vadd.f32 %v2888_v47, %v2835_v58 }
 0x17d   : >> { %v2960_v49 = vpop.f32.mrf.mxu1  ;;  %v4174_v50 = vpop.f32.mrf.mxu0 }
 0x17e   : >> { %v2965_v4 = vadd.f32 %v2960_v49, %v2893_v62 }
 0x17f   : >> { %v4180_v53 = vpop.f32.mrf.mxu1  ;;  %v3019_v54 = vpop.f32.mrf.mxu0 }
 0x180   : >> { %v3026_v3 = vadd.f32 %v3019_v54, %v2964_v61 }
 0x181   : >> { %v3081_v56 = vpop.f32.mrf.mxu1  ;;  %v4185_v57 = vpop.f32.mrf.mxu0 }
 0x182   : >> { %v3088_v9 = vadd.f32 %v3081_v56, %v3026_v3 }
 0x183   : >> { %v4191_v59 = vpop.f32.mrf.mxu1  ;;  %v3022_v60 = vpop.f32.mrf.mxu0 }
 0x184   : >> { %v3027_v10 = vadd.f32 %v3022_v60, %v2965_v4 }
 0x185   : >> { %v3084_v63 = vpop.f32.mrf.mxu1  ;;  %v4186_v2 = vpop.f32.mrf.mxu0 }
 0x186   : >> { %v3089_v16 = vadd.f32 %v3084_v63, %v3027_v10 }
 0x187   : >> { %v4192_v5 = vpop.f32.mrf.mxu1  ;;  %v3155_v6 = vpop.f32.mrf.mxu0 }
 0x188   : >> { %v3162_v13 = vadd.f32 %v3155_v6, %v3088_v9 }
 0x189   : >> { %v3229_v7 = vpop.f32.mrf.mxu1  ;;  %v4197_v8 = vpop.f32.mrf.mxu0 }
 0x18a   : >> { %v3236_v19 = vadd.f32 %v3229_v7, %v3162_v13 }
 0x18b   : >> { %v4203_v11 = vpop.f32.mrf.mxu1  ;;  %v3158_v12 = vpop.f32.mrf.mxu0 }
 0x18c   : >> { %v3163_v20 = vadd.f32 %v3158_v12, %v3089_v16 }
 0x18d   : >> { %v3232_v14 = vpop.f32.mrf.mxu1  ;;  %v4198_v15 = vpop.f32.mrf.mxu0 }
 0x18e   : >> { %v3237_v26 = vadd.f32 %v3232_v14, %v3163_v20 }
 0x18f   : >> { %v4204_v17 = vpop.f32.mrf.mxu1  ;;  %v3287_v18 = vpop.f32.mrf.mxu0 }
 0x190   : >> { %v3294_v23 = vadd.f32 %v3287_v18, %v3236_v19 }
 0x191   : >> { %v3345_v21 = vpop.f32.mrf.mxu1  ;;  %v4209_v22 = vpop.f32.mrf.mxu0 }
 0x192   : >> { %v3352_v29 = vadd.f32 %v3345_v21, %v3294_v23 }
 0x193   : >> { %v4215_v24 = vpop.f32.mrf.mxu1  ;;  %v3290_v25 = vpop.f32.mrf.mxu0 }
 0x194   : >> { %v3295_v30 = vadd.f32 %v3290_v25, %v3237_v26 }
 0x195   : >> { %v3348_v27 = vpop.f32.mrf.mxu1  ;;  %v4210_v28 = vpop.f32.mrf.mxu0 }
 0x196   : >> { %v3353_v35 = vadd.f32 %v3348_v27, %v3295_v30 }
 0x197   : >> { %v4216_v31 = vpop.f32.mrf.mxu1  ;;  %v3417_v32 = vpop.f32.mrf.mxu0 }
 0x198   : >> { %v3424_v33 = vadd.f32 %v3417_v32, %v3352_v29 }
 0x199   : >> { %v4221_v34 = vpop.f32.mrf.mxu0 }
 0x19a   : >> { %v3432_v36 = vmul.f32 %v4359_v0, %v3424_v33 }
 0x19b   : >> { %v3420_v37 = vpop.f32.mrf.mxu0 }
 0x19c   : >> { %v3425_v38 = vadd.f32 %v3420_v37, %v3353_v35  ;;  %v3440_v40 = vadd.f32 %v4364_v1, %v3432_v36 }
 0x19d   : >> { %v4222_v39 = vpop.f32.mrf.mxu0 }
 0x19e   : >> { %v3433_v41 = vmul.f32 %v4359_v0, %v3425_v38  ;;  %v3442_v43 = vmax.f32 %v3440_v40, 0.0 }
 0x1a0   : >> { %v3441_v42 = vadd.f32 %v4364_v1, %v3433_v41 }
 0x1a2   : >> { %v3443_v44 = vmax.f32 %v3441_v42, 0.0  ;;  %205 = sbr.rel (!%p203_p4) target bundleno = 15 (0xf), region = 136 }
 0x1a4   : >> { %v3829_v45 = vpack.c.bf16 %v3443_v44, %v3442_v43 }
 0x1a6   : >> { %3830 = vst [vmem:[%s3454_s21] sm:$0xff] %v3829_v45  }
 0x1a7 PF: > { %s14_s15 = sadd.s32 1, %s4315_s15  }
 0x1a8   : > { %p11_p5 = scmp.ge.s32.totalorder %s14_s15, 4  }
 0x1aa   :  { %13 = sbr.rel (!%p11_p5) target bundleno = 1 (0x1), region = 147 }

// kernel: _lambda_.14
= control target key start
LH: loop header
LB: loop body
LE: loop exit
PB: predicated region body
PF: predicated region fallthrough
CT: control target
= control target key end

     0   :  { %s1957_s15 = smov 0   ;;  %s2325_s0 = inlined_call_operand.vmem [shape: bf16[2,10,10,128], index: 0, kind: input, shape index: {}]   ;;  %s2326_s1 = inlined_call_operand.vmem [shape: bf16[9,128,128], index: 1, kind: input, shape index: {}]   ;;  %s2327_s2 = inlined_call_operand.vmem [shape: f32[1,128], index: 2, kind: input, shape index: {}]   ;;  %s2328_s3 = inlined_call_operand.vmem [shape: f32[1,128], index: 3, kind: input, shape index: {}]   ;;  %s2329_s4 = inlined_call_operand.vmem [shape: bf16[2,8,8,128], index: 4, kind: output, shape index: {}]  }
   0x1 LB: > { %s1323_s16 = sadd.s32 4294967295, %s1924_s15   ;;  %p1327_p0 = scmp.ge.s32.totalorder %s1924_s15, 1  ;;  %s1924_s15 = sphi %s1957_s15, %s14_s15  }
   0x2   : > { %p162_p1 = scmp.lt.s32.totalorder %s1924_s15, 3 }
   0x4   : > { %p163_p2 = pnand %p1327_p0, %p162_p1 }
   0x5   : > { %p188_p3 = scmp.lt.s32.totalorder (!%p163_p2), %s1323_s16, 1  ;;  %s1985_s29 = smov (!%p163_p2), 0  }
   0x6   : > { %166 = sbr.rel (%p163_p2) target bundleno = 380 (0x17c), region = 36 }
   0xb   : > { %v1968_v0 = vld [vmem:[%s2327_s2] ss:$0 sm:$0xff]  ;;  %s2331_s16 = smov (!%p188_p3, %s1323_s16), 1 }
   0xc   : > { %v1973_v1 = vld [vmem:[%s2328_s3] ss:$0 sm:$0xff]  ;;  %s1817_s21 = smul.u32 80, %s2331_s16  ;;  %s1554_s22 = sshll.u32 %s2331_s16, 5 }
   0xd   : > { %s1978_s25 = scalar_lea.vmem %s2329_s4, %s1554_s22 }
   0xe   : > { %s1983_s28 = scalar_lea.vmem %s2325_s0, %s1817_s21 }
   0xf LB: >> { %v1836_v2 = vld [vmem:[%s2326_s1 + $0x78] sm:$0xff]   ;;  %v1930_v3 = vmov 0.0   ;;  %v1838_v5 = vld [vmem:[%s2326_s1 + $0x70] sm:$0xff]   ;;  %vm1931_vm0 = vmmov 0   ;;  %v1840_v7 = vld [vmem:[%s2326_s1 + $0x68] sm:$0xff]   ;;  %s1555_s19 = sshll.u32 %s1928_s29, 3  ;;  %s1928_s29 = sphi %s1985_s29, %s206_s29  }
  0x10   : >> { %1637 = vmatprep.subr.bf16.mxu0 %v1930_v3  ;;  %1657 = vmatprep.subr.bf16.mxu1 %v1930_v3  ;;  %v1837_v4 = vld [vmem:[%s2326_s1 + $0x38] sm:$0xff]   ;;  %v1839_v6 = vld [vmem:[%s2326_s1 + $0x30] sm:$0xff]   ;;  %v1841_v8 = vld [vmem:[%s2326_s1 + $0x28] sm:$0xff]   ;;  %s2028_s22 = scalar_lea.vmem %s1983_s28, %s1555_s19 }
  0x11   : >> { %1638 = vmatpush3.bf16.msra.mxu0 %v1836_v2  ;;  %1653 = vmatprep.mubr.msk.bf16.mxu0 %vm1931_vm0, %v1930_v3  ;;  %v1842_v9 = vld [vmem:[%s2326_s1 + $0x60] sm:$0xff]   ;;  %v1844_v11 = vld [vmem:[%s2326_s1 + $0x58] sm:$0xff]   ;;  %v1846_v16 = vld [vmem:[%s2326_s1 + $0x50] sm:$0xff]  }
  0x12   : >> { %1658 = vmatpush3.bf16.msra.mxu1 %v1837_v4  ;;  %1639 = vmatprep.subr.bf16.mxu0 %v1930_v3  ;;  %v1843_v10 = vld [vmem:[%s2326_s1 + $0x20] sm:$0xff]   ;;  %v1845_v12 = vld [vmem:[%s2326_s1 + $0x18] sm:$0xff]   ;;  %v1847_v17 = vld [vmem:[%s2326_s1 + $0x10] sm:$0xff]  }
  0x13   : >> { %1659 = vmatprep.subr.bf16.mxu1 %v1930_v3  ;;  %1673 = vmatprep.mubr.msk.bf16.mxu1 %vm1931_vm0, %v1930_v3  ;;  %v210_v13 = vld [vmem:[%s2028_s22] sm:$0xf]  ;;  %v2040_v14 = vld [vmem:[%s2028_s22 + $0x4] sm:$0x1]  ;;  %v1848_v19 = vld [vmem:[%s2326_s1 + $0x48] sm:$0xff]  }
  0x14   : >> { %v1349_v15 = vcombine.low %v210_v13, %v2040_v14  ;;  %v1849_v20 = vld [vmem:[%s2326_s1 + $0x8] sm:$0xff]   ;;  %v1850_v23 = vld [vmem:[%s2326_s1 + $0x40] sm:$0xff]   ;;  %v1853_v26 = vld [vmem:[%s2326_s1 + $0xb8] sm:$0xff]  }
  0x15   : >> { %1640 = vmatpush3.bf16.msra.mxu0 %v1838_v5  ;;  %v1851_v24 = vld [vmem:[%s2326_s1] sm:$0xff]   ;;  %v1854_v27 = vld [vmem:[%s2326_s1 + $0xf8] sm:$0xff]   ;;  %v1855_v28 = vld [vmem:[%s2326_s1 + $0xb0] sm:$0xff]  }
  0x16   : >> { %1660 = vmatpush3.bf16.msra.mxu1 %v1839_v6  ;;  %1641 = vmatprep.subr.bf16.mxu0 %v1930_v3  ;;  %v253_v18 = vshll.u32 %v1349_v15, 16  ;;  %v251_v21 = vshrl.u32 %v1349_v15, 16  ;;  %v1856_v29 = vld [vmem:[%s2326_s1 + $0xf0] sm:$0xff]   ;;  %v1857_v30 = vld [vmem:[%s2326_s1 + $0xa8] sm:$0xff]   ;;  %v1859_v32 = vld [vmem:[%s2326_s1 + $0xa0] sm:$0xff]  }
  0x17   : >> { %1661 = vmatprep.subr.bf16.mxu1 %v1930_v3  ;;  %v1858_v31 = vld [vmem:[%s2326_s1 + $0xe8] sm:$0xff]   ;;  %v1860_v33 = vld [vmem:[%s2326_s1 + $0xe0] sm:$0xff]   ;;  %v1861_v34 = vld [vmem:[%s2326_s1 + $0x98] sm:$0xff]  }
  0x18   : >> { %v255_v22 = vrot.slane %v253_v18, 1  ;;  %v1862_v35 = vld [vmem:[%s2326_s1 + $0xd8] sm:$0xff]   ;;  %v1863_v36 = vld [vmem:[%s2326_s1 + $0x90] sm:$0xff]   ;;  %v1865_v38 = vld [vmem:[%s2326_s1 + $0x88] sm:$0xff]  }
  0x19   : >> { %1642 = vmatpush3.bf16.msra.mxu0 %v1840_v7  ;;  %v1864_v37 = vld [vmem:[%s2326_s1 + $0xd0] sm:$0xff]   ;;  %v1866_v39 = vld [vmem:[%s2326_s1 + $0xc8] sm:$0xff]   ;;  %v434_v40 = vld [vmem:[%s2028_s22] sm:$0xe] }
  0x1a   : >> { %1662 = vmatpush3.bf16.msra.mxu1 %v1841_v8  ;;  %1643 = vmatprep.subr.bf16.mxu0 %v1930_v3  ;;  %v256_v25 = vor.u32 %v255_v22, %v251_v21  ;;  %v1382_v41 = vcombine.low %v434_v40, %v2040_v14  ;;  %v1867_v42 = vld [vmem:[%s2326_s1 + $0x80] sm:$0xff]   ;;  %v1870_v45 = vld [vmem:[%s2326_s1 + $0x138] sm:$0xff]   ;;  %v1392_v46 = vld [vmem:[%s2028_s22 + $0x8] sm:$0xf] }
  0x1b   : >> { %1663 = vmatprep.subr.bf16.mxu1 %v1930_v3  ;;  %v1868_v43 = vld [vmem:[%s2326_s1 + $0xc0] sm:$0xff]   ;;  %v1871_v47 = vld [vmem:[%s2326_s1 + $0x178] sm:$0xff]   ;;  %v1872_v48 = vld [vmem:[%s2326_s1 + $0x130] sm:$0xff]  }
  0x1c   : >> { %v455_v44 = vrot.slane %v1382_v41, 1  ;;  %v1873_v49 = vld [vmem:[%s2326_s1 + $0x170] sm:$0xff]   ;;  %v1874_v50 = vld [vmem:[%s2326_s1 + $0x128] sm:$0xff]   ;;  %v1876_v52 = vld [vmem:[%s2326_s1 + $0x120] sm:$0xff]  }
  0x1d   : >> { %1644 = vmatpush3.bf16.msra.mxu0 %v1842_v9  ;;  %v1875_v51 = vld [vmem:[%s2326_s1 + $0x168] sm:$0xff]   ;;  %v1877_v53 = vld [vmem:[%s2326_s1 + $0x160] sm:$0xff]   ;;  %v1878_v54 = vld [vmem:[%s2326_s1 + $0x118] sm:$0xff]  }
  0x1e   : >> { %1664 = vmatpush3.bf16.msra.mxu1 %v1843_v10  ;;  %1645 = vmatprep.subr.bf16.mxu0 %v1930_v3  ;;  %v1417_v55 = vld [vmem:[%s2028_s22 + $0x8] sm:$0xf]  ;;  %v1418_v56 = vld [vmem:[%s2028_s22 + $0xc] sm:$0x1]  ;;  %v1879_v57 = vld [vmem:[%s2326_s1 + $0x158] sm:$0xff]  }
  0x1f   : >> { %1665 = vmatprep.subr.bf16.mxu1 %v1930_v3  ;;  %v1435_v58 = vcombine.low %v1417_v55, %v1418_v56  ;;  %v1880_v59 = vld [vmem:[%s2326_s1 + $0x110] sm:$0xff]   ;;  %v1882_v62 = vld [vmem:[%s2326_s1 + $0x108] sm:$0xff]   ;;  %v1884_v6 = vld [vmem:[%s2326_s1 + $0x100] sm:$0xff]  }
  0x20   : >> { %v1881_v60 = vld [vmem:[%s2326_s1 + $0x150] sm:$0xff]   ;;  %v1883_v63 = vld [vmem:[%s2326_s1 + $0x148] sm:$0xff]   ;;  %v1885_v8 = vld [vmem:[%s2326_s1 + $0x140] sm:$0xff]  }
  0x21   : >> { %1646 = vmatpush3.bf16.msra.mxu0 %v1844_v11  ;;  %v684_v61 = vshll.u32 %v1435_v58, 16  ;;  %v1444_v2 = vld [vmem:[%s2028_s22 + $0x8] sm:$0xe]  ;;  %v682_v4 = vshrl.u32 %v1435_v58, 16  ;;  %v1887_v10 = vld [vmem:[%s2326_s1 + $0x1b8] sm:$0xff]   ;;  %v1891_v14 = vld [vmem:[%s2326_s1 + $0x1f0] sm:$0xff]  }
  0x22   : >> { %1666 = vmatpush3.bf16.msra.mxu1 %v1845_v12  ;;  %1647 = vmatprep.subr.bf16.mxu0 %v1930_v3  ;;  %v1461_v7 = vcombine.low %v1444_v2, %v1418_v56  ;;  %v1889_v12 = vld [vmem:[%s2326_s1 + $0x1f8] sm:$0xff]   ;;  %v1892_v15 = vld [vmem:[%s2326_s1 + $0x1a8] sm:$0xff]   ;;  %v1895_v18 = vld [vmem:[%s2326_s1 + $0x1e0] sm:$0xff]  }
  0x23   : >> { %1667 = vmatprep.subr.bf16.mxu1 %v1930_v3  ;;  %v686_v5 = vrot.slane %v684_v61, 1  ;;  %v1496_v21 = vld [vmem:[%s2028_s22 + $0x10] sm:$0xf]  ;;  %v1497_v22 = vld [vmem:[%s2028_s22 + $0x14] sm:$0x1]  ;;  %v1911_v41 = vld [vmem:[%s2326_s1 + $0x208] sm:$0xff]  }
  0x24   : >> { %v799_v11 = vrot.slane %v1461_v7, 1  ;;  %v1910_v40 = vld [vmem:[%s2326_s1 + $0x210] sm:$0xff]  }
  0x25   : >> { %1648 = vmatpush3.bf16.msra.mxu0 %v1846_v16  ;;  %v687_v9 = vor.u32 %v686_v5, %v682_v4  ;;  %v1893_v16 = vld [vmem:[%s2326_s1 + $0x1e8] sm:$0xff]  }
  0x26   : >> { %1668 = vmatpush3.bf16.msra.mxu1 %v1847_v17  ;;  %1649 = vmatprep.subr.bf16.mxu0 %v1930_v3  ;;  %v1894_v17 = vld [vmem:[%s2326_s1 + $0x1a0] sm:$0xff]  }
  0x27   : >> { %1669 = vmatprep.subr.bf16.mxu1 %v1930_v3 }
  0x29   : >> { %1650 = vmatpush3.bf16.msra.mxu0 %v1848_v19  ;;  %v1896_v19 = vld [vmem:[%s2326_s1 + $0x198] sm:$0xff]  }
  0x2a   : >> { %1670 = vmatpush3.bf16.msra.mxu1 %v1849_v20  ;;  %1651 = vmatprep.subr.bf16.mxu0 %v1930_v3  ;;  %v1897_v20 = vld [vmem:[%s2326_s1 + $0x1d8] sm:$0xff]  }
  0x2b   : >> { %1671 = vmatprep.subr.bf16.mxu1 %v1930_v3 }
  0x2d   : >> { %1652 = vmatpush3.bf16.msra.mxu0 %v1850_v23  ;;  %v1898_v23 = vld [vmem:[%s2326_s1 + $0x190] sm:$0xff]  }
  0x2e   : >> { %1672 = vmatpush3.bf16.msra.mxu1 %v1851_v24  ;;  %1677 = vmatprep.subr.bf16.mxu0 %v1930_v3  ;;  %v1514_v24 = vcombine.low %v1496_v21, %v1497_v22 }
  0x2f   : >> { %1697 = vmatprep.subr.bf16.mxu1 %v1930_v3 }
  0x30   : >> { %1654 = vmatmul.mubr.bf16.vlgmr.msra.gmra.mxu0 %v256_v25  ;;  %v1899_v25 = vld [vmem:[%s2326_s1 + $0x1d0] sm:$0xff]  }
  0x31   : >> { %1674 = vmatmul.mubr.bf16.vlgmr.msra.gmra.mxu1 %v210_v13  ;;  %1678 = vmatpush3.bf16.msra.mxu0 %v1853_v26  ;;  %v1890_v13 = vld [vmem:[%s2326_s1 + $0x1b0] sm:$0xff]   ;;  %v1900_v26 = vld [vmem:[%s2326_s1 + $0x188] sm:$0xff]  }
  0x32   : >> { %1698 = vmatpush3.bf16.msra.mxu1 %v1854_v27  ;;  %1679 = vmatprep.subr.bf16.mxu0 %v1930_v3  ;;  %v1028_v27 = vshll.u32 %v1514_v24, 16 }
  0x33   : >> { %1699 = vmatprep.subr.bf16.mxu1 %v1930_v3  ;;  %1693 = vmatprep.mubr.msk.bf16.mxu0 %vm1931_vm0, %v1930_v3 }
  0x34   : >> { %1713 = vmatprep.mubr.msk.bf16.mxu1 %vm1931_vm0, %v1930_v3 }
  0x35   : >> { %1680 = vmatpush3.bf16.msra.mxu0 %v1855_v28  ;;  %v1901_v28 = vld [vmem:[%s2326_s1 + $0x1c8] sm:$0xff]  }
  0x36   : >> { %1700 = vmatpush3.bf16.msra.mxu1 %v1856_v29  ;;  %1681 = vmatprep.subr.bf16.mxu0 %v1930_v3  ;;  %v1902_v29 = vld [vmem:[%s2326_s1 + $0x180] sm:$0xff]  }
  0x37   : >> { %1701 = vmatprep.subr.bf16.mxu1 %v1930_v3 }
  0x39   : >> { %1682 = vmatpush3.bf16.msra.mxu0 %v1857_v30  ;;  %v1026_v30 = vshrl.u32 %v1514_v24, 16 }
  0x3a   : >> { %1702 = vmatpush3.bf16.msra.mxu1 %v1858_v31  ;;  %1683 = vmatprep.subr.bf16.mxu0 %v1930_v3  ;;  %v1030_v31 = vrot.slane %v1028_v27, 1 }
  0x3b   : >> { %1703 = vmatprep.subr.bf16.mxu1 %v1930_v3 }
  0x3d   : >> { %1684 = vmatpush3.bf16.msra.mxu0 %v1859_v32  ;;  %v1903_v32 = vld [vmem:[%s2326_s1 + $0x1c0] sm:$0xff]  }
  0x3e   : >> { %1704 = vmatpush3.bf16.msra.mxu1 %v1860_v33  ;;  %1685 = vmatprep.subr.bf16.mxu0 %v1930_v3  ;;  %v1471_v33 = vld [vmem:[%s2028_s22 + $0x10] sm:$0xf] }
  0x3f   : >> { %1705 = vmatprep.subr.bf16.mxu1 %v1930_v3 }
  0x41   : >> { %1686 = vmatpush3.bf16.msra.mxu0 %v1861_v34  ;;  %v1904_v34 = vld [vmem:[%s2326_s1 + $0x238] sm:$0xff]  }
  0x42   : >> { %1706 = vmatpush3.bf16.msra.mxu1 %v1862_v35  ;;  %1687 = vmatprep.subr.bf16.mxu0 %v1930_v3  ;;  %v1031_v35 = vor.u32 %v1030_v31, %v1026_v30 }
  0x43   : >> { %1707 = vmatprep.subr.bf16.mxu1 %v1930_v3 }
  0x45   : >> { %1688 = vmatpush3.bf16.msra.mxu0 %v1863_v36  ;;  %v1906_v36 = vld [vmem:[%s2326_s1 + $0x230] sm:$0xff]  }
  0x46   : >> { %1708 = vmatpush3.bf16.msra.mxu1 %v1864_v37  ;;  %1689 = vmatprep.subr.bf16.mxu0 %v1930_v3  ;;  %v1907_v37 = vld [vmem:[%s2326_s1 + $0x228] sm:$0xff]  }
  0x47   : >> { %1709 = vmatprep.subr.bf16.mxu1 %v1930_v3 }
  0x49   : >> { %1690 = vmatpush3.bf16.msra.mxu0 %v1865_v38  ;;  %v1908_v38 = vld [vmem:[%s2326_s1 + $0x220] sm:$0xff]  }
  0x4a   : >> { %1710 = vmatpush3.bf16.msra.mxu1 %v1866_v39  ;;  %1691 = vmatprep.subr.bf16.mxu0 %v1930_v3  ;;  %v1909_v39 = vld [vmem:[%s2326_s1 + $0x218] sm:$0xff]  }
  0x4b   : >> { %1711 = vmatprep.subr.bf16.mxu1 %v1930_v3 }
  0x4d   : >> { %1692 = vmatpush3.bf16.msra.mxu0 %v1867_v42  ;;  %v1523_v42 = vld [vmem:[%s2028_s22 + $0x10] sm:$0xe]  ;;  %s1551_s22 = sshll.u32 %s1928_s29, 2  ;;  %s206_s29 = sadd.s32 1, %s1928_s29  }
  0x4e   : >> { %1712 = vmatpush3.bf16.msra.mxu1 %v1868_v43  ;;  %1717 = vmatprep.subr.bf16.mxu0 %v1930_v3  ;;  %v1540_v43 = vcombine.low %v1523_v42, %v1497_v22  ;;  %s1251_s26 = scalar_lea.vmem %s1978_s25, %s1551_s22  ;;  %p203_p4 = scmp.ge.s32.totalorder %s206_s29, 8  }
  0x4f   : >> { %1737 = vmatprep.subr.bf16.mxu1 %v1930_v3 }
  0x50   : >> { %1694 = vmatmul.mubr.bf16.vlgmr.msra.gmra.mxu0 %v455_v44  ;;  %v1912_v44 = vld [vmem:[%s2326_s1 + $0x200] sm:$0xff]  }
  0x51   : >> { %1718 = vmatpush3.bf16.msra.mxu0 %v1870_v45  ;;  %1714 = vmatmul.mubr.bf16.vlgmr.msra.gmra.mxu1 %v1392_v46  ;;  %v1143_v45 = vrot.slane %v1540_v43, 1 }
  0x52   : >> { %1738 = vmatpush3.bf16.msra.mxu1 %v1871_v47  ;;  %1719 = vmatprep.subr.bf16.mxu0 %v1930_v3 }
  0x53   : >> { %1739 = vmatprep.subr.bf16.mxu1 %v1930_v3  ;;  %1733 = vmatprep.mubr.msk.bf16.mxu0 %vm1931_vm0, %v1930_v3 }
  0x54   : >> { %1753 = vmatprep.mubr.msk.bf16.mxu1 %vm1931_vm0, %v1930_v3 }
  0x55   : >> { %1720 = vmatpush3.bf16.msra.mxu0 %v1872_v48 }
  0x56   : >> { %1740 = vmatpush3.bf16.msra.mxu1 %v1873_v49  ;;  %1721 = vmatprep.subr.bf16.mxu0 %v1930_v3 }
  0x57   : >> { %1741 = vmatprep.subr.bf16.mxu1 %v1930_v3 }
  0x59   : >> { %1722 = vmatpush3.bf16.msra.mxu0 %v1874_v50 }
  0x5a   : >> { %1742 = vmatpush3.bf16.msra.mxu1 %v1875_v51  ;;  %1723 = vmatprep.subr.bf16.mxu0 %v1930_v3 }
  0x5b   : >> { %1743 = vmatprep.subr.bf16.mxu1 %v1930_v3 }
  0x5d   : >> { %1724 = vmatpush3.bf16.msra.mxu0 %v1876_v52 }
  0x5e   : >> { %1744 = vmatpush3.bf16.msra.mxu1 %v1877_v53  ;;  %1725 = vmatprep.subr.bf16.mxu0 %v1930_v3 }
  0x5f   : >> { %1745 = vmatprep.subr.bf16.mxu1 %v1930_v3 }
  0x61   : >> { %1726 = vmatpush3.bf16.msra.mxu0 %v1878_v54 }
  0x62   : >> { %1746 = vmatpush3.bf16.msra.mxu1 %v1879_v57  ;;  %1727 = vmatprep.subr.bf16.mxu0 %v1930_v3 }
  0x63   : >> { %1747 = vmatprep.subr.bf16.mxu1 %v1930_v3 }
  0x65   : >> { %1728 = vmatpush3.bf16.msra.mxu0 %v1880_v59 }
  0x66   : >> { %1748 = vmatpush3.bf16.msra.mxu1 %v1881_v60  ;;  %1729 = vmatprep.subr.bf16.mxu0 %v1930_v3 }
  0x67   : >> { %1749 = vmatprep.subr.bf16.mxu1 %v1930_v3 }
  0x69   : >> { %1730 = vmatpush3.bf16.msra.mxu0 %v1882_v62 }
  0x6a   : >> { %1750 = vmatpush3.bf16.msra.mxu1 %v1883_v63  ;;  %1731 = vmatprep.subr.bf16.mxu0 %v1930_v3 }
  0x6b   : >> { %1751 = vmatprep.subr.bf16.mxu1 %v1930_v3 }
  0x6d   : >> { %1732 = vmatpush3.bf16.msra.mxu0 %v1884_v6 }
  0x6e   : >> { %1752 = vmatpush3.bf16.msra.mxu1 %v1885_v8  ;;  %1757 = vmatprep.subr.bf16.mxu0 %v1930_v3 }
  0x6f   : >> { %1777 = vmatprep.subr.bf16.mxu1 %v1930_v3 }
  0x70   : >> { %1734 = vmatmul.mubr.bf16.vlgmr.msra.gmra.mxu0 %v687_v9 }
  0x71   : >> { %1758 = vmatpush3.bf16.msra.mxu0 %v1887_v10  ;;  %1754 = vmatmul.mubr.bf16.vlgmr.msra.gmra.mxu1 %v799_v11 }
  0x72   : >> { %1778 = vmatpush3.bf16.msra.mxu1 %v1889_v12  ;;  %1759 = vmatprep.subr.bf16.mxu0 %v1930_v3 }
  0x73   : >> { %1779 = vmatprep.subr.bf16.mxu1 %v1930_v3  ;;  %1773 = vmatprep.mubr.msk.bf16.mxu0 %vm1931_vm0, %v1930_v3 }
  0x74   : >> { %1793 = vmatprep.mubr.msk.bf16.mxu1 %vm1931_vm0, %v1930_v3 }
  0x75   : >> { %1760 = vmatpush3.bf16.msra.mxu0 %v1890_v13 }
  0x76   : >> { %1780 = vmatpush3.bf16.msra.mxu1 %v1891_v14  ;;  %1761 = vmatprep.subr.bf16.mxu0 %v1930_v3 }
  0x77   : >> { %1781 = vmatprep.subr.bf16.mxu1 %v1930_v3 }
  0x79   : >> { %1762 = vmatpush3.bf16.msra.mxu0 %v1892_v15 }
  0x7a   : >> { %1782 = vmatpush3.bf16.msra.mxu1 %v1893_v16  ;;  %1763 = vmatprep.subr.bf16.mxu0 %v1930_v3 }
  0x7b   : >> { %1783 = vmatprep.subr.bf16.mxu1 %v1930_v3 }
  0x7d   : >> { %1764 = vmatpush3.bf16.msra.mxu0 %v1894_v17 }
  0x7e   : >> { %1784 = vmatpush3.bf16.msra.mxu1 %v1895_v18  ;;  %1765 = vmatprep.subr.bf16.mxu0 %v1930_v3 }
  0x7f   : >> { %1785 = vmatprep.subr.bf16.mxu1 %v1930_v3 }
  0x81   : >> { %1766 = vmatpush3.bf16.msra.mxu0 %v1896_v19 }
  0x82   : >> { %1786 = vmatpush3.bf16.msra.mxu1 %v1897_v20  ;;  %1767 = vmatprep.subr.bf16.mxu0 %v1930_v3 }
  0x83   : >> { %1787 = vmatprep.subr.bf16.mxu1 %v1930_v3 }
  0x85   : >> { %1768 = vmatpush3.bf16.msra.mxu0 %v1898_v23 }
  0x86   : >> { %1788 = vmatpush3.bf16.msra.mxu1 %v1899_v25  ;;  %1769 = vmatprep.subr.bf16.mxu0 %v1930_v3 }
  0x87   : >> { %1789 = vmatprep.subr.bf16.mxu1 %v1930_v3 }
  0x89   : >> { %1770 = vmatpush3.bf16.msra.mxu0 %v1900_v26 }
  0x8a   : >> { %1790 = vmatpush3.bf16.msra.mxu1 %v1901_v28  ;;  %1771 = vmatprep.subr.bf16.mxu0 %v1930_v3 }
  0x8b   : >> { %1791 = vmatprep.subr.bf16.mxu1 %v1930_v3 }
  0x8d   : >> { %1772 = vmatpush3.bf16.msra.mxu0 %v1902_v29 }
  0x8e   : >> { %1792 = vmatpush3.bf16.msra.mxu1 %v1903_v32  ;;  %1797 = vmatprep.subr.bf16.mxu0 %v1930_v3 }
  0x90   : >> { %1774 = vmatmul.mubr.bf16.vlgmr.msra.gmra.mxu0 %v1471_v33 }
  0x91   : >> { %1798 = vmatpush3.bf16.msra.mxu0 %v1904_v34  ;;  %1794 = vmatmul.mubr.bf16.vlgmr.msra.gmra.mxu1 %v1031_v35 }
  0x92   : >> { %1799 = vmatprep.subr.bf16.mxu0 %v1930_v3  ;;  %1813 = vmatprep.mubr.msk.bf16.mxu0 %vm1931_vm0, %v1930_v3 }
  0x95   : >> { %1800 = vmatpush3.bf16.msra.mxu0 %v1906_v36 }
  0x96   : >> { %1801 = vmatprep.subr.bf16.mxu0 %v1930_v3 }
  0x99   : >> { %1802 = vmatpush3.bf16.msra.mxu0 %v1907_v37 }
  0x9a   : >> { %1803 = vmatprep.subr.bf16.mxu0 %v1930_v3 }
  0x9d   : >> { %1804 = vmatpush3.bf16.msra.mxu0 %v1908_v38 }
  0x9e   : >> { %1805 = vmatprep.subr.bf16.mxu0 %v1930_v3 }
  0xa1   : >> { %1806 = vmatpush3.bf16.msra.mxu0 %v1909_v39 }
  0xa2   : >> { %1807 = vmatprep.subr.bf16.mxu0 %v1930_v3 }
  0xa5   : >> { %1808 = vmatpush3.bf16.msra.mxu0 %v1910_v40 }
  0xa6   : >> { %1809 = vmatprep.subr.bf16.mxu0 %v1930_v3 }
  0xa9   : >> { %1810 = vmatpush3.bf16.msra.mxu0 %v1911_v41 }
  0xaa   : >> { %1811 = vmatprep.subr.bf16.mxu0 %v1930_v3 }
  0xad   : >> { %1812 = vmatpush3.bf16.msra.mxu0 %v1912_v44 }
  0xb0   : >> { %1814 = vmatmul.mubr.bf16.vlgmr.msra.gmra.mxu0 %v1143_v45 }
  0xf0   : >> { %v340_v46 = vpop.f32.mrf.mxu0 }
  0xf1   : >> { %v428_v47 = vpop.f32.mrf.mxu1 }
  0xf2   : >> { %v429_v48 = vadd.f32 %v428_v47, %v340_v46  ;;  %v1655_v49 = vpop.f32.mrf.mxu0 }
  0xf3   : >> { %v1675_v50 = vpop.f32.mrf.mxu1 }
  0xf4   : >> { %v343_v51 = vpop.f32.mrf.mxu0 }
  0xf5   : >> { %v431_v52 = vpop.f32.mrf.mxu1 }
  0xf6   : >> { %v1656_v53 = vpop.f32.mrf.mxu0 }
  0xf7   : >> { %v1676_v54 = vpop.f32.mrf.mxu1 }
 0x110   : >> { %v539_v55 = vpop.f32.mrf.mxu0 }
 0x111   : >> { %v545_v56 = vadd.f32 %v539_v55, %v429_v48  ;;  %v650_v57 = vpop.f32.mrf.mxu1 }
 0x112   : >> { %v1695_v58 = vpop.f32.mrf.mxu0 }
 0x113   : >> { %v656_v59 = vadd.f32 %v650_v57, %v545_v56  ;;  %v1715_v60 = vpop.f32.mrf.mxu1 }
 0x114   : >> { %v542_v61 = vpop.f32.mrf.mxu0 }
 0x115   : >> { %v653_v3 = vpop.f32.mrf.mxu1 }
 0x116   : >> { %v1696_v62 = vpop.f32.mrf.mxu0 }
 0x117   : >> { %v1716_v63 = vpop.f32.mrf.mxu1 }
 0x130   : >> { %v771_v2 = vpop.f32.mrf.mxu0 }
 0x131   : >> { %v883_v4 = vpop.f32.mrf.mxu1  ;;  %v777_v19 = vadd.f32 %v771_v2, %v656_v59 }
 0x132   : >> { %v1735_v5 = vpop.f32.mrf.mxu0 }
 0x133   : >> { %v1755_v6 = vpop.f32.mrf.mxu1  ;;  %v889_v20 = vadd.f32 %v883_v4, %v777_v19 }
 0x134   : >> { %v774_v7 = vpop.f32.mrf.mxu0 }
 0x135   : >> { %v886_v8 = vpop.f32.mrf.mxu1 }
 0x136   : >> { %v1736_v9 = vpop.f32.mrf.mxu0 }
 0x137   : >> { %v1756_v10 = vpop.f32.mrf.mxu1 }
 0x150   : >> { %v994_v11 = vpop.f32.mrf.mxu0 }
 0x151   : >> { %v1115_v12 = vpop.f32.mrf.mxu1  ;;  %v1000_v21 = vadd.f32 %v994_v11, %v889_v20 }
 0x152   : >> { %v1775_v13 = vpop.f32.mrf.mxu0 }
 0x153   : >> { %v1795_v14 = vpop.f32.mrf.mxu1  ;;  %v1121_v22 = vadd.f32 %v1115_v12, %v1000_v21 }
 0x154   : >> { %v997_v15 = vpop.f32.mrf.mxu0 }
 0x155   : >> { %v1118_v16 = vpop.f32.mrf.mxu1 }
 0x156   : >> { %v1776_v17 = vpop.f32.mrf.mxu0 }
 0x157   : >> { %v1796_v18 = vpop.f32.mrf.mxu1 }
 0x170   : >> { %v1227_v23 = vpop.f32.mrf.mxu0 }
 0x171   : >> { %v1233_v24 = vadd.f32 %v1227_v23, %v1121_v22 }
 0x172   : >> { %v1815_v25 = vpop.f32.mrf.mxu0 }
 0x173   : >> { %v1240_v26 = vmul.f32 %v1968_v0, %v1233_v24 }
 0x174   : >> { %v1230_v27 = vpop.f32.mrf.mxu0 }
 0x175   : >> { %v1247_v28 = vadd.f32 %v1973_v1, %v1240_v26 }
 0x176   : >> { %v1816_v29 = vpop.f32.mrf.mxu0 }
 0x177   : >> { %v1248_v30 = vmax.f32 %v1247_v28, 0.0  ;;  %205 = sbr.rel (!%p203_p4) target bundleno = 15 (0xf), region = 85 }
 0x179   : >> { %v1249_v31 = vpack.c.bf16 %v1248_v30, %v1248_v30 }
 0x17b   : >> { %1252 = vst [vmem:[%s1251_s26] sm:$0xf] %v1249_v31 }
 0x17c PF: > { %s14_s15 = sadd.s32 1, %s1924_s15  }
 0x17d   : > { %p11_p5 = scmp.ge.s32.totalorder %s14_s15, 4  }
 0x17f   :  { %13 = sbr.rel (!%p11_p5) target bundleno = 1 (0x1), region = 96 }

// kernel: _lambda_.15
= control target key start
LH: loop header
LB: loop body
LE: loop exit
PB: predicated region body
PF: predicated region fallthrough
CT: control target
= control target key end

     0   :  { %s2032_s18 = smov 0   ;;  %s2406_s0 = inlined_call_operand.vmem [shape: bf16[2,10,10,128], index: 0, kind: input, shape index: {}]   ;;  %s2407_s1 = inlined_call_operand.vmem [shape: bf16[9,128,128], index: 1, kind: input, shape index: {}]   ;;  %s2408_s2 = inlined_call_operand.vmem [shape: f32[1,128], index: 2, kind: input, shape index: {}]   ;;  %s2409_s3 = inlined_call_operand.vmem [shape: f32[1,128], index: 3, kind: input, shape index: {}]   ;;  %s2410_s4 = inlined_call_operand.vmem [shape: bf16[2,8,8,128], index: 4, kind: input, shape index: {}]   ;;  %s2411_s5 = inlined_call_operand.vmem [shape: bf16[2,8,8,128], index: 5, kind: output, shape index: {}]  }
   0x1 LB: > { %s1389_s19 = sadd.s32 4294967295, %s1994_s18   ;;  %p1393_p0 = scmp.ge.s32.totalorder %s1994_s18, 1  ;;  %s1994_s18 = sphi %s2032_s18, %s15_s18  }
   0x2   : > { %p197_p1 = scmp.lt.s32.totalorder %s1994_s18, 3 }
   0x4   : > { %p198_p2 = pnand %p1393_p0, %p197_p1 }
   0x5   : > { %p230_p3 = scmp.lt.s32.totalorder (!%p198_p2), %s1389_s19, 1  ;;  %s2065_s10 = smov (!%p198_p2), 0  }
   0x6   : > { %201 = sbr.rel (%p198_p2) target bundleno = 382 (0x17e), region = 40 }
   0xb   : > { %v2043_v0 = vld [vmem:[%s2408_s2] ss:$0 sm:$0xff]  ;;  %s2413_s19 = smov (!%p230_p3, %s1389_s19), 1 }
   0xc   : > { %v2048_v1 = vld [vmem:[%s2409_s3] ss:$0 sm:$0xff]  ;;  %s1887_s24 = smul.u32 80, %s2413_s19  ;;  %s1623_s25 = sshll.u32 %s2413_s19, 5 }
   0xd   : > { %s2053_s28 = scalar_lea.vmem %s2410_s4, %s1623_s25  ;;  %s2058_s6 = scalar_lea.vmem %s2411_s5, %s1623_s25 }
   0xe   : > { %s2063_s9 = scalar_lea.vmem %s2406_s0, %s1887_s24 }
   0xf LB: >> { %v1906_v2 = vld [vmem:[%s2407_s1 + $0x78] sm:$0xff]   ;;  %v2000_v3 = vmov 0.0   ;;  %v1908_v5 = vld [vmem:[%s2407_s1 + $0x70] sm:$0xff]   ;;  %vm2001_vm0 = vmmov 0   ;;  %v1910_v7 = vld [vmem:[%s2407_s1 + $0x68] sm:$0xff]   ;;  %s1625_s26 = sshll.u32 %s1998_s10, 3  ;;  %s1998_s10 = sphi %s2065_s10, %s253_s10  }
  0x10   : >> { %1707 = vmatprep.subr.bf16.mxu0 %v2000_v3  ;;  %1727 = vmatprep.subr.bf16.mxu1 %v2000_v3  ;;  %v1907_v4 = vld [vmem:[%s2407_s1 + $0x38] sm:$0xff]   ;;  %v1909_v6 = vld [vmem:[%s2407_s1 + $0x30] sm:$0xff]   ;;  %v1911_v8 = vld [vmem:[%s2407_s1 + $0x28] sm:$0xff]   ;;  %s2108_s30 = scalar_lea.vmem %s2063_s9, %s1625_s26 }
  0x11   : >> { %1708 = vmatpush3.bf16.msra.mxu0 %v1906_v2  ;;  %1723 = vmatprep.mubr.msk.bf16.mxu0 %vm2001_vm0, %v2000_v3  ;;  %v1912_v9 = vld [vmem:[%s2407_s1 + $0x60] sm:$0xff]   ;;  %v1914_v11 = vld [vmem:[%s2407_s1 + $0x58] sm:$0xff]   ;;  %v1916_v16 = vld [vmem:[%s2407_s1 + $0x50] sm:$0xff]  }
  0x12   : >> { %1728 = vmatpush3.bf16.msra.mxu1 %v1907_v4  ;;  %1709 = vmatprep.subr.bf16.mxu0 %v2000_v3  ;;  %v1913_v10 = vld [vmem:[%s2407_s1 + $0x20] sm:$0xff]   ;;  %v1915_v12 = vld [vmem:[%s2407_s1 + $0x18] sm:$0xff]   ;;  %v1917_v17 = vld [vmem:[%s2407_s1 + $0x10] sm:$0xff]  }
  0x13   : >> { %1729 = vmatprep.subr.bf16.mxu1 %v2000_v3  ;;  %1743 = vmatprep.mubr.msk.bf16.mxu1 %vm2001_vm0, %v2000_v3  ;;  %v257_v13 = vld [vmem:[%s2108_s30] sm:$0xf]  ;;  %v2120_v14 = vld [vmem:[%s2108_s30 + $0x4] sm:$0x1]  ;;  %v1918_v19 = vld [vmem:[%s2407_s1 + $0x48] sm:$0xff]  }
  0x14   : >> { %v1417_v15 = vcombine.low %v257_v13, %v2120_v14  ;;  %v1919_v20 = vld [vmem:[%s2407_s1 + $0x8] sm:$0xff]   ;;  %v1920_v23 = vld [vmem:[%s2407_s1 + $0x40] sm:$0xff]   ;;  %v1923_v26 = vld [vmem:[%s2407_s1 + $0xb8] sm:$0xff]  }
  0x15   : >> { %1710 = vmatpush3.bf16.msra.mxu0 %v1908_v5  ;;  %v1921_v24 = vld [vmem:[%s2407_s1] sm:$0xff]   ;;  %v1924_v27 = vld [vmem:[%s2407_s1 + $0xf8] sm:$0xff]   ;;  %v1925_v28 = vld [vmem:[%s2407_s1 + $0xb0] sm:$0xff]  }
  0x16   : >> { %1730 = vmatpush3.bf16.msra.mxu1 %v1909_v6  ;;  %1711 = vmatprep.subr.bf16.mxu0 %v2000_v3  ;;  %v300_v18 = vshll.u32 %v1417_v15, 16  ;;  %v298_v21 = vshrl.u32 %v1417_v15, 16  ;;  %v1926_v29 = vld [vmem:[%s2407_s1 + $0xf0] sm:$0xff]   ;;  %v1927_v30 = vld [vmem:[%s2407_s1 + $0xa8] sm:$0xff]   ;;  %v1929_v32 = vld [vmem:[%s2407_s1 + $0xa0] sm:$0xff]  }
  0x17   : >> { %1731 = vmatprep.subr.bf16.mxu1 %v2000_v3  ;;  %v1928_v31 = vld [vmem:[%s2407_s1 + $0xe8] sm:$0xff]   ;;  %v1930_v33 = vld [vmem:[%s2407_s1 + $0xe0] sm:$0xff]   ;;  %v1931_v34 = vld [vmem:[%s2407_s1 + $0x98] sm:$0xff]  }
  0x18   : >> { %v302_v22 = vrot.slane %v300_v18, 1  ;;  %v1932_v35 = vld [vmem:[%s2407_s1 + $0xd8] sm:$0xff]   ;;  %v1933_v36 = vld [vmem:[%s2407_s1 + $0x90] sm:$0xff]   ;;  %v1935_v38 = vld [vmem:[%s2407_s1 + $0x88] sm:$0xff]  }
  0x19   : >> { %1712 = vmatpush3.bf16.msra.mxu0 %v1910_v7  ;;  %v1934_v37 = vld [vmem:[%s2407_s1 + $0xd0] sm:$0xff]   ;;  %v1936_v39 = vld [vmem:[%s2407_s1 + $0xc8] sm:$0xff]   ;;  %v481_v40 = vld [vmem:[%s2108_s30] sm:$0xe] }
  0x1a   : >> { %1732 = vmatpush3.bf16.msra.mxu1 %v1911_v8  ;;  %1713 = vmatprep.subr.bf16.mxu0 %v2000_v3  ;;  %v303_v25 = vor.u32 %v302_v22, %v298_v21  ;;  %v1450_v41 = vcombine.low %v481_v40, %v2120_v14  ;;  %v1937_v42 = vld [vmem:[%s2407_s1 + $0x80] sm:$0xff]   ;;  %v1940_v45 = vld [vmem:[%s2407_s1 + $0x138] sm:$0xff]   ;;  %v1460_v46 = vld [vmem:[%s2108_s30 + $0x8] sm:$0xf] }
  0x1b   : >> { %1733 = vmatprep.subr.bf16.mxu1 %v2000_v3  ;;  %v1938_v43 = vld [vmem:[%s2407_s1 + $0xc0] sm:$0xff]   ;;  %v1941_v47 = vld [vmem:[%s2407_s1 + $0x178] sm:$0xff]   ;;  %v1942_v48 = vld [vmem:[%s2407_s1 + $0x130] sm:$0xff]  }
  0x1c   : >> { %v502_v44 = vrot.slane %v1450_v41, 1  ;;  %v1943_v49 = vld [vmem:[%s2407_s1 + $0x170] sm:$0xff]   ;;  %v1944_v50 = vld [vmem:[%s2407_s1 + $0x128] sm:$0xff]   ;;  %v1946_v52 = vld [vmem:[%s2407_s1 + $0x120] sm:$0xff]  }
  0x1d   : >> { %1714 = vmatpush3.bf16.msra.mxu0 %v1912_v9  ;;  %v1945_v51 = vld [vmem:[%s2407_s1 + $0x168] sm:$0xff]   ;;  %v1947_v53 = vld [vmem:[%s2407_s1 + $0x160] sm:$0xff]   ;;  %v1948_v54 = vld [vmem:[%s2407_s1 + $0x118] sm:$0xff]  }
  0x1e   : >> { %1734 = vmatpush3.bf16.msra.mxu1 %v1913_v10  ;;  %1715 = vmatprep.subr.bf16.mxu0 %v2000_v3  ;;  %v1485_v55 = vld [vmem:[%s2108_s30 + $0x8] sm:$0xf]  ;;  %v1486_v56 = vld [vmem:[%s2108_s30 + $0xc] sm:$0x1]  ;;  %v1949_v57 = vld [vmem:[%s2407_s1 + $0x158] sm:$0xff]  }
  0x1f   : >> { %1735 = vmatprep.subr.bf16.mxu1 %v2000_v3  ;;  %v1503_v58 = vcombine.low %v1485_v55, %v1486_v56  ;;  %v1950_v59 = vld [vmem:[%s2407_s1 + $0x110] sm:$0xff]   ;;  %v1952_v62 = vld [vmem:[%s2407_s1 + $0x108] sm:$0xff]   ;;  %v1954_v6 = vld [vmem:[%s2407_s1 + $0x100] sm:$0xff]  }
  0x20   : >> { %v1951_v60 = vld [vmem:[%s2407_s1 + $0x150] sm:$0xff]   ;;  %v1953_v63 = vld [vmem:[%s2407_s1 + $0x148] sm:$0xff]   ;;  %v1955_v8 = vld [vmem:[%s2407_s1 + $0x140] sm:$0xff]  }
  0x21   : >> { %1716 = vmatpush3.bf16.msra.mxu0 %v1914_v11  ;;  %v731_v61 = vshll.u32 %v1503_v58, 16  ;;  %v1512_v2 = vld [vmem:[%s2108_s30 + $0x8] sm:$0xe]  ;;  %v729_v4 = vshrl.u32 %v1503_v58, 16  ;;  %v1957_v10 = vld [vmem:[%s2407_s1 + $0x1b8] sm:$0xff]   ;;  %v1961_v14 = vld [vmem:[%s2407_s1 + $0x1f0] sm:$0xff]  }
  0x22   : >> { %1736 = vmatpush3.bf16.msra.mxu1 %v1915_v12  ;;  %1717 = vmatprep.subr.bf16.mxu0 %v2000_v3  ;;  %v1529_v7 = vcombine.low %v1512_v2, %v1486_v56  ;;  %v1959_v12 = vld [vmem:[%s2407_s1 + $0x1f8] sm:$0xff]   ;;  %v1962_v15 = vld [vmem:[%s2407_s1 + $0x1a8] sm:$0xff]   ;;  %v1965_v18 = vld [vmem:[%s2407_s1 + $0x1e0] sm:$0xff]  }
  0x23   : >> { %1737 = vmatprep.subr.bf16.mxu1 %v2000_v3  ;;  %v733_v5 = vrot.slane %v731_v61, 1  ;;  %v1564_v21 = vld [vmem:[%s2108_s30 + $0x10] sm:$0xf]  ;;  %v1565_v22 = vld [vmem:[%s2108_s30 + $0x14] sm:$0x1]  ;;  %v1981_v41 = vld [vmem:[%s2407_s1 + $0x208] sm:$0xff]  }
  0x24   : >> { %v846_v11 = vrot.slane %v1529_v7, 1  ;;  %v1980_v40 = vld [vmem:[%s2407_s1 + $0x210] sm:$0xff]  }
  0x25   : >> { %1718 = vmatpush3.bf16.msra.mxu0 %v1916_v16  ;;  %v734_v9 = vor.u32 %v733_v5, %v729_v4  ;;  %v1963_v16 = vld [vmem:[%s2407_s1 + $0x1e8] sm:$0xff]  }
  0x26   : >> { %1738 = vmatpush3.bf16.msra.mxu1 %v1917_v17  ;;  %1719 = vmatprep.subr.bf16.mxu0 %v2000_v3  ;;  %v1964_v17 = vld [vmem:[%s2407_s1 + $0x1a0] sm:$0xff]  }
  0x27   : >> { %1739 = vmatprep.subr.bf16.mxu1 %v2000_v3 }
  0x29   : >> { %1720 = vmatpush3.bf16.msra.mxu0 %v1918_v19  ;;  %v1966_v19 = vld [vmem:[%s2407_s1 + $0x198] sm:$0xff]  }
  0x2a   : >> { %1740 = vmatpush3.bf16.msra.mxu1 %v1919_v20  ;;  %1721 = vmatprep.subr.bf16.mxu0 %v2000_v3  ;;  %v1967_v20 = vld [vmem:[%s2407_s1 + $0x1d8] sm:$0xff]  }
  0x2b   : >> { %1741 = vmatprep.subr.bf16.mxu1 %v2000_v3 }
  0x2d   : >> { %1722 = vmatpush3.bf16.msra.mxu0 %v1920_v23  ;;  %v1968_v23 = vld [vmem:[%s2407_s1 + $0x190] sm:$0xff]  }
  0x2e   : >> { %1742 = vmatpush3.bf16.msra.mxu1 %v1921_v24  ;;  %1747 = vmatprep.subr.bf16.mxu0 %v2000_v3  ;;  %v1582_v24 = vcombine.low %v1564_v21, %v1565_v22 }
  0x2f   : >> { %1767 = vmatprep.subr.bf16.mxu1 %v2000_v3 }
  0x30   : >> { %1724 = vmatmul.mubr.bf16.vlgmr.msra.gmra.mxu0 %v303_v25  ;;  %v1969_v25 = vld [vmem:[%s2407_s1 + $0x1d0] sm:$0xff]  }
  0x31   : >> { %1744 = vmatmul.mubr.bf16.vlgmr.msra.gmra.mxu1 %v257_v13  ;;  %1748 = vmatpush3.bf16.msra.mxu0 %v1923_v26  ;;  %v1960_v13 = vld [vmem:[%s2407_s1 + $0x1b0] sm:$0xff]   ;;  %v1970_v26 = vld [vmem:[%s2407_s1 + $0x188] sm:$0xff]  }
  0x32   : >> { %1768 = vmatpush3.bf16.msra.mxu1 %v1924_v27  ;;  %1749 = vmatprep.subr.bf16.mxu0 %v2000_v3  ;;  %v1075_v27 = vshll.u32 %v1582_v24, 16 }
  0x33   : >> { %1769 = vmatprep.subr.bf16.mxu1 %v2000_v3  ;;  %1763 = vmatprep.mubr.msk.bf16.mxu0 %vm2001_vm0, %v2000_v3 }
  0x34   : >> { %1783 = vmatprep.mubr.msk.bf16.mxu1 %vm2001_vm0, %v2000_v3 }
  0x35   : >> { %1750 = vmatpush3.bf16.msra.mxu0 %v1925_v28  ;;  %v1971_v28 = vld [vmem:[%s2407_s1 + $0x1c8] sm:$0xff]  }
  0x36   : >> { %1770 = vmatpush3.bf16.msra.mxu1 %v1926_v29  ;;  %1751 = vmatprep.subr.bf16.mxu0 %v2000_v3  ;;  %v1972_v29 = vld [vmem:[%s2407_s1 + $0x180] sm:$0xff]  }
  0x37   : >> { %1771 = vmatprep.subr.bf16.mxu1 %v2000_v3 }
  0x39   : >> { %1752 = vmatpush3.bf16.msra.mxu0 %v1927_v30  ;;  %v1073_v30 = vshrl.u32 %v1582_v24, 16 }
  0x3a   : >> { %1772 = vmatpush3.bf16.msra.mxu1 %v1928_v31  ;;  %1753 = vmatprep.subr.bf16.mxu0 %v2000_v3  ;;  %v1077_v31 = vrot.slane %v1075_v27, 1 }
  0x3b   : >> { %1773 = vmatprep.subr.bf16.mxu1 %v2000_v3 }
  0x3d   : >> { %1754 = vmatpush3.bf16.msra.mxu0 %v1929_v32  ;;  %v1973_v32 = vld [vmem:[%s2407_s1 + $0x1c0] sm:$0xff]  }
  0x3e   : >> { %1774 = vmatpush3.bf16.msra.mxu1 %v1930_v33  ;;  %1755 = vmatprep.subr.bf16.mxu0 %v2000_v3  ;;  %v1539_v33 = vld [vmem:[%s2108_s30 + $0x10] sm:$0xf] }
  0x3f   : >> { %1775 = vmatprep.subr.bf16.mxu1 %v2000_v3 }
  0x41   : >> { %1756 = vmatpush3.bf16.msra.mxu0 %v1931_v34  ;;  %v1974_v34 = vld [vmem:[%s2407_s1 + $0x238] sm:$0xff]  }
  0x42   : >> { %1776 = vmatpush3.bf16.msra.mxu1 %v1932_v35  ;;  %1757 = vmatprep.subr.bf16.mxu0 %v2000_v3  ;;  %v1078_v35 = vor.u32 %v1077_v31, %v1073_v30 }
  0x43   : >> { %1777 = vmatprep.subr.bf16.mxu1 %v2000_v3 }
  0x45   : >> { %1758 = vmatpush3.bf16.msra.mxu0 %v1933_v36  ;;  %v1976_v36 = vld [vmem:[%s2407_s1 + $0x230] sm:$0xff]  }
  0x46   : >> { %1778 = vmatpush3.bf16.msra.mxu1 %v1934_v37  ;;  %1759 = vmatprep.subr.bf16.mxu0 %v2000_v3  ;;  %v1977_v37 = vld [vmem:[%s2407_s1 + $0x228] sm:$0xff]  }
  0x47   : >> { %1779 = vmatprep.subr.bf16.mxu1 %v2000_v3 }
  0x49   : >> { %1760 = vmatpush3.bf16.msra.mxu0 %v1935_v38  ;;  %v1978_v38 = vld [vmem:[%s2407_s1 + $0x220] sm:$0xff]  }
  0x4a   : >> { %1780 = vmatpush3.bf16.msra.mxu1 %v1936_v39  ;;  %1761 = vmatprep.subr.bf16.mxu0 %v2000_v3  ;;  %v1979_v39 = vld [vmem:[%s2407_s1 + $0x218] sm:$0xff]  }
  0x4b   : >> { %1781 = vmatprep.subr.bf16.mxu1 %v2000_v3 }
  0x4d   : >> { %1762 = vmatpush3.bf16.msra.mxu0 %v1937_v42  ;;  %v1591_v42 = vld [vmem:[%s2108_s30 + $0x10] sm:$0xe]  ;;  %s1619_s30 = sshll.u32 %s1998_s10, 2  ;;  %s253_s10 = sadd.s32 1, %s1998_s10  }
  0x4e   : >> { %1782 = vmatpush3.bf16.msra.mxu1 %v1938_v43  ;;  %1787 = vmatprep.subr.bf16.mxu0 %v2000_v3  ;;  %v1608_v43 = vcombine.low %v1591_v42, %v1565_v22  ;;  %s1296_s24 = scalar_lea.vmem %s2053_s28, %s1619_s30  ;;  %s1303_s25 = scalar_lea.vmem %s2058_s6, %s1619_s30 }
  0x4f   : >> { %1807 = vmatprep.subr.bf16.mxu1 %v2000_v3  ;;  %v1297_v24 = vld [vmem:[%s1296_s24] sm:$0xf]  ;;  %p250_p4 = scmp.ge.s32.totalorder %s253_s10, 8  }
  0x50   : >> { %1764 = vmatmul.mubr.bf16.vlgmr.msra.gmra.mxu0 %v502_v44  ;;  %v1982_v44 = vld [vmem:[%s2407_s1 + $0x200] sm:$0xff]  }
  0x51   : >> { %1788 = vmatpush3.bf16.msra.mxu0 %v1940_v45  ;;  %1784 = vmatmul.mubr.bf16.vlgmr.msra.gmra.mxu1 %v1460_v46  ;;  %v1190_v45 = vrot.slane %v1608_v43, 1 }
  0x52   : >> { %1808 = vmatpush3.bf16.msra.mxu1 %v1941_v47  ;;  %1789 = vmatprep.subr.bf16.mxu0 %v2000_v3 }
  0x53   : >> { %1809 = vmatprep.subr.bf16.mxu1 %v2000_v3  ;;  %1803 = vmatprep.mubr.msk.bf16.mxu0 %vm2001_vm0, %v2000_v3 }
  0x54   : >> { %1823 = vmatprep.mubr.msk.bf16.mxu1 %vm2001_vm0, %v2000_v3 }
  0x55   : >> { %1790 = vmatpush3.bf16.msra.mxu0 %v1942_v48 }
  0x56   : >> { %1810 = vmatpush3.bf16.msra.mxu1 %v1943_v49  ;;  %1791 = vmatprep.subr.bf16.mxu0 %v2000_v3 }
  0x57   : >> { %1811 = vmatprep.subr.bf16.mxu1 %v2000_v3 }
  0x59   : >> { %1792 = vmatpush3.bf16.msra.mxu0 %v1944_v50 }
  0x5a   : >> { %1812 = vmatpush3.bf16.msra.mxu1 %v1945_v51  ;;  %1793 = vmatprep.subr.bf16.mxu0 %v2000_v3 }
  0x5b   : >> { %1813 = vmatprep.subr.bf16.mxu1 %v2000_v3 }
  0x5d   : >> { %1794 = vmatpush3.bf16.msra.mxu0 %v1946_v52 }
  0x5e   : >> { %1814 = vmatpush3.bf16.msra.mxu1 %v1947_v53  ;;  %1795 = vmatprep.subr.bf16.mxu0 %v2000_v3 }
  0x5f   : >> { %1815 = vmatprep.subr.bf16.mxu1 %v2000_v3 }
  0x61   : >> { %1796 = vmatpush3.bf16.msra.mxu0 %v1948_v54 }
  0x62   : >> { %1816 = vmatpush3.bf16.msra.mxu1 %v1949_v57  ;;  %1797 = vmatprep.subr.bf16.mxu0 %v2000_v3 }
  0x63   : >> { %1817 = vmatprep.subr.bf16.mxu1 %v2000_v3 }
  0x65   : >> { %1798 = vmatpush3.bf16.msra.mxu0 %v1950_v59 }
  0x66   : >> { %1818 = vmatpush3.bf16.msra.mxu1 %v1951_v60  ;;  %1799 = vmatprep.subr.bf16.mxu0 %v2000_v3 }
  0x67   : >> { %1819 = vmatprep.subr.bf16.mxu1 %v2000_v3 }
  0x69   : >> { %1800 = vmatpush3.bf16.msra.mxu0 %v1952_v62 }
  0x6a   : >> { %1820 = vmatpush3.bf16.msra.mxu1 %v1953_v63  ;;  %1801 = vmatprep.subr.bf16.mxu0 %v2000_v3 }
  0x6b   : >> { %1821 = vmatprep.subr.bf16.mxu1 %v2000_v3 }
  0x6d   : >> { %1802 = vmatpush3.bf16.msra.mxu0 %v1954_v6 }
  0x6e   : >> { %1822 = vmatpush3.bf16.msra.mxu1 %v1955_v8  ;;  %1827 = vmatprep.subr.bf16.mxu0 %v2000_v3 }
  0x6f   : >> { %1847 = vmatprep.subr.bf16.mxu1 %v2000_v3 }
  0x70   : >> { %1804 = vmatmul.mubr.bf16.vlgmr.msra.gmra.mxu0 %v734_v9 }
  0x71   : >> { %1828 = vmatpush3.bf16.msra.mxu0 %v1957_v10  ;;  %1824 = vmatmul.mubr.bf16.vlgmr.msra.gmra.mxu1 %v846_v11 }
  0x72   : >> { %1848 = vmatpush3.bf16.msra.mxu1 %v1959_v12  ;;  %1829 = vmatprep.subr.bf16.mxu0 %v2000_v3 }
  0x73   : >> { %1849 = vmatprep.subr.bf16.mxu1 %v2000_v3  ;;  %1843 = vmatprep.mubr.msk.bf16.mxu0 %vm2001_vm0, %v2000_v3 }
  0x74   : >> { %1863 = vmatprep.mubr.msk.bf16.mxu1 %vm2001_vm0, %v2000_v3 }
  0x75   : >> { %1830 = vmatpush3.bf16.msra.mxu0 %v1960_v13 }
  0x76   : >> { %1850 = vmatpush3.bf16.msra.mxu1 %v1961_v14  ;;  %1831 = vmatprep.subr.bf16.mxu0 %v2000_v3 }
  0x77   : >> { %1851 = vmatprep.subr.bf16.mxu1 %v2000_v3 }
  0x79   : >> { %1832 = vmatpush3.bf16.msra.mxu0 %v1962_v15 }
  0x7a   : >> { %1852 = vmatpush3.bf16.msra.mxu1 %v1963_v16  ;;  %1833 = vmatprep.subr.bf16.mxu0 %v2000_v3 }
  0x7b   : >> { %1853 = vmatprep.subr.bf16.mxu1 %v2000_v3 }
  0x7d   : >> { %1834 = vmatpush3.bf16.msra.mxu0 %v1964_v17 }
  0x7e   : >> { %1854 = vmatpush3.bf16.msra.mxu1 %v1965_v18  ;;  %1835 = vmatprep.subr.bf16.mxu0 %v2000_v3 }
  0x7f   : >> { %1855 = vmatprep.subr.bf16.mxu1 %v2000_v3 }
  0x81   : >> { %1836 = vmatpush3.bf16.msra.mxu0 %v1966_v19 }
  0x82   : >> { %1856 = vmatpush3.bf16.msra.mxu1 %v1967_v20  ;;  %1837 = vmatprep.subr.bf16.mxu0 %v2000_v3 }
  0x83   : >> { %1857 = vmatprep.subr.bf16.mxu1 %v2000_v3 }
  0x85   : >> { %1838 = vmatpush3.bf16.msra.mxu0 %v1968_v23 }
  0x86   : >> { %1858 = vmatpush3.bf16.msra.mxu1 %v1969_v25  ;;  %1839 = vmatprep.subr.bf16.mxu0 %v2000_v3 }
  0x87   : >> { %1859 = vmatprep.subr.bf16.mxu1 %v2000_v3 }
  0x89   : >> { %1840 = vmatpush3.bf16.msra.mxu0 %v1970_v26 }
  0x8a   : >> { %1860 = vmatpush3.bf16.msra.mxu1 %v1971_v28  ;;  %1841 = vmatprep.subr.bf16.mxu0 %v2000_v3  ;;  %v1298_v28 = vunpack.c.l.bf16 %v1297_v24 }
  0x8b   : >> { %1861 = vmatprep.subr.bf16.mxu1 %v2000_v3 }
  0x8d   : >> { %1842 = vmatpush3.bf16.msra.mxu0 %v1972_v29 }
  0x8e   : >> { %1862 = vmatpush3.bf16.msra.mxu1 %v1973_v32  ;;  %1867 = vmatprep.subr.bf16.mxu0 %v2000_v3 }
  0x90   : >> { %1844 = vmatmul.mubr.bf16.vlgmr.msra.gmra.mxu0 %v1539_v33 }
  0x91   : >> { %1868 = vmatpush3.bf16.msra.mxu0 %v1974_v34  ;;  %1864 = vmatmul.mubr.bf16.vlgmr.msra.gmra.mxu1 %v1078_v35 }
  0x92   : >> { %1869 = vmatprep.subr.bf16.mxu0 %v2000_v3  ;;  %1883 = vmatprep.mubr.msk.bf16.mxu0 %vm2001_vm0, %v2000_v3 }
  0x95   : >> { %1870 = vmatpush3.bf16.msra.mxu0 %v1976_v36 }
  0x96   : >> { %1871 = vmatprep.subr.bf16.mxu0 %v2000_v3 }
  0x99   : >> { %1872 = vmatpush3.bf16.msra.mxu0 %v1977_v37 }
  0x9a   : >> { %1873 = vmatprep.subr.bf16.mxu0 %v2000_v3 }
  0x9d   : >> { %1874 = vmatpush3.bf16.msra.mxu0 %v1978_v38 }
  0x9e   : >> { %1875 = vmatprep.subr.bf16.mxu0 %v2000_v3 }
  0xa1   : >> { %1876 = vmatpush3.bf16.msra.mxu0 %v1979_v39 }
  0xa2   : >> { %1877 = vmatprep.subr.bf16.mxu0 %v2000_v3 }
  0xa5   : >> { %1878 = vmatpush3.bf16.msra.mxu0 %v1980_v40 }
  0xa6   : >> { %1879 = vmatprep.subr.bf16.mxu0 %v2000_v3 }
  0xa9   : >> { %1880 = vmatpush3.bf16.msra.mxu0 %v1981_v41 }
  0xaa   : >> { %1881 = vmatprep.subr.bf16.mxu0 %v2000_v3 }
  0xad   : >> { %1882 = vmatpush3.bf16.msra.mxu0 %v1982_v44 }
  0xb0   : >> { %1884 = vmatmul.mubr.bf16.vlgmr.msra.gmra.mxu0 %v1190_v45 }
  0xf0   : >> { %v387_v46 = vpop.f32.mrf.mxu0 }
  0xf1   : >> { %v475_v47 = vpop.f32.mrf.mxu1 }
  0xf2   : >> { %v476_v48 = vadd.f32 %v475_v47, %v387_v46  ;;  %v1725_v49 = vpop.f32.mrf.mxu0 }
  0xf3   : >> { %v1745_v50 = vpop.f32.mrf.mxu1 }
  0xf4   : >> { %v390_v51 = vpop.f32.mrf.mxu0 }
  0xf5   : >> { %v478_v52 = vpop.f32.mrf.mxu1 }
  0xf6   : >> { %v1726_v53 = vpop.f32.mrf.mxu0 }
  0xf7   : >> { %v1746_v54 = vpop.f32.mrf.mxu1 }
 0x110   : >> { %v586_v55 = vpop.f32.mrf.mxu0 }
 0x111   : >> { %v592_v56 = vadd.f32 %v586_v55, %v476_v48  ;;  %v697_v57 = vpop.f32.mrf.mxu1 }
 0x112   : >> { %v1765_v58 = vpop.f32.mrf.mxu0 }
 0x113   : >> { %v703_v59 = vadd.f32 %v697_v57, %v592_v56  ;;  %v1785_v60 = vpop.f32.mrf.mxu1 }
 0x114   : >> { %v589_v61 = vpop.f32.mrf.mxu0 }
 0x115   : >> { %v700_v3 = vpop.f32.mrf.mxu1 }
 0x116   : >> { %v1766_v62 = vpop.f32.mrf.mxu0 }
 0x117   : >> { %v1786_v63 = vpop.f32.mrf.mxu1 }
 0x130   : >> { %v818_v2 = vpop.f32.mrf.mxu0 }
 0x131   : >> { %v930_v4 = vpop.f32.mrf.mxu1  ;;  %v824_v19 = vadd.f32 %v818_v2, %v703_v59 }
 0x132   : >> { %v1805_v5 = vpop.f32.mrf.mxu0 }
 0x133   : >> { %v1825_v6 = vpop.f32.mrf.mxu1  ;;  %v936_v20 = vadd.f32 %v930_v4, %v824_v19 }
 0x134   : >> { %v821_v7 = vpop.f32.mrf.mxu0 }
 0x135   : >> { %v933_v8 = vpop.f32.mrf.mxu1 }
 0x136   : >> { %v1806_v9 = vpop.f32.mrf.mxu0 }
 0x137   : >> { %v1826_v10 = vpop.f32.mrf.mxu1 }
 0x150   : >> { %v1041_v11 = vpop.f32.mrf.mxu0 }
 0x151   : >> { %v1162_v12 = vpop.f32.mrf.mxu1  ;;  %v1047_v21 = vadd.f32 %v1041_v11, %v936_v20 }
 0x152   : >> { %v1845_v13 = vpop.f32.mrf.mxu0 }
 0x153   : >> { %v1865_v14 = vpop.f32.mrf.mxu1  ;;  %v1168_v22 = vadd.f32 %v1162_v12, %v1047_v21 }
 0x154   : >> { %v1044_v15 = vpop.f32.mrf.mxu0 }
 0x155   : >> { %v1165_v16 = vpop.f32.mrf.mxu1 }
 0x156   : >> { %v1846_v17 = vpop.f32.mrf.mxu0 }
 0x157   : >> { %v1866_v18 = vpop.f32.mrf.mxu1 }
 0x170   : >> { %v1274_v23 = vpop.f32.mrf.mxu0 }
 0x171   : >> { %v1280_v25 = vadd.f32 %v1274_v23, %v1168_v22 }
 0x172   : >> { %v1885_v26 = vpop.f32.mrf.mxu0 }
 0x173   : >> { %v1287_v27 = vmul.f32 %v2043_v0, %v1280_v25 }
 0x174   : >> { %v1277_v29 = vpop.f32.mrf.mxu0 }
 0x175   : >> { %v1294_v30 = vadd.f32 %v2048_v1, %v1287_v27 }
 0x176   : >> { %v1886_v31 = vpop.f32.mrf.mxu0 }
 0x177   : >> { %v1299_v32 = vadd.f32 %v1298_v28, %v1294_v30 }
 0x179   : >> { %v1300_v33 = vmax.f32 %v1299_v32, 0.0  ;;  %252 = sbr.rel (!%p250_p4) target bundleno = 15 (0xf), region = 93 }
 0x17b   : >> { %v1301_v34 = vpack.c.bf16 %v1300_v33, %v1300_v33 }
 0x17d   : >> { %1304 = vst [vmem:[%s1303_s25] sm:$0xf] %v1301_v34 }
 0x17e PF: > { %s15_s18 = sadd.s32 1, %s1994_s18  }
 0x17f   : > { %p12_p5 = scmp.ge.s32.totalorder %s15_s18, 4  }
 0x181   :  { %14 = sbr.rel (!%p12_p5) target bundleno = 1 (0x1), region = 104 }

// kernel: _lambda_.17
= control target key start
LH: loop header
LB: loop body
LE: loop exit
PB: predicated region body
PF: predicated region fallthrough
CT: control target
= control target key end

     0   :  { %s519_s15 = smov 0   ;;  %s581_s0 = inlined_call_operand.vmem [shape: bf16[2,16,4,128], index: 0, kind: input, shape index: {}]   ;;  %s582_s1 = inlined_call_operand.vmem [shape: bf16[1,128,128], index: 1, kind: input, shape index: {}]   ;;  %s583_s2 = inlined_call_operand.vmem [shape: f32[1,128], index: 2, kind: input, shape index: {}]   ;;  %s584_s3 = inlined_call_operand.vmem [shape: f32[1,128], index: 3, kind: input, shape index: {}]   ;;  %s585_s4 = inlined_call_operand.vmem [shape: bf16[2,4,4,128], index: 4, kind: output, shape index: {}]  }
   0x1 LB: > { %s396_s16 = sadd.s32 4294967295, %s486_s15   ;;  %p400_p0 = scmp.ge.s32.totalorder %s486_s15, 1  ;;  %s486_s15 = sphi %s519_s15, %s14_s15  }
   0x2   : > { %p162_p1 = scmp.lt.s32.totalorder %s486_s15, 3 }
   0x4   : > { %p163_p2 = pnand %p400_p0, %p162_p1 }
   0x5   : > { %p188_p3 = scmp.lt.s32.totalorder (!%p163_p2), %s396_s16, 1  ;;  %s543_s29 = smov (!%p163_p2), 0  }
   0x6   : > { %166 = sbr.rel (%p163_p2) target bundleno = 247 (0xf7), region = 36 }
   0xb   : > { %v414_v0 = vld [vmem:[%s583_s2] ss:$0 sm:$0xff]  ;;  %s587_s16 = smov (!%p188_p3, %s396_s16), 1 }
   0xc   : > { %v415_v1 = vld [vmem:[%s584_s3] ss:$0 sm:$0xff]  ;;  %s419_s21 = sshll.u32 %s587_s16, 5  ;;  %s420_s22 = sshll.u32 %s587_s16, 3 }
   0xd   : > { %s536_s25 = scalar_lea.vmem %s581_s0, %s419_s21  ;;  %s541_s28 = scalar_lea.vmem %s585_s4, %s420_s22 }
   0xe LB: >> { %v468_v2 = vld [vmem:[%s582_s1 + $0x38] sm:$0xff]   ;;  %v492_v3 = vmov 0.0   ;;  %v469_v4 = vld [vmem:[%s582_s1 + $0x30] sm:$0xff]   ;;  %vm493_vm0 = vmmov 0   ;;  %v470_v5 = vld [vmem:[%s582_s1 + $0x28] sm:$0xff]   ;;  %s405_s19 = sshll.u32 %s490_s29, 1  ;;  %s490_s29 = sphi %s543_s29, %s206_s29  }
   0xf   : >> { %430 = vmatprep.subr.bf16.mxu0 %v492_v3  ;;  %446 = vmatprep.mubr.msk.bf16.mxu0 %vm493_vm0, %v492_v3  ;;  %v471_v6 = vld [vmem:[%s582_s1 + $0x20] sm:$0xff]   ;;  %v472_v7 = vld [vmem:[%s582_s1 + $0x18] sm:$0xff]   ;;  %v473_v8 = vld [vmem:[%s582_s1 + $0x10] sm:$0xff]   ;;  %s208_s22 = scalar_lea.vmem %s536_s25, %s405_s19  ;;  %s330_s23 = scalar_lea.vmem %s541_s28, %s405_s19 }
  0x10   : >> { %431 = vmatpush3.bf16.msra.mxu0 %v468_v2  ;;  %v474_v9 = vld [vmem:[%s582_s1 + $0x8] sm:$0xff]   ;;  %v475_v10 = vld [vmem:[%s582_s1] sm:$0xff]   ;;  %s206_s29 = sadd.s32 1, %s490_s29  }
  0x11   : >> { %432 = vmatprep.subr.bf16.mxu0 %v492_v3  ;;  %v209_v11 = vld [vmem:[%s208_s22] sm:$0x3]  ;;  %p203_p4 = scmp.ge.s32.totalorder %s206_s29, 4  }
  0x14   : >> { %433 = vmatpush3.bf16.msra.mxu0 %v469_v4 }
  0x15   : >> { %434 = vmatprep.subr.bf16.mxu0 %v492_v3 }
  0x18   : >> { %435 = vmatpush3.bf16.msra.mxu0 %v470_v5 }
  0x19   : >> { %436 = vmatprep.subr.bf16.mxu0 %v492_v3 }
  0x1c   : >> { %437 = vmatpush3.bf16.msra.mxu0 %v471_v6 }
  0x1d   : >> { %438 = vmatprep.subr.bf16.mxu0 %v492_v3 }
  0x20   : >> { %439 = vmatpush3.bf16.msra.mxu0 %v472_v7 }
  0x21   : >> { %440 = vmatprep.subr.bf16.mxu0 %v492_v3 }
  0x24   : >> { %441 = vmatpush3.bf16.msra.mxu0 %v473_v8 }
  0x25   : >> { %442 = vmatprep.subr.bf16.mxu0 %v492_v3 }
  0x28   : >> { %443 = vmatpush3.bf16.msra.mxu0 %v474_v9 }
  0x29   : >> { %444 = vmatprep.subr.bf16.mxu0 %v492_v3 }
  0x2c   : >> { %445 = vmatpush3.bf16.msra.mxu0 %v475_v10 }
  0x2f   : >> { %447 = vmatmul.mubr.bf16.vlgmr.msra.gmra.mxu0 %v209_v11 }
  0xef   : >> { %v308_v12 = vpop.f32.mrf.mxu0 }
  0xf0   : >> { %v320_v13 = vmul.f32 %v414_v0, %v308_v12 }
  0xf1   : >> { %v448_v14 = vpop.f32.mrf.mxu0 }
  0xf2   : >> { %v327_v15 = vadd.f32 %v415_v1, %v320_v13  ;;  %205 = sbr.rel (!%p203_p4) target bundleno = 14 (0xe), region = 75 }
  0xf3   : >> { %v311_v16 = vpop.f32.mrf.mxu0 }
  0xf4   : >> { %v328_v17 = vpack.c.bf16 %v327_v15, %v327_v15 }
  0xf5   : >> { %v449_v18 = vpop.f32.mrf.mxu0 }
  0xf6   : >> { %331 = vst [vmem:[%s330_s23] sm:$0x3] %v328_v17 }
  0xf7 PF: > { %s14_s15 = sadd.s32 1, %s486_s15  }
  0xf8   : > { %p11_p5 = scmp.ge.s32.totalorder %s14_s15, 4  }
  0xfa   :  { %13 = sbr.rel (!%p11_p5) target bundleno = 1 (0x1), region = 86 }

// kernel: _lambda_.16
= control target key start
LH: loop header
LB: loop body
LE: loop exit
PB: predicated region body
PF: predicated region fallthrough
CT: control target
= control target key end

     0   :  { %s1943_s15 = smov 0   ;;  %s2305_s0 = inlined_call_operand.vmem [shape: bf16[2,20,5,128], index: 0, kind: input, shape index: {}]   ;;  %s2306_s1 = inlined_call_operand.vmem [shape: bf16[9,128,128], index: 1, kind: input, shape index: {}]   ;;  %s2307_s2 = inlined_call_operand.vmem [shape: f32[1,128], index: 2, kind: input, shape index: {}]   ;;  %s2308_s3 = inlined_call_operand.vmem [shape: f32[1,128], index: 3, kind: input, shape index: {}]   ;;  %s2309_s4 = inlined_call_operand.vmem [shape: bf16[2,4,4,128], index: 4, kind: output, shape index: {}]  }
   0x1 LB: > { %s1315_s16 = sadd.s32 4294967295, %s1910_s15   ;;  %p1319_p0 = scmp.ge.s32.totalorder %s1910_s15, 1  ;;  %s1910_s15 = sphi %s1943_s15, %s14_s15  }
   0x2   : > { %p162_p1 = scmp.lt.s32.totalorder %s1910_s15, 3 }
   0x4   : > { %p163_p2 = pnand %p1319_p0, %p162_p1 }
   0x5   : > { %p188_p3 = scmp.lt.s32.totalorder (!%p163_p2), %s1315_s16, 1  ;;  %s1971_s29 = smov (!%p163_p2), 0  }
   0x6   : > { %166 = sbr.rel (%p163_p2) target bundleno = 380 (0x17c), region = 36 }
   0xb   : > { %v1954_v0 = vld [vmem:[%s2307_s2] ss:$0 sm:$0xff]  ;;  %s2311_s16 = smov (!%p188_p3, %s1315_s16), 1 }
   0xc   : > { %v1959_v1 = vld [vmem:[%s2308_s3] ss:$0 sm:$0xff]  ;;  %s1806_s21 = smul.u32 80, %s2311_s16  ;;  %s1544_s22 = sshll.u32 %s2311_s16, 3 }
   0xd   : > { %s1964_s25 = scalar_lea.vmem %s2309_s4, %s1544_s22 }
   0xe   : > { %s1969_s28 = scalar_lea.vmem %s2305_s0, %s1806_s21 }
   0xf LB: >> { %v1825_v2 = vld [vmem:[%s2306_s1 + $0x78] sm:$0xff]   ;;  %v1916_v3 = vmov 0.0   ;;  %v1827_v5 = vld [vmem:[%s2306_s1 + $0x70] sm:$0xff]   ;;  %vm1917_vm0 = vmmov 0   ;;  %v1829_v7 = vld [vmem:[%s2306_s1 + $0x68] sm:$0xff]   ;;  %s1323_s8 = sshll.u32 %s1914_s29, 2  ;;  %s1914_s29 = sphi %s1971_s29, %s206_s29  }
  0x10   : >> { %1626 = vmatprep.subr.bf16.mxu0 %v1916_v3  ;;  %1646 = vmatprep.subr.bf16.mxu1 %v1916_v3  ;;  %v1826_v4 = vld [vmem:[%s2306_s1 + $0x38] sm:$0xff]   ;;  %v1828_v6 = vld [vmem:[%s2306_s1 + $0x30] sm:$0xff]   ;;  %v1830_v8 = vld [vmem:[%s2306_s1 + $0x28] sm:$0xff]   ;;  %s2038_s11 = scalar_lea.vmem %s1969_s28, %s1323_s8  ;;  %s1541_s23 = sshll.u32 %s1914_s29, 1 }
  0x11   : >> { %1627 = vmatpush3.bf16.msra.mxu0 %v1825_v2  ;;  %1642 = vmatprep.mubr.msk.bf16.mxu0 %vm1917_vm0, %v1916_v3  ;;  %v1831_v9 = vld [vmem:[%s2306_s1 + $0x60] sm:$0xff]   ;;  %v1833_v11 = vld [vmem:[%s2306_s1 + $0x58] sm:$0xff]   ;;  %v1835_v13 = vld [vmem:[%s2306_s1 + $0x50] sm:$0xff]   ;;  %s1234_s24 = scalar_lea.vmem %s1964_s25, %s1541_s23  ;;  %s206_s29 = sadd.s32 1, %s1914_s29  }
  0x12   : >> { %1647 = vmatpush3.bf16.msra.mxu1 %v1826_v4  ;;  %1628 = vmatprep.subr.bf16.mxu0 %v1916_v3  ;;  %v1832_v10 = vld [vmem:[%s2306_s1 + $0x20] sm:$0xff]   ;;  %v1834_v12 = vld [vmem:[%s2306_s1 + $0x18] sm:$0xff]   ;;  %v1836_v14 = vld [vmem:[%s2306_s1 + $0x10] sm:$0xff]   ;;  %p203_p4 = scmp.ge.s32.totalorder %s206_s29, 4  }
  0x13   : >> { %1648 = vmatprep.subr.bf16.mxu1 %v1916_v3  ;;  %1662 = vmatprep.mubr.msk.bf16.mxu1 %vm1917_vm0, %v1916_v3  ;;  %v1837_v15 = vld [vmem:[%s2306_s1 + $0x48] sm:$0xff]   ;;  %v1839_v17 = vld [vmem:[%s2306_s1 + $0x40] sm:$0xff]   ;;  %v1325_v19 = vld [vmem:[%s2038_s11 + $0x14] sm:$0x3] }
  0x14   : >> { %v1838_v16 = vld [vmem:[%s2306_s1 + $0x8] sm:$0xff]   ;;  %v1840_v18 = vld [vmem:[%s2306_s1] sm:$0xff]   ;;  %v1841_v21 = vld [vmem:[%s2306_s1 + $0xb8] sm:$0xff]  }
  0x15   : >> { %1629 = vmatpush3.bf16.msra.mxu0 %v1827_v5  ;;  %v209_v20 = vld [vmem:[%s2038_s11] sm:$0x3]  ;;  %v1842_v22 = vld [vmem:[%s2306_s1 + $0xf8] sm:$0xff]   ;;  %v1843_v23 = vld [vmem:[%s2306_s1 + $0xb0] sm:$0xff]  }
  0x16   : >> { %1649 = vmatpush3.bf16.msra.mxu1 %v1828_v6  ;;  %1630 = vmatprep.subr.bf16.mxu0 %v1916_v3  ;;  %v1844_v24 = vld [vmem:[%s2306_s1 + $0xf0] sm:$0xff]   ;;  %v1845_v25 = vld [vmem:[%s2306_s1 + $0xa8] sm:$0xff]   ;;  %v1847_v27 = vld [vmem:[%s2306_s1 + $0xa0] sm:$0xff]  }
  0x17   : >> { %1650 = vmatprep.subr.bf16.mxu1 %v1916_v3  ;;  %v1846_v26 = vld [vmem:[%s2306_s1 + $0xe8] sm:$0xff]   ;;  %v1848_v28 = vld [vmem:[%s2306_s1 + $0xe0] sm:$0xff]   ;;  %v1849_v29 = vld [vmem:[%s2306_s1 + $0x98] sm:$0xff]  }
  0x18   : >> { %v1850_v30 = vld [vmem:[%s2306_s1 + $0xd8] sm:$0xff]   ;;  %v1857_v31 = vld [vmem:[%s2038_s11] ss:$0 sps:$4 sm:$0x77]   ;;  %v1851_v32 = vld [vmem:[%s2306_s1 + $0x90] sm:$0xff]  }
  0x19   : >> { %1631 = vmatpush3.bf16.msra.mxu0 %v1829_v7  ;;  %v1852_v33 = vld [vmem:[%s2306_s1 + $0xd0] sm:$0xff]   ;;  %v1853_v34 = vld [vmem:[%s2306_s1 + $0x88] sm:$0xff]   ;;  %v447_v35 = vshll.u32 %v1857_v31, 16  ;;  %v445_v37 = vshrl.u32 %v1857_v31, 16  ;;  %v1855_v39 = vld [vmem:[%s2306_s1 + $0x80] sm:$0xff]  }
  0x1a   : >> { %1651 = vmatpush3.bf16.msra.mxu1 %v1830_v8  ;;  %1632 = vmatprep.subr.bf16.mxu0 %v1916_v3  ;;  %v1854_v36 = vld [vmem:[%s2306_s1 + $0xc8] sm:$0xff]   ;;  %v1856_v40 = vld [vmem:[%s2306_s1 + $0xc0] sm:$0xff]   ;;  %v1858_v42 = vld [vmem:[%s2306_s1 + $0x138] sm:$0xff]  }
  0x1b   : >> { %1652 = vmatprep.subr.bf16.mxu1 %v1916_v3  ;;  %v449_v38 = vrot.slane %v447_v35, 1  ;;  %v1384_v43 = vld [vmem:[%s2038_s11 + $0x28] sm:$0x3]  ;;  %v1859_v44 = vld [vmem:[%s2306_s1 + $0x178] sm:$0xff]   ;;  %v1860_v45 = vld [vmem:[%s2306_s1 + $0x130] sm:$0xff]  }
  0x1c   : >> { %v1861_v46 = vld [vmem:[%s2306_s1 + $0x170] sm:$0xff]   ;;  %v1862_v47 = vld [vmem:[%s2306_s1 + $0x128] sm:$0xff]   ;;  %v1864_v49 = vld [vmem:[%s2306_s1 + $0x120] sm:$0xff]  }
  0x1d   : >> { %1633 = vmatpush3.bf16.msra.mxu0 %v1831_v9  ;;  %v450_v41 = vor.u32 %v449_v38, %v445_v37  ;;  %v1863_v48 = vld [vmem:[%s2306_s1 + $0x168] sm:$0xff]   ;;  %v1865_v50 = vld [vmem:[%s2306_s1 + $0x160] sm:$0xff]   ;;  %v1866_v51 = vld [vmem:[%s2306_s1 + $0x118] sm:$0xff]  }
  0x1e   : >> { %1653 = vmatpush3.bf16.msra.mxu1 %v1832_v10  ;;  %1634 = vmatprep.subr.bf16.mxu0 %v1916_v3  ;;  %v1867_v52 = vld [vmem:[%s2306_s1 + $0x158] sm:$0xff]   ;;  %v1868_v53 = vld [vmem:[%s2306_s1 + $0x110] sm:$0xff]   ;;  %v1875_v54 = vld [vmem:[%s2038_s11 + $0x28] ss:$0 sps:$4 sm:$0x77]  }
  0x1f   : >> { %1654 = vmatprep.subr.bf16.mxu1 %v1916_v3  ;;  %v1869_v55 = vld [vmem:[%s2306_s1 + $0x150] sm:$0xff]   ;;  %v1870_v56 = vld [vmem:[%s2306_s1 + $0x108] sm:$0xff]   ;;  %v785_v57 = vshll.u32 %v1875_v54, 16  ;;  %v1872_v59 = vld [vmem:[%s2306_s1 + $0x100] sm:$0xff]   ;;  %v783_v60 = vshrl.u32 %v1875_v54, 16 }
  0x20   : >> { %v1871_v58 = vld [vmem:[%s2306_s1 + $0x148] sm:$0xff]   ;;  %v1873_v62 = vld [vmem:[%s2306_s1 + $0x140] sm:$0xff]   ;;  %v1410_v63 = vld [vmem:[%s2038_s11 + $0x3c] sm:$0x3] }
  0x21   : >> { %1635 = vmatpush3.bf16.msra.mxu0 %v1833_v11  ;;  %v787_v61 = vrot.slane %v785_v57, 1  ;;  %v1874_v2 = vld [vmem:[%s2306_s1 + $0x1b8] sm:$0xff]   ;;  %v1877_v6 = vld [vmem:[%s2306_s1 + $0x1b0] sm:$0xff]   ;;  %v1879_v8 = vld [vmem:[%s2306_s1 + $0x1a8] sm:$0xff]  }
  0x22   : >> { %1655 = vmatpush3.bf16.msra.mxu1 %v1834_v12  ;;  %1636 = vmatprep.subr.bf16.mxu0 %v1916_v3  ;;  %v1876_v5 = vld [vmem:[%s2306_s1 + $0x1f8] sm:$0xff]   ;;  %v1878_v7 = vld [vmem:[%s2306_s1 + $0x1f0] sm:$0xff]   ;;  %v1880_v9 = vld [vmem:[%s2306_s1 + $0x1e8] sm:$0xff]  }
  0x23   : >> { %1656 = vmatprep.subr.bf16.mxu1 %v1916_v3  ;;  %v788_v4 = vor.u32 %v787_v61, %v783_v60  ;;  %v1881_v10 = vld [vmem:[%s2306_s1 + $0x1a0] sm:$0xff]   ;;  %v1883_v12 = vld [vmem:[%s2306_s1 + $0x198] sm:$0xff]  }
  0x24   : >> { %v1882_v11 = vld [vmem:[%s2306_s1 + $0x1e0] sm:$0xff]  }
  0x25   : >> { %1637 = vmatpush3.bf16.msra.mxu0 %v1835_v13  ;;  %v1884_v13 = vld [vmem:[%s2306_s1 + $0x1d8] sm:$0xff]  }
  0x26   : >> { %1657 = vmatpush3.bf16.msra.mxu1 %v1836_v14  ;;  %1638 = vmatprep.subr.bf16.mxu0 %v1916_v3  ;;  %v1885_v14 = vld [vmem:[%s2306_s1 + $0x190] sm:$0xff]  }
  0x27   : >> { %1658 = vmatprep.subr.bf16.mxu1 %v1916_v3 }
  0x29   : >> { %1639 = vmatpush3.bf16.msra.mxu0 %v1837_v15  ;;  %v1886_v15 = vld [vmem:[%s2306_s1 + $0x1d0] sm:$0xff]  }
  0x2a   : >> { %1659 = vmatpush3.bf16.msra.mxu1 %v1838_v16  ;;  %1640 = vmatprep.subr.bf16.mxu0 %v1916_v3  ;;  %v1887_v16 = vld [vmem:[%s2306_s1 + $0x188] sm:$0xff]  }
  0x2b   : >> { %1660 = vmatprep.subr.bf16.mxu1 %v1916_v3 }
  0x2d   : >> { %1641 = vmatpush3.bf16.msra.mxu0 %v1839_v17  ;;  %v1888_v17 = vld [vmem:[%s2306_s1 + $0x1c8] sm:$0xff]  }
  0x2e   : >> { %1661 = vmatpush3.bf16.msra.mxu1 %v1840_v18  ;;  %1666 = vmatprep.subr.bf16.mxu0 %v1916_v3  ;;  %v1889_v18 = vld [vmem:[%s2306_s1 + $0x180] sm:$0xff]  }
  0x2f   : >> { %1686 = vmatprep.subr.bf16.mxu1 %v1916_v3 }
  0x30   : >> { %1643 = vmatmul.mubr.bf16.vlgmr.msra.gmra.mxu0 %v1325_v19  ;;  %v1890_v19 = vld [vmem:[%s2306_s1 + $0x1c0] sm:$0xff]  }
  0x31   : >> { %1663 = vmatmul.mubr.bf16.vlgmr.msra.gmra.mxu1 %v209_v20  ;;  %1667 = vmatpush3.bf16.msra.mxu0 %v1841_v21  ;;  %v1462_v20 = vld [vmem:[%s2038_s11 + $0x4] sm:$0x3]  ;;  %v1891_v21 = vld [vmem:[%s2306_s1 + $0x238] sm:$0xff]  }
  0x32   : >> { %1687 = vmatpush3.bf16.msra.mxu1 %v1842_v22  ;;  %1668 = vmatprep.subr.bf16.mxu0 %v1916_v3  ;;  %v1488_v22 = vld [vmem:[%s2038_s11 + $0x18] sm:$0x3] }
  0x33   : >> { %1688 = vmatprep.subr.bf16.mxu1 %v1916_v3  ;;  %1682 = vmatprep.mubr.msk.bf16.mxu0 %vm1917_vm0, %v1916_v3 }
  0x34   : >> { %1702 = vmatprep.mubr.msk.bf16.mxu1 %vm1917_vm0, %v1916_v3 }
  0x35   : >> { %1669 = vmatpush3.bf16.msra.mxu0 %v1843_v23  ;;  %v1892_v23 = vld [vmem:[%s2306_s1 + $0x230] sm:$0xff]  }
  0x36   : >> { %1689 = vmatpush3.bf16.msra.mxu1 %v1844_v24  ;;  %1670 = vmatprep.subr.bf16.mxu0 %v1916_v3  ;;  %v1893_v24 = vld [vmem:[%s2306_s1 + $0x228] sm:$0xff]  }
  0x37   : >> { %1690 = vmatprep.subr.bf16.mxu1 %v1916_v3 }
  0x39   : >> { %1671 = vmatpush3.bf16.msra.mxu0 %v1845_v25  ;;  %v1894_v25 = vld [vmem:[%s2306_s1 + $0x220] sm:$0xff]  }
  0x3a   : >> { %1691 = vmatpush3.bf16.msra.mxu1 %v1846_v26  ;;  %1672 = vmatprep.subr.bf16.mxu0 %v1916_v3  ;;  %v1895_v26 = vld [vmem:[%s2306_s1 + $0x218] sm:$0xff]  }
  0x3b   : >> { %1692 = vmatprep.subr.bf16.mxu1 %v1916_v3 }
  0x3d   : >> { %1673 = vmatpush3.bf16.msra.mxu0 %v1847_v27  ;;  %v1899_v27 = vld [vmem:[%s2038_s11 + $0x4] ss:$0 sps:$4 sm:$0x77]  }
  0x3e   : >> { %1693 = vmatpush3.bf16.msra.mxu1 %v1848_v28  ;;  %1674 = vmatprep.subr.bf16.mxu0 %v1916_v3  ;;  %v1896_v28 = vld [vmem:[%s2306_s1 + $0x210] sm:$0xff]   ;;  %v1121_v31 = vshrl.u32 %v1899_v27, 16 }
  0x3f   : >> { %1694 = vmatprep.subr.bf16.mxu1 %v1916_v3 }
  0x41   : >> { %1675 = vmatpush3.bf16.msra.mxu0 %v1849_v29  ;;  %v1123_v29 = vshll.u32 %v1899_v27, 16 }
  0x42   : >> { %1695 = vmatpush3.bf16.msra.mxu1 %v1850_v30  ;;  %1676 = vmatprep.subr.bf16.mxu0 %v1916_v3  ;;  %v1897_v30 = vld [vmem:[%s2306_s1 + $0x208] sm:$0xff]  }
  0x43   : >> { %1696 = vmatprep.subr.bf16.mxu1 %v1916_v3 }
  0x45   : >> { %1677 = vmatpush3.bf16.msra.mxu0 %v1851_v32  ;;  %v1125_v32 = vrot.slane %v1123_v29, 1 }
  0x46   : >> { %1697 = vmatpush3.bf16.msra.mxu1 %v1852_v33  ;;  %1678 = vmatprep.subr.bf16.mxu0 %v1916_v3  ;;  %v1898_v33 = vld [vmem:[%s2306_s1 + $0x200] sm:$0xff]  }
  0x47   : >> { %1698 = vmatprep.subr.bf16.mxu1 %v1916_v3 }
  0x49   : >> { %1679 = vmatpush3.bf16.msra.mxu0 %v1853_v34  ;;  %v1126_v34 = vor.u32 %v1125_v32, %v1121_v31 }
  0x4a   : >> { %1699 = vmatpush3.bf16.msra.mxu1 %v1854_v36  ;;  %1680 = vmatprep.subr.bf16.mxu0 %v1916_v3 }
  0x4b   : >> { %1700 = vmatprep.subr.bf16.mxu1 %v1916_v3 }
  0x4d   : >> { %1681 = vmatpush3.bf16.msra.mxu0 %v1855_v39 }
  0x4e   : >> { %1701 = vmatpush3.bf16.msra.mxu1 %v1856_v40  ;;  %1706 = vmatprep.subr.bf16.mxu0 %v1916_v3 }
  0x4f   : >> { %1726 = vmatprep.subr.bf16.mxu1 %v1916_v3 }
  0x50   : >> { %1683 = vmatmul.mubr.bf16.vlgmr.msra.gmra.mxu0 %v450_v41 }
  0x51   : >> { %1707 = vmatpush3.bf16.msra.mxu0 %v1858_v42  ;;  %1703 = vmatmul.mubr.bf16.vlgmr.msra.gmra.mxu1 %v1384_v43 }
  0x52   : >> { %1727 = vmatpush3.bf16.msra.mxu1 %v1859_v44  ;;  %1708 = vmatprep.subr.bf16.mxu0 %v1916_v3 }
  0x53   : >> { %1728 = vmatprep.subr.bf16.mxu1 %v1916_v3  ;;  %1722 = vmatprep.mubr.msk.bf16.mxu0 %vm1917_vm0, %v1916_v3 }
  0x54   : >> { %1742 = vmatprep.mubr.msk.bf16.mxu1 %vm1917_vm0, %v1916_v3 }
  0x55   : >> { %1709 = vmatpush3.bf16.msra.mxu0 %v1860_v45 }
  0x56   : >> { %1729 = vmatpush3.bf16.msra.mxu1 %v1861_v46  ;;  %1710 = vmatprep.subr.bf16.mxu0 %v1916_v3 }
  0x57   : >> { %1730 = vmatprep.subr.bf16.mxu1 %v1916_v3 }
  0x59   : >> { %1711 = vmatpush3.bf16.msra.mxu0 %v1862_v47 }
  0x5a   : >> { %1731 = vmatpush3.bf16.msra.mxu1 %v1863_v48  ;;  %1712 = vmatprep.subr.bf16.mxu0 %v1916_v3 }
  0x5b   : >> { %1732 = vmatprep.subr.bf16.mxu1 %v1916_v3 }
  0x5d   : >> { %1713 = vmatpush3.bf16.msra.mxu0 %v1864_v49 }
  0x5e   : >> { %1733 = vmatpush3.bf16.msra.mxu1 %v1865_v50  ;;  %1714 = vmatprep.subr.bf16.mxu0 %v1916_v3 }
  0x5f   : >> { %1734 = vmatprep.subr.bf16.mxu1 %v1916_v3 }
  0x61   : >> { %1715 = vmatpush3.bf16.msra.mxu0 %v1866_v51 }
  0x62   : >> { %1735 = vmatpush3.bf16.msra.mxu1 %v1867_v52  ;;  %1716 = vmatprep.subr.bf16.mxu0 %v1916_v3 }
  0x63   : >> { %1736 = vmatprep.subr.bf16.mxu1 %v1916_v3 }
  0x65   : >> { %1717 = vmatpush3.bf16.msra.mxu0 %v1868_v53 }
  0x66   : >> { %1737 = vmatpush3.bf16.msra.mxu1 %v1869_v55  ;;  %1718 = vmatprep.subr.bf16.mxu0 %v1916_v3 }
  0x67   : >> { %1738 = vmatprep.subr.bf16.mxu1 %v1916_v3 }
  0x69   : >> { %1719 = vmatpush3.bf16.msra.mxu0 %v1870_v56 }
  0x6a   : >> { %1739 = vmatpush3.bf16.msra.mxu1 %v1871_v58  ;;  %1720 = vmatprep.subr.bf16.mxu0 %v1916_v3 }
  0x6b   : >> { %1740 = vmatprep.subr.bf16.mxu1 %v1916_v3 }
  0x6d   : >> { %1721 = vmatpush3.bf16.msra.mxu0 %v1872_v59 }
  0x6e   : >> { %1741 = vmatpush3.bf16.msra.mxu1 %v1873_v62  ;;  %1746 = vmatprep.subr.bf16.mxu0 %v1916_v3 }
  0x6f   : >> { %1766 = vmatprep.subr.bf16.mxu1 %v1916_v3 }
  0x70   : >> { %1723 = vmatmul.mubr.bf16.vlgmr.msra.gmra.mxu0 %v1410_v63 }
  0x71   : >> { %1747 = vmatpush3.bf16.msra.mxu0 %v1874_v2  ;;  %1743 = vmatmul.mubr.bf16.vlgmr.msra.gmra.mxu1 %v788_v4 }
  0x72   : >> { %1767 = vmatpush3.bf16.msra.mxu1 %v1876_v5  ;;  %1748 = vmatprep.subr.bf16.mxu0 %v1916_v3 }
  0x73   : >> { %1768 = vmatprep.subr.bf16.mxu1 %v1916_v3  ;;  %1762 = vmatprep.mubr.msk.bf16.mxu0 %vm1917_vm0, %v1916_v3 }
  0x74   : >> { %1782 = vmatprep.mubr.msk.bf16.mxu1 %vm1917_vm0, %v1916_v3 }
  0x75   : >> { %1749 = vmatpush3.bf16.msra.mxu0 %v1877_v6 }
  0x76   : >> { %1769 = vmatpush3.bf16.msra.mxu1 %v1878_v7  ;;  %1750 = vmatprep.subr.bf16.mxu0 %v1916_v3 }
  0x77   : >> { %1770 = vmatprep.subr.bf16.mxu1 %v1916_v3 }
  0x79   : >> { %1751 = vmatpush3.bf16.msra.mxu0 %v1879_v8 }
  0x7a   : >> { %1771 = vmatpush3.bf16.msra.mxu1 %v1880_v9  ;;  %1752 = vmatprep.subr.bf16.mxu0 %v1916_v3 }
  0x7b   : >> { %1772 = vmatprep.subr.bf16.mxu1 %v1916_v3 }
  0x7d   : >> { %1753 = vmatpush3.bf16.msra.mxu0 %v1881_v10 }
  0x7e   : >> { %1773 = vmatpush3.bf16.msra.mxu1 %v1882_v11  ;;  %1754 = vmatprep.subr.bf16.mxu0 %v1916_v3 }
  0x7f   : >> { %1774 = vmatprep.subr.bf16.mxu1 %v1916_v3 }
  0x81   : >> { %1755 = vmatpush3.bf16.msra.mxu0 %v1883_v12 }
  0x82   : >> { %1775 = vmatpush3.bf16.msra.mxu1 %v1884_v13  ;;  %1756 = vmatprep.subr.bf16.mxu0 %v1916_v3 }
  0x83   : >> { %1776 = vmatprep.subr.bf16.mxu1 %v1916_v3 }
  0x85   : >> { %1757 = vmatpush3.bf16.msra.mxu0 %v1885_v14 }
  0x86   : >> { %1777 = vmatpush3.bf16.msra.mxu1 %v1886_v15  ;;  %1758 = vmatprep.subr.bf16.mxu0 %v1916_v3 }
  0x87   : >> { %1778 = vmatprep.subr.bf16.mxu1 %v1916_v3 }
  0x89   : >> { %1759 = vmatpush3.bf16.msra.mxu0 %v1887_v16 }
  0x8a   : >> { %1779 = vmatpush3.bf16.msra.mxu1 %v1888_v17  ;;  %1760 = vmatprep.subr.bf16.mxu0 %v1916_v3 }
  0x8b   : >> { %1780 = vmatprep.subr.bf16.mxu1 %v1916_v3 }
  0x8d   : >> { %1761 = vmatpush3.bf16.msra.mxu0 %v1889_v18 }
  0x8e   : >> { %1781 = vmatpush3.bf16.msra.mxu1 %v1890_v19  ;;  %1786 = vmatprep.subr.bf16.mxu0 %v1916_v3 }
  0x90   : >> { %1763 = vmatmul.mubr.bf16.vlgmr.msra.gmra.mxu0 %v1462_v20 }
  0x91   : >> { %1787 = vmatpush3.bf16.msra.mxu0 %v1891_v21  ;;  %1783 = vmatmul.mubr.bf16.vlgmr.msra.gmra.mxu1 %v1488_v22 }
  0x92   : >> { %1788 = vmatprep.subr.bf16.mxu0 %v1916_v3  ;;  %1802 = vmatprep.mubr.msk.bf16.mxu0 %vm1917_vm0, %v1916_v3 }
  0x95   : >> { %1789 = vmatpush3.bf16.msra.mxu0 %v1892_v23 }
  0x96   : >> { %1790 = vmatprep.subr.bf16.mxu0 %v1916_v3 }
  0x99   : >> { %1791 = vmatpush3.bf16.msra.mxu0 %v1893_v24 }
  0x9a   : >> { %1792 = vmatprep.subr.bf16.mxu0 %v1916_v3 }
  0x9d   : >> { %1793 = vmatpush3.bf16.msra.mxu0 %v1894_v25 }
  0x9e   : >> { %1794 = vmatprep.subr.bf16.mxu0 %v1916_v3 }
  0xa1   : >> { %1795 = vmatpush3.bf16.msra.mxu0 %v1895_v26 }
  0xa2   : >> { %1796 = vmatprep.subr.bf16.mxu0 %v1916_v3 }
  0xa5   : >> { %1797 = vmatpush3.bf16.msra.mxu0 %v1896_v28 }
  0xa6   : >> { %1798 = vmatprep.subr.bf16.mxu0 %v1916_v3 }
  0xa9   : >> { %1799 = vmatpush3.bf16.msra.mxu0 %v1897_v30 }
  0xaa   : >> { %1800 = vmatprep.subr.bf16.mxu0 %v1916_v3 }
  0xad   : >> { %1801 = vmatpush3.bf16.msra.mxu0 %v1898_v33 }
  0xb0   : >> { %1803 = vmatmul.mubr.bf16.vlgmr.msra.gmra.mxu0 %v1126_v34 }
  0xf0   : >> { %v329_v35 = vpop.f32.mrf.mxu0 }
  0xf1   : >> { %v417_v36 = vpop.f32.mrf.mxu1 }
  0xf2   : >> { %v418_v37 = vadd.f32 %v417_v36, %v329_v35  ;;  %v1644_v38 = vpop.f32.mrf.mxu0 }
  0xf3   : >> { %v1664_v39 = vpop.f32.mrf.mxu1 }
  0xf4   : >> { %v332_v40 = vpop.f32.mrf.mxu0 }
  0xf5   : >> { %v420_v41 = vpop.f32.mrf.mxu1 }
  0xf6   : >> { %v1645_v42 = vpop.f32.mrf.mxu0 }
  0xf7   : >> { %v1665_v43 = vpop.f32.mrf.mxu1 }
 0x110   : >> { %v534_v44 = vpop.f32.mrf.mxu0 }
 0x111   : >> { %v540_v45 = vadd.f32 %v534_v44, %v418_v37  ;;  %v644_v46 = vpop.f32.mrf.mxu1 }
 0x112   : >> { %v1684_v47 = vpop.f32.mrf.mxu0 }
 0x113   : >> { %v650_v48 = vadd.f32 %v644_v46, %v540_v45  ;;  %v1704_v49 = vpop.f32.mrf.mxu1 }
 0x114   : >> { %v537_v50 = vpop.f32.mrf.mxu0 }
 0x115   : >> { %v647_v3 = vpop.f32.mrf.mxu1 }
 0x116   : >> { %v1685_v51 = vpop.f32.mrf.mxu0 }
 0x117   : >> { %v1705_v52 = vpop.f32.mrf.mxu1 }
 0x130   : >> { %v754_v53 = vpop.f32.mrf.mxu0 }
 0x131   : >> { %v872_v54 = vpop.f32.mrf.mxu1  ;;  %v760_v8 = vadd.f32 %v754_v53, %v650_v48 }
 0x132   : >> { %v1724_v55 = vpop.f32.mrf.mxu0 }
 0x133   : >> { %v1744_v56 = vpop.f32.mrf.mxu1  ;;  %v878_v9 = vadd.f32 %v872_v54, %v760_v8 }
 0x134   : >> { %v757_v57 = vpop.f32.mrf.mxu0 }
 0x135   : >> { %v875_v58 = vpop.f32.mrf.mxu1 }
 0x136   : >> { %v1725_v59 = vpop.f32.mrf.mxu0 }
 0x137   : >> { %v1745_v60 = vpop.f32.mrf.mxu1 }
 0x150   : >> { %v982_v61 = vpop.f32.mrf.mxu0 }
 0x151   : >> { %v1092_v62 = vpop.f32.mrf.mxu1  ;;  %v988_v10 = vadd.f32 %v982_v61, %v878_v9 }
 0x152   : >> { %v1764_v63 = vpop.f32.mrf.mxu0 }
 0x153   : >> { %v1784_v2 = vpop.f32.mrf.mxu1  ;;  %v1098_v11 = vadd.f32 %v1092_v62, %v988_v10 }
 0x154   : >> { %v985_v4 = vpop.f32.mrf.mxu0 }
 0x155   : >> { %v1095_v5 = vpop.f32.mrf.mxu1 }
 0x156   : >> { %v1765_v6 = vpop.f32.mrf.mxu0 }
 0x157   : >> { %v1785_v7 = vpop.f32.mrf.mxu1 }
 0x170   : >> { %v1210_v12 = vpop.f32.mrf.mxu0 }
 0x171   : >> { %v1216_v13 = vadd.f32 %v1210_v12, %v1098_v11 }
 0x172   : >> { %v1804_v14 = vpop.f32.mrf.mxu0 }
 0x173   : >> { %v1223_v15 = vmul.f32 %v1954_v0, %v1216_v13 }
 0x174   : >> { %v1213_v16 = vpop.f32.mrf.mxu0 }
 0x175   : >> { %v1230_v17 = vadd.f32 %v1959_v1, %v1223_v15 }
 0x176   : >> { %v1805_v18 = vpop.f32.mrf.mxu0 }
 0x177   : >> { %v1231_v19 = vmax.f32 %v1230_v17, 0.0  ;;  %205 = sbr.rel (!%p203_p4) target bundleno = 15 (0xf), region = 88 }
 0x179   : >> { %v1232_v20 = vpack.c.bf16 %v1231_v19, %v1231_v19 }
 0x17b   : >> { %1235 = vst [vmem:[%s1234_s24] sm:$0x3] %v1232_v20 }
 0x17c PF: > { %s14_s15 = sadd.s32 1, %s1910_s15  }
 0x17d   : > { %p11_p5 = scmp.ge.s32.totalorder %s14_s15, 4  }
 0x17f   :  { %13 = sbr.rel (!%p11_p5) target bundleno = 1 (0x1), region = 99 }

// kernel: _lambda_.18
= control target key start
LH: loop header
LB: loop body
LE: loop exit
PB: predicated region body
PF: predicated region fallthrough
CT: control target
= control target key end

     0   :  { %s2017_s18 = smov 0   ;;  %s2385_s0 = inlined_call_operand.vmem [shape: bf16[2,6,6,128], index: 0, kind: input, shape index: {}]   ;;  %s2386_s1 = inlined_call_operand.vmem [shape: bf16[9,128,128], index: 1, kind: input, shape index: {}]   ;;  %s2387_s2 = inlined_call_operand.vmem [shape: f32[1,128], index: 2, kind: input, shape index: {}]   ;;  %s2388_s3 = inlined_call_operand.vmem [shape: f32[1,128], index: 3, kind: input, shape index: {}]   ;;  %s2389_s4 = inlined_call_operand.vmem [shape: bf16[2,4,4,128], index: 4, kind: input, shape index: {}]   ;;  %s2390_s5 = inlined_call_operand.vmem [shape: bf16[2,4,4,128], index: 5, kind: output, shape index: {}]  }
   0x1 LB: > { %s1378_s19 = sadd.s32 4294967295, %s1979_s18   ;;  %p1382_p0 = scmp.ge.s32.totalorder %s1979_s18, 1  ;;  %s1979_s18 = sphi %s2017_s18, %s15_s18  }
   0x2   : > { %p197_p1 = scmp.lt.s32.totalorder %s1979_s18, 3 }
   0x4   : > { %p198_p2 = pnand %p1382_p0, %p197_p1 }
   0x5   : > { %p230_p3 = scmp.lt.s32.totalorder (!%p198_p2), %s1378_s19, 1  ;;  %s2050_s10 = smov (!%p198_p2), 0  }
   0x6   : > { %201 = sbr.rel (%p198_p2) target bundleno = 382 (0x17e), region = 40 }
   0xb   : > { %v2028_v0 = vld [vmem:[%s2387_s2] ss:$0 sm:$0xff]  ;;  %s2392_s19 = smov (!%p230_p3, %s1378_s19), 1 }
   0xc   : > { %v2033_v1 = vld [vmem:[%s2388_s3] ss:$0 sm:$0xff]  ;;  %s1872_s24 = smul.u32 24, %s2392_s19  ;;  %s1609_s25 = sshll.u32 %s2392_s19, 3 }
   0xd   : > { %s2038_s28 = scalar_lea.vmem %s2389_s4, %s1609_s25  ;;  %s2043_s6 = scalar_lea.vmem %s2390_s5, %s1609_s25 }
   0xe   : > { %s2048_s9 = scalar_lea.vmem %s2385_s0, %s1872_s24 }
   0xf LB: >> { %v1891_v2 = vld [vmem:[%s2386_s1 + $0x78] sm:$0xff]   ;;  %v1985_v3 = vmov 0.0   ;;  %v1893_v5 = vld [vmem:[%s2386_s1 + $0x70] sm:$0xff]   ;;  %vm1986_vm0 = vmmov 0   ;;  %v1895_v7 = vld [vmem:[%s2386_s1 + $0x68] sm:$0xff]   ;;  %s1388_s26 = sshll.u32 %s1983_s10, 2  ;;  %s1983_s10 = sphi %s2050_s10, %s253_s10  }
  0x10   : >> { %1692 = vmatprep.subr.bf16.mxu0 %v1985_v3  ;;  %1712 = vmatprep.subr.bf16.mxu1 %v1985_v3  ;;  %v1892_v4 = vld [vmem:[%s2386_s1 + $0x38] sm:$0xff]   ;;  %v1894_v6 = vld [vmem:[%s2386_s1 + $0x30] sm:$0xff]   ;;  %v1896_v8 = vld [vmem:[%s2386_s1 + $0x28] sm:$0xff]   ;;  %s2093_s30 = scalar_lea.vmem %s2048_s9, %s1388_s26 }
  0x11   : >> { %1693 = vmatpush3.bf16.msra.mxu0 %v1891_v2  ;;  %1708 = vmatprep.mubr.msk.bf16.mxu0 %vm1986_vm0, %v1985_v3  ;;  %v1897_v9 = vld [vmem:[%s2386_s1 + $0x60] sm:$0xff]   ;;  %v1899_v11 = vld [vmem:[%s2386_s1 + $0x58] sm:$0xff]   ;;  %v1901_v14 = vld [vmem:[%s2386_s1 + $0x50] sm:$0xff]  }
  0x12   : >> { %1713 = vmatpush3.bf16.msra.mxu1 %v1892_v4  ;;  %1694 = vmatprep.subr.bf16.mxu0 %v1985_v3  ;;  %v1898_v10 = vld [vmem:[%s2386_s1 + $0x20] sm:$0xff]   ;;  %v1900_v12 = vld [vmem:[%s2386_s1 + $0x18] sm:$0xff]   ;;  %v1902_v15 = vld [vmem:[%s2386_s1 + $0x10] sm:$0xff]  }
  0x13   : >> { %1714 = vmatprep.subr.bf16.mxu1 %v1985_v3  ;;  %1728 = vmatprep.mubr.msk.bf16.mxu1 %vm1986_vm0, %v1985_v3  ;;  %v1907_v13 = vld [vmem:[%s2093_s30] ss:$0 sps:$4 sm:$0x77]   ;;  %v1903_v17 = vld [vmem:[%s2386_s1 + $0x48] sm:$0xff]   ;;  %v1908_v24 = vld [vmem:[%s2386_s1 + $0xb8] sm:$0xff]  }
  0x14   : >> { %v297_v16 = vshll.u32 %v1907_v13, 16  ;;  %v1904_v18 = vld [vmem:[%s2386_s1 + $0x8] sm:$0xff]   ;;  %v295_v19 = vshrl.u32 %v1907_v13, 16  ;;  %v1905_v21 = vld [vmem:[%s2386_s1 + $0x40] sm:$0xff]   ;;  %v1909_v26 = vld [vmem:[%s2386_s1 + $0xf8] sm:$0xff]  }
  0x15   : >> { %1695 = vmatpush3.bf16.msra.mxu0 %v1893_v5  ;;  %v1906_v22 = vld [vmem:[%s2386_s1] sm:$0xff]   ;;  %v1910_v27 = vld [vmem:[%s2386_s1 + $0xb0] sm:$0xff]   ;;  %v1912_v29 = vld [vmem:[%s2386_s1 + $0xa8] sm:$0xff]  }
  0x16   : >> { %1715 = vmatpush3.bf16.msra.mxu1 %v1894_v6  ;;  %1696 = vmatprep.subr.bf16.mxu0 %v1985_v3  ;;  %v299_v20 = vrot.slane %v297_v16, 1  ;;  %v256_v25 = vld [vmem:[%s2093_s30] sm:$0x3]  ;;  %v1911_v28 = vld [vmem:[%s2386_s1 + $0xf0] sm:$0xff]   ;;  %v1913_v30 = vld [vmem:[%s2386_s1 + $0xe8] sm:$0xff]  }
  0x17   : >> { %1716 = vmatprep.subr.bf16.mxu1 %v1985_v3  ;;  %v1914_v31 = vld [vmem:[%s2386_s1 + $0xa0] sm:$0xff]   ;;  %v1916_v33 = vld [vmem:[%s2386_s1 + $0x98] sm:$0xff]   ;;  %v1918_v35 = vld [vmem:[%s2386_s1 + $0x90] sm:$0xff]  }
  0x18   : >> { %v300_v23 = vor.u32 %v299_v20, %v295_v19  ;;  %v1915_v32 = vld [vmem:[%s2386_s1 + $0xe0] sm:$0xff]   ;;  %v1917_v34 = vld [vmem:[%s2386_s1 + $0xd8] sm:$0xff]   ;;  %v1919_v36 = vld [vmem:[%s2386_s1 + $0xd0] sm:$0xff]  }
  0x19   : >> { %1697 = vmatpush3.bf16.msra.mxu0 %v1895_v7  ;;  %v1920_v37 = vld [vmem:[%s2386_s1 + $0x88] sm:$0xff]   ;;  %v1924_v39 = vld [vmem:[%s2093_s30] ss:$0 sps:$4 sm:$0x66]   ;;  %v1925_v43 = vld [vmem:[%s2386_s1 + $0x138] sm:$0xff]  }
  0x1a   : >> { %1717 = vmatpush3.bf16.msra.mxu1 %v1896_v8  ;;  %1698 = vmatprep.subr.bf16.mxu0 %v1985_v3  ;;  %v1921_v38 = vld [vmem:[%s2386_s1 + $0xc8] sm:$0xff]   ;;  %v1922_v40 = vld [vmem:[%s2386_s1 + $0x80] sm:$0xff]   ;;  %v499_v42 = vrot.slane %v1924_v39, 1  ;;  %v1926_v45 = vld [vmem:[%s2386_s1 + $0x178] sm:$0xff]  }
  0x1b   : >> { %1718 = vmatprep.subr.bf16.mxu1 %v1985_v3  ;;  %v1923_v41 = vld [vmem:[%s2386_s1 + $0xc0] sm:$0xff]   ;;  %v1927_v46 = vld [vmem:[%s2386_s1 + $0x130] sm:$0xff]   ;;  %v1929_v48 = vld [vmem:[%s2386_s1 + $0x128] sm:$0xff]  }
  0x1c   : >> { %v1448_v44 = vld [vmem:[%s2093_s30 + $0x4] sm:$0x3]  ;;  %v1928_v47 = vld [vmem:[%s2386_s1 + $0x170] sm:$0xff]   ;;  %v1930_v49 = vld [vmem:[%s2386_s1 + $0x168] sm:$0xff]  }
  0x1d   : >> { %1699 = vmatpush3.bf16.msra.mxu0 %v1897_v9  ;;  %v1931_v50 = vld [vmem:[%s2386_s1 + $0x120] sm:$0xff]   ;;  %v1933_v52 = vld [vmem:[%s2386_s1 + $0x118] sm:$0xff]   ;;  %v1935_v55 = vld [vmem:[%s2386_s1 + $0x110] sm:$0xff]  }
  0x1e   : >> { %1719 = vmatpush3.bf16.msra.mxu1 %v1898_v10  ;;  %1700 = vmatprep.subr.bf16.mxu0 %v1985_v3  ;;  %v1932_v51 = vld [vmem:[%s2386_s1 + $0x160] sm:$0xff]   ;;  %v1934_v53 = vld [vmem:[%s2386_s1 + $0x158] sm:$0xff]   ;;  %v1936_v56 = vld [vmem:[%s2386_s1 + $0x150] sm:$0xff]  }
  0x1f   : >> { %1720 = vmatprep.subr.bf16.mxu1 %v1985_v3  ;;  %v1941_v54 = vld [vmem:[%s2093_s30 + $0x4] ss:$0 sps:$4 sm:$0x77]   ;;  %v1937_v58 = vld [vmem:[%s2386_s1 + $0x108] sm:$0xff]   ;;  %v1942_v5 = vld [vmem:[%s2386_s1 + $0x1b8] sm:$0xff]  }
  0x20   : >> { %v724_v57 = vshll.u32 %v1941_v54, 16  ;;  %v1938_v59 = vld [vmem:[%s2386_s1 + $0x148] sm:$0xff]   ;;  %v722_v60 = vshrl.u32 %v1941_v54, 16  ;;  %v1939_v62 = vld [vmem:[%s2386_s1 + $0x100] sm:$0xff]   ;;  %v1944_v7 = vld [vmem:[%s2386_s1 + $0x1f8] sm:$0xff]  }
  0x21   : >> { %1701 = vmatpush3.bf16.msra.mxu0 %v1899_v11  ;;  %v1943_v63 = vld [vmem:[%s2093_s30 + $0x4] ss:$0 sps:$4 sm:$0x66]   ;;  %v1945_v8 = vld [vmem:[%s2386_s1 + $0x1b0] sm:$0xff]   ;;  %v1947_v10 = vld [vmem:[%s2386_s1 + $0x1a8] sm:$0xff]  }
  0x22   : >> { %1721 = vmatpush3.bf16.msra.mxu1 %v1900_v12  ;;  %1702 = vmatprep.subr.bf16.mxu0 %v1985_v3  ;;  %v726_v61 = vrot.slane %v724_v57, 1  ;;  %v1940_v2 = vld [vmem:[%s2386_s1 + $0x140] sm:$0xff]   ;;  %v839_v6 = vrot.slane %v1943_v63, 1  ;;  %v1946_v9 = vld [vmem:[%s2386_s1 + $0x1f0] sm:$0xff]   ;;  %v1948_v11 = vld [vmem:[%s2386_s1 + $0x1e8] sm:$0xff]  }
  0x23   : >> { %1722 = vmatprep.subr.bf16.mxu1 %v1985_v3  ;;  %v1949_v12 = vld [vmem:[%s2386_s1 + $0x1a0] sm:$0xff]   ;;  %v1953_v16 = vld [vmem:[%s2386_s1 + $0x190] sm:$0xff]   ;;  %v1955_v19 = vld [vmem:[%s2386_s1 + $0x188] sm:$0xff]  }
  0x24   : >> { %v727_v4 = vor.u32 %v726_v61, %v722_v60  ;;  %v1950_v13 = vld [vmem:[%s2386_s1 + $0x1e0] sm:$0xff]  }
  0x25   : >> { %1703 = vmatpush3.bf16.msra.mxu0 %v1901_v14  ;;  %v1951_v14 = vld [vmem:[%s2386_s1 + $0x198] sm:$0xff]  }
  0x26   : >> { %1723 = vmatpush3.bf16.msra.mxu1 %v1902_v15  ;;  %1704 = vmatprep.subr.bf16.mxu0 %v1985_v3  ;;  %v1952_v15 = vld [vmem:[%s2386_s1 + $0x1d8] sm:$0xff]  }
  0x27   : >> { %1724 = vmatprep.subr.bf16.mxu1 %v1985_v3 }
  0x29   : >> { %1705 = vmatpush3.bf16.msra.mxu0 %v1903_v17  ;;  %v1960_v17 = vld [vmem:[%s2093_s30 + $0x8] ss:$0 sps:$4 sm:$0x77]  }
  0x2a   : >> { %1725 = vmatpush3.bf16.msra.mxu1 %v1904_v18  ;;  %1706 = vmatprep.subr.bf16.mxu0 %v1985_v3  ;;  %v1954_v18 = vld [vmem:[%s2386_s1 + $0x1d0] sm:$0xff]   ;;  %v1064_v20 = vshll.u32 %v1960_v17, 16 }
  0x2b   : >> { %1726 = vmatprep.subr.bf16.mxu1 %v1985_v3 }
  0x2d   : >> { %1707 = vmatpush3.bf16.msra.mxu0 %v1905_v21  ;;  %v1956_v21 = vld [vmem:[%s2386_s1 + $0x1c8] sm:$0xff]  }
  0x2e   : >> { %1727 = vmatpush3.bf16.msra.mxu1 %v1906_v22  ;;  %1732 = vmatprep.subr.bf16.mxu0 %v1985_v3  ;;  %v1957_v22 = vld [vmem:[%s2386_s1 + $0x180] sm:$0xff]  }
  0x2f   : >> { %1752 = vmatprep.subr.bf16.mxu1 %v1985_v3 }
  0x30   : >> { %1709 = vmatmul.mubr.bf16.vlgmr.msra.gmra.mxu0 %v300_v23  ;;  %v1062_v23 = vshrl.u32 %v1960_v17, 16 }
  0x31   : >> { %1729 = vmatmul.mubr.bf16.vlgmr.msra.gmra.mxu1 %v256_v25  ;;  %1733 = vmatpush3.bf16.msra.mxu0 %v1908_v24  ;;  %v1066_v24 = vrot.slane %v1064_v20, 1  ;;  %v1958_v25 = vld [vmem:[%s2386_s1 + $0x1c0] sm:$0xff]  }
  0x32   : >> { %1753 = vmatpush3.bf16.msra.mxu1 %v1909_v26  ;;  %1734 = vmatprep.subr.bf16.mxu0 %v1985_v3  ;;  %v1526_v26 = vld [vmem:[%s2093_s30 + $0x8] sm:$0x3] }
  0x33   : >> { %1754 = vmatprep.subr.bf16.mxu1 %v1985_v3  ;;  %1748 = vmatprep.mubr.msk.bf16.mxu0 %vm1986_vm0, %v1985_v3 }
  0x34   : >> { %1768 = vmatprep.mubr.msk.bf16.mxu1 %vm1986_vm0, %v1985_v3 }
  0x35   : >> { %1735 = vmatpush3.bf16.msra.mxu0 %v1910_v27  ;;  %v1959_v27 = vld [vmem:[%s2386_s1 + $0x238] sm:$0xff]  }
  0x36   : >> { %1755 = vmatpush3.bf16.msra.mxu1 %v1911_v28  ;;  %1736 = vmatprep.subr.bf16.mxu0 %v1985_v3  ;;  %v1067_v28 = vor.u32 %v1066_v24, %v1062_v23 }
  0x37   : >> { %1756 = vmatprep.subr.bf16.mxu1 %v1985_v3 }
  0x39   : >> { %1737 = vmatpush3.bf16.msra.mxu0 %v1912_v29  ;;  %v1961_v29 = vld [vmem:[%s2386_s1 + $0x230] sm:$0xff]  }
  0x3a   : >> { %1757 = vmatpush3.bf16.msra.mxu1 %v1913_v30  ;;  %1738 = vmatprep.subr.bf16.mxu0 %v1985_v3  ;;  %v1962_v30 = vld [vmem:[%s2386_s1 + $0x228] sm:$0xff]  }
  0x3b   : >> { %1758 = vmatprep.subr.bf16.mxu1 %v1985_v3 }
  0x3d   : >> { %1739 = vmatpush3.bf16.msra.mxu0 %v1914_v31  ;;  %v1963_v31 = vld [vmem:[%s2386_s1 + $0x220] sm:$0xff]  }
  0x3e   : >> { %1759 = vmatpush3.bf16.msra.mxu1 %v1915_v32  ;;  %1740 = vmatprep.subr.bf16.mxu0 %v1985_v3  ;;  %v1964_v32 = vld [vmem:[%s2386_s1 + $0x218] sm:$0xff]  }
  0x3f   : >> { %1760 = vmatprep.subr.bf16.mxu1 %v1985_v3 }
  0x41   : >> { %1741 = vmatpush3.bf16.msra.mxu0 %v1916_v33  ;;  %v1965_v33 = vld [vmem:[%s2386_s1 + $0x210] sm:$0xff]  }
  0x42   : >> { %1761 = vmatpush3.bf16.msra.mxu1 %v1917_v34  ;;  %1742 = vmatprep.subr.bf16.mxu0 %v1985_v3  ;;  %v1966_v34 = vld [vmem:[%s2386_s1 + $0x208] sm:$0xff]  }
  0x43   : >> { %1762 = vmatprep.subr.bf16.mxu1 %v1985_v3 }
  0x45   : >> { %1743 = vmatpush3.bf16.msra.mxu0 %v1918_v35  ;;  %v1968_v35 = vld [vmem:[%s2093_s30 + $0x8] ss:$0 sps:$4 sm:$0x66]   ;;  %s1605_s30 = sshll.u32 %s1983_s10, 1  ;;  %s253_s10 = sadd.s32 1, %s1983_s10  }
  0x46   : >> { %1763 = vmatpush3.bf16.msra.mxu1 %v1919_v36  ;;  %1744 = vmatprep.subr.bf16.mxu0 %v1985_v3  ;;  %v1967_v36 = vld [vmem:[%s2386_s1 + $0x200] sm:$0xff]   ;;  %s1285_s24 = scalar_lea.vmem %s2038_s28, %s1605_s30  ;;  %s1292_s25 = scalar_lea.vmem %s2043_s6, %s1605_s30 }
  0x47   : >> { %1764 = vmatprep.subr.bf16.mxu1 %v1985_v3  ;;  %p250_p4 = scmp.ge.s32.totalorder %s253_s10, 4  }
  0x49   : >> { %1745 = vmatpush3.bf16.msra.mxu0 %v1920_v37  ;;  %v1179_v37 = vrot.slane %v1968_v35, 1 }
  0x4a   : >> { %1765 = vmatpush3.bf16.msra.mxu1 %v1921_v38  ;;  %1746 = vmatprep.subr.bf16.mxu0 %v1985_v3 }
  0x4b   : >> { %1766 = vmatprep.subr.bf16.mxu1 %v1985_v3 }
  0x4d   : >> { %1747 = vmatpush3.bf16.msra.mxu0 %v1922_v40 }
  0x4e   : >> { %1767 = vmatpush3.bf16.msra.mxu1 %v1923_v41  ;;  %1772 = vmatprep.subr.bf16.mxu0 %v1985_v3 }
  0x4f   : >> { %1792 = vmatprep.subr.bf16.mxu1 %v1985_v3 }
  0x50   : >> { %1749 = vmatmul.mubr.bf16.vlgmr.msra.gmra.mxu0 %v499_v42 }
  0x51   : >> { %1773 = vmatpush3.bf16.msra.mxu0 %v1925_v43  ;;  %1769 = vmatmul.mubr.bf16.vlgmr.msra.gmra.mxu1 %v1448_v44 }
  0x52   : >> { %1793 = vmatpush3.bf16.msra.mxu1 %v1926_v45  ;;  %1774 = vmatprep.subr.bf16.mxu0 %v1985_v3 }
  0x53   : >> { %1794 = vmatprep.subr.bf16.mxu1 %v1985_v3  ;;  %1788 = vmatprep.mubr.msk.bf16.mxu0 %vm1986_vm0, %v1985_v3 }
  0x54   : >> { %1808 = vmatprep.mubr.msk.bf16.mxu1 %vm1986_vm0, %v1985_v3 }
  0x55   : >> { %1775 = vmatpush3.bf16.msra.mxu0 %v1927_v46 }
  0x56   : >> { %1795 = vmatpush3.bf16.msra.mxu1 %v1928_v47  ;;  %1776 = vmatprep.subr.bf16.mxu0 %v1985_v3 }
  0x57   : >> { %1796 = vmatprep.subr.bf16.mxu1 %v1985_v3 }
  0x59   : >> { %1777 = vmatpush3.bf16.msra.mxu0 %v1929_v48 }
  0x5a   : >> { %1797 = vmatpush3.bf16.msra.mxu1 %v1930_v49  ;;  %1778 = vmatprep.subr.bf16.mxu0 %v1985_v3 }
  0x5b   : >> { %1798 = vmatprep.subr.bf16.mxu1 %v1985_v3 }
  0x5d   : >> { %1779 = vmatpush3.bf16.msra.mxu0 %v1931_v50 }
  0x5e   : >> { %1799 = vmatpush3.bf16.msra.mxu1 %v1932_v51  ;;  %1780 = vmatprep.subr.bf16.mxu0 %v1985_v3 }
  0x5f   : >> { %1800 = vmatprep.subr.bf16.mxu1 %v1985_v3 }
  0x61   : >> { %1781 = vmatpush3.bf16.msra.mxu0 %v1933_v52 }
  0x62   : >> { %1801 = vmatpush3.bf16.msra.mxu1 %v1934_v53  ;;  %1782 = vmatprep.subr.bf16.mxu0 %v1985_v3 }
  0x63   : >> { %1802 = vmatprep.subr.bf16.mxu1 %v1985_v3 }
  0x65   : >> { %1783 = vmatpush3.bf16.msra.mxu0 %v1935_v55 }
  0x66   : >> { %1803 = vmatpush3.bf16.msra.mxu1 %v1936_v56  ;;  %1784 = vmatprep.subr.bf16.mxu0 %v1985_v3 }
  0x67   : >> { %1804 = vmatprep.subr.bf16.mxu1 %v1985_v3 }
  0x69   : >> { %1785 = vmatpush3.bf16.msra.mxu0 %v1937_v58 }
  0x6a   : >> { %1805 = vmatpush3.bf16.msra.mxu1 %v1938_v59  ;;  %1786 = vmatprep.subr.bf16.mxu0 %v1985_v3 }
  0x6b   : >> { %1806 = vmatprep.subr.bf16.mxu1 %v1985_v3 }
  0x6d   : >> { %1787 = vmatpush3.bf16.msra.mxu0 %v1939_v62 }
  0x6e   : >> { %1807 = vmatpush3.bf16.msra.mxu1 %v1940_v2  ;;  %1812 = vmatprep.subr.bf16.mxu0 %v1985_v3 }
  0x6f   : >> { %1832 = vmatprep.subr.bf16.mxu1 %v1985_v3 }
  0x70   : >> { %1789 = vmatmul.mubr.bf16.vlgmr.msra.gmra.mxu0 %v727_v4 }
  0x71   : >> { %1813 = vmatpush3.bf16.msra.mxu0 %v1942_v5  ;;  %1809 = vmatmul.mubr.bf16.vlgmr.msra.gmra.mxu1 %v839_v6 }
  0x72   : >> { %1833 = vmatpush3.bf16.msra.mxu1 %v1944_v7  ;;  %1814 = vmatprep.subr.bf16.mxu0 %v1985_v3 }
  0x73   : >> { %1834 = vmatprep.subr.bf16.mxu1 %v1985_v3  ;;  %1828 = vmatprep.mubr.msk.bf16.mxu0 %vm1986_vm0, %v1985_v3 }
  0x74   : >> { %1848 = vmatprep.mubr.msk.bf16.mxu1 %vm1986_vm0, %v1985_v3 }
  0x75   : >> { %1815 = vmatpush3.bf16.msra.mxu0 %v1945_v8 }
  0x76   : >> { %1835 = vmatpush3.bf16.msra.mxu1 %v1946_v9  ;;  %1816 = vmatprep.subr.bf16.mxu0 %v1985_v3 }
  0x77   : >> { %1836 = vmatprep.subr.bf16.mxu1 %v1985_v3 }
  0x79   : >> { %1817 = vmatpush3.bf16.msra.mxu0 %v1947_v10 }
  0x7a   : >> { %1837 = vmatpush3.bf16.msra.mxu1 %v1948_v11  ;;  %1818 = vmatprep.subr.bf16.mxu0 %v1985_v3 }
  0x7b   : >> { %1838 = vmatprep.subr.bf16.mxu1 %v1985_v3 }
  0x7d   : >> { %1819 = vmatpush3.bf16.msra.mxu0 %v1949_v12 }
  0x7e   : >> { %1839 = vmatpush3.bf16.msra.mxu1 %v1950_v13  ;;  %1820 = vmatprep.subr.bf16.mxu0 %v1985_v3 }
  0x7f   : >> { %1840 = vmatprep.subr.bf16.mxu1 %v1985_v3 }
  0x81   : >> { %1821 = vmatpush3.bf16.msra.mxu0 %v1951_v14 }
  0x82   : >> { %1841 = vmatpush3.bf16.msra.mxu1 %v1952_v15  ;;  %1822 = vmatprep.subr.bf16.mxu0 %v1985_v3 }
  0x83   : >> { %1842 = vmatprep.subr.bf16.mxu1 %v1985_v3 }
  0x85   : >> { %1823 = vmatpush3.bf16.msra.mxu0 %v1953_v16  ;;  %v1286_v16 = vld [vmem:[%s1285_s24] sm:$0x3] }
  0x86   : >> { %1843 = vmatpush3.bf16.msra.mxu1 %v1954_v18  ;;  %1824 = vmatprep.subr.bf16.mxu0 %v1985_v3  ;;  %v1287_v20 = vunpack.c.l.bf16 %v1286_v16 }
  0x87   : >> { %1844 = vmatprep.subr.bf16.mxu1 %v1985_v3 }
  0x89   : >> { %1825 = vmatpush3.bf16.msra.mxu0 %v1955_v19 }
  0x8a   : >> { %1845 = vmatpush3.bf16.msra.mxu1 %v1956_v21  ;;  %1826 = vmatprep.subr.bf16.mxu0 %v1985_v3 }
  0x8b   : >> { %1846 = vmatprep.subr.bf16.mxu1 %v1985_v3 }
  0x8d   : >> { %1827 = vmatpush3.bf16.msra.mxu0 %v1957_v22 }
  0x8e   : >> { %1847 = vmatpush3.bf16.msra.mxu1 %v1958_v25  ;;  %1852 = vmatprep.subr.bf16.mxu0 %v1985_v3 }
  0x90   : >> { %1829 = vmatmul.mubr.bf16.vlgmr.msra.gmra.mxu0 %v1526_v26 }
  0x91   : >> { %1853 = vmatpush3.bf16.msra.mxu0 %v1959_v27  ;;  %1849 = vmatmul.mubr.bf16.vlgmr.msra.gmra.mxu1 %v1067_v28 }
  0x92   : >> { %1854 = vmatprep.subr.bf16.mxu0 %v1985_v3  ;;  %1868 = vmatprep.mubr.msk.bf16.mxu0 %vm1986_vm0, %v1985_v3 }
  0x95   : >> { %1855 = vmatpush3.bf16.msra.mxu0 %v1961_v29 }
  0x96   : >> { %1856 = vmatprep.subr.bf16.mxu0 %v1985_v3 }
  0x99   : >> { %1857 = vmatpush3.bf16.msra.mxu0 %v1962_v30 }
  0x9a   : >> { %1858 = vmatprep.subr.bf16.mxu0 %v1985_v3 }
  0x9d   : >> { %1859 = vmatpush3.bf16.msra.mxu0 %v1963_v31 }
  0x9e   : >> { %1860 = vmatprep.subr.bf16.mxu0 %v1985_v3 }
  0xa1   : >> { %1861 = vmatpush3.bf16.msra.mxu0 %v1964_v32 }
  0xa2   : >> { %1862 = vmatprep.subr.bf16.mxu0 %v1985_v3 }
  0xa5   : >> { %1863 = vmatpush3.bf16.msra.mxu0 %v1965_v33 }
  0xa6   : >> { %1864 = vmatprep.subr.bf16.mxu0 %v1985_v3 }
  0xa9   : >> { %1865 = vmatpush3.bf16.msra.mxu0 %v1966_v34 }
  0xaa   : >> { %1866 = vmatprep.subr.bf16.mxu0 %v1985_v3 }
  0xad   : >> { %1867 = vmatpush3.bf16.msra.mxu0 %v1967_v36 }
  0xb0   : >> { %1869 = vmatmul.mubr.bf16.vlgmr.msra.gmra.mxu0 %v1179_v37 }
  0xf0   : >> { %v384_v38 = vpop.f32.mrf.mxu0 }
  0xf1   : >> { %v472_v39 = vpop.f32.mrf.mxu1 }
  0xf2   : >> { %v473_v40 = vadd.f32 %v472_v39, %v384_v38  ;;  %v1710_v41 = vpop.f32.mrf.mxu0 }
  0xf3   : >> { %v1730_v42 = vpop.f32.mrf.mxu1 }
  0xf4   : >> { %v387_v43 = vpop.f32.mrf.mxu0 }
  0xf5   : >> { %v475_v44 = vpop.f32.mrf.mxu1 }
  0xf6   : >> { %v1711_v45 = vpop.f32.mrf.mxu0 }
  0xf7   : >> { %v1731_v46 = vpop.f32.mrf.mxu1 }
 0x110   : >> { %v583_v47 = vpop.f32.mrf.mxu0 }
 0x111   : >> { %v589_v48 = vadd.f32 %v583_v47, %v473_v40  ;;  %v693_v49 = vpop.f32.mrf.mxu1 }
 0x112   : >> { %v1750_v50 = vpop.f32.mrf.mxu0 }
 0x113   : >> { %v699_v51 = vadd.f32 %v693_v49, %v589_v48  ;;  %v1770_v52 = vpop.f32.mrf.mxu1 }
 0x114   : >> { %v586_v53 = vpop.f32.mrf.mxu0 }
 0x115   : >> { %v696_v3 = vpop.f32.mrf.mxu1 }
 0x116   : >> { %v1751_v54 = vpop.f32.mrf.mxu0 }
 0x117   : >> { %v1771_v55 = vpop.f32.mrf.mxu1 }
 0x130   : >> { %v811_v56 = vpop.f32.mrf.mxu0 }
 0x131   : >> { %v923_v57 = vpop.f32.mrf.mxu1  ;;  %v817_v11 = vadd.f32 %v811_v56, %v699_v51 }
 0x132   : >> { %v1790_v58 = vpop.f32.mrf.mxu0 }
 0x133   : >> { %v1810_v59 = vpop.f32.mrf.mxu1  ;;  %v929_v12 = vadd.f32 %v923_v57, %v817_v11 }
 0x134   : >> { %v814_v60 = vpop.f32.mrf.mxu0 }
 0x135   : >> { %v926_v61 = vpop.f32.mrf.mxu1 }
 0x136   : >> { %v1791_v62 = vpop.f32.mrf.mxu0 }
 0x137   : >> { %v1811_v63 = vpop.f32.mrf.mxu1 }
 0x150   : >> { %v1033_v2 = vpop.f32.mrf.mxu0 }
 0x151   : >> { %v1151_v4 = vpop.f32.mrf.mxu1  ;;  %v1039_v13 = vadd.f32 %v1033_v2, %v929_v12 }
 0x152   : >> { %v1830_v5 = vpop.f32.mrf.mxu0 }
 0x153   : >> { %v1850_v6 = vpop.f32.mrf.mxu1  ;;  %v1157_v14 = vadd.f32 %v1151_v4, %v1039_v13 }
 0x154   : >> { %v1036_v7 = vpop.f32.mrf.mxu0 }
 0x155   : >> { %v1154_v8 = vpop.f32.mrf.mxu1 }
 0x156   : >> { %v1831_v9 = vpop.f32.mrf.mxu0 }
 0x157   : >> { %v1851_v10 = vpop.f32.mrf.mxu1 }
 0x170   : >> { %v1263_v15 = vpop.f32.mrf.mxu0 }
 0x171   : >> { %v1269_v17 = vadd.f32 %v1263_v15, %v1157_v14 }
 0x172   : >> { %v1870_v18 = vpop.f32.mrf.mxu0 }
 0x173   : >> { %v1276_v19 = vmul.f32 %v2028_v0, %v1269_v17 }
 0x174   : >> { %v1266_v21 = vpop.f32.mrf.mxu0 }
 0x175   : >> { %v1283_v22 = vadd.f32 %v2033_v1, %v1276_v19 }
 0x176   : >> { %v1871_v23 = vpop.f32.mrf.mxu0 }
 0x177   : >> { %v1288_v24 = vadd.f32 %v1287_v20, %v1283_v22 }
 0x179   : >> { %v1289_v25 = vmax.f32 %v1288_v24, 0.0  ;;  %252 = sbr.rel (!%p250_p4) target bundleno = 15 (0xf), region = 93 }
 0x17b   : >> { %v1290_v26 = vpack.c.bf16 %v1289_v25, %v1289_v25 }
 0x17d   : >> { %1293 = vst [vmem:[%s1292_s25] sm:$0x3] %v1290_v26 }
 0x17e PF: > { %s15_s18 = sadd.s32 1, %s1979_s18  }
 0x17f   : > { %p12_p5 = scmp.ge.s32.totalorder %s15_s18, 4  }
 0x181   :  { %14 = sbr.rel (!%p12_p5) target bundleno = 1 (0x1), region = 104 }

// kernel: _lambda_.20
= control target key start
LH: loop header
LB: loop body
LE: loop exit
PB: predicated region body
PF: predicated region fallthrough
CT: control target
= control target key end

     0   :  { %s502_s15 = smov 0   ;;  %s565_s0 = inlined_call_operand.vmem [shape: bf16[2,8,2,128], index: 0, kind: input, shape index: {}]   ;;  %s566_s1 = inlined_call_operand.vmem [shape: bf16[1,128,128], index: 1, kind: input, shape index: {}]   ;;  %s567_s2 = inlined_call_operand.vmem [shape: f32[1,128], index: 2, kind: input, shape index: {}]   ;;  %s568_s3 = inlined_call_operand.vmem [shape: f32[1,128], index: 3, kind: input, shape index: {}]   ;;  %s569_s4 = inlined_call_operand.vmem [shape: bf16[2,2,2,128], index: 4, kind: output, shape index: {}]  }
   0x1 LB: > { %s385_s16 = sadd.s32 4294967295, %s469_s15   ;;  %p389_p0 = scmp.ge.s32.totalorder %s469_s15, 1  ;;  %s469_s15 = sphi %s502_s15, %s14_s15  }
   0x2   : > { %p161_p1 = scmp.lt.s32.totalorder %s469_s15, 3 }
   0x4   : > { %p162_p2 = pnand %p389_p0, %p161_p1 }
   0x5   : > { %p185_p3 = scmp.lt.s32.totalorder (!%p162_p2), %s385_s16, 1  ;;  %s526_s29 = smov (!%p162_p2), 0  }
   0x6   : > { %165 = sbr.rel (%p162_p2) target bundleno = 247 (0xf7), region = 36 }
   0xb   : > { %v400_v0 = vld [vmem:[%s567_s2] ss:$0 sm:$0xff]  ;;  %s571_s16 = smov (!%p185_p3, %s385_s16), 1 }
   0xc   : > { %v401_v1 = vld [vmem:[%s568_s3] ss:$0 sm:$0xff]  ;;  %s390_s21 = sshll.u32 %s571_s16, 3  ;;  %s391_s22 = sshll.u32 %s571_s16, 1 }
   0xd   : > { %s519_s25 = scalar_lea.vmem %s565_s0, %s390_s21  ;;  %s524_s28 = scalar_lea.vmem %s569_s4, %s391_s22 }
   0xe LB: >> { %v451_v2 = vld [vmem:[%s566_s1 + $0x38] sm:$0xff]   ;;  %v475_v3 = vmov 0.0   ;;  %v452_v4 = vld [vmem:[%s566_s1 + $0x30] sm:$0xff]   ;;  %vm476_vm0 = vmmov 0   ;;  %v453_v5 = vld [vmem:[%s566_s1 + $0x28] sm:$0xff]   ;;  %s202_s21 = scalar_lea.vmem %s519_s25, %s473_s29  ;;  %s323_s22 = scalar_lea.vmem %s524_s28, %s473_s29  ;;  %s473_s29 = sphi %s526_s29, %s201_s29  }
   0xf   : >> { %413 = vmatprep.subr.bf16.mxu0 %v475_v3  ;;  %429 = vmatprep.mubr.msk.bf16.mxu0 %vm476_vm0, %v475_v3  ;;  %v454_v6 = vld [vmem:[%s566_s1 + $0x20] sm:$0xff]   ;;  %v455_v7 = vld [vmem:[%s566_s1 + $0x18] sm:$0xff]   ;;  %v456_v8 = vld [vmem:[%s566_s1 + $0x10] sm:$0xff]   ;;  %s201_s29 = sadd.s32 1, %s473_s29  }
  0x10   : >> { %414 = vmatpush3.bf16.msra.mxu0 %v451_v2  ;;  %v457_v9 = vld [vmem:[%s566_s1 + $0x8] sm:$0xff]   ;;  %v458_v10 = vld [vmem:[%s566_s1] sm:$0xff]   ;;  %p198_p4 = scmp.ge.s32.totalorder %s201_s29, 2  }
  0x11   : >> { %415 = vmatprep.subr.bf16.mxu0 %v475_v3  ;;  %v203_v11 = vld [vmem:[%s202_s21] sm:$0x1] }
  0x14   : >> { %416 = vmatpush3.bf16.msra.mxu0 %v452_v4 }
  0x15   : >> { %417 = vmatprep.subr.bf16.mxu0 %v475_v3 }
  0x18   : >> { %418 = vmatpush3.bf16.msra.mxu0 %v453_v5 }
  0x19   : >> { %419 = vmatprep.subr.bf16.mxu0 %v475_v3 }
  0x1c   : >> { %420 = vmatpush3.bf16.msra.mxu0 %v454_v6 }
  0x1d   : >> { %421 = vmatprep.subr.bf16.mxu0 %v475_v3 }
  0x20   : >> { %422 = vmatpush3.bf16.msra.mxu0 %v455_v7 }
  0x21   : >> { %423 = vmatprep.subr.bf16.mxu0 %v475_v3 }
  0x24   : >> { %424 = vmatpush3.bf16.msra.mxu0 %v456_v8 }
  0x25   : >> { %425 = vmatprep.subr.bf16.mxu0 %v475_v3 }
  0x28   : >> { %426 = vmatpush3.bf16.msra.mxu0 %v457_v9 }
  0x29   : >> { %427 = vmatprep.subr.bf16.mxu0 %v475_v3 }
  0x2c   : >> { %428 = vmatpush3.bf16.msra.mxu0 %v458_v10 }
  0x2f   : >> { %430 = vmatmul.mubr.bf16.vlgmr.msra.gmra.mxu0 %v203_v11 }
  0xef   : >> { %v302_v12 = vpop.f32.mrf.mxu0 }
  0xf0   : >> { %v314_v13 = vmul.f32 %v400_v0, %v302_v12 }
  0xf1   : >> { %v431_v14 = vpop.f32.mrf.mxu0 }
  0xf2   : >> { %v321_v15 = vadd.f32 %v401_v1, %v314_v13  ;;  %200 = sbr.rel (!%p198_p4) target bundleno = 14 (0xe), region = 75 }
  0xf3   : >> { %v305_v16 = vpop.f32.mrf.mxu0 }
  0xf4   : >> { %v322_v17 = vpack.c.bf16 %v321_v15, %v321_v15 }
  0xf5   : >> { %v432_v18 = vpop.f32.mrf.mxu0 }
  0xf6   : >> { %324 = vst [vmem:[%s323_s22] sm:$0x1] %v322_v17 }
  0xf7 PF: > { %s14_s15 = sadd.s32 1, %s469_s15  }
  0xf8   : > { %p11_p5 = scmp.ge.s32.totalorder %s14_s15, 4  }
  0xfa   :  { %13 = sbr.rel (!%p11_p5) target bundleno = 1 (0x1), region = 86 }

// kernel: _lambda_.19
= control target key start
LH: loop header
LB: loop body
LE: loop exit
PB: predicated region body
PF: predicated region fallthrough
CT: control target
= control target key end

     0   :  { %s1946_s15 = smov 0   ;;  %s2308_s0 = inlined_call_operand.vmem [shape: bf16[2,12,3,128], index: 0, kind: input, shape index: {}]   ;;  %s2309_s1 = inlined_call_operand.vmem [shape: bf16[9,128,128], index: 1, kind: input, shape index: {}]   ;;  %s2310_s2 = inlined_call_operand.vmem [shape: f32[1,128], index: 2, kind: input, shape index: {}]   ;;  %s2311_s3 = inlined_call_operand.vmem [shape: f32[1,128], index: 3, kind: input, shape index: {}]   ;;  %s2312_s4 = inlined_call_operand.vmem [shape: bf16[2,2,2,128], index: 4, kind: output, shape index: {}]  }
   0x1 LB: > { %s1324_s16 = sadd.s32 4294967295, %s1913_s15   ;;  %p1328_p0 = scmp.ge.s32.totalorder %s1913_s15, 1  ;;  %s1913_s15 = sphi %s1946_s15, %s14_s15  }
   0x2   : > { %p162_p1 = scmp.lt.s32.totalorder %s1913_s15, 3 }
   0x4   : > { %p163_p2 = pnand %p1328_p0, %p162_p1 }
   0x5   : > { %p187_p3 = scmp.lt.s32.totalorder (!%p163_p2), %s1324_s16, 1  ;;  %s1974_s29 = smov (!%p163_p2), 0  }
   0x6   : > { %166 = sbr.rel (%p163_p2) target bundleno = 380 (0x17c), region = 36 }
   0xb   : > { %v1957_v0 = vld [vmem:[%s2310_s2] ss:$0 sm:$0xff]  ;;  %s2314_s16 = smov (!%p187_p3, %s1324_s16), 1 }
   0xc   : > { %v1962_v1 = vld [vmem:[%s2311_s3] ss:$0 sm:$0xff]  ;;  %s1812_s21 = smul.u32 24, %s2314_s16  ;;  %s1330_s22 = sshll.u32 %s2314_s16, 1 }
   0xd   : > { %s1967_s25 = scalar_lea.vmem %s2312_s4, %s1330_s22 }
   0xe   : > { %s1972_s28 = scalar_lea.vmem %s2308_s0, %s1812_s21 }
   0xf LB: >> { %v1831_v2 = vld [vmem:[%s2309_s1 + $0x78] sm:$0xff]   ;;  %v1919_v3 = vmov 0.0   ;;  %v1833_v5 = vld [vmem:[%s2309_s1 + $0x70] sm:$0xff]   ;;  %vm1920_vm0 = vmmov 0   ;;  %v1835_v7 = vld [vmem:[%s2309_s1 + $0x68] sm:$0xff]   ;;  %s1331_s8 = sshll.u32 %s1917_s29, 1  ;;  %s1917_s29 = sphi %s1974_s29, %s204_s29  }
  0x10   : >> { %1632 = vmatprep.subr.bf16.mxu0 %v1919_v3  ;;  %1652 = vmatprep.subr.bf16.mxu1 %v1919_v3  ;;  %v1832_v4 = vld [vmem:[%s2309_s1 + $0x38] sm:$0xff]   ;;  %v1834_v6 = vld [vmem:[%s2309_s1 + $0x30] sm:$0xff]   ;;  %v1836_v8 = vld [vmem:[%s2309_s1 + $0x28] sm:$0xff]   ;;  %s2041_s11 = scalar_lea.vmem %s1972_s28, %s1331_s8 }
  0x11   : >> { %1633 = vmatpush3.bf16.msra.mxu0 %v1831_v2  ;;  %1648 = vmatprep.mubr.msk.bf16.mxu0 %vm1920_vm0, %v1919_v3  ;;  %v1837_v9 = vld [vmem:[%s2309_s1 + $0x60] sm:$0xff]   ;;  %v1839_v11 = vld [vmem:[%s2309_s1 + $0x58] sm:$0xff]   ;;  %v1841_v13 = vld [vmem:[%s2309_s1 + $0x50] sm:$0xff]  }
  0x12   : >> { %1653 = vmatpush3.bf16.msra.mxu1 %v1832_v4  ;;  %1634 = vmatprep.subr.bf16.mxu0 %v1919_v3  ;;  %v1838_v10 = vld [vmem:[%s2309_s1 + $0x20] sm:$0xff]   ;;  %v1840_v12 = vld [vmem:[%s2309_s1 + $0x18] sm:$0xff]   ;;  %v1842_v14 = vld [vmem:[%s2309_s1 + $0x10] sm:$0xff]  }
  0x13   : >> { %1654 = vmatprep.subr.bf16.mxu1 %v1919_v3  ;;  %1668 = vmatprep.mubr.msk.bf16.mxu1 %vm1920_vm0, %v1919_v3  ;;  %v1843_v15 = vld [vmem:[%s2309_s1 + $0x48] sm:$0xff]   ;;  %v1845_v17 = vld [vmem:[%s2309_s1 + $0x40] sm:$0xff]   ;;  %v1847_v21 = vld [vmem:[%s2309_s1 + $0xb8] sm:$0xff]  }
  0x14   : >> { %v1844_v16 = vld [vmem:[%s2309_s1 + $0x8] sm:$0xff]   ;;  %v1846_v18 = vld [vmem:[%s2309_s1] sm:$0xff]   ;;  %v1848_v22 = vld [vmem:[%s2309_s1 + $0xf8] sm:$0xff]  }
  0x15   : >> { %1635 = vmatpush3.bf16.msra.mxu0 %v1833_v5  ;;  %v1333_v19 = vld [vmem:[%s2041_s11 + $0x6] sm:$0x1]  ;;  %v207_v20 = vld [vmem:[%s2041_s11] sm:$0x1]  ;;  %v1849_v23 = vld [vmem:[%s2309_s1 + $0xb0] sm:$0xff]  }
  0x16   : >> { %1655 = vmatpush3.bf16.msra.mxu1 %v1834_v6  ;;  %1636 = vmatprep.subr.bf16.mxu0 %v1919_v3  ;;  %v1850_v24 = vld [vmem:[%s2309_s1 + $0xf0] sm:$0xff]   ;;  %v1851_v25 = vld [vmem:[%s2309_s1 + $0xa8] sm:$0xff]   ;;  %v1853_v27 = vld [vmem:[%s2309_s1 + $0xa0] sm:$0xff]  }
  0x17   : >> { %1656 = vmatprep.subr.bf16.mxu1 %v1919_v3  ;;  %v1852_v26 = vld [vmem:[%s2309_s1 + $0xe8] sm:$0xff]   ;;  %v1854_v28 = vld [vmem:[%s2309_s1 + $0xe0] sm:$0xff]   ;;  %v1855_v29 = vld [vmem:[%s2309_s1 + $0x98] sm:$0xff]  }
  0x18   : >> { %v1856_v30 = vld [vmem:[%s2309_s1 + $0xd8] sm:$0xff]   ;;  %v1382_v31 = vld.sshfl [vmem:[%s2041_s11] sm:$0x3 pattern:$0x76325410]  ;;  %v1857_v32 = vld [vmem:[%s2309_s1 + $0x90] sm:$0xff]  }
  0x19   : >> { %1637 = vmatpush3.bf16.msra.mxu0 %v1835_v7  ;;  %v1858_v33 = vld [vmem:[%s2309_s1 + $0xd0] sm:$0xff]   ;;  %v450_v34 = vshll.u32 %v1382_v31, 16  ;;  %v1859_v35 = vld [vmem:[%s2309_s1 + $0x88] sm:$0xff]   ;;  %v448_v37 = vshrl.u32 %v1382_v31, 16  ;;  %v1861_v39 = vld [vmem:[%s2309_s1 + $0x80] sm:$0xff]  }
  0x1a   : >> { %1657 = vmatpush3.bf16.msra.mxu1 %v1836_v8  ;;  %1638 = vmatprep.subr.bf16.mxu0 %v1919_v3  ;;  %v1860_v36 = vld [vmem:[%s2309_s1 + $0xc8] sm:$0xff]   ;;  %v1862_v40 = vld [vmem:[%s2309_s1 + $0xc0] sm:$0xff]   ;;  %v1863_v42 = vld [vmem:[%s2309_s1 + $0x138] sm:$0xff]  }
  0x1b   : >> { %1658 = vmatprep.subr.bf16.mxu1 %v1919_v3  ;;  %v452_v38 = vrot.slane %v450_v34, 1  ;;  %v1392_v43 = vld [vmem:[%s2041_s11 + $0xc] sm:$0x1]  ;;  %v1864_v44 = vld [vmem:[%s2309_s1 + $0x178] sm:$0xff]   ;;  %v1865_v45 = vld [vmem:[%s2309_s1 + $0x130] sm:$0xff]  }
  0x1c   : >> { %v1866_v46 = vld [vmem:[%s2309_s1 + $0x170] sm:$0xff]   ;;  %v1867_v47 = vld [vmem:[%s2309_s1 + $0x128] sm:$0xff]   ;;  %v1869_v49 = vld [vmem:[%s2309_s1 + $0x120] sm:$0xff]  }
  0x1d   : >> { %1639 = vmatpush3.bf16.msra.mxu0 %v1837_v9  ;;  %v453_v41 = vor.u32 %v452_v38, %v448_v37  ;;  %v1868_v48 = vld [vmem:[%s2309_s1 + $0x168] sm:$0xff]   ;;  %v1870_v50 = vld [vmem:[%s2309_s1 + $0x160] sm:$0xff]   ;;  %v1871_v51 = vld [vmem:[%s2309_s1 + $0x118] sm:$0xff]  }
  0x1e   : >> { %1659 = vmatpush3.bf16.msra.mxu1 %v1838_v10  ;;  %1640 = vmatprep.subr.bf16.mxu0 %v1919_v3  ;;  %v1872_v52 = vld [vmem:[%s2309_s1 + $0x158] sm:$0xff]   ;;  %v1873_v53 = vld [vmem:[%s2309_s1 + $0x110] sm:$0xff]   ;;  %v1460_v55 = vld.sshfl [vmem:[%s2041_s11 + $0xc] sm:$0x3 pattern:$0x76325410] }
  0x1f   : >> { %1660 = vmatprep.subr.bf16.mxu1 %v1919_v3  ;;  %v1874_v54 = vld [vmem:[%s2309_s1 + $0x150] sm:$0xff]   ;;  %v1875_v56 = vld [vmem:[%s2309_s1 + $0x108] sm:$0xff]   ;;  %v793_v57 = vshll.u32 %v1460_v55, 16  ;;  %v1877_v59 = vld [vmem:[%s2309_s1 + $0x100] sm:$0xff]   ;;  %v791_v60 = vshrl.u32 %v1460_v55, 16 }
  0x20   : >> { %v1876_v58 = vld [vmem:[%s2309_s1 + $0x148] sm:$0xff]   ;;  %v1878_v62 = vld [vmem:[%s2309_s1 + $0x140] sm:$0xff]   ;;  %v1418_v63 = vld [vmem:[%s2041_s11 + $0x12] sm:$0x1] }
  0x21   : >> { %1641 = vmatpush3.bf16.msra.mxu0 %v1839_v11  ;;  %v795_v61 = vrot.slane %v793_v57, 1  ;;  %v1879_v2 = vld [vmem:[%s2309_s1 + $0x1b8] sm:$0xff]   ;;  %v1881_v6 = vld [vmem:[%s2309_s1 + $0x1b0] sm:$0xff]   ;;  %v1883_v8 = vld [vmem:[%s2309_s1 + $0x1a8] sm:$0xff]  }
  0x22   : >> { %1661 = vmatpush3.bf16.msra.mxu1 %v1840_v12  ;;  %1642 = vmatprep.subr.bf16.mxu0 %v1919_v3  ;;  %v1880_v5 = vld [vmem:[%s2309_s1 + $0x1f8] sm:$0xff]   ;;  %v1882_v7 = vld [vmem:[%s2309_s1 + $0x1f0] sm:$0xff]   ;;  %v1884_v9 = vld [vmem:[%s2309_s1 + $0x1e8] sm:$0xff]  }
  0x23   : >> { %1662 = vmatprep.subr.bf16.mxu1 %v1919_v3  ;;  %v796_v4 = vor.u32 %v795_v61, %v791_v60  ;;  %v1885_v10 = vld [vmem:[%s2309_s1 + $0x1a0] sm:$0xff]   ;;  %v1887_v12 = vld [vmem:[%s2309_s1 + $0x198] sm:$0xff]  }
  0x24   : >> { %v1886_v11 = vld [vmem:[%s2309_s1 + $0x1e0] sm:$0xff]  }
  0x25   : >> { %1643 = vmatpush3.bf16.msra.mxu0 %v1841_v13  ;;  %v1888_v13 = vld [vmem:[%s2309_s1 + $0x1d8] sm:$0xff]  }
  0x26   : >> { %1663 = vmatpush3.bf16.msra.mxu1 %v1842_v14  ;;  %1644 = vmatprep.subr.bf16.mxu0 %v1919_v3  ;;  %v1889_v14 = vld [vmem:[%s2309_s1 + $0x190] sm:$0xff]  }
  0x27   : >> { %1664 = vmatprep.subr.bf16.mxu1 %v1919_v3 }
  0x29   : >> { %1645 = vmatpush3.bf16.msra.mxu0 %v1843_v15  ;;  %v1890_v15 = vld [vmem:[%s2309_s1 + $0x1d0] sm:$0xff]  }
  0x2a   : >> { %1665 = vmatpush3.bf16.msra.mxu1 %v1844_v16  ;;  %1646 = vmatprep.subr.bf16.mxu0 %v1919_v3  ;;  %v1891_v16 = vld [vmem:[%s2309_s1 + $0x188] sm:$0xff]  }
  0x2b   : >> { %1666 = vmatprep.subr.bf16.mxu1 %v1919_v3 }
  0x2d   : >> { %1647 = vmatpush3.bf16.msra.mxu0 %v1845_v17  ;;  %v1892_v17 = vld [vmem:[%s2309_s1 + $0x1c8] sm:$0xff]  }
  0x2e   : >> { %1667 = vmatpush3.bf16.msra.mxu1 %v1846_v18  ;;  %1672 = vmatprep.subr.bf16.mxu0 %v1919_v3  ;;  %v1893_v18 = vld [vmem:[%s2309_s1 + $0x180] sm:$0xff]  }
  0x2f   : >> { %1692 = vmatprep.subr.bf16.mxu1 %v1919_v3 }
  0x30   : >> { %1649 = vmatmul.mubr.bf16.vlgmr.msra.gmra.mxu0 %v1333_v19  ;;  %v1894_v19 = vld [vmem:[%s2309_s1 + $0x1c0] sm:$0xff]  }
  0x31   : >> { %1669 = vmatmul.mubr.bf16.vlgmr.msra.gmra.mxu1 %v207_v20  ;;  %1673 = vmatpush3.bf16.msra.mxu0 %v1847_v21  ;;  %v1470_v20 = vld [vmem:[%s2041_s11 + $0x2] sm:$0x1]  ;;  %v1895_v21 = vld [vmem:[%s2309_s1 + $0x238] sm:$0xff]  }
  0x32   : >> { %1693 = vmatpush3.bf16.msra.mxu1 %v1848_v22  ;;  %1674 = vmatprep.subr.bf16.mxu0 %v1919_v3  ;;  %v1496_v22 = vld [vmem:[%s2041_s11 + $0x8] sm:$0x1] }
  0x33   : >> { %1694 = vmatprep.subr.bf16.mxu1 %v1919_v3  ;;  %1688 = vmatprep.mubr.msk.bf16.mxu0 %vm1920_vm0, %v1919_v3 }
  0x34   : >> { %1708 = vmatprep.mubr.msk.bf16.mxu1 %vm1920_vm0, %v1919_v3 }
  0x35   : >> { %1675 = vmatpush3.bf16.msra.mxu0 %v1849_v23  ;;  %v1896_v23 = vld [vmem:[%s2309_s1 + $0x230] sm:$0xff]  }
  0x36   : >> { %1695 = vmatpush3.bf16.msra.mxu1 %v1850_v24  ;;  %1676 = vmatprep.subr.bf16.mxu0 %v1919_v3  ;;  %v1897_v24 = vld [vmem:[%s2309_s1 + $0x228] sm:$0xff]  }
  0x37   : >> { %1696 = vmatprep.subr.bf16.mxu1 %v1919_v3 }
  0x39   : >> { %1677 = vmatpush3.bf16.msra.mxu0 %v1851_v25  ;;  %v1898_v25 = vld [vmem:[%s2309_s1 + $0x220] sm:$0xff]  }
  0x3a   : >> { %1697 = vmatpush3.bf16.msra.mxu1 %v1852_v26  ;;  %1678 = vmatprep.subr.bf16.mxu0 %v1919_v3  ;;  %v1899_v26 = vld [vmem:[%s2309_s1 + $0x218] sm:$0xff]  }
  0x3b   : >> { %1698 = vmatprep.subr.bf16.mxu1 %v1919_v3 }
  0x3d   : >> { %1679 = vmatpush3.bf16.msra.mxu0 %v1853_v27  ;;  %v1900_v27 = vld [vmem:[%s2309_s1 + $0x210] sm:$0xff]  }
  0x3e   : >> { %1699 = vmatpush3.bf16.msra.mxu1 %v1854_v28  ;;  %1680 = vmatprep.subr.bf16.mxu0 %v1919_v3  ;;  %v1538_v28 = vld.sshfl [vmem:[%s2041_s11 + $0x2] sm:$0x3 pattern:$0x76325410]  ;;  %s1246_s11 = scalar_lea.vmem %s1967_s25, %s1917_s29  ;;  %s204_s29 = sadd.s32 1, %s1917_s29  }
  0x3f   : >> { %1700 = vmatprep.subr.bf16.mxu1 %v1919_v3  ;;  %v1134_v31 = vshrl.u32 %v1538_v28, 16  ;;  %p201_p4 = scmp.ge.s32.totalorder %s204_s29, 2  }
  0x41   : >> { %1681 = vmatpush3.bf16.msra.mxu0 %v1855_v29  ;;  %v1136_v29 = vshll.u32 %v1538_v28, 16 }
  0x42   : >> { %1701 = vmatpush3.bf16.msra.mxu1 %v1856_v30  ;;  %1682 = vmatprep.subr.bf16.mxu0 %v1919_v3  ;;  %v1901_v30 = vld [vmem:[%s2309_s1 + $0x208] sm:$0xff]  }
  0x43   : >> { %1702 = vmatprep.subr.bf16.mxu1 %v1919_v3 }
  0x45   : >> { %1683 = vmatpush3.bf16.msra.mxu0 %v1857_v32  ;;  %v1138_v32 = vrot.slane %v1136_v29, 1 }
  0x46   : >> { %1703 = vmatpush3.bf16.msra.mxu1 %v1858_v33  ;;  %1684 = vmatprep.subr.bf16.mxu0 %v1919_v3  ;;  %v1902_v33 = vld [vmem:[%s2309_s1 + $0x200] sm:$0xff]  }
  0x47   : >> { %1704 = vmatprep.subr.bf16.mxu1 %v1919_v3  ;;  %v1139_v34 = vor.u32 %v1138_v32, %v1134_v31 }
  0x49   : >> { %1685 = vmatpush3.bf16.msra.mxu0 %v1859_v35 }
  0x4a   : >> { %1705 = vmatpush3.bf16.msra.mxu1 %v1860_v36  ;;  %1686 = vmatprep.subr.bf16.mxu0 %v1919_v3 }
  0x4b   : >> { %1706 = vmatprep.subr.bf16.mxu1 %v1919_v3 }
  0x4d   : >> { %1687 = vmatpush3.bf16.msra.mxu0 %v1861_v39 }
  0x4e   : >> { %1707 = vmatpush3.bf16.msra.mxu1 %v1862_v40  ;;  %1712 = vmatprep.subr.bf16.mxu0 %v1919_v3 }
  0x4f   : >> { %1732 = vmatprep.subr.bf16.mxu1 %v1919_v3 }
  0x50   : >> { %1689 = vmatmul.mubr.bf16.vlgmr.msra.gmra.mxu0 %v453_v41 }
  0x51   : >> { %1713 = vmatpush3.bf16.msra.mxu0 %v1863_v42  ;;  %1709 = vmatmul.mubr.bf16.vlgmr.msra.gmra.mxu1 %v1392_v43 }
  0x52   : >> { %1733 = vmatpush3.bf16.msra.mxu1 %v1864_v44  ;;  %1714 = vmatprep.subr.bf16.mxu0 %v1919_v3 }
  0x53   : >> { %1734 = vmatprep.subr.bf16.mxu1 %v1919_v3  ;;  %1728 = vmatprep.mubr.msk.bf16.mxu0 %vm1920_vm0, %v1919_v3 }
  0x54   : >> { %1748 = vmatprep.mubr.msk.bf16.mxu1 %vm1920_vm0, %v1919_v3 }
  0x55   : >> { %1715 = vmatpush3.bf16.msra.mxu0 %v1865_v45 }
  0x56   : >> { %1735 = vmatpush3.bf16.msra.mxu1 %v1866_v46  ;;  %1716 = vmatprep.subr.bf16.mxu0 %v1919_v3 }
  0x57   : >> { %1736 = vmatprep.subr.bf16.mxu1 %v1919_v3 }
  0x59   : >> { %1717 = vmatpush3.bf16.msra.mxu0 %v1867_v47 }
  0x5a   : >> { %1737 = vmatpush3.bf16.msra.mxu1 %v1868_v48  ;;  %1718 = vmatprep.subr.bf16.mxu0 %v1919_v3 }
  0x5b   : >> { %1738 = vmatprep.subr.bf16.mxu1 %v1919_v3 }
  0x5d   : >> { %1719 = vmatpush3.bf16.msra.mxu0 %v1869_v49 }
  0x5e   : >> { %1739 = vmatpush3.bf16.msra.mxu1 %v1870_v50  ;;  %1720 = vmatprep.subr.bf16.mxu0 %v1919_v3 }
  0x5f   : >> { %1740 = vmatprep.subr.bf16.mxu1 %v1919_v3 }
  0x61   : >> { %1721 = vmatpush3.bf16.msra.mxu0 %v1871_v51 }
  0x62   : >> { %1741 = vmatpush3.bf16.msra.mxu1 %v1872_v52  ;;  %1722 = vmatprep.subr.bf16.mxu0 %v1919_v3 }
  0x63   : >> { %1742 = vmatprep.subr.bf16.mxu1 %v1919_v3 }
  0x65   : >> { %1723 = vmatpush3.bf16.msra.mxu0 %v1873_v53 }
  0x66   : >> { %1743 = vmatpush3.bf16.msra.mxu1 %v1874_v54  ;;  %1724 = vmatprep.subr.bf16.mxu0 %v1919_v3 }
  0x67   : >> { %1744 = vmatprep.subr.bf16.mxu1 %v1919_v3 }
  0x69   : >> { %1725 = vmatpush3.bf16.msra.mxu0 %v1875_v56 }
  0x6a   : >> { %1745 = vmatpush3.bf16.msra.mxu1 %v1876_v58  ;;  %1726 = vmatprep.subr.bf16.mxu0 %v1919_v3 }
  0x6b   : >> { %1746 = vmatprep.subr.bf16.mxu1 %v1919_v3 }
  0x6d   : >> { %1727 = vmatpush3.bf16.msra.mxu0 %v1877_v59 }
  0x6e   : >> { %1747 = vmatpush3.bf16.msra.mxu1 %v1878_v62  ;;  %1752 = vmatprep.subr.bf16.mxu0 %v1919_v3 }
  0x6f   : >> { %1772 = vmatprep.subr.bf16.mxu1 %v1919_v3 }
  0x70   : >> { %1729 = vmatmul.mubr.bf16.vlgmr.msra.gmra.mxu0 %v1418_v63 }
  0x71   : >> { %1753 = vmatpush3.bf16.msra.mxu0 %v1879_v2  ;;  %1749 = vmatmul.mubr.bf16.vlgmr.msra.gmra.mxu1 %v796_v4 }
  0x72   : >> { %1773 = vmatpush3.bf16.msra.mxu1 %v1880_v5  ;;  %1754 = vmatprep.subr.bf16.mxu0 %v1919_v3 }
  0x73   : >> { %1774 = vmatprep.subr.bf16.mxu1 %v1919_v3  ;;  %1768 = vmatprep.mubr.msk.bf16.mxu0 %vm1920_vm0, %v1919_v3 }
  0x74   : >> { %1788 = vmatprep.mubr.msk.bf16.mxu1 %vm1920_vm0, %v1919_v3 }
  0x75   : >> { %1755 = vmatpush3.bf16.msra.mxu0 %v1881_v6 }
  0x76   : >> { %1775 = vmatpush3.bf16.msra.mxu1 %v1882_v7  ;;  %1756 = vmatprep.subr.bf16.mxu0 %v1919_v3 }
  0x77   : >> { %1776 = vmatprep.subr.bf16.mxu1 %v1919_v3 }
  0x79   : >> { %1757 = vmatpush3.bf16.msra.mxu0 %v1883_v8 }
  0x7a   : >> { %1777 = vmatpush3.bf16.msra.mxu1 %v1884_v9  ;;  %1758 = vmatprep.subr.bf16.mxu0 %v1919_v3 }
  0x7b   : >> { %1778 = vmatprep.subr.bf16.mxu1 %v1919_v3 }
  0x7d   : >> { %1759 = vmatpush3.bf16.msra.mxu0 %v1885_v10 }
  0x7e   : >> { %1779 = vmatpush3.bf16.msra.mxu1 %v1886_v11  ;;  %1760 = vmatprep.subr.bf16.mxu0 %v1919_v3 }
  0x7f   : >> { %1780 = vmatprep.subr.bf16.mxu1 %v1919_v3 }
  0x81   : >> { %1761 = vmatpush3.bf16.msra.mxu0 %v1887_v12 }
  0x82   : >> { %1781 = vmatpush3.bf16.msra.mxu1 %v1888_v13  ;;  %1762 = vmatprep.subr.bf16.mxu0 %v1919_v3 }
  0x83   : >> { %1782 = vmatprep.subr.bf16.mxu1 %v1919_v3 }
  0x85   : >> { %1763 = vmatpush3.bf16.msra.mxu0 %v1889_v14 }
  0x86   : >> { %1783 = vmatpush3.bf16.msra.mxu1 %v1890_v15  ;;  %1764 = vmatprep.subr.bf16.mxu0 %v1919_v3 }
  0x87   : >> { %1784 = vmatprep.subr.bf16.mxu1 %v1919_v3 }
  0x89   : >> { %1765 = vmatpush3.bf16.msra.mxu0 %v1891_v16 }
  0x8a   : >> { %1785 = vmatpush3.bf16.msra.mxu1 %v1892_v17  ;;  %1766 = vmatprep.subr.bf16.mxu0 %v1919_v3 }
  0x8b   : >> { %1786 = vmatprep.subr.bf16.mxu1 %v1919_v3 }
  0x8d   : >> { %1767 = vmatpush3.bf16.msra.mxu0 %v1893_v18 }
  0x8e   : >> { %1787 = vmatpush3.bf16.msra.mxu1 %v1894_v19  ;;  %1792 = vmatprep.subr.bf16.mxu0 %v1919_v3 }
  0x90   : >> { %1769 = vmatmul.mubr.bf16.vlgmr.msra.gmra.mxu0 %v1470_v20 }
  0x91   : >> { %1793 = vmatpush3.bf16.msra.mxu0 %v1895_v21  ;;  %1789 = vmatmul.mubr.bf16.vlgmr.msra.gmra.mxu1 %v1496_v22 }
  0x92   : >> { %1794 = vmatprep.subr.bf16.mxu0 %v1919_v3  ;;  %1808 = vmatprep.mubr.msk.bf16.mxu0 %vm1920_vm0, %v1919_v3 }
  0x95   : >> { %1795 = vmatpush3.bf16.msra.mxu0 %v1896_v23 }
  0x96   : >> { %1796 = vmatprep.subr.bf16.mxu0 %v1919_v3 }
  0x99   : >> { %1797 = vmatpush3.bf16.msra.mxu0 %v1897_v24 }
  0x9a   : >> { %1798 = vmatprep.subr.bf16.mxu0 %v1919_v3 }
  0x9d   : >> { %1799 = vmatpush3.bf16.msra.mxu0 %v1898_v25 }
  0x9e   : >> { %1800 = vmatprep.subr.bf16.mxu0 %v1919_v3 }
  0xa1   : >> { %1801 = vmatpush3.bf16.msra.mxu0 %v1899_v26 }
  0xa2   : >> { %1802 = vmatprep.subr.bf16.mxu0 %v1919_v3 }
  0xa5   : >> { %1803 = vmatpush3.bf16.msra.mxu0 %v1900_v27 }
  0xa6   : >> { %1804 = vmatprep.subr.bf16.mxu0 %v1919_v3 }
  0xa9   : >> { %1805 = vmatpush3.bf16.msra.mxu0 %v1901_v30 }
  0xaa   : >> { %1806 = vmatprep.subr.bf16.mxu0 %v1919_v3 }
  0xad   : >> { %1807 = vmatpush3.bf16.msra.mxu0 %v1902_v33 }
  0xb0   : >> { %1809 = vmatmul.mubr.bf16.vlgmr.msra.gmra.mxu0 %v1139_v34 }
  0xf0   : >> { %v327_v35 = vpop.f32.mrf.mxu0 }
  0xf1   : >> { %v415_v36 = vpop.f32.mrf.mxu1 }
  0xf2   : >> { %v416_v37 = vadd.f32 %v415_v36, %v327_v35  ;;  %v1650_v38 = vpop.f32.mrf.mxu0 }
  0xf3   : >> { %v1670_v39 = vpop.f32.mrf.mxu1 }
  0xf4   : >> { %v330_v40 = vpop.f32.mrf.mxu0 }
  0xf5   : >> { %v418_v41 = vpop.f32.mrf.mxu1 }
  0xf6   : >> { %v1651_v42 = vpop.f32.mrf.mxu0 }
  0xf7   : >> { %v1671_v43 = vpop.f32.mrf.mxu1 }
 0x110   : >> { %v537_v44 = vpop.f32.mrf.mxu0 }
 0x111   : >> { %v543_v45 = vadd.f32 %v537_v44, %v416_v37  ;;  %v647_v46 = vpop.f32.mrf.mxu1 }
 0x112   : >> { %v1690_v47 = vpop.f32.mrf.mxu0 }
 0x113   : >> { %v653_v48 = vadd.f32 %v647_v46, %v543_v45  ;;  %v1710_v49 = vpop.f32.mrf.mxu1 }
 0x114   : >> { %v540_v50 = vpop.f32.mrf.mxu0 }
 0x115   : >> { %v650_v3 = vpop.f32.mrf.mxu1 }
 0x116   : >> { %v1691_v51 = vpop.f32.mrf.mxu0 }
 0x117   : >> { %v1711_v52 = vpop.f32.mrf.mxu1 }
 0x130   : >> { %v757_v53 = vpop.f32.mrf.mxu0 }
 0x131   : >> { %v880_v54 = vpop.f32.mrf.mxu1  ;;  %v763_v8 = vadd.f32 %v757_v53, %v653_v48 }
 0x132   : >> { %v1730_v55 = vpop.f32.mrf.mxu0 }
 0x133   : >> { %v1750_v56 = vpop.f32.mrf.mxu1  ;;  %v886_v9 = vadd.f32 %v880_v54, %v763_v8 }
 0x134   : >> { %v760_v57 = vpop.f32.mrf.mxu0 }
 0x135   : >> { %v883_v58 = vpop.f32.mrf.mxu1 }
 0x136   : >> { %v1731_v59 = vpop.f32.mrf.mxu0 }
 0x137   : >> { %v1751_v60 = vpop.f32.mrf.mxu1 }
 0x150   : >> { %v990_v61 = vpop.f32.mrf.mxu0 }
 0x151   : >> { %v1100_v62 = vpop.f32.mrf.mxu1  ;;  %v996_v10 = vadd.f32 %v990_v61, %v886_v9 }
 0x152   : >> { %v1770_v63 = vpop.f32.mrf.mxu0 }
 0x153   : >> { %v1790_v2 = vpop.f32.mrf.mxu1  ;;  %v1106_v11 = vadd.f32 %v1100_v62, %v996_v10 }
 0x154   : >> { %v993_v4 = vpop.f32.mrf.mxu0 }
 0x155   : >> { %v1103_v5 = vpop.f32.mrf.mxu1 }
 0x156   : >> { %v1771_v6 = vpop.f32.mrf.mxu0 }
 0x157   : >> { %v1791_v7 = vpop.f32.mrf.mxu1 }
 0x170   : >> { %v1223_v12 = vpop.f32.mrf.mxu0 }
 0x171   : >> { %v1229_v13 = vadd.f32 %v1223_v12, %v1106_v11 }
 0x172   : >> { %v1810_v14 = vpop.f32.mrf.mxu0 }
 0x173   : >> { %v1236_v15 = vmul.f32 %v1957_v0, %v1229_v13 }
 0x174   : >> { %v1226_v16 = vpop.f32.mrf.mxu0 }
 0x175   : >> { %v1243_v17 = vadd.f32 %v1962_v1, %v1236_v15 }
 0x176   : >> { %v1811_v18 = vpop.f32.mrf.mxu0 }
 0x177   : >> { %v1244_v19 = vmax.f32 %v1243_v17, 0.0  ;;  %203 = sbr.rel (!%p201_p4) target bundleno = 15 (0xf), region = 88 }
 0x179   : >> { %v1245_v20 = vpack.c.bf16 %v1244_v19, %v1244_v19 }
 0x17b   : >> { %1247 = vst [vmem:[%s1246_s11] sm:$0x1] %v1245_v20 }
 0x17c PF: > { %s14_s15 = sadd.s32 1, %s1913_s15  }
 0x17d   : > { %p11_p5 = scmp.ge.s32.totalorder %s14_s15, 4  }
 0x17f   :  { %13 = sbr.rel (!%p11_p5) target bundleno = 1 (0x1), region = 99 }

// kernel: _lambda_.23
= control target key start
LH: loop header
LB: loop body
LE: loop exit
PB: predicated region body
PF: predicated region fallthrough
CT: control target
= control target key end

     0   :  { %s453_s15 = smov 0   ;;  %s500_s0 = inlined_call_operand.vmem [shape: bf16[2,4,1,128], index: 0, kind: input, shape index: {}]   ;;  %s501_s1 = inlined_call_operand.vmem [shape: bf16[1,128,128], index: 1, kind: input, shape index: {}]   ;;  %s502_s2 = inlined_call_operand.vmem [shape: f32[1,128], index: 2, kind: input, shape index: {}]   ;;  %s503_s3 = inlined_call_operand.vmem [shape: f32[1,128], index: 3, kind: input, shape index: {}]   ;;  %s504_s4 = inlined_call_operand.vmem [shape: bf16[2,1,1,128], index: 4, kind: output, shape index: {}]  }
   0x1 LB: > { %s355_s16 = sadd.s32 4294967295, %s424_s15   ;;  %p359_p0 = scmp.ge.s32.totalorder %s424_s15, 1  ;;  %s424_s15 = sphi %s453_s15, %s14_s15  }
   0x2   : > { %p161_p1 = scmp.lt.s32.totalorder %s424_s15, 3 }
   0x4   : > { %p162_p2 = pnand %p359_p0, %p161_p1 }
   0x5   : > { %p184_p3 = scmp.lt.s32.totalorder (!%p162_p2), %s355_s16, 1 }
   0x6   : > { %165 = sbr.rel (%p162_p2) target bundleno = 245 (0xf5), region = 36 }
   0xb   : > { %v410_v0 = vld [vmem:[%s501_s1 + $0x38] sm:$0xff]   ;;  %v426_v1 = vmov 0.0   ;;  %v411_v2 = vld [vmem:[%s501_s1 + $0x30] sm:$0xff]   ;;  %vm427_vm0 = vmmov 0   ;;  %v412_v3 = vld [vmem:[%s501_s1 + $0x28] sm:$0xff]   ;;  %s506_s16 = smov (!%p184_p3, %s355_s16), 1 }
   0xc   : > { %380 = vmatprep.subr.bf16.mxu0 %v426_v1  ;;  %396 = vmatprep.mubr.msk.bf16.mxu0 %vm427_vm0, %v426_v1  ;;  %v413_v4 = vld [vmem:[%s501_s1 + $0x20] sm:$0xff]   ;;  %v414_v5 = vld [vmem:[%s501_s1 + $0x18] sm:$0xff]   ;;  %v415_v6 = vld [vmem:[%s501_s1 + $0x10] sm:$0xff]   ;;  %s360_s5 = sshll.u32 %s506_s16, 2  ;;  %s190_s19 = scalar_lea.vmem %s504_s4, %s506_s16  ;;  %vm302_vm1 = vcmask 1040384  }
   0xd   : > { %381 = vmatpush3.bf16.msra.mxu0 %v410_v0  ;;  %v416_v7 = vld [vmem:[%s501_s1 + $0x8] sm:$0xff]   ;;  %v417_v8 = vld [vmem:[%s501_s1] sm:$0xff]   ;;  %s187_s10 = scalar_lea.vmem %s500_s0, %s360_s5  ;;  %vm303_vm2 = vsmask.f32 256 }
   0xe   : > { %382 = vmatprep.subr.bf16.mxu0 %v426_v1  ;;  %v194_v9 = vld [vmem:[%s187_s10] sm:$0x1]  ;;  %vm304_vm3 = vmand %vm302_vm1, %vm303_vm2 }
   0xf   : > { %v192_v10 = vld [vmem:[%s502_s2] sm:$0x1] }
  0x10   : > { %v193_v11 = vld [vmem:[%s503_s3] sm:$0x1] }
  0x11   : > { %383 = vmatpush3.bf16.msra.mxu0 %v411_v2  ;;  %v305_v16 = vld [vmem:[%s190_s19] sm:$0x1] }
  0x12   : > { %384 = vmatprep.subr.bf16.mxu0 %v426_v1 }
  0x15   : > { %385 = vmatpush3.bf16.msra.mxu0 %v412_v3 }
  0x16   : > { %386 = vmatprep.subr.bf16.mxu0 %v426_v1 }
  0x19   : > { %387 = vmatpush3.bf16.msra.mxu0 %v413_v4 }
  0x1a   : > { %388 = vmatprep.subr.bf16.mxu0 %v426_v1 }
  0x1d   : > { %389 = vmatpush3.bf16.msra.mxu0 %v414_v5 }
  0x1e   : > { %390 = vmatprep.subr.bf16.mxu0 %v426_v1 }
  0x21   : > { %391 = vmatpush3.bf16.msra.mxu0 %v415_v6 }
  0x22   : > { %392 = vmatprep.subr.bf16.mxu0 %v426_v1 }
  0x25   : > { %393 = vmatpush3.bf16.msra.mxu0 %v416_v7 }
  0x26   : > { %394 = vmatprep.subr.bf16.mxu0 %v426_v1 }
  0x29   : > { %395 = vmatpush3.bf16.msra.mxu0 %v417_v8 }
  0x2c   : > { %397 = vmatmul.mubr.bf16.vlgmr.msra.gmra.mxu0 %v194_v9 }
  0xec   : > { %v293_v12 = vpop.f32.mrf.mxu0 }
  0xed   : > { %v299_v13 = vmul.f32 %v293_v12, %v192_v10 }
  0xee   : > { %v398_v14 = vpop.f32.mrf.mxu0 }
  0xef   : > { %v300_v15 = vadd.f32 %v299_v13, %v193_v11 }
  0xf0   : > { %v296_v17 = vpop.f32.mrf.mxu0 }
  0xf1   : > { %v301_v18 = vpack.c.bf16 %v300_v15, %v300_v15 }
  0xf2   : > { %v399_v19 = vpop.f32.mrf.mxu0 }
  0xf3   : > { %v306_v20 = vsel %vm304_vm3, %v301_v18, %v305_v16 }
  0xf4   : > { %307 = vst [vmem:[%s190_s19] sm:$0x1] %v306_v20 }
  0xf5 PF: > { %s14_s15 = sadd.s32 1, %s424_s15  }
  0xf6   : > { %p11_p4 = scmp.ge.s32.totalorder %s14_s15, 4  }
  0xf8   :  { %13 = sbr.rel (!%p11_p4) target bundleno = 1 (0x1), region = 66 }

// kernel: _lambda_.21
= control target key start
LH: loop header
LB: loop body
LE: loop exit
PB: predicated region body
PF: predicated region fallthrough
CT: control target
= control target key end

     0   :  { %s2025_s18 = smov 0   ;;  %s2394_s0 = inlined_call_operand.vmem [shape: bf16[2,4,4,128], index: 0, kind: input, shape index: {}]   ;;  %s2395_s1 = inlined_call_operand.vmem [shape: bf16[9,128,128], index: 1, kind: input, shape index: {}]   ;;  %s2396_s2 = inlined_call_operand.vmem [shape: f32[1,128], index: 2, kind: input, shape index: {}]   ;;  %s2397_s3 = inlined_call_operand.vmem [shape: f32[1,128], index: 3, kind: input, shape index: {}]   ;;  %s2398_s4 = inlined_call_operand.vmem [shape: bf16[2,2,2,128], index: 4, kind: input, shape index: {}]   ;;  %s2399_s5 = inlined_call_operand.vmem [shape: bf16[2,2,2,128], index: 5, kind: output, shape index: {}]  }
   0x1 LB: > { %s1397_s19 = sadd.s32 4294967295, %s1987_s18   ;;  %p1401_p0 = scmp.ge.s32.totalorder %s1987_s18, 1  ;;  %s1987_s18 = sphi %s2025_s18, %s15_s18  }
   0x2   : > { %p196_p1 = scmp.lt.s32.totalorder %s1987_s18, 3 }
   0x4   : > { %p197_p2 = pnand %p1401_p0, %p196_p1 }
   0x5   : > { %p227_p3 = scmp.lt.s32.totalorder (!%p197_p2), %s1397_s19, 1  ;;  %s2058_s10 = smov (!%p197_p2), 0  }
   0x6   : > { %200 = sbr.rel (%p197_p2) target bundleno = 382 (0x17e), region = 40 }
   0xb   : > { %v2036_v0 = vld [vmem:[%s2396_s2] ss:$0 sm:$0xff]  ;;  %s2401_s19 = smov (!%p227_p3, %s1397_s19), 1 }
   0xc   : > { %v2041_v1 = vld [vmem:[%s2397_s3] ss:$0 sm:$0xff]  ;;  %s1625_s24 = sshll.u32 %s2401_s19, 3  ;;  %s1404_s25 = sshll.u32 %s2401_s19, 1 }
   0xd   : > { %s2046_s28 = scalar_lea.vmem %s2394_s0, %s1625_s24  ;;  %s2051_s6 = scalar_lea.vmem %s2398_s4, %s1404_s25 }
   0xe   : > { %s2056_s9 = scalar_lea.vmem %s2399_s5, %s1404_s25 }
   0xf LB: >> { %v1905_v2 = vld [vmem:[%s2395_s1 + $0x78] sm:$0xff]   ;;  %v1993_v3 = vmov 0.0   ;;  %v1907_v5 = vld [vmem:[%s2395_s1 + $0x70] sm:$0xff]   ;;  %vm1994_vm0 = vmmov 0   ;;  %v1909_v7 = vld [vmem:[%s2395_s1 + $0x68] sm:$0xff]   ;;  %s1406_s26 = sshll.u32 %s1991_s10, 1  ;;  %s1315_s24 = scalar_lea.vmem %s2056_s9, %s1991_s10  ;;  %s1991_s10 = sphi %s2058_s10, %s248_s10  }
  0x10   : >> { %1707 = vmatprep.subr.bf16.mxu0 %v1993_v3  ;;  %1727 = vmatprep.subr.bf16.mxu1 %v1993_v3  ;;  %v1906_v4 = vld [vmem:[%s2395_s1 + $0x38] sm:$0xff]   ;;  %v1908_v6 = vld [vmem:[%s2395_s1 + $0x30] sm:$0xff]   ;;  %v1910_v8 = vld [vmem:[%s2395_s1 + $0x28] sm:$0xff]   ;;  %s2101_s30 = scalar_lea.vmem %s2046_s28, %s1406_s26 }
  0x11   : >> { %1708 = vmatpush3.bf16.msra.mxu0 %v1905_v2  ;;  %1723 = vmatprep.mubr.msk.bf16.mxu0 %vm1994_vm0, %v1993_v3  ;;  %v1911_v9 = vld [vmem:[%s2395_s1 + $0x60] sm:$0xff]   ;;  %v1913_v11 = vld [vmem:[%s2395_s1 + $0x58] sm:$0xff]   ;;  %v1915_v14 = vld [vmem:[%s2395_s1 + $0x50] sm:$0xff]  }
  0x12   : >> { %1728 = vmatpush3.bf16.msra.mxu1 %v1906_v4  ;;  %1709 = vmatprep.subr.bf16.mxu0 %v1993_v3  ;;  %v1912_v10 = vld [vmem:[%s2395_s1 + $0x20] sm:$0xff]   ;;  %v1914_v12 = vld [vmem:[%s2395_s1 + $0x18] sm:$0xff]   ;;  %v1916_v15 = vld [vmem:[%s2395_s1 + $0x10] sm:$0xff]  }
  0x13   : >> { %1729 = vmatprep.subr.bf16.mxu1 %v1993_v3  ;;  %1743 = vmatprep.mubr.msk.bf16.mxu1 %vm1994_vm0, %v1993_v3  ;;  %v1423_v13 = vld.sshfl [vmem:[%s2101_s30] sm:$0x3 pattern:$0x76325410]  ;;  %v1917_v17 = vld [vmem:[%s2395_s1 + $0x48] sm:$0xff]   ;;  %v1921_v25 = vld [vmem:[%s2395_s1 + $0xb8] sm:$0xff]  }
  0x14   : >> { %v297_v16 = vshll.u32 %v1423_v13, 16  ;;  %v1918_v18 = vld [vmem:[%s2395_s1 + $0x8] sm:$0xff]   ;;  %v295_v19 = vshrl.u32 %v1423_v13, 16  ;;  %v1919_v21 = vld [vmem:[%s2395_s1 + $0x40] sm:$0xff]   ;;  %v1922_v26 = vld [vmem:[%s2395_s1 + $0xf8] sm:$0xff]  }
  0x15   : >> { %1710 = vmatpush3.bf16.msra.mxu0 %v1907_v5  ;;  %v1920_v22 = vld [vmem:[%s2395_s1] sm:$0xff]   ;;  %v1923_v27 = vld [vmem:[%s2395_s1 + $0xb0] sm:$0xff]   ;;  %v1925_v29 = vld [vmem:[%s2395_s1 + $0xa8] sm:$0xff]  }
  0x16   : >> { %1730 = vmatpush3.bf16.msra.mxu1 %v1908_v6  ;;  %1711 = vmatprep.subr.bf16.mxu0 %v1993_v3  ;;  %v299_v20 = vrot.slane %v297_v16, 1  ;;  %v251_v24 = vld [vmem:[%s2101_s30] sm:$0x1]  ;;  %v1924_v28 = vld [vmem:[%s2395_s1 + $0xf0] sm:$0xff]   ;;  %v1926_v30 = vld [vmem:[%s2395_s1 + $0xe8] sm:$0xff]  }
  0x17   : >> { %1731 = vmatprep.subr.bf16.mxu1 %v1993_v3  ;;  %v1927_v31 = vld [vmem:[%s2395_s1 + $0xa0] sm:$0xff]   ;;  %v1929_v33 = vld [vmem:[%s2395_s1 + $0x98] sm:$0xff]   ;;  %v1931_v35 = vld [vmem:[%s2395_s1 + $0x90] sm:$0xff]  }
  0x18   : >> { %v300_v23 = vor.u32 %v299_v20, %v295_v19  ;;  %v1928_v32 = vld [vmem:[%s2395_s1 + $0xe0] sm:$0xff]   ;;  %v1930_v34 = vld [vmem:[%s2395_s1 + $0xd8] sm:$0xff]   ;;  %v1932_v36 = vld [vmem:[%s2395_s1 + $0xd0] sm:$0xff]  }
  0x19   : >> { %1712 = vmatpush3.bf16.msra.mxu0 %v1909_v7  ;;  %v1933_v37 = vld [vmem:[%s2395_s1 + $0x88] sm:$0xff]   ;;  %v1456_v39 = vld.sshfl [vmem:[%s2101_s30] sm:$0x2 pattern:$0x76325410]  ;;  %v1937_v43 = vld [vmem:[%s2395_s1 + $0x138] sm:$0xff]  }
  0x1a   : >> { %1732 = vmatpush3.bf16.msra.mxu1 %v1910_v8  ;;  %1713 = vmatprep.subr.bf16.mxu0 %v1993_v3  ;;  %v1934_v38 = vld [vmem:[%s2395_s1 + $0xc8] sm:$0xff]   ;;  %v1935_v40 = vld [vmem:[%s2395_s1 + $0x80] sm:$0xff]   ;;  %v504_v42 = vrot.slane %v1456_v39, 1  ;;  %v1938_v44 = vld [vmem:[%s2395_s1 + $0x178] sm:$0xff]  }
  0x1b   : >> { %1733 = vmatprep.subr.bf16.mxu1 %v1993_v3  ;;  %v1936_v41 = vld [vmem:[%s2395_s1 + $0xc0] sm:$0xff]   ;;  %v1939_v46 = vld [vmem:[%s2395_s1 + $0x130] sm:$0xff]   ;;  %v1941_v48 = vld [vmem:[%s2395_s1 + $0x128] sm:$0xff]  }
  0x1c   : >> { %v1466_v45 = vld [vmem:[%s2101_s30 + $0x2] sm:$0x1]  ;;  %v1940_v47 = vld [vmem:[%s2395_s1 + $0x170] sm:$0xff]   ;;  %v1942_v49 = vld [vmem:[%s2395_s1 + $0x168] sm:$0xff]  }
  0x1d   : >> { %1714 = vmatpush3.bf16.msra.mxu0 %v1911_v9  ;;  %v1943_v50 = vld [vmem:[%s2395_s1 + $0x120] sm:$0xff]   ;;  %v1945_v52 = vld [vmem:[%s2395_s1 + $0x118] sm:$0xff]   ;;  %v1947_v54 = vld [vmem:[%s2395_s1 + $0x110] sm:$0xff]  }
  0x1e   : >> { %1734 = vmatpush3.bf16.msra.mxu1 %v1912_v10  ;;  %1715 = vmatprep.subr.bf16.mxu0 %v1993_v3  ;;  %v1944_v51 = vld [vmem:[%s2395_s1 + $0x160] sm:$0xff]   ;;  %v1946_v53 = vld [vmem:[%s2395_s1 + $0x158] sm:$0xff]   ;;  %v1948_v56 = vld [vmem:[%s2395_s1 + $0x150] sm:$0xff]  }
  0x1f   : >> { %1735 = vmatprep.subr.bf16.mxu1 %v1993_v3  ;;  %v1508_v55 = vld.sshfl [vmem:[%s2101_s30 + $0x2] sm:$0x3 pattern:$0x76325410]  ;;  %v1949_v58 = vld [vmem:[%s2395_s1 + $0x108] sm:$0xff]   ;;  %v1953_v5 = vld [vmem:[%s2395_s1 + $0x1b8] sm:$0xff]  }
  0x20   : >> { %v734_v57 = vshll.u32 %v1508_v55, 16  ;;  %v1950_v59 = vld [vmem:[%s2395_s1 + $0x148] sm:$0xff]   ;;  %v732_v60 = vshrl.u32 %v1508_v55, 16  ;;  %v1951_v62 = vld [vmem:[%s2395_s1 + $0x100] sm:$0xff]   ;;  %v1954_v7 = vld [vmem:[%s2395_s1 + $0x1f8] sm:$0xff]  }
  0x21   : >> { %1716 = vmatpush3.bf16.msra.mxu0 %v1913_v11  ;;  %v1952_v63 = vld [vmem:[%s2395_s1 + $0x140] sm:$0xff]   ;;  %v1955_v8 = vld [vmem:[%s2395_s1 + $0x1b0] sm:$0xff]   ;;  %v1957_v10 = vld [vmem:[%s2395_s1 + $0x1a8] sm:$0xff]  }
  0x22   : >> { %1736 = vmatpush3.bf16.msra.mxu1 %v1914_v12  ;;  %1717 = vmatprep.subr.bf16.mxu0 %v1993_v3  ;;  %v736_v61 = vrot.slane %v734_v57, 1  ;;  %v1534_v2 = vld.sshfl [vmem:[%s2101_s30 + $0x2] sm:$0x2 pattern:$0x76325410]  ;;  %v1956_v9 = vld [vmem:[%s2395_s1 + $0x1f0] sm:$0xff]  }
  0x23   : >> { %1737 = vmatprep.subr.bf16.mxu1 %v1993_v3  ;;  %v854_v6 = vrot.slane %v1534_v2, 1  ;;  %v1958_v11 = vld [vmem:[%s2395_s1 + $0x1e8] sm:$0xff]   ;;  %v1959_v12 = vld [vmem:[%s2395_s1 + $0x1a0] sm:$0xff]   ;;  %v1963_v16 = vld [vmem:[%s2395_s1 + $0x190] sm:$0xff]  }
  0x24   : >> { %v737_v4 = vor.u32 %v736_v61, %v732_v60  ;;  %v1960_v13 = vld [vmem:[%s2395_s1 + $0x1e0] sm:$0xff]   ;;  %v1965_v19 = vld [vmem:[%s2395_s1 + $0x188] sm:$0xff]  }
  0x25   : >> { %1718 = vmatpush3.bf16.msra.mxu0 %v1915_v14  ;;  %v1961_v14 = vld [vmem:[%s2395_s1 + $0x198] sm:$0xff]  }
  0x26   : >> { %1738 = vmatpush3.bf16.msra.mxu1 %v1916_v15  ;;  %1719 = vmatprep.subr.bf16.mxu0 %v1993_v3  ;;  %v1962_v15 = vld [vmem:[%s2395_s1 + $0x1d8] sm:$0xff]  }
  0x27   : >> { %1739 = vmatprep.subr.bf16.mxu1 %v1993_v3 }
  0x29   : >> { %1720 = vmatpush3.bf16.msra.mxu0 %v1917_v17  ;;  %v1964_v17 = vld [vmem:[%s2395_s1 + $0x1d0] sm:$0xff]  }
  0x2a   : >> { %1740 = vmatpush3.bf16.msra.mxu1 %v1918_v18  ;;  %1721 = vmatprep.subr.bf16.mxu0 %v1993_v3  ;;  %v1586_v18 = vld.sshfl [vmem:[%s2101_s30 + $0x4] sm:$0x3 pattern:$0x76325410] }
  0x2b   : >> { %1741 = vmatprep.subr.bf16.mxu1 %v1993_v3  ;;  %v1084_v20 = vshll.u32 %v1586_v18, 16 }
  0x2d   : >> { %1722 = vmatpush3.bf16.msra.mxu0 %v1919_v21  ;;  %v1966_v21 = vld [vmem:[%s2395_s1 + $0x1c8] sm:$0xff]  }
  0x2e   : >> { %1742 = vmatpush3.bf16.msra.mxu1 %v1920_v22  ;;  %1747 = vmatprep.subr.bf16.mxu0 %v1993_v3  ;;  %v1967_v22 = vld [vmem:[%s2395_s1 + $0x180] sm:$0xff]  }
  0x2f   : >> { %1767 = vmatprep.subr.bf16.mxu1 %v1993_v3 }
  0x30   : >> { %1724 = vmatmul.mubr.bf16.vlgmr.msra.gmra.mxu0 %v300_v23  ;;  %v1082_v23 = vshrl.u32 %v1586_v18, 16 }
  0x31   : >> { %1744 = vmatmul.mubr.bf16.vlgmr.msra.gmra.mxu1 %v251_v24  ;;  %1748 = vmatpush3.bf16.msra.mxu0 %v1921_v25  ;;  %v1086_v24 = vrot.slane %v1084_v20, 1  ;;  %v1968_v25 = vld [vmem:[%s2395_s1 + $0x1c0] sm:$0xff]  }
  0x32   : >> { %1768 = vmatpush3.bf16.msra.mxu1 %v1922_v26  ;;  %1749 = vmatprep.subr.bf16.mxu0 %v1993_v3  ;;  %v1544_v26 = vld [vmem:[%s2101_s30 + $0x4] sm:$0x1] }
  0x33   : >> { %1769 = vmatprep.subr.bf16.mxu1 %v1993_v3  ;;  %1763 = vmatprep.mubr.msk.bf16.mxu0 %vm1994_vm0, %v1993_v3 }
  0x34   : >> { %1783 = vmatprep.mubr.msk.bf16.mxu1 %vm1994_vm0, %v1993_v3 }
  0x35   : >> { %1750 = vmatpush3.bf16.msra.mxu0 %v1923_v27  ;;  %v1969_v27 = vld [vmem:[%s2395_s1 + $0x238] sm:$0xff]  }
  0x36   : >> { %1770 = vmatpush3.bf16.msra.mxu1 %v1924_v28  ;;  %1751 = vmatprep.subr.bf16.mxu0 %v1993_v3  ;;  %v1087_v28 = vor.u32 %v1086_v24, %v1082_v23 }
  0x37   : >> { %1771 = vmatprep.subr.bf16.mxu1 %v1993_v3 }
  0x39   : >> { %1752 = vmatpush3.bf16.msra.mxu0 %v1925_v29  ;;  %v1970_v29 = vld [vmem:[%s2395_s1 + $0x230] sm:$0xff]  }
  0x3a   : >> { %1772 = vmatpush3.bf16.msra.mxu1 %v1926_v30  ;;  %1753 = vmatprep.subr.bf16.mxu0 %v1993_v3  ;;  %v1971_v30 = vld [vmem:[%s2395_s1 + $0x228] sm:$0xff]  }
  0x3b   : >> { %1773 = vmatprep.subr.bf16.mxu1 %v1993_v3 }
  0x3d   : >> { %1754 = vmatpush3.bf16.msra.mxu0 %v1927_v31  ;;  %v1972_v31 = vld [vmem:[%s2395_s1 + $0x220] sm:$0xff]  }
  0x3e   : >> { %1774 = vmatpush3.bf16.msra.mxu1 %v1928_v32  ;;  %1755 = vmatprep.subr.bf16.mxu0 %v1993_v3  ;;  %v1973_v32 = vld [vmem:[%s2395_s1 + $0x218] sm:$0xff]  }
  0x3f   : >> { %1775 = vmatprep.subr.bf16.mxu1 %v1993_v3 }
  0x41   : >> { %1756 = vmatpush3.bf16.msra.mxu0 %v1929_v33  ;;  %v1974_v33 = vld [vmem:[%s2395_s1 + $0x210] sm:$0xff]  }
  0x42   : >> { %1776 = vmatpush3.bf16.msra.mxu1 %v1930_v34  ;;  %1757 = vmatprep.subr.bf16.mxu0 %v1993_v3  ;;  %v1975_v34 = vld [vmem:[%s2395_s1 + $0x208] sm:$0xff]  }
  0x43   : >> { %1777 = vmatprep.subr.bf16.mxu1 %v1993_v3 }
  0x45   : >> { %1758 = vmatpush3.bf16.msra.mxu0 %v1931_v35  ;;  %v1976_v35 = vld [vmem:[%s2395_s1 + $0x200] sm:$0xff]  }
  0x46   : >> { %1778 = vmatpush3.bf16.msra.mxu1 %v1932_v36  ;;  %1759 = vmatprep.subr.bf16.mxu0 %v1993_v3  ;;  %v1612_v36 = vld.sshfl [vmem:[%s2101_s30 + $0x4] sm:$0x2 pattern:$0x76325410]  ;;  %s1309_s30 = scalar_lea.vmem %s2051_s6, %s1991_s10  ;;  %s248_s10 = sadd.s32 1, %s1991_s10  }
  0x47   : >> { %1779 = vmatprep.subr.bf16.mxu1 %v1993_v3  ;;  %p245_p4 = scmp.ge.s32.totalorder %s248_s10, 2  }
  0x49   : >> { %1760 = vmatpush3.bf16.msra.mxu0 %v1933_v37  ;;  %v1204_v37 = vrot.slane %v1612_v36, 1 }
  0x4a   : >> { %1780 = vmatpush3.bf16.msra.mxu1 %v1934_v38  ;;  %1761 = vmatprep.subr.bf16.mxu0 %v1993_v3 }
  0x4b   : >> { %1781 = vmatprep.subr.bf16.mxu1 %v1993_v3 }
  0x4d   : >> { %1762 = vmatpush3.bf16.msra.mxu0 %v1935_v40 }
  0x4e   : >> { %1782 = vmatpush3.bf16.msra.mxu1 %v1936_v41  ;;  %1787 = vmatprep.subr.bf16.mxu0 %v1993_v3 }
  0x4f   : >> { %1807 = vmatprep.subr.bf16.mxu1 %v1993_v3 }
  0x50   : >> { %1764 = vmatmul.mubr.bf16.vlgmr.msra.gmra.mxu0 %v504_v42 }
  0x51   : >> { %1788 = vmatpush3.bf16.msra.mxu0 %v1937_v43  ;;  %1784 = vmatmul.mubr.bf16.vlgmr.msra.gmra.mxu1 %v1466_v45 }
  0x52   : >> { %1808 = vmatpush3.bf16.msra.mxu1 %v1938_v44  ;;  %1789 = vmatprep.subr.bf16.mxu0 %v1993_v3 }
  0x53   : >> { %1809 = vmatprep.subr.bf16.mxu1 %v1993_v3  ;;  %1803 = vmatprep.mubr.msk.bf16.mxu0 %vm1994_vm0, %v1993_v3 }
  0x54   : >> { %1823 = vmatprep.mubr.msk.bf16.mxu1 %vm1994_vm0, %v1993_v3 }
  0x55   : >> { %1790 = vmatpush3.bf16.msra.mxu0 %v1939_v46 }
  0x56   : >> { %1810 = vmatpush3.bf16.msra.mxu1 %v1940_v47  ;;  %1791 = vmatprep.subr.bf16.mxu0 %v1993_v3 }
  0x57   : >> { %1811 = vmatprep.subr.bf16.mxu1 %v1993_v3 }
  0x59   : >> { %1792 = vmatpush3.bf16.msra.mxu0 %v1941_v48 }
  0x5a   : >> { %1812 = vmatpush3.bf16.msra.mxu1 %v1942_v49  ;;  %1793 = vmatprep.subr.bf16.mxu0 %v1993_v3 }
  0x5b   : >> { %1813 = vmatprep.subr.bf16.mxu1 %v1993_v3 }
  0x5d   : >> { %1794 = vmatpush3.bf16.msra.mxu0 %v1943_v50 }
  0x5e   : >> { %1814 = vmatpush3.bf16.msra.mxu1 %v1944_v51  ;;  %1795 = vmatprep.subr.bf16.mxu0 %v1993_v3 }
  0x5f   : >> { %1815 = vmatprep.subr.bf16.mxu1 %v1993_v3 }
  0x61   : >> { %1796 = vmatpush3.bf16.msra.mxu0 %v1945_v52 }
  0x62   : >> { %1816 = vmatpush3.bf16.msra.mxu1 %v1946_v53  ;;  %1797 = vmatprep.subr.bf16.mxu0 %v1993_v3 }
  0x63   : >> { %1817 = vmatprep.subr.bf16.mxu1 %v1993_v3 }
  0x65   : >> { %1798 = vmatpush3.bf16.msra.mxu0 %v1947_v54 }
  0x66   : >> { %1818 = vmatpush3.bf16.msra.mxu1 %v1948_v56  ;;  %1799 = vmatprep.subr.bf16.mxu0 %v1993_v3 }
  0x67   : >> { %1819 = vmatprep.subr.bf16.mxu1 %v1993_v3 }
  0x69   : >> { %1800 = vmatpush3.bf16.msra.mxu0 %v1949_v58 }
  0x6a   : >> { %1820 = vmatpush3.bf16.msra.mxu1 %v1950_v59  ;;  %1801 = vmatprep.subr.bf16.mxu0 %v1993_v3 }
  0x6b   : >> { %1821 = vmatprep.subr.bf16.mxu1 %v1993_v3 }
  0x6d   : >> { %1802 = vmatpush3.bf16.msra.mxu0 %v1951_v62 }
  0x6e   : >> { %1822 = vmatpush3.bf16.msra.mxu1 %v1952_v63  ;;  %1827 = vmatprep.subr.bf16.mxu0 %v1993_v3 }
  0x6f   : >> { %1847 = vmatprep.subr.bf16.mxu1 %v1993_v3 }
  0x70   : >> { %1804 = vmatmul.mubr.bf16.vlgmr.msra.gmra.mxu0 %v737_v4 }
  0x71   : >> { %1828 = vmatpush3.bf16.msra.mxu0 %v1953_v5  ;;  %1824 = vmatmul.mubr.bf16.vlgmr.msra.gmra.mxu1 %v854_v6 }
  0x72   : >> { %1848 = vmatpush3.bf16.msra.mxu1 %v1954_v7  ;;  %1829 = vmatprep.subr.bf16.mxu0 %v1993_v3 }
  0x73   : >> { %1849 = vmatprep.subr.bf16.mxu1 %v1993_v3  ;;  %1843 = vmatprep.mubr.msk.bf16.mxu0 %vm1994_vm0, %v1993_v3 }
  0x74   : >> { %1863 = vmatprep.mubr.msk.bf16.mxu1 %vm1994_vm0, %v1993_v3 }
  0x75   : >> { %1830 = vmatpush3.bf16.msra.mxu0 %v1955_v8 }
  0x76   : >> { %1850 = vmatpush3.bf16.msra.mxu1 %v1956_v9  ;;  %1831 = vmatprep.subr.bf16.mxu0 %v1993_v3 }
  0x77   : >> { %1851 = vmatprep.subr.bf16.mxu1 %v1993_v3 }
  0x79   : >> { %1832 = vmatpush3.bf16.msra.mxu0 %v1957_v10 }
  0x7a   : >> { %1852 = vmatpush3.bf16.msra.mxu1 %v1958_v11  ;;  %1833 = vmatprep.subr.bf16.mxu0 %v1993_v3 }
  0x7b   : >> { %1853 = vmatprep.subr.bf16.mxu1 %v1993_v3 }
  0x7d   : >> { %1834 = vmatpush3.bf16.msra.mxu0 %v1959_v12 }
  0x7e   : >> { %1854 = vmatpush3.bf16.msra.mxu1 %v1960_v13  ;;  %1835 = vmatprep.subr.bf16.mxu0 %v1993_v3 }
  0x7f   : >> { %1855 = vmatprep.subr.bf16.mxu1 %v1993_v3 }
  0x81   : >> { %1836 = vmatpush3.bf16.msra.mxu0 %v1961_v14 }
  0x82   : >> { %1856 = vmatpush3.bf16.msra.mxu1 %v1962_v15  ;;  %1837 = vmatprep.subr.bf16.mxu0 %v1993_v3 }
  0x83   : >> { %1857 = vmatprep.subr.bf16.mxu1 %v1993_v3 }
  0x85   : >> { %1838 = vmatpush3.bf16.msra.mxu0 %v1963_v16  ;;  %v1310_v16 = vld [vmem:[%s1309_s30] sm:$0x1] }
  0x86   : >> { %1858 = vmatpush3.bf16.msra.mxu1 %v1964_v17  ;;  %1839 = vmatprep.subr.bf16.mxu0 %v1993_v3  ;;  %v1311_v20 = vunpack.c.l.bf16 %v1310_v16 }
  0x87   : >> { %1859 = vmatprep.subr.bf16.mxu1 %v1993_v3 }
  0x89   : >> { %1840 = vmatpush3.bf16.msra.mxu0 %v1965_v19 }
  0x8a   : >> { %1860 = vmatpush3.bf16.msra.mxu1 %v1966_v21  ;;  %1841 = vmatprep.subr.bf16.mxu0 %v1993_v3 }
  0x8b   : >> { %1861 = vmatprep.subr.bf16.mxu1 %v1993_v3 }
  0x8d   : >> { %1842 = vmatpush3.bf16.msra.mxu0 %v1967_v22 }
  0x8e   : >> { %1862 = vmatpush3.bf16.msra.mxu1 %v1968_v25  ;;  %1867 = vmatprep.subr.bf16.mxu0 %v1993_v3 }
  0x90   : >> { %1844 = vmatmul.mubr.bf16.vlgmr.msra.gmra.mxu0 %v1544_v26 }
  0x91   : >> { %1868 = vmatpush3.bf16.msra.mxu0 %v1969_v27  ;;  %1864 = vmatmul.mubr.bf16.vlgmr.msra.gmra.mxu1 %v1087_v28 }
  0x92   : >> { %1869 = vmatprep.subr.bf16.mxu0 %v1993_v3  ;;  %1883 = vmatprep.mubr.msk.bf16.mxu0 %vm1994_vm0, %v1993_v3 }
  0x95   : >> { %1870 = vmatpush3.bf16.msra.mxu0 %v1970_v29 }
  0x96   : >> { %1871 = vmatprep.subr.bf16.mxu0 %v1993_v3 }
  0x99   : >> { %1872 = vmatpush3.bf16.msra.mxu0 %v1971_v30 }
  0x9a   : >> { %1873 = vmatprep.subr.bf16.mxu0 %v1993_v3 }
  0x9d   : >> { %1874 = vmatpush3.bf16.msra.mxu0 %v1972_v31 }
  0x9e   : >> { %1875 = vmatprep.subr.bf16.mxu0 %v1993_v3 }
  0xa1   : >> { %1876 = vmatpush3.bf16.msra.mxu0 %v1973_v32 }
  0xa2   : >> { %1877 = vmatprep.subr.bf16.mxu0 %v1993_v3 }
  0xa5   : >> { %1878 = vmatpush3.bf16.msra.mxu0 %v1974_v33 }
  0xa6   : >> { %1879 = vmatprep.subr.bf16.mxu0 %v1993_v3 }
  0xa9   : >> { %1880 = vmatpush3.bf16.msra.mxu0 %v1975_v34 }
  0xaa   : >> { %1881 = vmatprep.subr.bf16.mxu0 %v1993_v3 }
  0xad   : >> { %1882 = vmatpush3.bf16.msra.mxu0 %v1976_v35 }
  0xb0   : >> { %1884 = vmatmul.mubr.bf16.vlgmr.msra.gmra.mxu0 %v1204_v37 }
  0xf0   : >> { %v384_v38 = vpop.f32.mrf.mxu0 }
  0xf1   : >> { %v472_v39 = vpop.f32.mrf.mxu1 }
  0xf2   : >> { %v473_v40 = vadd.f32 %v472_v39, %v384_v38  ;;  %v1725_v41 = vpop.f32.mrf.mxu0 }
  0xf3   : >> { %v1745_v42 = vpop.f32.mrf.mxu1 }
  0xf4   : >> { %v387_v43 = vpop.f32.mrf.mxu0 }
  0xf5   : >> { %v475_v44 = vpop.f32.mrf.mxu1 }
  0xf6   : >> { %v1726_v45 = vpop.f32.mrf.mxu0 }
  0xf7   : >> { %v1746_v46 = vpop.f32.mrf.mxu1 }
 0x110   : >> { %v588_v47 = vpop.f32.mrf.mxu0 }
 0x111   : >> { %v594_v48 = vadd.f32 %v588_v47, %v473_v40  ;;  %v698_v49 = vpop.f32.mrf.mxu1 }
 0x112   : >> { %v1765_v50 = vpop.f32.mrf.mxu0 }
 0x113   : >> { %v704_v51 = vadd.f32 %v698_v49, %v594_v48  ;;  %v1785_v52 = vpop.f32.mrf.mxu1 }
 0x114   : >> { %v591_v53 = vpop.f32.mrf.mxu0 }
 0x115   : >> { %v701_v3 = vpop.f32.mrf.mxu1 }
 0x116   : >> { %v1766_v54 = vpop.f32.mrf.mxu0 }
 0x117   : >> { %v1786_v55 = vpop.f32.mrf.mxu1 }
 0x130   : >> { %v821_v56 = vpop.f32.mrf.mxu0 }
 0x131   : >> { %v938_v57 = vpop.f32.mrf.mxu1  ;;  %v827_v11 = vadd.f32 %v821_v56, %v704_v51 }
 0x132   : >> { %v1805_v58 = vpop.f32.mrf.mxu0 }
 0x133   : >> { %v1825_v59 = vpop.f32.mrf.mxu1  ;;  %v944_v12 = vadd.f32 %v938_v57, %v827_v11 }
 0x134   : >> { %v824_v60 = vpop.f32.mrf.mxu0 }
 0x135   : >> { %v941_v61 = vpop.f32.mrf.mxu1 }
 0x136   : >> { %v1806_v62 = vpop.f32.mrf.mxu0 }
 0x137   : >> { %v1826_v63 = vpop.f32.mrf.mxu1 }
 0x150   : >> { %v1048_v2 = vpop.f32.mrf.mxu0 }
 0x151   : >> { %v1171_v4 = vpop.f32.mrf.mxu1  ;;  %v1054_v13 = vadd.f32 %v1048_v2, %v944_v12 }
 0x152   : >> { %v1845_v5 = vpop.f32.mrf.mxu0 }
 0x153   : >> { %v1865_v6 = vpop.f32.mrf.mxu1  ;;  %v1177_v14 = vadd.f32 %v1171_v4, %v1054_v13 }
 0x154   : >> { %v1051_v7 = vpop.f32.mrf.mxu0 }
 0x155   : >> { %v1174_v8 = vpop.f32.mrf.mxu1 }
 0x156   : >> { %v1846_v9 = vpop.f32.mrf.mxu0 }
 0x157   : >> { %v1866_v10 = vpop.f32.mrf.mxu1 }
 0x170   : >> { %v1288_v15 = vpop.f32.mrf.mxu0 }
 0x171   : >> { %v1294_v17 = vadd.f32 %v1288_v15, %v1177_v14 }
 0x172   : >> { %v1885_v18 = vpop.f32.mrf.mxu0 }
 0x173   : >> { %v1301_v19 = vmul.f32 %v2036_v0, %v1294_v17 }
 0x174   : >> { %v1291_v21 = vpop.f32.mrf.mxu0 }
 0x175   : >> { %v1308_v22 = vadd.f32 %v2041_v1, %v1301_v19 }
 0x176   : >> { %v1886_v23 = vpop.f32.mrf.mxu0 }
 0x177   : >> { %v1312_v24 = vadd.f32 %v1311_v20, %v1308_v22 }
 0x179   : >> { %v1313_v25 = vmax.f32 %v1312_v24, 0.0  ;;  %247 = sbr.rel (!%p245_p4) target bundleno = 15 (0xf), region = 93 }
 0x17b   : >> { %v1314_v26 = vpack.c.bf16 %v1313_v25, %v1313_v25 }
 0x17d   : >> { %1316 = vst [vmem:[%s1315_s24] sm:$0x1] %v1314_v26 }
 0x17e PF: > { %s15_s18 = sadd.s32 1, %s1987_s18  }
 0x17f   : > { %p12_p5 = scmp.ge.s32.totalorder %s15_s18, 4  }
 0x181   :  { %14 = sbr.rel (!%p12_p5) target bundleno = 1 (0x1), region = 104 }

// kernel: _lambda_.25
= control target key start
LH: loop header
LB: loop body
LE: loop exit
PB: predicated region body
PF: predicated region fallthrough
CT: control target
= control target key end

     0   :  { %v215_v1 = vmov 0.0   ;;  %vm216_vm0 = vmmov 0   ;;  %s271_s0 = inlined_call_operand.vmem [shape: bf16[2,128], index: 0, kind: input, shape index: {}]   ;;  %s272_s1 = inlined_call_operand.vmem [shape: bf16[128,10], index: 1, kind: input, shape index: {}]   ;;  %s273_s2 = inlined_call_operand.vmem [shape: f32[1,10], index: 2, kind: input, shape index: {}]   ;;  %s274_s3 = inlined_call_operand.hbm [shape: f32[2,10], index: 3, kind: output, shape index: {}]  }
   0x1   :  { %v185_v0 = vld [vmem:[%s272_s1 + $0x38] sm:$0xff]   ;;  %162 = vmatprep.subr.bf16.mxu0 %v215_v1  ;;  %v186_v2 = vld [vmem:[%s272_s1 + $0x30] sm:$0xff]   ;;  %178 = vmatprep.mubr.msk.bf16.mxu0 %vm216_vm0, %v215_v1  ;;  %v187_v3 = vld [vmem:[%s272_s1 + $0x28] sm:$0xff]  }
   0x2   :  { %163 = vmatpush3.bf16.msra.mxu0 %v185_v0 }
   0x3   :  { %164 = vmatprep.subr.bf16.mxu0 %v215_v1 }
   0x6   :  { %165 = vmatpush3.bf16.msra.mxu0 %v186_v2 }
   0x7   :  { %166 = vmatprep.subr.bf16.mxu0 %v215_v1 }
   0x8   :  { %8 = vsyncpa [#allocation3], 0  ;;  %v188_v4 = vld [vmem:[%s272_s1 + $0x20] sm:$0xff]   ;;  %v189_v5 = vld [vmem:[%s272_s1 + $0x18] sm:$0xff]   ;;  %s217_s5 = smov [#allocation2]   ;;  %vm128_vm1 = vcmask 74752  }
   0x9   :  { %v190_v6 = vld [vmem:[%s272_s1 + $0x10] sm:$0xff]   ;;  %v191_v7 = vld [vmem:[%s272_s1 + $0x8] sm:$0xff]   ;;  %v192_v8 = vld [vmem:[%s272_s1] sm:$0xff]   ;;  %s136_s6 = sshll.u32 %s217_s5, 4  ;;  %s137_s6 = int_to_ptr.vmem [resolvable:$true] %s136_s6 }
   0xa   :  { %167 = vmatpush3.bf16.msra.mxu0 %v187_v3  ;;  %v16_v9 = vld [vmem:[%s271_s0] sm:$0x1]  ;;  %s193_s1 = scalar_lea.vmem %s137_s6, 32  ;;  %p198_p1 = scmp.lt.s32.totalorder %s137_s6, %s137_s6 }
   0xb   :  { %168 = vmatprep.subr.bf16.mxu0 %v215_v1  ;;  %v144_v10 = vld [vmem:[%s273_s2] ss:$0 sm:$0xff]  ;;  %p194_p0 = scmp.ne.s32.totalorder %s137_s6, %s193_s1  ;;  %p199_p2 = scmp.lt.s32.totalorder %s193_s1, %s193_s1 }
   0xd   :  { %p200_p3 = por %p199_p2, %p198_p1 }
   0xe   :  { %169 = vmatpush3.bf16.msra.mxu0 %v188_v4 }
   0xf   :  { %170 = vmatprep.subr.bf16.mxu0 %v215_v1  ;;  %p201_p4 = pnand %p200_p3, %p194_p0 }
  0x12   :  { %171 = vmatpush3.bf16.msra.mxu0 %v189_v5 }
  0x13   :  { %172 = vmatprep.subr.bf16.mxu0 %v215_v1 }
  0x16   :  { %173 = vmatpush3.bf16.msra.mxu0 %v190_v6 }
  0x17   :  { %174 = vmatprep.subr.bf16.mxu0 %v215_v1 }
  0x1a   :  { %175 = vmatpush3.bf16.msra.mxu0 %v191_v7 }
  0x1b   :  { %176 = vmatprep.subr.bf16.mxu0 %v215_v1 }
  0x1e   :  { %177 = vmatpush3.bf16.msra.mxu0 %v192_v8 }
  0x21   :  { %179 = vmatmul.mubr.bf16.vlgmr.msra.gmra.mxu0 %v16_v9 }
  0xe1   :  { %v122_v11 = vpop.f32.mrf.mxu0 }
  0xe2   :  { %v123_v12 = vadd.f32 %v144_v10, %v122_v11 }
  0xe3   :  { %v180_v13 = vpop.f32.mrf.mxu0 }
  0xe4   :  { %129 = vst.msk [vmem:[#allocation2] sm:$0x3] %vm128_vm1, %v123_v12 }
  0xe5   :  { %v125_v14 = vpop.f32.mrf.mxu0 }
  0xe6   :  { %204 = shalt.err (!%p201_p4)
}
  0xe7   :  { %139 = dma.vmem_to_hbm [thread:$0]  %s137_s6, 32, %s274_s3, [#allocation3]   ;;  %v181_v15 = vpop.f32.mrf.mxu0 }
  0xe8   :  { %213 = dma.done.wait [#allocation3], 32  }
  0xe9   :  { %214 = vsyncadd [#allocation3], 4294967264 }
  0xea   :  { %143 = vsyncpa [#allocation3], 1 }

// kernel: _lambda_.22
= control target key start
LH: loop header
LB: loop body
LE: loop exit
PB: predicated region body
PF: predicated region fallthrough
CT: control target
= control target key end

     0   :  { %s1863_s15 = smov 0   ;;  %s2223_s0 = inlined_call_operand.vmem [shape: bf16[2,8,2,128], index: 0, kind: input, shape index: {}]   ;;  %s2224_s1 = inlined_call_operand.vmem [shape: bf16[9,128,128], index: 1, kind: input, shape index: {}]   ;;  %s2225_s2 = inlined_call_operand.vmem [shape: f32[1,128], index: 2, kind: input, shape index: {}]   ;;  %s2226_s3 = inlined_call_operand.vmem [shape: f32[1,128], index: 3, kind: input, shape index: {}]   ;;  %s2227_s4 = inlined_call_operand.vmem [shape: bf16[2,1,1,128], index: 4, kind: output, shape index: {}]  }
   0x1 LB: > { %s1270_s16 = sadd.s32 4294967295, %s1833_s15   ;;  %p1274_p0 = scmp.ge.s32.totalorder %s1833_s15, 1  ;;  %s1833_s15 = sphi %s1863_s15, %s14_s15  }
   0x2   : > { %p161_p1 = scmp.lt.s32.totalorder %s1833_s15, 3 }
   0x4   : > { %p162_p2 = pnand %p1274_p0, %p161_p1 }
   0x5   : > { %p184_p3 = scmp.lt.s32.totalorder (!%p162_p2), %s1270_s16, 1 }
   0x6   : > { %165 = sbr.rel (%p162_p2) target bundleno = 377 (0x179), region = 36 }
   0xb   : > { %v1755_v0 = vld [vmem:[%s2224_s1 + $0x78] sm:$0xff]   ;;  %v1835_v1 = vmov 0.0   ;;  %v1757_v3 = vld [vmem:[%s2224_s1 + $0x70] sm:$0xff]   ;;  %vm1836_vm0 = vmmov 0   ;;  %v1759_v5 = vld [vmem:[%s2224_s1 + $0x68] sm:$0xff]   ;;  %s2229_s16 = smov (!%p184_p3, %s1270_s16), 1  ;;  %v427_v27 = vlaneseq }
   0xc   : > { %1564 = vmatprep.subr.bf16.mxu0 %v1835_v1  ;;  %1584 = vmatprep.subr.bf16.mxu1 %v1835_v1  ;;  %v1756_v2 = vld [vmem:[%s2224_s1 + $0x38] sm:$0xff]   ;;  %v1758_v4 = vld [vmem:[%s2224_s1 + $0x30] sm:$0xff]   ;;  %v1760_v6 = vld [vmem:[%s2224_s1 + $0x28] sm:$0xff]   ;;  %s1275_s19 = sshll.u32 %s2229_s16, 3  ;;  %v1837_v25 = vmov 1966171168   ;;  %s190_s5 = scalar_lea.vmem %s2227_s4, %s2229_s16 }
   0xd   : > { %1565 = vmatpush3.bf16.msra.mxu0 %v1755_v0  ;;  %1580 = vmatprep.mubr.msk.bf16.mxu0 %vm1836_vm0, %v1835_v1  ;;  %v1761_v7 = vld [vmem:[%s2224_s1 + $0x60] sm:$0xff]   ;;  %v1763_v9 = vld [vmem:[%s2224_s1 + $0x58] sm:$0xff]   ;;  %v1765_v11 = vld [vmem:[%s2224_s1 + $0x50] sm:$0xff]   ;;  %s1941_s24 = scalar_lea.vmem %s2223_s0, %s1275_s19  ;;  %v425_v26 = vunpack.c.l.s4 %v1837_v25  ;;  %v428_v31 = vshrl.u32 %v427_v27, 7  ;;  %vm1217_vm1 = vcmask 1040384  }
   0xe   : > { %1585 = vmatpush3.bf16.msra.mxu1 %v1756_v2  ;;  %1566 = vmatprep.subr.bf16.mxu0 %v1835_v1  ;;  %v1762_v8 = vld [vmem:[%s2224_s1 + $0x20] sm:$0xff]   ;;  %v1764_v10 = vld [vmem:[%s2224_s1 + $0x18] sm:$0xff]   ;;  %v1766_v12 = vld [vmem:[%s2224_s1 + $0x10] sm:$0xff]   ;;  %vm1218_vm2 = vsmask.f32 256 }
   0xf   : > { %1586 = vmatprep.subr.bf16.mxu1 %v1835_v1  ;;  %1600 = vmatprep.mubr.msk.bf16.mxu1 %vm1836_vm0, %v1835_v1  ;;  %v1767_v13 = vld [vmem:[%s2224_s1 + $0x48] sm:$0xff]   ;;  %v1769_v15 = vld [vmem:[%s2224_s1 + $0x40] sm:$0xff]   ;;  %v1771_v19 = vld [vmem:[%s2224_s1 + $0xb8] sm:$0xff]   ;;  %v426_v30 = vunpack.c.0.s8 %v425_v26 }
  0x10   : > { %v1768_v14 = vld [vmem:[%s2224_s1 + $0x8] sm:$0xff]   ;;  %v1770_v16 = vld [vmem:[%s2224_s1] sm:$0xff]   ;;  %v1772_v20 = vld [vmem:[%s2224_s1 + $0xf8] sm:$0xff]  }
  0x11   : > { %1567 = vmatpush3.bf16.msra.mxu0 %v1757_v3  ;;  %v1276_v17 = vld [vmem:[%s1941_s24 + $0x2] sm:$0x1]  ;;  %v194_v18 = vld [vmem:[%s1941_s24] sm:$0x1]  ;;  %v1773_v21 = vld [vmem:[%s2224_s1 + $0xb0] sm:$0xff]   ;;  %v1997_v34 = vsub.s32 %v426_v30, %v428_v31 }
  0x12   : > { %1587 = vmatpush3.bf16.msra.mxu1 %v1758_v4  ;;  %1568 = vmatprep.subr.bf16.mxu0 %v1835_v1  ;;  %v1774_v22 = vld [vmem:[%s2224_s1 + $0xf0] sm:$0xff]   ;;  %v1775_v23 = vld [vmem:[%s2224_s1 + $0xa8] sm:$0xff]   ;;  %v1777_v28 = vld [vmem:[%s2224_s1 + $0xa0] sm:$0xff]  }
  0x13   : > { %1588 = vmatprep.subr.bf16.mxu1 %v1835_v1  ;;  %v1776_v24 = vld [vmem:[%s2224_s1 + $0xe8] sm:$0xff]   ;;  %v1778_v29 = vld [vmem:[%s2224_s1 + $0xe0] sm:$0xff]   ;;  %v1779_v32 = vld [vmem:[%s2224_s1 + $0x98] sm:$0xff]   ;;  %v430_v37 = vrot.slane %v194_v18, %v1997_v34 }
  0x14   : > { %v1780_v33 = vld [vmem:[%s2224_s1 + $0xd8] sm:$0xff]   ;;  %v1781_v35 = vld [vmem:[%s2224_s1 + $0x90] sm:$0xff]   ;;  %v1783_v38 = vld [vmem:[%s2224_s1 + $0x88] sm:$0xff]  }
  0x15   : > { %1569 = vmatpush3.bf16.msra.mxu0 %v1759_v5  ;;  %v1782_v36 = vld [vmem:[%s2224_s1 + $0xd0] sm:$0xff]   ;;  %v1784_v39 = vld [vmem:[%s2224_s1 + $0xc8] sm:$0xff]   ;;  %v437_v40 = vrot.slane %v430_v37, %v1997_v34  ;;  %v1785_v41 = vld [vmem:[%s2224_s1 + $0x80] sm:$0xff]  }
  0x16   : > { %1589 = vmatpush3.bf16.msra.mxu1 %v1760_v6  ;;  %1570 = vmatprep.subr.bf16.mxu0 %v1835_v1  ;;  %v1786_v42 = vld [vmem:[%s2224_s1 + $0xc0] sm:$0xff]   ;;  %v1787_v44 = vld [vmem:[%s2224_s1 + $0x138] sm:$0xff]   ;;  %v1789_v48 = vld [vmem:[%s2224_s1 + $0x130] sm:$0xff]  }
  0x17   : > { %1590 = vmatprep.subr.bf16.mxu1 %v1835_v1  ;;  %v439_v43 = vshrl.u32 %v437_v40, 16  ;;  %v1333_v45 = vld [vmem:[%s1941_s24 + $0x4] sm:$0x1]  ;;  %v1788_v46 = vld [vmem:[%s2224_s1 + $0x178] sm:$0xff]   ;;  %v2035_v47 = vld [vmem:[%s1941_s24 + $0x1] sm:$0x1] }
  0x18   : > { %v1112_v49 = vrot.slane %v2035_v47, %v1997_v34  ;;  %v1790_v50 = vld [vmem:[%s2224_s1 + $0x170] sm:$0xff]   ;;  %v1791_v52 = vld [vmem:[%s2224_s1 + $0x128] sm:$0xff]   ;;  %v1793_v54 = vld [vmem:[%s2224_s1 + $0x120] sm:$0xff]   ;;  %v771_v60 = vrot.slane %v1333_v45, %v1997_v34 }
  0x19   : > { %1571 = vmatpush3.bf16.msra.mxu0 %v1761_v7  ;;  %v1792_v53 = vld [vmem:[%s2224_s1 + $0x168] sm:$0xff]   ;;  %v1794_v55 = vld [vmem:[%s2224_s1 + $0x160] sm:$0xff]   ;;  %v1795_v56 = vld [vmem:[%s2224_s1 + $0x118] sm:$0xff]  }
  0x1a   : > { %1591 = vmatpush3.bf16.msra.mxu1 %v1762_v8  ;;  %1572 = vmatprep.subr.bf16.mxu0 %v1835_v1  ;;  %v2050_v51 = vrot.slane %v1112_v49, %v1997_v34  ;;  %v1796_v57 = vld [vmem:[%s2224_s1 + $0x158] sm:$0xff]   ;;  %v1797_v58 = vld [vmem:[%s2224_s1 + $0x110] sm:$0xff]   ;;  %v1799_v61 = vld [vmem:[%s2224_s1 + $0x108] sm:$0xff]   ;;  %v778_v63 = vrot.slane %v771_v60, %v1997_v34 }
  0x1b   : > { %1592 = vmatprep.subr.bf16.mxu1 %v1835_v1  ;;  %v1798_v59 = vld [vmem:[%s2224_s1 + $0x150] sm:$0xff]   ;;  %v1800_v62 = vld [vmem:[%s2224_s1 + $0x148] sm:$0xff]   ;;  %v1801_v0 = vld [vmem:[%s2224_s1 + $0x100] sm:$0xff]  }
  0x1c   : > { %v1802_v2 = vld [vmem:[%s2224_s1 + $0x140] sm:$0xff]   ;;  %v780_v3 = vshrl.u32 %v778_v63, 16  ;;  %v1803_v5 = vld [vmem:[%s2224_s1 + $0x1b8] sm:$0xff]   ;;  %v1805_v7 = vld [vmem:[%s2224_s1 + $0x1b0] sm:$0xff]   ;;  %v1121_v30 = vshrl.u32 %v2050_v51, 16 }
  0x1d   : > { %1573 = vmatpush3.bf16.msra.mxu0 %v1763_v9  ;;  %v1358_v4 = vld [vmem:[%s1941_s24 + $0x6] sm:$0x1]  ;;  %v1804_v6 = vld [vmem:[%s2224_s1 + $0x1f8] sm:$0xff]   ;;  %v1806_v8 = vld [vmem:[%s2224_s1 + $0x1f0] sm:$0xff]  }
  0x1e   : > { %1593 = vmatpush3.bf16.msra.mxu1 %v1764_v10  ;;  %1574 = vmatprep.subr.bf16.mxu0 %v1835_v1  ;;  %v1807_v9 = vld [vmem:[%s2224_s1 + $0x1a8] sm:$0xff]   ;;  %v1822_v25 = vld [vmem:[%s2224_s1 + $0x220] sm:$0xff]   ;;  %v1823_v26 = vld [vmem:[%s2224_s1 + $0x218] sm:$0xff]  }
  0x1f   : > { %1594 = vmatprep.subr.bf16.mxu1 %v1835_v1  ;;  %v1808_v10 = vld [vmem:[%s2224_s1 + $0x1e8] sm:$0xff]   ;;  %v1824_v27 = vld [vmem:[%s2224_s1 + $0x210] sm:$0xff]   ;;  %vm1219_vm3 = vmand %vm1217_vm1, %vm1218_vm2 }
  0x21   : > { %1575 = vmatpush3.bf16.msra.mxu0 %v1765_v11  ;;  %v1809_v11 = vld [vmem:[%s2224_s1 + $0x1a0] sm:$0xff]  }
  0x22   : > { %1595 = vmatpush3.bf16.msra.mxu1 %v1766_v12  ;;  %1576 = vmatprep.subr.bf16.mxu0 %v1835_v1  ;;  %v1810_v12 = vld [vmem:[%s2224_s1 + $0x1e0] sm:$0xff]  }
  0x23   : > { %1596 = vmatprep.subr.bf16.mxu1 %v1835_v1 }
  0x25   : > { %1577 = vmatpush3.bf16.msra.mxu0 %v1767_v13  ;;  %v1811_v13 = vld [vmem:[%s2224_s1 + $0x198] sm:$0xff]  }
  0x26   : > { %1597 = vmatpush3.bf16.msra.mxu1 %v1768_v14  ;;  %1578 = vmatprep.subr.bf16.mxu0 %v1835_v1  ;;  %v1812_v14 = vld [vmem:[%s2224_s1 + $0x1d8] sm:$0xff]  }
  0x27   : > { %1598 = vmatprep.subr.bf16.mxu1 %v1835_v1 }
  0x29   : > { %1579 = vmatpush3.bf16.msra.mxu0 %v1769_v15  ;;  %v1813_v15 = vld [vmem:[%s2224_s1 + $0x190] sm:$0xff]  }
  0x2a   : > { %1599 = vmatpush3.bf16.msra.mxu1 %v1770_v16  ;;  %1604 = vmatprep.subr.bf16.mxu0 %v1835_v1  ;;  %v1814_v16 = vld [vmem:[%s2224_s1 + $0x1d0] sm:$0xff]  }
  0x2b   : > { %1624 = vmatprep.subr.bf16.mxu1 %v1835_v1 }
  0x2c   : > { %1581 = vmatmul.mubr.bf16.vlgmr.msra.gmra.mxu0 %v1276_v17  ;;  %v1815_v17 = vld [vmem:[%s2224_s1 + $0x188] sm:$0xff]  }
  0x2d   : > { %1601 = vmatmul.mubr.bf16.vlgmr.msra.gmra.mxu1 %v194_v18  ;;  %1605 = vmatpush3.bf16.msra.mxu0 %v1771_v19  ;;  %v1816_v18 = vld [vmem:[%s2224_s1 + $0x1c8] sm:$0xff]   ;;  %v1817_v19 = vld [vmem:[%s2224_s1 + $0x180] sm:$0xff]  }
  0x2e   : > { %1625 = vmatpush3.bf16.msra.mxu1 %v1772_v20  ;;  %1606 = vmatprep.subr.bf16.mxu0 %v1835_v1  ;;  %v1818_v20 = vld [vmem:[%s2224_s1 + $0x1c0] sm:$0xff]  }
  0x2f   : > { %1626 = vmatprep.subr.bf16.mxu1 %v1835_v1  ;;  %1620 = vmatprep.mubr.msk.bf16.mxu0 %vm1836_vm0, %v1835_v1 }
  0x30   : > { %1640 = vmatprep.mubr.msk.bf16.mxu1 %vm1836_vm0, %v1835_v1 }
  0x31   : > { %1607 = vmatpush3.bf16.msra.mxu0 %v1773_v21  ;;  %v1819_v21 = vld [vmem:[%s2224_s1 + $0x238] sm:$0xff]  }
  0x32   : > { %1627 = vmatpush3.bf16.msra.mxu1 %v1774_v22  ;;  %1608 = vmatprep.subr.bf16.mxu0 %v1835_v1  ;;  %v1432_v22 = vld [vmem:[%s1941_s24 + $0x3] sm:$0x1] }
  0x33   : > { %1628 = vmatprep.subr.bf16.mxu1 %v1835_v1 }
  0x35   : > { %1609 = vmatpush3.bf16.msra.mxu0 %v1775_v23  ;;  %v1820_v23 = vld [vmem:[%s2224_s1 + $0x230] sm:$0xff]  }
  0x36   : > { %1629 = vmatpush3.bf16.msra.mxu1 %v1776_v24  ;;  %1610 = vmatprep.subr.bf16.mxu0 %v1835_v1  ;;  %v1821_v24 = vld [vmem:[%s2224_s1 + $0x228] sm:$0xff]  }
  0x37   : > { %1630 = vmatprep.subr.bf16.mxu1 %v1835_v1 }
  0x39   : > { %1611 = vmatpush3.bf16.msra.mxu0 %v1777_v28  ;;  %v1825_v28 = vld [vmem:[%s2224_s1 + $0x208] sm:$0xff]  }
  0x3a   : > { %1631 = vmatpush3.bf16.msra.mxu1 %v1778_v29  ;;  %1612 = vmatprep.subr.bf16.mxu0 %v1835_v1  ;;  %v1826_v29 = vld [vmem:[%s2224_s1 + $0x200] sm:$0xff]  }
  0x3b   : > { %1632 = vmatprep.subr.bf16.mxu1 %v1835_v1 }
  0x3d   : > { %1613 = vmatpush3.bf16.msra.mxu0 %v1779_v32 }
  0x3e   : > { %1633 = vmatpush3.bf16.msra.mxu1 %v1780_v33  ;;  %1614 = vmatprep.subr.bf16.mxu0 %v1835_v1 }
  0x3f   : > { %1634 = vmatprep.subr.bf16.mxu1 %v1835_v1 }
  0x41   : > { %1615 = vmatpush3.bf16.msra.mxu0 %v1781_v35 }
  0x42   : > { %1635 = vmatpush3.bf16.msra.mxu1 %v1782_v36  ;;  %1616 = vmatprep.subr.bf16.mxu0 %v1835_v1 }
  0x43   : > { %1636 = vmatprep.subr.bf16.mxu1 %v1835_v1 }
  0x45   : > { %1617 = vmatpush3.bf16.msra.mxu0 %v1783_v38 }
  0x46   : > { %1637 = vmatpush3.bf16.msra.mxu1 %v1784_v39  ;;  %1618 = vmatprep.subr.bf16.mxu0 %v1835_v1 }
  0x47   : > { %1638 = vmatprep.subr.bf16.mxu1 %v1835_v1 }
  0x49   : > { %1619 = vmatpush3.bf16.msra.mxu0 %v1785_v41 }
  0x4a   : > { %1639 = vmatpush3.bf16.msra.mxu1 %v1786_v42  ;;  %1644 = vmatprep.subr.bf16.mxu0 %v1835_v1 }
  0x4b   : > { %1664 = vmatprep.subr.bf16.mxu1 %v1835_v1 }
  0x4c   : > { %1621 = vmatmul.mubr.bf16.vlgmr.msra.gmra.mxu0 %v439_v43 }
  0x4d   : > { %1645 = vmatpush3.bf16.msra.mxu0 %v1787_v44  ;;  %1641 = vmatmul.mubr.bf16.vlgmr.msra.gmra.mxu1 %v1333_v45 }
  0x4e   : > { %1665 = vmatpush3.bf16.msra.mxu1 %v1788_v46  ;;  %1646 = vmatprep.subr.bf16.mxu0 %v1835_v1 }
  0x4f   : > { %1666 = vmatprep.subr.bf16.mxu1 %v1835_v1  ;;  %1660 = vmatprep.mubr.msk.bf16.mxu0 %vm1836_vm0, %v1835_v1 }
  0x50   : > { %1680 = vmatprep.mubr.msk.bf16.mxu1 %vm1836_vm0, %v1835_v1 }
  0x51   : > { %1647 = vmatpush3.bf16.msra.mxu0 %v1789_v48 }
  0x52   : > { %1667 = vmatpush3.bf16.msra.mxu1 %v1790_v50  ;;  %1648 = vmatprep.subr.bf16.mxu0 %v1835_v1 }
  0x53   : > { %1668 = vmatprep.subr.bf16.mxu1 %v1835_v1 }
  0x55   : > { %1649 = vmatpush3.bf16.msra.mxu0 %v1791_v52 }
  0x56   : > { %1669 = vmatpush3.bf16.msra.mxu1 %v1792_v53  ;;  %1650 = vmatprep.subr.bf16.mxu0 %v1835_v1 }
  0x57   : > { %1670 = vmatprep.subr.bf16.mxu1 %v1835_v1 }
  0x59   : > { %1651 = vmatpush3.bf16.msra.mxu0 %v1793_v54 }
  0x5a   : > { %1671 = vmatpush3.bf16.msra.mxu1 %v1794_v55  ;;  %1652 = vmatprep.subr.bf16.mxu0 %v1835_v1 }
  0x5b   : > { %1672 = vmatprep.subr.bf16.mxu1 %v1835_v1 }
  0x5d   : > { %1653 = vmatpush3.bf16.msra.mxu0 %v1795_v56 }
  0x5e   : > { %1673 = vmatpush3.bf16.msra.mxu1 %v1796_v57  ;;  %1654 = vmatprep.subr.bf16.mxu0 %v1835_v1 }
  0x5f   : > { %1674 = vmatprep.subr.bf16.mxu1 %v1835_v1 }
  0x61   : > { %1655 = vmatpush3.bf16.msra.mxu0 %v1797_v58 }
  0x62   : > { %1675 = vmatpush3.bf16.msra.mxu1 %v1798_v59  ;;  %1656 = vmatprep.subr.bf16.mxu0 %v1835_v1 }
  0x63   : > { %1676 = vmatprep.subr.bf16.mxu1 %v1835_v1 }
  0x65   : > { %1657 = vmatpush3.bf16.msra.mxu0 %v1799_v61 }
  0x66   : > { %1677 = vmatpush3.bf16.msra.mxu1 %v1800_v62  ;;  %1658 = vmatprep.subr.bf16.mxu0 %v1835_v1 }
  0x67   : > { %1678 = vmatprep.subr.bf16.mxu1 %v1835_v1 }
  0x69   : > { %1659 = vmatpush3.bf16.msra.mxu0 %v1801_v0 }
  0x6a   : > { %1679 = vmatpush3.bf16.msra.mxu1 %v1802_v2  ;;  %1684 = vmatprep.subr.bf16.mxu0 %v1835_v1 }
  0x6b   : > { %1704 = vmatprep.subr.bf16.mxu1 %v1835_v1 }
  0x6c   : > { %1661 = vmatmul.mubr.bf16.vlgmr.msra.gmra.mxu0 %v1358_v4 }
  0x6d   : > { %1685 = vmatpush3.bf16.msra.mxu0 %v1803_v5  ;;  %1681 = vmatmul.mubr.bf16.vlgmr.msra.gmra.mxu1 %v780_v3 }
  0x6e   : > { %1705 = vmatpush3.bf16.msra.mxu1 %v1804_v6  ;;  %1686 = vmatprep.subr.bf16.mxu0 %v1835_v1  ;;  %v192_v6 = vld [vmem:[%s2225_s2] sm:$0x1] }
  0x6f   : > { %1706 = vmatprep.subr.bf16.mxu1 %v1835_v1  ;;  %1700 = vmatprep.mubr.msk.bf16.mxu0 %vm1836_vm0, %v1835_v1 }
  0x70   : > { %1720 = vmatprep.mubr.msk.bf16.mxu1 %vm1836_vm0, %v1835_v1 }
  0x71   : > { %1687 = vmatpush3.bf16.msra.mxu0 %v1805_v7 }
  0x72   : > { %1707 = vmatpush3.bf16.msra.mxu1 %v1806_v8  ;;  %1688 = vmatprep.subr.bf16.mxu0 %v1835_v1 }
  0x73   : > { %1708 = vmatprep.subr.bf16.mxu1 %v1835_v1 }
  0x75   : > { %1689 = vmatpush3.bf16.msra.mxu0 %v1807_v9  ;;  %v193_v9 = vld [vmem:[%s2226_s3] sm:$0x1] }
  0x76   : > { %1709 = vmatpush3.bf16.msra.mxu1 %v1808_v10  ;;  %1690 = vmatprep.subr.bf16.mxu0 %v1835_v1 }
  0x77   : > { %1710 = vmatprep.subr.bf16.mxu1 %v1835_v1 }
  0x79   : > { %1691 = vmatpush3.bf16.msra.mxu0 %v1809_v11 }
  0x7a   : > { %1711 = vmatpush3.bf16.msra.mxu1 %v1810_v12  ;;  %1692 = vmatprep.subr.bf16.mxu0 %v1835_v1 }
  0x7b   : > { %1712 = vmatprep.subr.bf16.mxu1 %v1835_v1 }
  0x7d   : > { %1693 = vmatpush3.bf16.msra.mxu0 %v1811_v13 }
  0x7e   : > { %1713 = vmatpush3.bf16.msra.mxu1 %v1812_v14  ;;  %1694 = vmatprep.subr.bf16.mxu0 %v1835_v1 }
  0x7f   : > { %1714 = vmatprep.subr.bf16.mxu1 %v1835_v1 }
  0x81   : > { %1695 = vmatpush3.bf16.msra.mxu0 %v1813_v15 }
  0x82   : > { %1715 = vmatpush3.bf16.msra.mxu1 %v1814_v16  ;;  %1696 = vmatprep.subr.bf16.mxu0 %v1835_v1  ;;  %v1220_v16 = vld [vmem:[%s190_s5] sm:$0x1] }
  0x83   : > { %1716 = vmatprep.subr.bf16.mxu1 %v1835_v1 }
  0x85   : > { %1697 = vmatpush3.bf16.msra.mxu0 %v1815_v17 }
  0x86   : > { %1717 = vmatpush3.bf16.msra.mxu1 %v1816_v18  ;;  %1698 = vmatprep.subr.bf16.mxu0 %v1835_v1 }
  0x87   : > { %1718 = vmatprep.subr.bf16.mxu1 %v1835_v1 }
  0x89   : > { %1699 = vmatpush3.bf16.msra.mxu0 %v1817_v19 }
  0x8a   : > { %1719 = vmatpush3.bf16.msra.mxu1 %v1818_v20  ;;  %1724 = vmatprep.subr.bf16.mxu0 %v1835_v1 }
  0x8c   : > { %1701 = vmatmul.mubr.bf16.vlgmr.msra.gmra.mxu0 %v2035_v47 }
  0x8d   : > { %1725 = vmatpush3.bf16.msra.mxu0 %v1819_v21  ;;  %1721 = vmatmul.mubr.bf16.vlgmr.msra.gmra.mxu1 %v1432_v22 }
  0x8e   : > { %1726 = vmatprep.subr.bf16.mxu0 %v1835_v1  ;;  %1740 = vmatprep.mubr.msk.bf16.mxu0 %vm1836_vm0, %v1835_v1 }
  0x91   : > { %1727 = vmatpush3.bf16.msra.mxu0 %v1820_v23 }
  0x92   : > { %1728 = vmatprep.subr.bf16.mxu0 %v1835_v1 }
  0x95   : > { %1729 = vmatpush3.bf16.msra.mxu0 %v1821_v24 }
  0x96   : > { %1730 = vmatprep.subr.bf16.mxu0 %v1835_v1 }
  0x99   : > { %1731 = vmatpush3.bf16.msra.mxu0 %v1822_v25 }
  0x9a   : > { %1732 = vmatprep.subr.bf16.mxu0 %v1835_v1 }
  0x9d   : > { %1733 = vmatpush3.bf16.msra.mxu0 %v1823_v26 }
  0x9e   : > { %1734 = vmatprep.subr.bf16.mxu0 %v1835_v1 }
  0xa1   : > { %1735 = vmatpush3.bf16.msra.mxu0 %v1824_v27 }
  0xa2   : > { %1736 = vmatprep.subr.bf16.mxu0 %v1835_v1 }
  0xa5   : > { %1737 = vmatpush3.bf16.msra.mxu0 %v1825_v28 }
  0xa6   : > { %1738 = vmatprep.subr.bf16.mxu0 %v1835_v1 }
  0xa9   : > { %1739 = vmatpush3.bf16.msra.mxu0 %v1826_v29 }
  0xac   : > { %1741 = vmatmul.mubr.bf16.vlgmr.msra.gmra.mxu0 %v1121_v30 }
  0xec   : > { %v312_v31 = vpop.f32.mrf.mxu0 }
  0xed   : > { %v400_v32 = vpop.f32.mrf.mxu1 }
  0xee   : > { %v401_v33 = vadd.f32 %v400_v32, %v312_v31  ;;  %v1582_v34 = vpop.f32.mrf.mxu0 }
  0xef   : > { %v1602_v35 = vpop.f32.mrf.mxu1 }
  0xf0   : > { %v315_v36 = vpop.f32.mrf.mxu0 }
  0xf1   : > { %v403_v37 = vpop.f32.mrf.mxu1 }
  0xf2   : > { %v1583_v38 = vpop.f32.mrf.mxu0 }
  0xf3   : > { %v1603_v39 = vpop.f32.mrf.mxu1 }
 0x10c   : > { %v524_v40 = vpop.f32.mrf.mxu0 }
 0x10d   : > { %v530_v41 = vadd.f32 %v524_v40, %v401_v33  ;;  %v632_v42 = vpop.f32.mrf.mxu1 }
 0x10e   : > { %v1622_v43 = vpop.f32.mrf.mxu0 }
 0x10f   : > { %v638_v44 = vadd.f32 %v632_v42, %v530_v41  ;;  %v1642_v45 = vpop.f32.mrf.mxu1 }
 0x110   : > { %v527_v1 = vpop.f32.mrf.mxu0 }
 0x111   : > { %v635_v46 = vpop.f32.mrf.mxu1 }
 0x112   : > { %v1623_v47 = vpop.f32.mrf.mxu0 }
 0x113   : > { %v1643_v48 = vpop.f32.mrf.mxu1 }
 0x12c   : > { %v740_v49 = vpop.f32.mrf.mxu0 }
 0x12d   : > { %v865_v50 = vpop.f32.mrf.mxu1  ;;  %v746_v2 = vadd.f32 %v740_v49, %v638_v44 }
 0x12e   : > { %v1662_v51 = vpop.f32.mrf.mxu0 }
 0x12f   : > { %v1682_v52 = vpop.f32.mrf.mxu1  ;;  %v871_v3 = vadd.f32 %v865_v50, %v746_v2 }
 0x130   : > { %v743_v53 = vpop.f32.mrf.mxu0 }
 0x131   : > { %v868_v54 = vpop.f32.mrf.mxu1 }
 0x132   : > { %v1663_v55 = vpop.f32.mrf.mxu0 }
 0x133   : > { %v1683_v56 = vpop.f32.mrf.mxu1 }
 0x14c   : > { %v973_v57 = vpop.f32.mrf.mxu0 }
 0x14d   : > { %v1081_v58 = vpop.f32.mrf.mxu1  ;;  %v979_v4 = vadd.f32 %v973_v57, %v871_v3 }
 0x14e   : > { %v1702_v59 = vpop.f32.mrf.mxu0 }
 0x14f   : > { %v1722_v60 = vpop.f32.mrf.mxu1  ;;  %v1087_v5 = vadd.f32 %v1081_v58, %v979_v4 }
 0x150   : > { %v976_v61 = vpop.f32.mrf.mxu0 }
 0x151   : > { %v1084_v62 = vpop.f32.mrf.mxu1 }
 0x152   : > { %v1703_v63 = vpop.f32.mrf.mxu0 }
 0x153   : > { %v1723_v0 = vpop.f32.mrf.mxu1 }
 0x16c   : > { %v1206_v7 = vpop.f32.mrf.mxu0 }
 0x16d   : > { %v1212_v8 = vadd.f32 %v1206_v7, %v1087_v5 }
 0x16e   : > { %v1742_v10 = vpop.f32.mrf.mxu0 }
 0x16f   : > { %v1213_v11 = vmul.f32 %v1212_v8, %v192_v6 }
 0x170   : > { %v1209_v12 = vpop.f32.mrf.mxu0 }
 0x171   : > { %v1214_v13 = vadd.f32 %v1213_v11, %v193_v9 }
 0x172   : > { %v1743_v14 = vpop.f32.mrf.mxu0 }
 0x173   : > { %v1215_v15 = vmax.f32 %v1214_v13, 0.0 }
 0x175   : > { %v1216_v17 = vpack.c.bf16 %v1215_v15, %v1215_v15 }
 0x177   : > { %v1221_v18 = vsel %vm1219_vm3, %v1216_v17, %v1220_v16 }
 0x178   : > { %1222 = vst [vmem:[%s190_s5] sm:$0x1] %v1221_v18 }
 0x179 PF: > { %s14_s15 = sadd.s32 1, %s1833_s15  }
 0x17a   : > { %p11_p4 = scmp.ge.s32.totalorder %s14_s15, 4  }
 0x17c   :  { %13 = sbr.rel (!%p11_p4) target bundleno = 1 (0x1), region = 79 }

// kernel: _lambda_.24
= control target key start
LH: loop header
LB: loop body
LE: loop exit
PB: predicated region body
PF: predicated region fallthrough
CT: control target
= control target key end

     0   :  { %s1933_s18 = smov 0   ;;  %s2294_s0 = inlined_call_operand.vmem [shape: bf16[2,3,3,128], index: 0, kind: input, shape index: {}]   ;;  %s2295_s1 = inlined_call_operand.vmem [shape: bf16[9,128,128], index: 1, kind: input, shape index: {}]   ;;  %s2296_s2 = inlined_call_operand.vmem [shape: f32[1,128], index: 2, kind: input, shape index: {}]   ;;  %s2297_s3 = inlined_call_operand.vmem [shape: f32[1,128], index: 3, kind: input, shape index: {}]   ;;  %s2298_s4 = inlined_call_operand.vmem [shape: bf16[2,1,1,128], index: 4, kind: input, shape index: {}]   ;;  %s2299_s5 = inlined_call_operand.vmem [shape: bf16[2,1,1,128], index: 5, kind: output, shape index: {}]  }
   0x1 LB: > { %s1332_s19 = sadd.s32 4294967295, %s1898_s18   ;;  %p1336_p0 = scmp.ge.s32.totalorder %s1898_s18, 1  ;;  %s1898_s18 = sphi %s1933_s18, %s15_s18  }
   0x2   : > { %p195_p1 = scmp.lt.s32.totalorder %s1898_s18, 3 }
   0x4   : > { %p196_p2 = pnand %p1336_p0, %p195_p1 }
   0x5   : > { %p224_p3 = scmp.lt.s32.totalorder (!%p196_p2), %s1332_s19, 1 }
   0x6   : > { %199 = sbr.rel (%p196_p2) target bundleno = 379 (0x17b), region = 40 }
   0xb   : > { %v1820_v0 = vld [vmem:[%s2295_s1 + $0x78] sm:$0xff]   ;;  %v1900_v1 = vmov 0.0   ;;  %v1822_v3 = vld [vmem:[%s2295_s1 + $0x70] sm:$0xff]   ;;  %vm1901_vm0 = vmmov 0   ;;  %v1824_v5 = vld [vmem:[%s2295_s1 + $0x68] sm:$0xff]   ;;  %s2301_s19 = smov (!%p224_p3, %s1332_s19), 1  ;;  %v276_v9 = vlaneseq }
   0xc   : > { %1628 = vmatprep.subr.bf16.mxu0 %v1900_v1  ;;  %1648 = vmatprep.subr.bf16.mxu1 %v1900_v1  ;;  %v1821_v2 = vld [vmem:[%s2295_s1 + $0x38] sm:$0xff]   ;;  %v1823_v4 = vld [vmem:[%s2295_s1 + $0x30] sm:$0xff]   ;;  %v1825_v6 = vld [vmem:[%s2295_s1 + $0x28] sm:$0xff]   ;;  %s1808_s15 = smul.u32 6, %s2301_s19  ;;  %v1902_v12 = vmov 1983009808   ;;  %s231_s11 = scalar_lea.vmem %s2298_s4, %s2301_s19 }
   0xd   : > { %1629 = vmatpush3.bf16.msra.mxu0 %v1820_v0  ;;  %1644 = vmatprep.mubr.msk.bf16.mxu0 %vm1901_vm0, %v1900_v1  ;;  %v1826_v7 = vld [vmem:[%s2295_s1 + $0x60] sm:$0xff]   ;;  %v1828_v10 = vld [vmem:[%s2295_s1 + $0x58] sm:$0xff]   ;;  %v274_v13 = vunpack.c.l.s4 %v1902_v12  ;;  %v277_v14 = vshrl.u32 %v276_v9, 7  ;;  %v1830_v15 = vld [vmem:[%s2295_s1 + $0x50] sm:$0xff]   ;;  %s234_s20 = scalar_lea.vmem %s2299_s5, %s2301_s19  ;;  %vm1270_vm1 = vcmask 1040384  }
   0xe   : > { %1649 = vmatpush3.bf16.msra.mxu1 %v1821_v2  ;;  %1630 = vmatprep.subr.bf16.mxu0 %v1900_v1  ;;  %v1827_v8 = vld [vmem:[%s2295_s1 + $0x20] sm:$0xff]   ;;  %v1829_v11 = vld [vmem:[%s2295_s1 + $0x18] sm:$0xff]   ;;  %v1831_v16 = vld [vmem:[%s2295_s1 + $0x10] sm:$0xff]   ;;  %s2002_s24 = scalar_lea.vmem %s2294_s0, %s1808_s15  ;;  %vm1271_vm2 = vsmask.f32 256 }
   0xf   : > { %1650 = vmatprep.subr.bf16.mxu1 %v1900_v1  ;;  %1664 = vmatprep.mubr.msk.bf16.mxu1 %vm1901_vm0, %v1900_v1  ;;  %v275_v17 = vunpack.c.0.s8 %v274_v13  ;;  %v1832_v18 = vld [vmem:[%s2295_s1 + $0x48] sm:$0xff]   ;;  %v238_v20 = vld [vmem:[%s2002_s24] sm:$0x1]  ;;  %v1836_v26 = vld [vmem:[%s2295_s1 + $0xb8] sm:$0xff]  }
  0x10   : > { %v1833_v21 = vld [vmem:[%s2295_s1 + $0x8] sm:$0xff]   ;;  %v1834_v23 = vld [vmem:[%s2295_s1 + $0x40] sm:$0xff]   ;;  %v1837_v27 = vld [vmem:[%s2295_s1 + $0xf8] sm:$0xff]  }
  0x11   : > { %1631 = vmatpush3.bf16.msra.mxu0 %v1822_v3  ;;  %v2008_v19 = vsub.s32 %v275_v17, %v277_v14  ;;  %v1835_v24 = vld [vmem:[%s2295_s1] sm:$0xff]   ;;  %v1838_v28 = vld [vmem:[%s2295_s1 + $0xb0] sm:$0xff]   ;;  %v1840_v30 = vld [vmem:[%s2295_s1 + $0xa8] sm:$0xff]  }
  0x12   : > { %1651 = vmatpush3.bf16.msra.mxu1 %v1823_v4  ;;  %1632 = vmatprep.subr.bf16.mxu0 %v1900_v1  ;;  %v1839_v29 = vld [vmem:[%s2295_s1 + $0xf0] sm:$0xff]   ;;  %v1841_v31 = vld [vmem:[%s2295_s1 + $0xe8] sm:$0xff]   ;;  %v1842_v32 = vld [vmem:[%s2295_s1 + $0xa0] sm:$0xff]  }
  0x13   : > { %1652 = vmatprep.subr.bf16.mxu1 %v1900_v1  ;;  %v279_v22 = vrot.slane %v238_v20, %v2008_v19  ;;  %v1843_v33 = vld [vmem:[%s2295_s1 + $0xe0] sm:$0xff]   ;;  %v1844_v34 = vld [vmem:[%s2295_s1 + $0x98] sm:$0xff]   ;;  %v1846_v36 = vld [vmem:[%s2295_s1 + $0x90] sm:$0xff]  }
  0x14   : > { %v1845_v35 = vld [vmem:[%s2295_s1 + $0xd8] sm:$0xff]   ;;  %v1847_v37 = vld [vmem:[%s2295_s1 + $0xd0] sm:$0xff]   ;;  %v1848_v38 = vld [vmem:[%s2295_s1 + $0x88] sm:$0xff]  }
  0x15   : > { %1633 = vmatpush3.bf16.msra.mxu0 %v1824_v5  ;;  %v281_v25 = vshrl.u32 %v279_v22, 16  ;;  %v1849_v39 = vld [vmem:[%s2295_s1 + $0xc8] sm:$0xff]   ;;  %v1386_v40 = vld.sshfl [vmem:[%s2002_s24] sm:$0x2 pattern:$0x76325410]  ;;  %vm1272_vm3 = vmand %vm1270_vm1, %vm1271_vm2 }
  0x16   : > { %1653 = vmatpush3.bf16.msra.mxu1 %v1825_v6  ;;  %1634 = vmatprep.subr.bf16.mxu0 %v1900_v1  ;;  %v1850_v41 = vld [vmem:[%s2295_s1 + $0x80] sm:$0xff]   ;;  %v486_v43 = vrot.slane %v1386_v40, 1  ;;  %v1852_v44 = vld [vmem:[%s2295_s1 + $0x138] sm:$0xff]   ;;  %v1854_v47 = vld [vmem:[%s2295_s1 + $0x130] sm:$0xff]  }
  0x17   : > { %1654 = vmatprep.subr.bf16.mxu1 %v1900_v1  ;;  %v1851_v42 = vld [vmem:[%s2295_s1 + $0xc0] sm:$0xff]   ;;  %v1853_v46 = vld [vmem:[%s2295_s1 + $0x178] sm:$0xff]   ;;  %v1855_v49 = vld [vmem:[%s2295_s1 + $0x170] sm:$0xff]  }
  0x18   : > { %v1395_v45 = vld [vmem:[%s2002_s24 + $0x2] sm:$0x1]  ;;  %v2107_v48 = vld [vmem:[%s2002_s24 + $0x4] sm:$0x1]  ;;  %v1856_v51 = vld [vmem:[%s2295_s1 + $0x128] sm:$0xff]  }
  0x19   : > { %1635 = vmatpush3.bf16.msra.mxu0 %v1826_v7  ;;  %v1052_v50 = vrot.slane %v2107_v48, %v2008_v19  ;;  %v1857_v52 = vld [vmem:[%s2295_s1 + $0x168] sm:$0xff]   ;;  %v1858_v53 = vld [vmem:[%s2295_s1 + $0x120] sm:$0xff]   ;;  %v1860_v55 = vld [vmem:[%s2295_s1 + $0x118] sm:$0xff]   ;;  %v709_v61 = vrot.slane %v1395_v45, %v2008_v19 }
  0x1a   : > { %1655 = vmatpush3.bf16.msra.mxu1 %v1827_v8  ;;  %1636 = vmatprep.subr.bf16.mxu0 %v1900_v1  ;;  %v1859_v54 = vld [vmem:[%s2295_s1 + $0x160] sm:$0xff]   ;;  %v1861_v56 = vld [vmem:[%s2295_s1 + $0x158] sm:$0xff]   ;;  %v1862_v57 = vld [vmem:[%s2295_s1 + $0x110] sm:$0xff]  }
  0x1b   : > { %1656 = vmatprep.subr.bf16.mxu1 %v1900_v1  ;;  %v1863_v58 = vld [vmem:[%s2295_s1 + $0x150] sm:$0xff]   ;;  %v1864_v59 = vld [vmem:[%s2295_s1 + $0x108] sm:$0xff]   ;;  %v1866_v62 = vld [vmem:[%s2295_s1 + $0x100] sm:$0xff]   ;;  %v711_v2 = vshrl.u32 %v709_v61, 16 }
  0x1c   : > { %v1865_v60 = vld [vmem:[%s2295_s1 + $0x148] sm:$0xff]   ;;  %v1867_v63 = vld [vmem:[%s2295_s1 + $0x140] sm:$0xff]   ;;  %v1868_v3 = vld [vmem:[%s2295_s1 + $0x1b8] sm:$0xff]  }
  0x1d   : > { %1637 = vmatpush3.bf16.msra.mxu0 %v1828_v10  ;;  %v1461_v0 = vld.sshfl [vmem:[%s2002_s24 + $0x2] sm:$0x2 pattern:$0x76325410]  ;;  %v1869_v5 = vld [vmem:[%s2295_s1 + $0x1f8] sm:$0xff]   ;;  %v1870_v6 = vld [vmem:[%s2295_s1 + $0x1b0] sm:$0xff]  }
  0x1e   : > { %1657 = vmatpush3.bf16.msra.mxu1 %v1829_v11  ;;  %1638 = vmatprep.subr.bf16.mxu0 %v1900_v1  ;;  %v829_v4 = vrot.slane %v1461_v0, 1  ;;  %v1871_v7 = vld [vmem:[%s2295_s1 + $0x1f0] sm:$0xff]   ;;  %v1872_v8 = vld [vmem:[%s2295_s1 + $0x1a8] sm:$0xff]   ;;  %v1874_v10 = vld [vmem:[%s2295_s1 + $0x1a0] sm:$0xff]  }
  0x1f   : > { %1658 = vmatprep.subr.bf16.mxu1 %v1900_v1  ;;  %v1873_v9 = vld [vmem:[%s2295_s1 + $0x1e8] sm:$0xff]   ;;  %v1875_v11 = vld [vmem:[%s2295_s1 + $0x1e0] sm:$0xff]   ;;  %v1876_v12 = vld [vmem:[%s2295_s1 + $0x198] sm:$0xff]  }
  0x20   : > { %v1877_v13 = vld [vmem:[%s2295_s1 + $0x1d8] sm:$0xff]   ;;  %v1878_v14 = vld [vmem:[%s2295_s1 + $0x190] sm:$0xff]   ;;  %v1881_v17 = vld [vmem:[%s2295_s1 + $0x1c8] sm:$0xff]  }
  0x21   : > { %1639 = vmatpush3.bf16.msra.mxu0 %v1830_v15  ;;  %v1879_v15 = vld [vmem:[%s2295_s1 + $0x1d0] sm:$0xff]   ;;  %v1884_v22 = vld [vmem:[%s2295_s1 + $0x238] sm:$0xff]   ;;  %v1886_v19 = vld [vmem:[%s2295_s1 + $0x228] sm:$0xff]  }
  0x22   : > { %1659 = vmatpush3.bf16.msra.mxu1 %v1831_v16  ;;  %1640 = vmatprep.subr.bf16.mxu0 %v1900_v1  ;;  %v1880_v16 = vld [vmem:[%s2295_s1 + $0x188] sm:$0xff]  }
  0x23   : > { %1660 = vmatprep.subr.bf16.mxu1 %v1900_v1 }
  0x25   : > { %1641 = vmatpush3.bf16.msra.mxu0 %v1832_v18  ;;  %v1882_v18 = vld [vmem:[%s2295_s1 + $0x180] sm:$0xff]  }
  0x26   : > { %1661 = vmatpush3.bf16.msra.mxu1 %v1833_v21  ;;  %1642 = vmatprep.subr.bf16.mxu0 %v1900_v1  ;;  %v1054_v21 = vshrl.u32 %v1052_v50, 16 }
  0x27   : > { %1662 = vmatprep.subr.bf16.mxu1 %v1900_v1 }
  0x29   : > { %1643 = vmatpush3.bf16.msra.mxu0 %v1834_v23  ;;  %v1885_v23 = vld [vmem:[%s2295_s1 + $0x230] sm:$0xff]  }
  0x2a   : > { %1663 = vmatpush3.bf16.msra.mxu1 %v1835_v24  ;;  %1668 = vmatprep.subr.bf16.mxu0 %v1900_v1  ;;  %v1887_v24 = vld [vmem:[%s2295_s1 + $0x220] sm:$0xff]  }
  0x2b   : > { %1688 = vmatprep.subr.bf16.mxu1 %v1900_v1 }
  0x2c   : > { %1645 = vmatmul.mubr.bf16.vlgmr.msra.gmra.mxu0 %v281_v25  ;;  %v1888_v25 = vld [vmem:[%s2295_s1 + $0x218] sm:$0xff]  }
  0x2d   : > { %1665 = vmatmul.mubr.bf16.vlgmr.msra.gmra.mxu1 %v238_v20  ;;  %1669 = vmatpush3.bf16.msra.mxu0 %v1836_v26  ;;  %v1883_v20 = vld [vmem:[%s2295_s1 + $0x1c0] sm:$0xff]   ;;  %v1889_v26 = vld [vmem:[%s2295_s1 + $0x210] sm:$0xff]  }
  0x2e   : > { %1689 = vmatpush3.bf16.msra.mxu1 %v1837_v27  ;;  %1670 = vmatprep.subr.bf16.mxu0 %v1900_v1  ;;  %v1890_v27 = vld [vmem:[%s2295_s1 + $0x208] sm:$0xff]  }
  0x2f   : > { %1690 = vmatprep.subr.bf16.mxu1 %v1900_v1  ;;  %1684 = vmatprep.mubr.msk.bf16.mxu0 %vm1901_vm0, %v1900_v1 }
  0x30   : > { %1704 = vmatprep.mubr.msk.bf16.mxu1 %vm1901_vm0, %v1900_v1 }
  0x31   : > { %1671 = vmatpush3.bf16.msra.mxu0 %v1838_v28  ;;  %v1891_v28 = vld [vmem:[%s2295_s1 + $0x200] sm:$0xff]  }
  0x32   : > { %1691 = vmatpush3.bf16.msra.mxu1 %v1839_v29  ;;  %1672 = vmatprep.subr.bf16.mxu0 %v1900_v1  ;;  %v1536_v29 = vld.sshfl [vmem:[%s2002_s24 + $0x4] sm:$0x2 pattern:$0x76325410] }
  0x33   : > { %1692 = vmatprep.subr.bf16.mxu1 %v1900_v1 }
  0x35   : > { %1673 = vmatpush3.bf16.msra.mxu0 %v1840_v30  ;;  %v1172_v30 = vrot.slane %v1536_v29, 1 }
  0x36   : > { %1693 = vmatpush3.bf16.msra.mxu1 %v1841_v31  ;;  %1674 = vmatprep.subr.bf16.mxu0 %v1900_v1 }
  0x37   : > { %1694 = vmatprep.subr.bf16.mxu1 %v1900_v1 }
  0x39   : > { %1675 = vmatpush3.bf16.msra.mxu0 %v1842_v32 }
  0x3a   : > { %1695 = vmatpush3.bf16.msra.mxu1 %v1843_v33  ;;  %1676 = vmatprep.subr.bf16.mxu0 %v1900_v1 }
  0x3b   : > { %1696 = vmatprep.subr.bf16.mxu1 %v1900_v1 }
  0x3d   : > { %1677 = vmatpush3.bf16.msra.mxu0 %v1844_v34 }
  0x3e   : > { %1697 = vmatpush3.bf16.msra.mxu1 %v1845_v35  ;;  %1678 = vmatprep.subr.bf16.mxu0 %v1900_v1 }
  0x3f   : > { %1698 = vmatprep.subr.bf16.mxu1 %v1900_v1 }
  0x41   : > { %1679 = vmatpush3.bf16.msra.mxu0 %v1846_v36 }
  0x42   : > { %1699 = vmatpush3.bf16.msra.mxu1 %v1847_v37  ;;  %1680 = vmatprep.subr.bf16.mxu0 %v1900_v1 }
  0x43   : > { %1700 = vmatprep.subr.bf16.mxu1 %v1900_v1 }
  0x45   : > { %1681 = vmatpush3.bf16.msra.mxu0 %v1848_v38 }
  0x46   : > { %1701 = vmatpush3.bf16.msra.mxu1 %v1849_v39  ;;  %1682 = vmatprep.subr.bf16.mxu0 %v1900_v1 }
  0x47   : > { %1702 = vmatprep.subr.bf16.mxu1 %v1900_v1 }
  0x49   : > { %1683 = vmatpush3.bf16.msra.mxu0 %v1850_v41 }
  0x4a   : > { %1703 = vmatpush3.bf16.msra.mxu1 %v1851_v42  ;;  %1708 = vmatprep.subr.bf16.mxu0 %v1900_v1 }
  0x4b   : > { %1728 = vmatprep.subr.bf16.mxu1 %v1900_v1 }
  0x4c   : > { %1685 = vmatmul.mubr.bf16.vlgmr.msra.gmra.mxu0 %v486_v43 }
  0x4d   : > { %1709 = vmatpush3.bf16.msra.mxu0 %v1852_v44  ;;  %1705 = vmatmul.mubr.bf16.vlgmr.msra.gmra.mxu1 %v1395_v45 }
  0x4e   : > { %1729 = vmatpush3.bf16.msra.mxu1 %v1853_v46  ;;  %1710 = vmatprep.subr.bf16.mxu0 %v1900_v1 }
  0x4f   : > { %1730 = vmatprep.subr.bf16.mxu1 %v1900_v1  ;;  %1724 = vmatprep.mubr.msk.bf16.mxu0 %vm1901_vm0, %v1900_v1 }
  0x50   : > { %1744 = vmatprep.mubr.msk.bf16.mxu1 %vm1901_vm0, %v1900_v1 }
  0x51   : > { %1711 = vmatpush3.bf16.msra.mxu0 %v1854_v47 }
  0x52   : > { %1731 = vmatpush3.bf16.msra.mxu1 %v1855_v49  ;;  %1712 = vmatprep.subr.bf16.mxu0 %v1900_v1 }
  0x53   : > { %1732 = vmatprep.subr.bf16.mxu1 %v1900_v1 }
  0x55   : > { %1713 = vmatpush3.bf16.msra.mxu0 %v1856_v51 }
  0x56   : > { %1733 = vmatpush3.bf16.msra.mxu1 %v1857_v52  ;;  %1714 = vmatprep.subr.bf16.mxu0 %v1900_v1 }
  0x57   : > { %1734 = vmatprep.subr.bf16.mxu1 %v1900_v1 }
  0x59   : > { %1715 = vmatpush3.bf16.msra.mxu0 %v1858_v53 }
  0x5a   : > { %1735 = vmatpush3.bf16.msra.mxu1 %v1859_v54  ;;  %1716 = vmatprep.subr.bf16.mxu0 %v1900_v1 }
  0x5b   : > { %1736 = vmatprep.subr.bf16.mxu1 %v1900_v1 }
  0x5d   : > { %1717 = vmatpush3.bf16.msra.mxu0 %v1860_v55 }
  0x5e   : > { %1737 = vmatpush3.bf16.msra.mxu1 %v1861_v56  ;;  %1718 = vmatprep.subr.bf16.mxu0 %v1900_v1 }
  0x5f   : > { %1738 = vmatprep.subr.bf16.mxu1 %v1900_v1 }
  0x61   : > { %1719 = vmatpush3.bf16.msra.mxu0 %v1862_v57 }
  0x62   : > { %1739 = vmatpush3.bf16.msra.mxu1 %v1863_v58  ;;  %1720 = vmatprep.subr.bf16.mxu0 %v1900_v1 }
  0x63   : > { %1740 = vmatprep.subr.bf16.mxu1 %v1900_v1 }
  0x65   : > { %1721 = vmatpush3.bf16.msra.mxu0 %v1864_v59 }
  0x66   : > { %1741 = vmatpush3.bf16.msra.mxu1 %v1865_v60  ;;  %1722 = vmatprep.subr.bf16.mxu0 %v1900_v1 }
  0x67   : > { %1742 = vmatprep.subr.bf16.mxu1 %v1900_v1 }
  0x69   : > { %1723 = vmatpush3.bf16.msra.mxu0 %v1866_v62 }
  0x6a   : > { %1743 = vmatpush3.bf16.msra.mxu1 %v1867_v63  ;;  %1748 = vmatprep.subr.bf16.mxu0 %v1900_v1 }
  0x6b   : > { %1768 = vmatprep.subr.bf16.mxu1 %v1900_v1 }
  0x6c   : > { %1725 = vmatmul.mubr.bf16.vlgmr.msra.gmra.mxu0 %v711_v2 }
  0x6d   : > { %1749 = vmatpush3.bf16.msra.mxu0 %v1868_v3  ;;  %1745 = vmatmul.mubr.bf16.vlgmr.msra.gmra.mxu1 %v829_v4 }
  0x6e   : > { %1769 = vmatpush3.bf16.msra.mxu1 %v1869_v5  ;;  %1750 = vmatprep.subr.bf16.mxu0 %v1900_v1 }
  0x6f   : > { %1770 = vmatprep.subr.bf16.mxu1 %v1900_v1  ;;  %1764 = vmatprep.mubr.msk.bf16.mxu0 %vm1901_vm0, %v1900_v1 }
  0x70   : > { %1784 = vmatprep.mubr.msk.bf16.mxu1 %vm1901_vm0, %v1900_v1 }
  0x71   : > { %1751 = vmatpush3.bf16.msra.mxu0 %v1870_v6  ;;  %v236_v6 = vld [vmem:[%s2296_s2] sm:$0x1] }
  0x72   : > { %1771 = vmatpush3.bf16.msra.mxu1 %v1871_v7  ;;  %1752 = vmatprep.subr.bf16.mxu0 %v1900_v1 }
  0x73   : > { %1772 = vmatprep.subr.bf16.mxu1 %v1900_v1 }
  0x75   : > { %1753 = vmatpush3.bf16.msra.mxu0 %v1872_v8  ;;  %v1265_v8 = vld [vmem:[%s231_s11] sm:$0x1] }
  0x76   : > { %1773 = vmatpush3.bf16.msra.mxu1 %v1873_v9  ;;  %1754 = vmatprep.subr.bf16.mxu0 %v1900_v1 }
  0x77   : > { %1774 = vmatprep.subr.bf16.mxu1 %v1900_v1 }
  0x79   : > { %1755 = vmatpush3.bf16.msra.mxu0 %v1874_v10  ;;  %v237_v10 = vld [vmem:[%s2297_s3] sm:$0x1] }
  0x7a   : > { %1775 = vmatpush3.bf16.msra.mxu1 %v1875_v11  ;;  %1756 = vmatprep.subr.bf16.mxu0 %v1900_v1 }
  0x7b   : > { %1776 = vmatprep.subr.bf16.mxu1 %v1900_v1 }
  0x7d   : > { %1757 = vmatpush3.bf16.msra.mxu0 %v1876_v12 }
  0x7e   : > { %1777 = vmatpush3.bf16.msra.mxu1 %v1877_v13  ;;  %1758 = vmatprep.subr.bf16.mxu0 %v1900_v1  ;;  %v1266_v13 = vunpack.c.l.bf16 %v1265_v8 }
  0x7f   : > { %1778 = vmatprep.subr.bf16.mxu1 %v1900_v1 }
  0x81   : > { %1759 = vmatpush3.bf16.msra.mxu0 %v1878_v14 }
  0x82   : > { %1779 = vmatpush3.bf16.msra.mxu1 %v1879_v15  ;;  %1760 = vmatprep.subr.bf16.mxu0 %v1900_v1 }
  0x83   : > { %1780 = vmatprep.subr.bf16.mxu1 %v1900_v1 }
  0x85   : > { %1761 = vmatpush3.bf16.msra.mxu0 %v1880_v16 }
  0x86   : > { %1781 = vmatpush3.bf16.msra.mxu1 %v1881_v17  ;;  %1762 = vmatprep.subr.bf16.mxu0 %v1900_v1 }
  0x87   : > { %1782 = vmatprep.subr.bf16.mxu1 %v1900_v1 }
  0x89   : > { %1763 = vmatpush3.bf16.msra.mxu0 %v1882_v18 }
  0x8a   : > { %1783 = vmatpush3.bf16.msra.mxu1 %v1883_v20  ;;  %1788 = vmatprep.subr.bf16.mxu0 %v1900_v1  ;;  %v1273_v20 = vld [vmem:[%s234_s20] sm:$0x1] }
  0x8c   : > { %1765 = vmatmul.mubr.bf16.vlgmr.msra.gmra.mxu0 %v2107_v48 }
  0x8d   : > { %1789 = vmatpush3.bf16.msra.mxu0 %v1884_v22  ;;  %1785 = vmatmul.mubr.bf16.vlgmr.msra.gmra.mxu1 %v1054_v21 }
  0x8e   : > { %1790 = vmatprep.subr.bf16.mxu0 %v1900_v1  ;;  %1804 = vmatprep.mubr.msk.bf16.mxu0 %vm1901_vm0, %v1900_v1 }
  0x91   : > { %1791 = vmatpush3.bf16.msra.mxu0 %v1885_v23 }
  0x92   : > { %1792 = vmatprep.subr.bf16.mxu0 %v1900_v1 }
  0x95   : > { %1793 = vmatpush3.bf16.msra.mxu0 %v1886_v19 }
  0x96   : > { %1794 = vmatprep.subr.bf16.mxu0 %v1900_v1 }
  0x99   : > { %1795 = vmatpush3.bf16.msra.mxu0 %v1887_v24 }
  0x9a   : > { %1796 = vmatprep.subr.bf16.mxu0 %v1900_v1 }
  0x9d   : > { %1797 = vmatpush3.bf16.msra.mxu0 %v1888_v25 }
  0x9e   : > { %1798 = vmatprep.subr.bf16.mxu0 %v1900_v1 }
  0xa1   : > { %1799 = vmatpush3.bf16.msra.mxu0 %v1889_v26 }
  0xa2   : > { %1800 = vmatprep.subr.bf16.mxu0 %v1900_v1 }
  0xa5   : > { %1801 = vmatpush3.bf16.msra.mxu0 %v1890_v27 }
  0xa6   : > { %1802 = vmatprep.subr.bf16.mxu0 %v1900_v1 }
  0xa9   : > { %1803 = vmatpush3.bf16.msra.mxu0 %v1891_v28 }
  0xac   : > { %1805 = vmatmul.mubr.bf16.vlgmr.msra.gmra.mxu0 %v1172_v30 }
  0xec   : > { %v366_v31 = vpop.f32.mrf.mxu0 }
  0xed   : > { %v454_v32 = vpop.f32.mrf.mxu1 }
  0xee   : > { %v455_v33 = vadd.f32 %v454_v32, %v366_v31  ;;  %v1646_v34 = vpop.f32.mrf.mxu0 }
  0xef   : > { %v1666_v35 = vpop.f32.mrf.mxu1 }
  0xf0   : > { %v369_v36 = vpop.f32.mrf.mxu0 }
  0xf1   : > { %v457_v37 = vpop.f32.mrf.mxu1 }
  0xf2   : > { %v1647_v38 = vpop.f32.mrf.mxu0 }
  0xf3   : > { %v1667_v39 = vpop.f32.mrf.mxu1 }
 0x10c   : > { %v570_v40 = vpop.f32.mrf.mxu0 }
 0x10d   : > { %v576_v41 = vadd.f32 %v570_v40, %v455_v33  ;;  %v678_v42 = vpop.f32.mrf.mxu1 }
 0x10e   : > { %v1686_v43 = vpop.f32.mrf.mxu0 }
 0x10f   : > { %v684_v44 = vadd.f32 %v678_v42, %v576_v41  ;;  %v1706_v45 = vpop.f32.mrf.mxu1 }
 0x110   : > { %v573_v46 = vpop.f32.mrf.mxu0 }
 0x111   : > { %v681_v1 = vpop.f32.mrf.mxu1 }
 0x112   : > { %v1687_v47 = vpop.f32.mrf.mxu0 }
 0x113   : > { %v1707_v48 = vpop.f32.mrf.mxu1 }
 0x12c   : > { %v796_v49 = vpop.f32.mrf.mxu0 }
 0x12d   : > { %v913_v50 = vpop.f32.mrf.mxu1  ;;  %v802_v2 = vadd.f32 %v796_v49, %v684_v44 }
 0x12e   : > { %v1726_v51 = vpop.f32.mrf.mxu0 }
 0x12f   : > { %v1746_v52 = vpop.f32.mrf.mxu1  ;;  %v919_v3 = vadd.f32 %v913_v50, %v802_v2 }
 0x130   : > { %v799_v53 = vpop.f32.mrf.mxu0 }
 0x131   : > { %v916_v54 = vpop.f32.mrf.mxu1 }
 0x132   : > { %v1727_v55 = vpop.f32.mrf.mxu0 }
 0x133   : > { %v1747_v56 = vpop.f32.mrf.mxu1 }
 0x14c   : > { %v1021_v57 = vpop.f32.mrf.mxu0 }
 0x14d   : > { %v1139_v58 = vpop.f32.mrf.mxu1  ;;  %v1027_v4 = vadd.f32 %v1021_v57, %v919_v3 }
 0x14e   : > { %v1766_v59 = vpop.f32.mrf.mxu0 }
 0x14f   : > { %v1786_v60 = vpop.f32.mrf.mxu1  ;;  %v1145_v5 = vadd.f32 %v1139_v58, %v1027_v4 }
 0x150   : > { %v1024_v61 = vpop.f32.mrf.mxu0 }
 0x151   : > { %v1142_v62 = vpop.f32.mrf.mxu1 }
 0x152   : > { %v1767_v63 = vpop.f32.mrf.mxu0 }
 0x153   : > { %v1787_v0 = vpop.f32.mrf.mxu1 }
 0x16c   : > { %v1256_v7 = vpop.f32.mrf.mxu0 }
 0x16d   : > { %v1262_v9 = vadd.f32 %v1256_v7, %v1145_v5 }
 0x16e   : > { %v1806_v11 = vpop.f32.mrf.mxu0 }
 0x16f   : > { %v1263_v12 = vmul.f32 %v1262_v9, %v236_v6 }
 0x170   : > { %v1259_v14 = vpop.f32.mrf.mxu0 }
 0x171   : > { %v1264_v15 = vadd.f32 %v1263_v12, %v237_v10 }
 0x172   : > { %v1807_v16 = vpop.f32.mrf.mxu0 }
 0x173   : > { %v1267_v17 = vadd.f32 %v1266_v13, %v1264_v15 }
 0x175   : > { %v1268_v18 = vmax.f32 %v1267_v17, 0.0 }
 0x177   : > { %v1269_v21 = vpack.c.bf16 %v1268_v18, %v1268_v18 }
 0x179   : > { %v1274_v22 = vsel %vm1272_vm3, %v1269_v21, %v1273_v20 }
 0x17a   : > { %1275 = vst [vmem:[%s234_s20] sm:$0x1] %v1274_v22 }
 0x17b PF: > { %s15_s18 = sadd.s32 1, %s1898_s18  }
 0x17c   : > { %p12_p4 = scmp.ge.s32.totalorder %s15_s18, 4  }
 0x17e   :  { %14 = sbr.rel (!%p12_p4) target bundleno = 1 (0x1), region = 83 }

</bundles_post_ra>
